<compile_context>
chip_gen: v6e
topology: v6e:2x2x1
jax: 0.10.0
libtpu: 0.0.40
codegen_flags: <defaults>
</compile_context>

<pallas_src>
import functools

import jax
import jax.numpy as jnp
import numpy as np
from jax.experimental import pallas as pl
from jax.experimental.pallas import tpu as pltpu

NEG_SLOPE = 0.01          # F.leaky_relu default negative_slope
BN_EPS = 1e-5

CV1_CIN_PAD = 16          # 3 + 10 label channels, padded -> im2col K = 16*16 = 256
CV2_CIN_PAD = 80          # 64 + 10 label channels, padded -> im2col K = 80*16 = 1280
FC1_K = 128 * 8 * 8 + 10  # 8202
FC1_KP = 8320             # round_up(8202, 128) = 5 * 1664
FC1_TK = 1664
FC1_N = 1024
M_ALIGN = 16              # bf16 sublane tile


def _round_up(x, m):
    return (x + m - 1) // m * m


def _num_tensorcores():
    """Crude 1-vs-2 TensorCore detection (v7x exposes a 2-TC part)."""
    try:
        kind = jax.devices()[0].device_kind.lower()
    except Exception:
        return 1
    return 2 if "v7" in kind else 1


_NUM_TC = _num_tensorcores()


# ---------------------------------------------------------------------------
# shared epilogue:  act( BN( scale*acc + bias ) )
#   p_ref rows: 0 = bias, 1 = gamma, 2 = beta, 3 = weight dequant scale
# ---------------------------------------------------------------------------
def _epilogue(acc, p_ref, *, bn, n_valid, act, need_mask, has_scale):
    if has_scale:
        acc = acc * p_ref[3:4, :]
    acc = acc + p_ref[0:1, :]
    if bn:
        inv_n = 1.0 / float(n_valid)
        if need_mask:
            row = jax.lax.broadcasted_iota(jnp.int32, (acc.shape[0], 1), 0)
            x = jnp.where(row < n_valid, acc, 0.0)
        else:
            x = acc
        mean = jnp.sum(x, axis=0, keepdims=True) * inv_n
        var = jnp.sum(x * x, axis=0, keepdims=True) * inv_n - mean * mean
        acc = (acc - mean) * jax.lax.rsqrt(var + BN_EPS) * p_ref[1:2, :] + p_ref[2:3, :]
    if act == "leaky_relu":
        acc = jnp.where(acc > 0, acc, NEG_SLOPE * acc)
    elif act == "sigmoid":
        acc = jax.nn.sigmoid(acc)
    return acc


# ---------------------------------------------------------------------------
# kernel 1: single-K-step fused matmul (cv1, cv2) -- no accumulator scratch
# ---------------------------------------------------------------------------
def _single_step_kernel(a_ref, w_ref, p_ref, o_ref, *, bn, n_valid, act, need_mask):
    acc = jnp.dot(a_ref[...], w_ref[...], preferred_element_type=jnp.float32)
    o_ref[...] = _epilogue(acc, p_ref, bn=bn, n_valid=n_valid, act=act,
                           need_mask=need_mask, has_scale=False).astype(o_ref.dtype)


def _single_step_matmul(a, w, prm, *, bn, act, n_valid, tm, out_dtype=jnp.bfloat16):
    """act(BN(a @ w + bias)) with the whole K axis resident in one VMEM block."""
    M, Kp = a.shape
    Kw, Np = w.shape
    assert Kw == Kp and M % tm == 0 and Np % 128 == 0
    if bn:
        assert tm == M, "BN fusion keeps the whole row axis in one M tile"
    kernel = functools.partial(_single_step_kernel, bn=bn, n_valid=n_valid,
                               act=act, need_mask=(n_valid != tm))
    return pl.pallas_call(
        kernel,
        out_shape=jax.ShapeDtypeStruct((M, Np), out_dtype),
        grid_spec=pltpu.PrefetchScalarGridSpec(
            num_scalar_prefetch=0,
            grid=(M // tm,),
            in_specs=[pl.BlockSpec((tm, Kp), lambda i: (i, 0)),
                      pl.BlockSpec((Kp, Np), lambda i: (0, 0)),
                      pl.BlockSpec((8, Np), lambda i: (0, 0))],
            out_specs=pl.BlockSpec((tm, Np), lambda i: (i, 0)),
        ),
        compiler_params=pltpu.CompilerParams(dimension_semantics=("parallel",)),
    )(a, w, prm)


# ---------------------------------------------------------------------------
# kernel 2: fused fc1(int8 W) + bias + BatchNorm1d + leaky_relu + fc2 + sigmoid
# ---------------------------------------------------------------------------
def _fc_fused_kernel(a_ref, w1_ref, p_ref, w2_ref, lab2_ref, o_ref, acc_ref,
                     *, n_valid, need_mask):
    k = pl.program_id(0)

    @pl.when(k == 0)
    def _():
        acc_ref[...] = jnp.zeros_like(acc_ref)

    # int8 -> bf16 dequant (per-column scale applied in the f32 epilogue); hides
    # under the (halved) weight DMA on the bandwidth-bound chips.
    w1 = w1_ref[...].astype(jnp.float32).astype(jnp.bfloat16)
    acc_ref[...] += jnp.dot(a_ref[...], w1, preferred_element_type=jnp.float32)

    @pl.when(k == pl.num_programs(0) - 1)
    def _():
        h = _epilogue(acc_ref[...], p_ref, bn=True, n_valid=n_valid,
                      act="leaky_relu", need_mask=need_mask, has_scale=True)
        # fc2 (1024 -> 1) folded in: column 0 of w2 holds the fc2 weights for h,
        # lab2 already contains label @ w2_label + fc2 bias.
        z = jnp.dot(h.astype(jnp.bfloat16), w2_ref[...],
                    preferred_element_type=jnp.float32) + lab2_ref[...]
        o_ref[...] = jax.nn.sigmoid(z).astype(o_ref.dtype)


def _fc_fused(a, w1q, prm, w2h, lab2, *, n_valid, tk=FC1_TK):
    Mp, Kp = a.shape
    _, Np = w1q.shape
    assert Kp % tk == 0
    kernel = functools.partial(_fc_fused_kernel, n_valid=n_valid,
                               need_mask=(n_valid != Mp))
    return pl.pallas_call(
        kernel,
        out_shape=jax.ShapeDtypeStruct((Mp, 128), jnp.float32),
        grid_spec=pltpu.PrefetchScalarGridSpec(
            num_scalar_prefetch=0,
            grid=(Kp // tk,),
            in_specs=[pl.BlockSpec((Mp, tk), lambda k: (0, k)),
                      pl.BlockSpec((tk, Np), lambda k: (k, 0)),
                      pl.BlockSpec((8, Np), lambda k: (0, 0)),
                      pl.BlockSpec((Np, 128), lambda k: (0, 0)),
                      pl.BlockSpec((Mp, 128), lambda k: (0, 0))],
            out_specs=pl.BlockSpec((Mp, 128), lambda k: (0, 0)),
            scratch_shapes=[pltpu.VMEM((Mp, Np), jnp.float32)],
        ),
        compiler_params=pltpu.CompilerParams(dimension_semantics=("arbitrary",)),
    )(a, w1q, prm, w2h, lab2)


# ---------------------------------------------------------------------------
# light XLA glue: label concat (channel-padded) + NHWC im2col
# ---------------------------------------------------------------------------
def _cat_label(h, lab, c_total):
    B, H, W, C = h.shape
    lab_map = jnp.broadcast_to(lab[:, None, None, :], (B, H, W, lab.shape[-1]))
    pad = c_total - C - lab.shape[-1]
    parts = [h, lab_map]
    if pad:
        parts.append(jnp.zeros((B, H, W, pad), h.dtype))
    return jnp.concatenate(parts, axis=-1)


def _im2col(x, k=4, stride=2, pad=1):
    """NHWC im2col; column order (ky, kx, c) matches the conv weight repack."""
    B, H, W, C = x.shape
    OH = (H + 2 * pad - k) // stride + 1
    OW = (W + 2 * pad - k) // stride + 1
    xp = jnp.pad(x, ((0, 0), (pad, pad), (pad, pad), (0, 0)))
    cols = [xp[:, ky:ky + stride * OH:stride, kx:kx + stride * OW:stride, :]
            for ky in range(k) for kx in range(k)]
    # TODO(synk): lax.conv_general_dilated_patches or an in-kernel strided gather would
    # cut this glue further; kept explicit so the (ky,kx,c) order is unambiguous.
    return jnp.concatenate(cols, axis=-1).reshape(B * OH * OW, k * k * C), OH, OW


# ---------------------------------------------------------------------------
# one-time repack of PyTorch-layout parameters into kernel-ready tensors
# ---------------------------------------------------------------------------
def _pack_prm(n_pad, bias, gamma=None, beta=None, scale=None):
    prm = jnp.zeros((8, n_pad), jnp.float32)
    n = bias.shape[0]
    prm = prm.at[0, :n].set(bias.astype(jnp.float32))
    if gamma is not None:
        prm = prm.at[1, :n].set(gamma.astype(jnp.float32))
        prm = prm.at[2, :n].set(beta.astype(jnp.float32))
    if scale is not None:
        prm = prm.at[3, :scale.shape[0]].set(scale.astype(jnp.float32))
    return prm


def _pack_conv_w(w, cin_pad):
    """(Cout,Cin,kh,kw) -> bf16 (kh*kw*cin_pad, round_up(Cout,128)); rows in (ky,kx,c)."""
    cout, cin, kh, kw = w.shape
    wp = jnp.pad(w, ((0, 0), (0, cin_pad - cin), (0, 0), (0, 0)))
    wm = jnp.transpose(wp, (2, 3, 1, 0)).reshape(kh * kw * cin_pad, cout)
    n_pad = _round_up(cout, 128)
    return jnp.pad(wm, ((0, 0), (0, n_pad - cout))).astype(jnp.bfloat16)


def _quant_int8_cols(w, k_pad):
    """(K,N) f32 -> (k_pad,N) int8 weights + per-output-column f32 dequant scale."""
    K, N = w.shape
    scale = jnp.maximum(jnp.max(jnp.abs(w), axis=0), 1e-12) / 127.0
    q = jnp.clip(jnp.round(w / scale), -127, 127).astype(jnp.int8)
    return jnp.pad(q, ((0, k_pad - K), (0, 0))), scale


def prepare_params(p):
    # fc1: permute image columns from NCHW flatten (c,h,w) to NHWC flatten (h,w,c)
    w_img = p["fc1_w"][:, :128 * 8 * 8].reshape(1024, 128, 8, 8)
    w_img = jnp.transpose(w_img, (0, 2, 3, 1)).reshape(1024, 128 * 8 * 8)
    fc1_w = jnp.concatenate([w_img, p["fc1_w"][:, 128 * 8 * 8:]], axis=1).T  # (8202,1024)
    fc1_q, fc1_scale = _quant_int8_cols(fc1_w, FC1_KP)
    # TODO(synk): on v7x store this as fp8 e4m3 (native MXU input) instead of int8.

    w2h = jnp.zeros((FC1_N, 128), jnp.float32).at[:, 0].set(p["fc2_w"][0, :FC1_N])
    return {
        "cv1_wm": _pack_conv_w(p["cv1_w"], CV1_CIN_PAD),
        "cv1_prm": _pack_prm(128, p["cv1_b"]),
        "cv2_wm": _pack_conv_w(p["cv2_w"], CV2_CIN_PAD),
        "cv2_prm": _pack_prm(128, p["cv2_b"], p["bm1_g"], p["bm1_b"]),
        "fc1_wq": fc1_q,
        "fc1_prm": _pack_prm(FC1_N, p["fc1_b"], p["bm2_g"], p["bm2_b"], fc1_scale),
        "fc2_wh": w2h.astype(jnp.bfloat16),
        "fc2_wlab": p["fc2_w"][:, FC1_N:].T.astype(jnp.float32),   # (10, 1)
        "fc2_b": p["fc2_b"].astype(jnp.float32),
    }


# ---------------------------------------------------------------------------
# Discriminator forward
# ---------------------------------------------------------------------------
@jax.jit
def discriminator_forward(pp, x_nchw, label):
    B = x_nchw.shape[0]
    x = jnp.transpose(x_nchw, (0, 2, 3, 1)).astype(jnp.bfloat16)      # NHWC once
    lab = label.astype(jnp.bfloat16)

    # cv1 -> leaky_relu                  (B,32,32,13+pad) -> (B,16,16,64)
    a1, oh1, ow1 = _im2col(_cat_label(x, lab, CV1_CIN_PAD))
    m1 = a1.shape[0]
    tm1 = m1 // _NUM_TC if m1 % (_NUM_TC * M_ALIGN) == 0 else m1
    h = _single_step_matmul(a1, pp["cv1_wm"], pp["cv1_prm"],
                            bn=False, act="leaky_relu", n_valid=m1, tm=tm1)
    h = h[:, :64].reshape(B, oh1, ow1, 64)

    # cv2 -> bm1 -> leaky_relu           (B,16,16,74+pad) -> (B,8,8,128)
    a2, oh2, ow2 = _im2col(_cat_label(h, lab, CV2_CIN_PAD))
    h = _single_step_matmul(a2, pp["cv2_wm"], pp["cv2_prm"],
                            bn=True, act="leaky_relu",
                            n_valid=a2.shape[0], tm=a2.shape[0])
    h = h.reshape(B, oh2, ow2, 128)

    # fc1 -> bm2 -> leaky_relu -> fc2 -> sigmoid    (one fused kernel)
    mp = _round_up(B, M_ALIGN)
    a3 = jnp.concatenate([h.reshape(B, 128 * 8 * 8), lab], axis=1)
    a3 = jnp.pad(a3, ((0, mp - B), (0, FC1_KP - a3.shape[1])))
    lab2 = label.astype(jnp.float32) @ pp["fc2_wlab"] + pp["fc2_b"]   # (B, 1)
    lab2 = jnp.pad(lab2, ((0, mp - B), (0, 127)))
    out = _fc_fused(a3, pp["fc1_wq"], pp["fc1_prm"], pp["fc2_wh"], lab2, n_valid=B)
    return out[:B, :1]


# ---------------------------------------------------------------------------
# Pure-JAX (f32) reference with PyTorch semantics for a correctness check
# ---------------------------------------------------------------------------
def discriminator_reference(p, x, label):
    def lrelu(v):
        return jnp.where(v > 0, v, NEG_SLOPE * v)

    def bn(v, g, b, axes):
        m = v.mean(axes, keepdims=True)
        var = v.var(axes, keepdims=True)          # biased variance, like PyTorch BN
        return (v - m) * jax.lax.rsqrt(var + BN_EPS) * g + b

    def conv(v, w, b):
        y = jax.lax.conv_general_dilated(
            v, w, window_strides=(2, 2), padding=[(1, 1), (1, 1)],
            dimension_numbers=("NCHW", "OIHW", "NCHW"))
        return y + b.reshape(1, -1, 1, 1)

    B = x.shape[0]
    lab = label.reshape(B, 10, 1, 1)
    h = lrelu(conv(jnp.concatenate([x, jnp.broadcast_to(lab, (B, 10, 32, 32))], 1),
                   p["cv1_w"], p["cv1_b"]))
    h = conv(jnp.concatenate([h, jnp.broadcast_to(lab, (B, 10, 16, 16))], 1),
             p["cv2_w"], p["cv2_b"])
    h = lrelu(bn(h, p["bm1_g"].reshape(1, -1, 1, 1),
                 p["bm1_b"].reshape(1, -1, 1, 1), (0, 2, 3)))
    h = jnp.concatenate([h.reshape(B, -1), label], 1) @ p["fc1_w"].T + p["fc1_b"]
    h = lrelu(bn(h, p["bm2_g"], p["bm2_b"], (0,)))
    return jax.nn.sigmoid(jnp.concatenate([h, label], 1) @ p["fc2_w"].T + p["fc2_b"])


# ---------------------------------------------------------------------------
def init_params(key):
    ks = jax.random.split(key, 12)
    n = lambda k, shape, s=0.05: (s * jax.random.normal(k, shape)).astype(jnp.float32)
    return {
        "cv1_w": n(ks[0], (64, 13, 4, 4)),            "cv1_b": n(ks[1], (64,)),
        "cv2_w": n(ks[2], (128, 74, 4, 4)),           "cv2_b": n(ks[3], (128,)),
        "bm1_g": 1.0 + n(ks[4], (128,)),              "bm1_b": n(ks[5], (128,)),
        "fc1_w": n(ks[6], (1024, 128 * 8 * 8 + 10)),  "fc1_b": n(ks[7], (1024,)),
        "bm2_g": 1.0 + n(ks[8], (1024,)),             "bm2_b": n(ks[9], (1024,)),
        "fc2_w": n(ks[10], (1, 1024 + 10)),           "fc2_b": n(ks[11], (1,)),
    }


if __name__ == "__main__":
    key = jax.random.PRNGKey(0)
    k_x, k_p = jax.random.split(key)

    B = 4
    x = jax.random.normal(k_x, (B, 3, 32, 32), dtype=jnp.float32)
    label = jax.nn.one_hot(jnp.arange(B) % 10, 10, dtype=jnp.float32)

    params = init_params(k_p)
    prepped = prepare_params(params)      # one-time weight repack (bf16/int8, padded)

    out = jax.block_until_ready(discriminator_forward(prepped, x, label))
    assert out.shape == (B, 1), out.shape

    ref = jax.block_until_ready(discriminator_reference(params, x, label))
    out_np, ref_np = np.asarray(out), np.asarray(ref)
    if not np.allclose(out_np, ref_np, atol=3e-2, rtol=3e-2):
        raise AssertionError(
            f"Pallas output does not match reference "
            f"(max abs err {np.max(np.abs(out_np - ref_np)):.4f})")

    print("KERNEL_OK")
</pallas_src>

<mosaic_0001>
module attributes {stable_mosaic.version = 11 : i64} {
  func.func @_single_step_kernel(%arg0: i32, %arg1: memref<1024x256xbf16, #tpu.memory_space<vmem>>, %arg2: memref<256x128xbf16, #tpu.memory_space<vmem>>, %arg3: memref<8x128xf32, #tpu.memory_space<vmem>>, %arg4: memref<1024x128xbf16, #tpu.memory_space<vmem>>) attributes {dimension_semantics = [#tpu.dimension_semantics<parallel>], iteration_bounds = array<i64: 1>, scalar_prefetch = 0 : i64, scratch_operands = 0 : i64, tpu.core_type = #tpu.core_type<tc>, window_params = [{transform_indices = @transform_0, window_bounds = array<i64: 1024, 256>}, {pipeline_mode = #tpu.pipeline_mode<synchronous>, transform_indices = @transform_1, window_bounds = array<i64: 256, 128>}, {pipeline_mode = #tpu.pipeline_mode<synchronous>, transform_indices = @transform_2, window_bounds = array<i64: 8, 128>}, {transform_indices = @transform_3, window_bounds = array<i64: 1024, 128>}]} {
    %c0 = arith.constant 0 : index
    %c0_0 = arith.constant 0 : index
    %0 = vector.load %arg1[%c0, %c0_0] : memref<1024x256xbf16, #tpu.memory_space<vmem>>, vector<1024x256xbf16>
    %c0_1 = arith.constant 0 : index
    %c0_2 = arith.constant 0 : index
    %1 = vector.load %arg2[%c0_1, %c0_2] : memref<256x128xbf16, #tpu.memory_space<vmem>>, vector<256x128xbf16>
    %cst = arith.constant dense<0.000000e+00> : vector<1024x128xf32>
    %2 = tpu.matmul %0, %1, %cst {dimension_numbers = #tpu.dot_dimension_numbers<[1], [0], [0], [1], [0, 0, 1, 1], [], []>} : vector<1024x256xbf16>, vector<256x128xbf16>, vector<1024x128xf32> -> vector<1024x128xf32>
    %c0_3 = arith.constant 0 : index
    %c0_4 = arith.constant 0 : index
    %3 = vector.load %arg3[%c0_3, %c0_4] : memref<8x128xf32, #tpu.memory_space<vmem>>, vector<1x128xf32>
    %4 = vector.broadcast %3 : vector<1x128xf32> to vector<1024x128xf32>
    %5 = arith.addf %2, %4 : vector<1024x128xf32>
    %cst_5 = arith.constant 0.000000e+00 : f32
    %6 = vector.broadcast %cst_5 : f32 to vector<1024x128xf32>
    %7 = arith.cmpf ogt, %5, %6 : vector<1024x128xf32>
    %cst_6 = arith.constant 0.00999999977 : f32
    %8 = vector.broadcast %cst_6 : f32 to vector<1024x128xf32>
    %9 = arith.mulf %8, %5 : vector<1024x128xf32>
    %10 = arith.select %7, %5, %9 : vector<1024x128xi1>, vector<1024x128xf32>
    %11 = arith.truncf %10 : vector<1024x128xf32> to vector<1024x128xbf16>
    %c0_7 = arith.constant 0 : index
    %c0_8 = arith.constant 0 : index
    %12 = vector.load %arg4[%c0_7, %c0_8] : memref<1024x128xbf16, #tpu.memory_space<vmem>>, vector<1024x128xbf16>
    tpu.vector_store %arg4[%c0_7, %c0_8], %11 {strides = array<i32>} : memref<1024x128xbf16, #tpu.memory_space<vmem>>, vector<1024x128xbf16>,
    return
  }
  func.func @transform_0(%arg0: i32) -> (i32, i32) {
    %c0_i32 = arith.constant 0 : i32
    %c0_i32_0 = arith.constant 0 : i32
    return %arg0, %c0_i32 : i32, i32
  }
  func.func @transform_1(%arg0: i32) -> (i32, i32) {
    %c0_i32 = arith.constant 0 : i32
    %c0_i32_0 = arith.constant 0 : i32
    %c0_i32_1 = arith.constant 0 : i32
    return %c0_i32, %c0_i32_0 : i32, i32
  }
  func.func @transform_2(%arg0: i32) -> (i32, i32) {
    %c0_i32 = arith.constant 0 : i32
    %c0_i32_0 = arith.constant 0 : i32
    %c0_i32_1 = arith.constant 0 : i32
    return %c0_i32, %c0_i32_0 : i32, i32
  }
  func.func @transform_3(%arg0: i32) -> (i32, i32) {
    %c0_i32 = arith.constant 0 : i32
    %c0_i32_0 = arith.constant 0 : i32
    return %arg0, %c0_i32 : i32, i32
  }
}

module attributes {stable_mosaic.version = 11 : i64} {
  func.func @_single_step_kernel(%arg0: i32, %arg1: memref<256x1280xbf16, #tpu.memory_space<vmem>>, %arg2: memref<1280x128xbf16, #tpu.memory_space<vmem>>, %arg3: memref<8x128xf32, #tpu.memory_space<vmem>>, %arg4: memref<256x128xbf16, #tpu.memory_space<vmem>>) attributes {dimension_semantics = [#tpu.dimension_semantics<parallel>], iteration_bounds = array<i64: 1>, scalar_prefetch = 0 : i64, scratch_operands = 0 : i64, tpu.core_type = #tpu.core_type<tc>, window_params = [{transform_indices = @transform_0, window_bounds = array<i64: 256, 1280>}, {pipeline_mode = #tpu.pipeline_mode<synchronous>, transform_indices = @transform_1, window_bounds = array<i64: 1280, 128>}, {pipeline_mode = #tpu.pipeline_mode<synchronous>, transform_indices = @transform_2, window_bounds = array<i64: 8, 128>}, {transform_indices = @transform_3, window_bounds = array<i64: 256, 128>}]} {
    %c0 = arith.constant 0 : index
    %c0_0 = arith.constant 0 : index
    %0 = vector.load %arg1[%c0, %c0_0] : memref<256x1280xbf16, #tpu.memory_space<vmem>>, vector<256x1280xbf16>
    %c0_1 = arith.constant 0 : index
    %c0_2 = arith.constant 0 : index
    %1 = vector.load %arg2[%c0_1, %c0_2] : memref<1280x128xbf16, #tpu.memory_space<vmem>>, vector<1280x128xbf16>
    %cst = arith.constant dense<0.000000e+00> : vector<256x128xf32>
    %2 = tpu.matmul %0, %1, %cst {dimension_numbers = #tpu.dot_dimension_numbers<[1], [0], [0], [1], [0, 0, 1, 1], [], []>} : vector<256x1280xbf16>, vector<1280x128xbf16>, vector<256x128xf32> -> vector<256x128xf32>
    %c0_3 = arith.constant 0 : index
    %c0_4 = arith.constant 0 : index
    %3 = vector.load %arg3[%c0_3, %c0_4] : memref<8x128xf32, #tpu.memory_space<vmem>>, vector<1x128xf32>
    %4 = vector.broadcast %3 : vector<1x128xf32> to vector<256x128xf32>
    %5 = arith.addf %2, %4 : vector<256x128xf32>
    %cst_5 = arith.constant dense<0.000000e+00> : vector<128xf32>
    %6 = vector.multi_reduction <add>, %5, %cst_5 [0] : vector<256x128xf32> to vector<128xf32>
    %7 = vector.shape_cast %6 : vector<128xf32> to vector<1x128xf32>
    %cst_6 = arith.constant 3.906250e-03 : f32
    %8 = vector.broadcast %cst_6 : f32 to vector<1x128xf32>
    %9 = arith.mulf %7, %8 : vector<1x128xf32>
    %10 = arith.mulf %5, %5 : vector<256x128xf32>
    %cst_7 = arith.constant dense<0.000000e+00> : vector<128xf32>
    %11 = vector.multi_reduction <add>, %10, %cst_7 [0] : vector<256x128xf32> to vector<128xf32>
    %12 = vector.shape_cast %11 : vector<128xf32> to vector<1x128xf32>
    %cst_8 = arith.constant 3.906250e-03 : f32
    %13 = vector.broadcast %cst_8 : f32 to vector<1x128xf32>
    %14 = arith.mulf %12, %13 : vector<1x128xf32>
    %15 = arith.mulf %9, %9 : vector<1x128xf32>
    %16 = arith.subf %14, %15 : vector<1x128xf32>
    %17 = vector.broadcast %9 : vector<1x128xf32> to vector<256x128xf32>
    %18 = arith.subf %5, %17 : vector<256x128xf32>
    %cst_9 = arith.constant 9.99999974E-6 : f32
    %19 = vector.broadcast %cst_9 : f32 to vector<1x128xf32>
    %20 = arith.addf %16, %19 : vector<1x128xf32>
    %21 = math.rsqrt %20 : vector<1x128xf32>
    %22 = vector.broadcast %21 : vector<1x128xf32> to vector<256x128xf32>
    %23 = arith.mulf %18, %22 : vector<256x128xf32>
    %c1 = arith.constant 1 : index
    %c0_10 = arith.constant 0 : index
    %24 = vector.load %arg3[%c1, %c0_10] : memref<8x128xf32, #tpu.memory_space<vmem>>, vector<1x128xf32>
    %25 = vector.broadcast %24 : vector<1x128xf32> to vector<256x128xf32>
    %26 = arith.mulf %23, %25 : vector<256x128xf32>
    %c2 = arith.constant 2 : index
    %c0_11 = arith.constant 0 : index
    %27 = vector.load %arg3[%c2, %c0_11] : memref<8x128xf32, #tpu.memory_space<vmem>>, vector<1x128xf32>
    %28 = vector.broadcast %27 : vector<1x128xf32> to vector<256x128xf32>
    %29 = arith.addf %26, %28 : vector<256x128xf32>
    %cst_12 = arith.constant 0.000000e+00 : f32
    %30 = vector.broadcast %cst_12 : f32 to vector<256x128xf32>
    %31 = arith.cmpf ogt, %29, %30 : vector<256x128xf32>
    %cst_13 = arith.constant 0.00999999977 : f32
    %32 = vector.broadcast %cst_13 : f32 to vector<256x128xf32>
    %33 = arith.mulf %32, %29 : vector<256x128xf32>
    %34 = arith.select %31, %29, %33 : vector<256x128xi1>, vector<256x128xf32>
    %35 = arith.truncf %34 : vector<256x128xf32> to vector<256x128xbf16>
    %c0_14 = arith.constant 0 : index
    %c0_15 = arith.constant 0 : index
    %36 = vector.load %arg4[%c0_14, %c0_15] : memref<256x128xbf16, #tpu.memory_space<vmem>>, vector<256x128xbf16>
    tpu.vector_store %arg4[%c0_14, %c0_15], %35 {strides = array<i32>} : memref<256x128xbf16, #tpu.memory_space<vmem>>, vector<256x128xbf16>,
    return
  }
  func.func @transform_0(%arg0: i32) -> (i32, i32) {
    %c0_i32 = arith.constant 0 : i32
    %c0_i32_0 = arith.constant 0 : i32
    return %arg0, %c0_i32 : i32, i32
  }
  func.func @transform_1(%arg0: i32) -> (i32, i32) {
    %c0_i32 = arith.constant 0 : i32
    %c0_i32_0 = arith.constant 0 : i32
    %c0_i32_1 = arith.constant 0 : i32
    return %c0_i32, %c0_i32_0 : i32, i32
  }
  func.func @transform_2(%arg0: i32) -> (i32, i32) {
    %c0_i32 = arith.constant 0 : i32
    %c0_i32_0 = arith.constant 0 : i32
    %c0_i32_1 = arith.constant 0 : i32
    return %c0_i32, %c0_i32_0 : i32, i32
  }
  func.func @transform_3(%arg0: i32) -> (i32, i32) {
    %c0_i32 = arith.constant 0 : i32
    %c0_i32_0 = arith.constant 0 : i32
    return %arg0, %c0_i32 : i32, i32
  }
}

module attributes {stable_mosaic.version = 11 : i64} {
  func.func @_fc_fused_kernel(%arg0: i32, %arg1: memref<16x1664xbf16, #tpu.memory_space<vmem>>, %arg2: memref<1664x1024xi8, #tpu.memory_space<vmem>>, %arg3: memref<8x1024xf32, #tpu.memory_space<vmem>>, %arg4: memref<1024x128xbf16, #tpu.memory_space<vmem>>, %arg5: memref<16x128xf32, #tpu.memory_space<vmem>>, %arg6: memref<16x128xf32, #tpu.memory_space<vmem>>, %arg7: memref<16x1024xf32, #tpu.memory_space<vmem>>) attributes {dimension_semantics = [#tpu.dimension_semantics<arbitrary>], iteration_bounds = array<i64: 5>, scalar_prefetch = 0 : i64, scratch_operands = 1 : i64, tpu.core_type = #tpu.core_type<tc>, window_params = [{transform_indices = @transform_0, window_bounds = array<i64: 16, 1664>}, {transform_indices = @transform_1, window_bounds = array<i64: 1664, 1024>}, {pipeline_mode = #tpu.pipeline_mode<synchronous>, transform_indices = @transform_2, window_bounds = array<i64: 8, 1024>}, {pipeline_mode = #tpu.pipeline_mode<synchronous>, transform_indices = @transform_3, window_bounds = array<i64: 1024, 128>}, {pipeline_mode = #tpu.pipeline_mode<synchronous>, transform_indices = @transform_4, window_bounds = array<i64: 16, 128>}, {pipeline_mode = #tpu.pipeline_mode<synchronous>, transform_indices = @transform_5, window_bounds = array<i64: 16, 128>}]} {
    %c0_i32 = arith.constant 0 : i32
    %0 = arith.cmpi eq, %arg0, %c0_i32 : i32
    %1 = arith.extui %0 : i1 to i32
    %c0_i32_0 = arith.constant 0 : i32
    %2 = arith.cmpi ne, %1, %c0_i32_0 : i32
    scf.if %2 {
      %cst_9 = arith.constant 0.000000e+00 : f32
      %14 = vector.broadcast %cst_9 : f32 to vector<16x1024xf32>
      %c0_10 = arith.constant 0 : index
      %c0_11 = arith.constant 0 : index
      %15 = vector.load %arg7[%c0_10, %c0_11] : memref<16x1024xf32, #tpu.memory_space<vmem>>, vector<16x1024xf32>
      tpu.vector_store %arg7[%c0_10, %c0_11], %14 {strides = array<i32>} : memref<16x1024xf32, #tpu.memory_space<vmem>>, vector<16x1024xf32>,
    } else {
    }
    %c0 = arith.constant 0 : index
    %c0_1 = arith.constant 0 : index
    %3 = vector.load %arg2[%c0, %c0_1] : memref<1664x1024xi8, #tpu.memory_space<vmem>>, vector<1664x1024xi8>
    %4 = arith.sitofp %3 : vector<1664x1024xi8> to vector<1664x1024xf32>
    %5 = arith.truncf %4 : vector<1664x1024xf32> to vector<1664x1024xbf16>
    %c0_2 = arith.constant 0 : index
    %c0_3 = arith.constant 0 : index
    %6 = vector.load %arg7[%c0_2, %c0_3] : memref<16x1024xf32, #tpu.memory_space<vmem>>, vector<16x1024xf32>
    %c0_4 = arith.constant 0 : index
    %c0_5 = arith.constant 0 : index
    %7 = vector.load %arg1[%c0_4, %c0_5] : memref<16x1664xbf16, #tpu.memory_space<vmem>>, vector<16x1664xbf16>
    %cst = arith.constant dense<0.000000e+00> : vector<16x1024xf32>
    %8 = tpu.matmul %7, %5, %cst {dimension_numbers = #tpu.dot_dimension_numbers<[1], [0], [0], [1], [0, 0, 1, 1], [], []>} : vector<16x1664xbf16>, vector<1664x1024xbf16>, vector<16x1024xf32> -> vector<16x1024xf32>
    %9 = arith.addf %6, %8 : vector<16x1024xf32>
    %c0_6 = arith.constant 0 : index
    %c0_7 = arith.constant 0 : index
    %10 = vector.load %arg7[%c0_6, %c0_7] : memref<16x1024xf32, #tpu.memory_space<vmem>>, vector<16x1024xf32>
    tpu.vector_store %arg7[%c0_6, %c0_7], %9 {strides = array<i32>} : memref<16x1024xf32, #tpu.memory_space<vmem>>, vector<16x1024xf32>,
    %c4_i32 = arith.constant 4 : i32
    %11 = arith.cmpi eq, %arg0, %c4_i32 : i32
    %12 = arith.extui %11 : i1 to i32
    %c0_i32_8 = arith.constant 0 : i32
    %13 = arith.cmpi ne, %12, %c0_i32_8 : i32
    scf.if %13 {
      %c0_9 = arith.constant 0 : index
      %c0_10 = arith.constant 0 : index
      %14 = vector.load %arg7[%c0_9, %c0_10] : memref<16x1024xf32, #tpu.memory_space<vmem>>, vector<16x1024xf32>
      %c3 = arith.constant 3 : index
      %c0_11 = arith.constant 0 : index
      %15 = vector.load %arg3[%c3, %c0_11] : memref<8x1024xf32, #tpu.memory_space<vmem>>, vector<1x1024xf32>
      %16 = vector.broadcast %15 : vector<1x1024xf32> to vector<16x1024xf32>
      %17 = arith.mulf %14, %16 : vector<16x1024xf32>
      %c0_12 = arith.constant 0 : index
      %c0_13 = arith.constant 0 : index
      %18 = vector.load %arg3[%c0_12, %c0_13] : memref<8x1024xf32, #tpu.memory_space<vmem>>, vector<1x1024xf32>
      %19 = vector.broadcast %18 : vector<1x1024xf32> to vector<16x1024xf32>
      %20 = arith.addf %17, %19 : vector<16x1024xf32>
      %21 = tpu.iota {dimensions = array<i32: 0>} : vector<16x1xi32>
      %c4_i32_14 = arith.constant 4 : i32
      %22 = vector.broadcast %c4_i32_14 : i32 to vector<16x1xi32>
      %23 = arith.cmpi slt, %21, %22 : vector<16x1xi32>
      %cst_15 = arith.constant 0.000000e+00 : f32
      %24 = vector.shape_cast %23 : vector<16x1xi1> to vector<16x1xi1>
      %25 = vector.broadcast %24 : vector<16x1xi1> to vector<16x1024xi1>
      %26 = vector.broadcast %cst_15 : f32 to vector<16x1024xf32>
      %27 = arith.select %25, %20, %26 : vector<16x1024xi1>, vector<16x1024xf32>
      %cst_16 = arith.constant dense<0.000000e+00> : vector<1024xf32>
      %28 = vector.multi_reduction <add>, %27, %cst_16 [0] : vector<16x1024xf32> to vector<1024xf32>
      %29 = vector.shape_cast %28 : vector<1024xf32> to vector<1x1024xf32>
      %cst_17 = arith.constant 2.500000e-01 : f32
      %30 = vector.broadcast %cst_17 : f32 to vector<1x1024xf32>
      %31 = arith.mulf %29, %30 : vector<1x1024xf32>
      %32 = arith.mulf %27, %27 : vector<16x1024xf32>
      %cst_18 = arith.constant dense<0.000000e+00> : vector<1024xf32>
      %33 = vector.multi_reduction <add>, %32, %cst_18 [0] : vector<16x1024xf32> to vector<1024xf32>
      %34 = vector.shape_cast %33 : vector<1024xf32> to vector<1x1024xf32>
      %cst_19 = arith.constant 2.500000e-01 : f32
      %35 = vector.broadcast %cst_19 : f32 to vector<1x1024xf32>
      %36 = arith.mulf %34, %35 : vector<1x1024xf32>
      %37 = arith.mulf %31, %31 : vector<1x1024xf32>
      %38 = arith.subf %36, %37 : vector<1x1024xf32>
      %39 = vector.broadcast %31 : vector<1x1024xf32> to vector<16x1024xf32>
      %40 = arith.subf %20, %39 : vector<16x1024xf32>
      %cst_20 = arith.constant 9.99999974E-6 : f32
      %41 = vector.broadcast %cst_20 : f32 to vector<1x1024xf32>
      %42 = arith.addf %38, %41 : vector<1x1024xf32>
      %43 = math.rsqrt %42 : vector<1x1024xf32>
      %44 = vector.broadcast %43 : vector<1x1024xf32> to vector<16x1024xf32>
      %45 = arith.mulf %40, %44 : vector<16x1024xf32>
      %c1 = arith.constant 1 : index
      %c0_21 = arith.constant 0 : index
      %46 = vector.load %arg3[%c1, %c0_21] : memref<8x1024xf32, #tpu.memory_space<vmem>>, vector<1x1024xf32>
      %47 = vector.broadcast %46 : vector<1x1024xf32> to vector<16x1024xf32>
      %48 = arith.mulf %45, %47 : vector<16x1024xf32>
      %c2 = arith.constant 2 : index
      %c0_22 = arith.constant 0 : index
      %49 = vector.load %arg3[%c2, %c0_22] : memref<8x1024xf32, #tpu.memory_space<vmem>>, vector<1x1024xf32>
      %50 = vector.broadcast %49 : vector<1x1024xf32> to vector<16x1024xf32>
      %51 = arith.addf %48, %50 : vector<16x1024xf32>
      %cst_23 = arith.constant 0.000000e+00 : f32
      %52 = vector.broadcast %cst_23 : f32 to vector<16x1024xf32>
      %53 = arith.cmpf ogt, %51, %52 : vector<16x1024xf32>
      %cst_24 = arith.constant 0.00999999977 : f32
      %54 = vector.broadcast %cst_24 : f32 to vector<16x1024xf32>
      %55 = arith.mulf %54, %51 : vector<16x1024xf32>
      %56 = arith.select %53, %51, %55 : vector<16x1024xi1>, vector<16x1024xf32>
      %57 = arith.truncf %56 : vector<16x1024xf32> to vector<16x1024xbf16>
      %c0_25 = arith.constant 0 : index
      %c0_26 = arith.constant 0 : index
      %58 = vector.load %arg4[%c0_25, %c0_26] : memref<1024x128xbf16, #tpu.memory_space<vmem>>, vector<1024x128xbf16>
      %cst_27 = arith.constant dense<0.000000e+00> : vector<16x128xf32>
      %59 = tpu.matmul %57, %58, %cst_27 {dimension_numbers = #tpu.dot_dimension_numbers<[1], [0], [0], [1], [0, 0, 1, 1], [], []>} : vector<16x1024xbf16>, vector<1024x128xbf16>, vector<16x128xf32> -> vector<16x128xf32>
      %c0_28 = arith.constant 0 : index
      %c0_29 = arith.constant 0 : index
      %60 = vector.load %arg5[%c0_28, %c0_29] : memref<16x128xf32, #tpu.memory_space<vmem>>, vector<16x128xf32>
      %61 = arith.addf %59, %60 : vector<16x128xf32>
      %62 = arith.negf %61 : vector<16x128xf32>
      %63 = math.exp %62 : vector<16x128xf32>
      %cst_30 = arith.constant 1.000000e+00 : f32
      %64 = vector.broadcast %cst_30 : f32 to vector<16x128xf32>
      %65 = arith.addf %64, %63 : vector<16x128xf32>
      %66 = arith.divf %64, %65 : vector<16x128xf32>
      %c0_31 = arith.constant 0 : index
      %c0_32 = arith.constant 0 : index
      %67 = vector.load %arg6[%c0_31, %c0_32] : memref<16x128xf32, #tpu.memory_space<vmem>>, vector<16x128xf32>
      tpu.vector_store %arg6[%c0_31, %c0_32], %66 {strides = array<i32>} : memref<16x128xf32, #tpu.memory_space<vmem>>, vector<16x128xf32>,
    } else {
    }
    return
  }
  func.func @transform_0(%arg0: i32) -> (i32, i32) {
    %c0_i32 = arith.constant 0 : i32
    %c0_i32_0 = arith.constant 0 : i32
    return %c0_i32, %arg0 : i32, i32
  }
  func.func @transform_1(%arg0: i32) -> (i32, i32) {
    %c0_i32 = arith.constant 0 : i32
    %c0_i32_0 = arith.constant 0 : i32
    return %arg0, %c0_i32 : i32, i32
  }
  func.func @transform_2(%arg0: i32) -> (i32, i32) {
    %c0_i32 = arith.constant 0 : i32
    %c0_i32_0 = arith.constant 0 : i32
    %c0_i32_1 = arith.constant 0 : i32
    return %c0_i32, %c0_i32_0 : i32, i32
  }
  func.func @transform_3(%arg0: i32) -> (i32, i32) {
    %c0_i32 = arith.constant 0 : i32
    %c0_i32_0 = arith.constant 0 : i32
    %c0_i32_1 = arith.constant 0 : i32
    return %c0_i32, %c0_i32_0 : i32, i32
  }
  func.func @transform_4(%arg0: i32) -> (i32, i32) {
    %c0_i32 = arith.constant 0 : i32
    %c0_i32_0 = arith.constant 0 : i32
    %c0_i32_1 = arith.constant 0 : i32
    return %c0_i32, %c0_i32_0 : i32, i32
  }
  func.func @transform_5(%arg0: i32) -> (i32, i32) {
    %c0_i32 = arith.constant 0 : i32
    %c0_i32_0 = arith.constant 0 : i32
    %c0_i32_1 = arith.constant 0 : i32
    return %c0_i32, %c0_i32_0 : i32, i32
  }
}

</mosaic_0001>

<bundles_post_ra>
// kernel: discriminator_forward.3
= control target key start
LH: loop header
LB: loop body
LE: loop exit
PB: predicated region body
PF: predicated region fallthrough
CT: control target
= control target key end

     0   :  { %v3515_v0 = vmov 0   ;;  %s4330_s1 = inlined_call_operand.vmem [shape: bf16[256,128], index: 1, kind: input, shape index: {}]   ;;  %s4331_s0 = inlined_call_operand.vmem [shape: bf16[1024,256], index: 0, kind: input, shape index: {}]   ;;  %s4332_s2 = inlined_call_operand.vmem [shape: f32[8,128], index: 2, kind: input, shape index: {}]   ;;  %s4333_s3 = inlined_call_operand.vmem [shape: bf16[1024,128], index: 3, kind: output, shape index: {}]  }
   0x1   :  { %916 = vmatprep.subr.bf16.mxu0 %v3515_v0  ;;  %3273 = vmatprep.subr.bf16.mxu1 %v3515_v0  ;;  %v3306_v1 = vld [vmem:[%s4330_s1 + $0x38] sm:$0xff]   ;;  %v3307_v2 = vld [vmem:[%s4330_s1 + $0x30] sm:$0xff]   ;;  %v3308_v3 = vld [vmem:[%s4330_s1 + $0x28] sm:$0xff]  }
   0x2   :  { %917 = vmatpush1.bf16.msra.mxu0 %v3306_v1  ;;  %3289 = vmatpush1.bf16.msra.mxu1 %v3306_v1  ;;  %v3309_v4 = vld [vmem:[%s4330_s1 + $0x20] sm:$0xff]   ;;  %v3310_v5 = vld [vmem:[%s4330_s1 + $0x18] sm:$0xff]   ;;  %v3311_v7 = vld [vmem:[%s4330_s1 + $0x10] sm:$0xff]  }
   0x3   :  { %918 = vmatprep.subr.bf16.mxu0 %v3515_v0  ;;  %3274 = vmatprep.subr.bf16.mxu1 %v3515_v0  ;;  %v3324_v6 = vld [vmem:[%s4331_s0 + $0x4] ss:$8 sps:$4 sm:$0xff]   ;;  %v3314_v11 = vld [vmem:[%s4330_s1 + $0x78] sm:$0xff]   ;;  %v3315_v12 = vld [vmem:[%s4330_s1 + $0x70] sm:$0xff]  }
   0x4   :  { %v3327_v8 = vld [vmem:[%s4331_s0 + $0x204] ss:$8 sps:$4 sm:$0xff]   ;;  %948 = vmatprep.mubr.bf16.mxu0 %v3324_v6  ;;  %v3318_v15 = vld [vmem:[%s4330_s1 + $0x58] sm:$0xff]   ;;  %v3319_v16 = vld [vmem:[%s4330_s1 + $0x50] sm:$0xff]  }
   0x5   :  { %1204 = vmatprep.mubr.bf16.mxu1 %v3327_v8  ;;  %v3312_v9 = vld [vmem:[%s4330_s1 + $0x8] sm:$0xff]   ;;  %v3313_v10 = vld [vmem:[%s4330_s1] sm:$0xff]   ;;  %v3328_v21 = vld [vmem:[%s4331_s0 + $0x14] ss:$8 sps:$4 sm:$0xff]  }
   0x6   :  { %919 = vmatpush1.bf16.msra.mxu0 %v3307_v2  ;;  %3290 = vmatpush1.bf16.msra.mxu1 %v3307_v2  ;;  %v3316_v13 = vld [vmem:[%s4330_s1 + $0x68] sm:$0xff]   ;;  %v3317_v14 = vld [vmem:[%s4330_s1 + $0x60] sm:$0xff]   ;;  %v3330_v22 = vld [vmem:[%s4331_s0 + $0x214] ss:$8 sps:$4 sm:$0xff]  }
   0x7   :  { %920 = vmatprep.subr.bf16.mxu0 %v3515_v0  ;;  %3275 = vmatprep.subr.bf16.mxu1 %v3515_v0  ;;  %v3320_v17 = vld [vmem:[%s4330_s1 + $0x48] sm:$0xff]   ;;  %v3321_v18 = vld [vmem:[%s4330_s1 + $0x40] sm:$0xff]   ;;  %v3332_v23 = vld [vmem:[%s4331_s0 + $0x10] ss:$8 sps:$4 sm:$0xff]  }
   0x8   :  { %v3322_v19 = vld [vmem:[%s4331_s0] ss:$8 sps:$4 sm:$0xff]   ;;  %v3333_v24 = vld [vmem:[%s4331_s0 + $0x210] ss:$8 sps:$4 sm:$0xff]   ;;  %v3334_v25 = vld [vmem:[%s4331_s0 + $0x24] ss:$8 sps:$4 sm:$0xff]  }
   0x9   :  { %v3325_v20 = vld [vmem:[%s4331_s0 + $0x200] ss:$8 sps:$4 sm:$0xff]   ;;  %v3336_v26 = vld [vmem:[%s4331_s0 + $0x224] ss:$8 sps:$4 sm:$0xff]   ;;  %v3340_v29 = vld [vmem:[%s4331_s0 + $0x34] ss:$8 sps:$4 sm:$0xff]  }
   0xa   :  { %921 = vmatpush1.bf16.msra.mxu0 %v3308_v3  ;;  %3291 = vmatpush1.bf16.msra.mxu1 %v3308_v3  ;;  %v3338_v27 = vld [vmem:[%s4331_s0 + $0x20] ss:$8 sps:$4 sm:$0xff]   ;;  %v3342_v30 = vld [vmem:[%s4331_s0 + $0x234] ss:$8 sps:$4 sm:$0xff]   ;;  %v3344_v31 = vld [vmem:[%s4331_s0 + $0x30] ss:$8 sps:$4 sm:$0xff]  }
   0xb   :  { %922 = vmatprep.subr.bf16.mxu0 %v3515_v0  ;;  %3276 = vmatprep.subr.bf16.mxu1 %v3515_v0  ;;  %v3339_v28 = vld [vmem:[%s4331_s0 + $0x220] ss:$8 sps:$4 sm:$0xff]   ;;  %v3345_v32 = vld [vmem:[%s4331_s0 + $0x230] ss:$8 sps:$4 sm:$0xff]   ;;  %v3346_v33 = vld [vmem:[%s4331_s0 + $0x44] ss:$8 sps:$4 sm:$0xff]  }
   0xc   :  { %v3348_v34 = vld [vmem:[%s4331_s0 + $0x244] ss:$8 sps:$4 sm:$0xff]   ;;  %v3350_v35 = vld [vmem:[%s4331_s0 + $0x40] ss:$8 sps:$4 sm:$0xff]   ;;  %v3352_v37 = vld [vmem:[%s4331_s0 + $0x54] ss:$8 sps:$4 sm:$0xff]  }
   0xd   :  { %v3351_v36 = vld [vmem:[%s4331_s0 + $0x240] ss:$8 sps:$4 sm:$0xff]   ;;  %v3354_v38 = vld [vmem:[%s4331_s0 + $0x254] ss:$8 sps:$4 sm:$0xff]   ;;  %v3356_v39 = vld [vmem:[%s4331_s0 + $0x50] ss:$8 sps:$4 sm:$0xff]  }
   0xe   :  { %923 = vmatpush1.bf16.msra.mxu0 %v3309_v4  ;;  %3292 = vmatpush1.bf16.msra.mxu1 %v3309_v4  ;;  %v3357_v40 = vld [vmem:[%s4331_s0 + $0x250] ss:$8 sps:$4 sm:$0xff]   ;;  %v3358_v41 = vld [vmem:[%s4331_s0 + $0x64] ss:$8 sps:$4 sm:$0xff]   ;;  %v3362_v43 = vld [vmem:[%s4331_s0 + $0x60] ss:$8 sps:$4 sm:$0xff]  }
   0xf   :  { %924 = vmatprep.subr.bf16.mxu0 %v3515_v0  ;;  %3277 = vmatprep.subr.bf16.mxu1 %v3515_v0  ;;  %v3360_v42 = vld [vmem:[%s4331_s0 + $0x264] ss:$8 sps:$4 sm:$0xff]   ;;  %v3363_v44 = vld [vmem:[%s4331_s0 + $0x260] ss:$8 sps:$4 sm:$0xff]   ;;  %v3364_v45 = vld [vmem:[%s4331_s0 + $0x74] ss:$8 sps:$4 sm:$0xff]  }
  0x10   :  { %v3366_v46 = vld [vmem:[%s4331_s0 + $0x274] ss:$8 sps:$4 sm:$0xff]   ;;  %v3368_v47 = vld [vmem:[%s4331_s0 + $0x70] ss:$8 sps:$4 sm:$0xff]   ;;  %v3370_v49 = vld [vmem:[%s4331_s0 + $0x84] ss:$8 sps:$4 sm:$0xff]  }
  0x11   :  { %v3369_v48 = vld [vmem:[%s4331_s0 + $0x270] ss:$8 sps:$4 sm:$0xff]   ;;  %v3372_v50 = vld [vmem:[%s4331_s0 + $0x284] ss:$8 sps:$4 sm:$0xff]   ;;  %v3374_v51 = vld [vmem:[%s4331_s0 + $0x80] ss:$8 sps:$4 sm:$0xff]  }
  0x12   :  { %925 = vmatpush1.bf16.msra.mxu0 %v3310_v5  ;;  %3293 = vmatpush1.bf16.msra.mxu1 %v3310_v5  ;;  %v3375_v52 = vld [vmem:[%s4331_s0 + $0x280] ss:$8 sps:$4 sm:$0xff]   ;;  %v3376_v53 = vld [vmem:[%s4331_s0 + $0x94] ss:$8 sps:$4 sm:$0xff]   ;;  %v3380_v55 = vld [vmem:[%s4331_s0 + $0x90] ss:$8 sps:$4 sm:$0xff]  }
  0x13   :  { %926 = vmatprep.subr.bf16.mxu0 %v3515_v0  ;;  %3278 = vmatprep.subr.bf16.mxu1 %v3515_v0  ;;  %v3378_v54 = vld [vmem:[%s4331_s0 + $0x294] ss:$8 sps:$4 sm:$0xff]   ;;  %v3381_v56 = vld [vmem:[%s4331_s0 + $0x290] ss:$8 sps:$4 sm:$0xff]   ;;  %v3382_v57 = vld [vmem:[%s4331_s0 + $0xa4] ss:$8 sps:$4 sm:$0xff]  }
  0x14   :  { %v3384_v58 = vld [vmem:[%s4331_s0 + $0x2a4] ss:$8 sps:$4 sm:$0xff]   ;;  %v3386_v59 = vld [vmem:[%s4331_s0 + $0xa0] ss:$8 sps:$4 sm:$0xff]   ;;  %v3388_v61 = vld [vmem:[%s4331_s0 + $0xb4] ss:$8 sps:$4 sm:$0xff]  }
  0x15   :  { %v3387_v60 = vld [vmem:[%s4331_s0 + $0x2a0] ss:$8 sps:$4 sm:$0xff]   ;;  %v3390_v62 = vld [vmem:[%s4331_s0 + $0x2b4] ss:$8 sps:$4 sm:$0xff]   ;;  %v3392_v63 = vld [vmem:[%s4331_s0 + $0xb0] ss:$8 sps:$4 sm:$0xff]  }
  0x16   :  { %927 = vmatpush1.bf16.msra.mxu0 %v3311_v7  ;;  %3294 = vmatpush1.bf16.msra.mxu1 %v3311_v7  ;;  %v3394_v1 = vld [vmem:[%s4331_s0 + $0xc4] ss:$8 sps:$4 sm:$0xff]   ;;  %v3398_v3 = vld [vmem:[%s4331_s0 + $0xc0] ss:$8 sps:$4 sm:$0xff]   ;;  %v3400_v5 = vld [vmem:[%s4331_s0 + $0xd4] ss:$8 sps:$4 sm:$0xff]  }
  0x17   :  { %928 = vmatprep.subr.bf16.mxu0 %v3515_v0  ;;  %3279 = vmatprep.subr.bf16.mxu1 %v3515_v0  ;;  %v3396_v2 = vld [vmem:[%s4331_s0 + $0x2c4] ss:$8 sps:$4 sm:$0xff]   ;;  %v3399_v4 = vld [vmem:[%s4331_s0 + $0x2c0] ss:$8 sps:$4 sm:$0xff]   ;;  %v3402_v6 = vld [vmem:[%s4331_s0 + $0x2d4] ss:$8 sps:$4 sm:$0xff]  }
  0x18   :  { %v3404_v7 = vld [vmem:[%s4331_s0 + $0xd0] ss:$8 sps:$4 sm:$0xff]  }
  0x19   :  { %v3405_v8 = vld [vmem:[%s4331_s0 + $0x2d0] ss:$8 sps:$4 sm:$0xff]  }
  0x1a   :  { %929 = vmatpush1.bf16.msra.mxu0 %v3312_v9  ;;  %3295 = vmatpush1.bf16.msra.mxu1 %v3312_v9  ;;  %v3406_v9 = vld [vmem:[%s4331_s0 + $0xe4] ss:$8 sps:$4 sm:$0xff]  }
  0x1b   :  { %930 = vmatprep.subr.bf16.mxu0 %v3515_v0  ;;  %3280 = vmatprep.subr.bf16.mxu1 %v3515_v0 }
  0x1e   :  { %931 = vmatpush1.bf16.msra.mxu0 %v3313_v10  ;;  %3296 = vmatpush1.bf16.msra.mxu1 %v3313_v10  ;;  %v3408_v10 = vld [vmem:[%s4331_s0 + $0x2e4] ss:$8 sps:$4 sm:$0xff]  }
  0x1f   :  { %932 = vmatprep.subr.bf16.mxu0 %v3515_v0  ;;  %3281 = vmatprep.subr.bf16.mxu1 %v3515_v0 }
  0x22   :  { %933 = vmatpush2.bf16.msra.mxu0 %v3314_v11  ;;  %3297 = vmatpush2.bf16.msra.mxu1 %v3314_v11  ;;  %v3410_v11 = vld [vmem:[%s4331_s0 + $0xe0] ss:$8 sps:$4 sm:$0xff]  }
  0x23   :  { %934 = vmatprep.subr.bf16.mxu0 %v3515_v0  ;;  %3282 = vmatprep.subr.bf16.mxu1 %v3515_v0 }
  0x26   :  { %935 = vmatpush2.bf16.msra.mxu0 %v3315_v12  ;;  %3298 = vmatpush2.bf16.msra.mxu1 %v3315_v12  ;;  %v3411_v12 = vld [vmem:[%s4331_s0 + $0x2e0] ss:$8 sps:$4 sm:$0xff]  }
  0x27   :  { %936 = vmatprep.subr.bf16.mxu0 %v3515_v0  ;;  %3283 = vmatprep.subr.bf16.mxu1 %v3515_v0 }
  0x2a   :  { %937 = vmatpush2.bf16.msra.mxu0 %v3316_v13  ;;  %3299 = vmatpush2.bf16.msra.mxu1 %v3316_v13  ;;  %v3412_v13 = vld [vmem:[%s4331_s0 + $0xf4] ss:$8 sps:$4 sm:$0xff]  }
  0x2b   :  { %938 = vmatprep.subr.bf16.mxu0 %v3515_v0  ;;  %3284 = vmatprep.subr.bf16.mxu1 %v3515_v0 }
  0x2e   :  { %939 = vmatpush2.bf16.msra.mxu0 %v3317_v14  ;;  %3300 = vmatpush2.bf16.msra.mxu1 %v3317_v14  ;;  %v3414_v14 = vld [vmem:[%s4331_s0 + $0x2f4] ss:$8 sps:$4 sm:$0xff]  }
  0x2f   :  { %940 = vmatprep.subr.bf16.mxu0 %v3515_v0  ;;  %3285 = vmatprep.subr.bf16.mxu1 %v3515_v0 }
  0x32   :  { %941 = vmatpush2.bf16.msra.mxu0 %v3318_v15  ;;  %3301 = vmatpush2.bf16.msra.mxu1 %v3318_v15  ;;  %v3416_v15 = vld [vmem:[%s4331_s0 + $0xf0] ss:$8 sps:$4 sm:$0xff]  }
  0x33   :  { %942 = vmatprep.subr.bf16.mxu0 %v3515_v0  ;;  %3286 = vmatprep.subr.bf16.mxu1 %v3515_v0 }
  0x36   :  { %943 = vmatpush2.bf16.msra.mxu0 %v3319_v16  ;;  %3302 = vmatpush2.bf16.msra.mxu1 %v3319_v16  ;;  %v3417_v16 = vld [vmem:[%s4331_s0 + $0x2f0] ss:$8 sps:$4 sm:$0xff]  }
  0x37   :  { %944 = vmatprep.subr.bf16.mxu0 %v3515_v0  ;;  %3287 = vmatprep.subr.bf16.mxu1 %v3515_v0 }
  0x3a   :  { %945 = vmatpush2.bf16.msra.mxu0 %v3320_v17  ;;  %3303 = vmatpush2.bf16.msra.mxu1 %v3320_v17  ;;  %v3418_v17 = vld [vmem:[%s4331_s0 + $0x104] ss:$8 sps:$4 sm:$0xff]  }
  0x3b   :  { %946 = vmatprep.subr.bf16.mxu0 %v3515_v0  ;;  %3288 = vmatprep.subr.bf16.mxu1 %v3515_v0  ;;  %v3393_v0 = vld [vmem:[%s4331_s0 + $0x2b0] ss:$8 sps:$4 sm:$0xff]  }
  0x3e   :  { %947 = vmatpush2.bf16.msra.mxu0 %v3321_v18  ;;  %3304 = vmatpush2.bf16.msra.mxu1 %v3321_v18  ;;  %v3420_v18 = vld [vmem:[%s4331_s0 + $0x304] ss:$8 sps:$4 sm:$0xff]  }
  0x41   :  { %949 = vmatmul.mubr.bf16.vlgmr.msra.gmra.mxu0 %v3322_v19  ;;  %1205 = vmatmul.mubr.bf16.vlgmr.msra.gmra.mxu1 %v3325_v20  ;;  %v3422_v19 = vld [vmem:[%s4331_s0 + $0x100] ss:$8 sps:$4 sm:$0xff]  }
  0x42   :  { %956 = vmatprep.mubr.bf16.mxu0 %v3328_v21  ;;  %1212 = vmatprep.mubr.bf16.mxu1 %v3330_v22  ;;  %v3423_v20 = vld [vmem:[%s4331_s0 + $0x300] ss:$8 sps:$4 sm:$0xff]   ;;  %v3424_v21 = vld [vmem:[%s4331_s0 + $0x114] ss:$8 sps:$4 sm:$0xff]  }
  0x43   :  { %v3426_v22 = vld [vmem:[%s4331_s0 + $0x314] ss:$8 sps:$4 sm:$0xff]  }
  0x49   :  { %957 = vmatmul.mubr.bf16.gmra.mxu0 %v3332_v23  ;;  %1213 = vmatmul.mubr.bf16.gmra.mxu1 %v3333_v24  ;;  %v3428_v23 = vld [vmem:[%s4331_s0 + $0x110] ss:$8 sps:$4 sm:$0xff]  }
  0x4a   :  { %964 = vmatprep.mubr.bf16.mxu0 %v3334_v25  ;;  %1220 = vmatprep.mubr.bf16.mxu1 %v3336_v26  ;;  %v3429_v24 = vld [vmem:[%s4331_s0 + $0x310] ss:$8 sps:$4 sm:$0xff]   ;;  %v3430_v25 = vld [vmem:[%s4331_s0 + $0x124] ss:$8 sps:$4 sm:$0xff]  }
  0x4b   :  { %v3432_v26 = vld [vmem:[%s4331_s0 + $0x324] ss:$8 sps:$4 sm:$0xff]  }
  0x51   :  { %965 = vmatmul.mubr.bf16.gmra.mxu0 %v3338_v27  ;;  %1221 = vmatmul.mubr.bf16.gmra.mxu1 %v3339_v28  ;;  %v3434_v27 = vld [vmem:[%s4331_s0 + $0x120] ss:$8 sps:$4 sm:$0xff]  }
  0x52   :  { %972 = vmatprep.mubr.bf16.mxu0 %v3340_v29  ;;  %1228 = vmatprep.mubr.bf16.mxu1 %v3342_v30  ;;  %v3435_v28 = vld [vmem:[%s4331_s0 + $0x320] ss:$8 sps:$4 sm:$0xff]   ;;  %v3436_v29 = vld [vmem:[%s4331_s0 + $0x134] ss:$8 sps:$4 sm:$0xff]  }
  0x53   :  { %v3438_v30 = vld [vmem:[%s4331_s0 + $0x334] ss:$8 sps:$4 sm:$0xff]  }
  0x59   :  { %973 = vmatmul.mubr.bf16.gmra.mxu0 %v3344_v31  ;;  %1229 = vmatmul.mubr.bf16.gmra.mxu1 %v3345_v32  ;;  %v3440_v31 = vld [vmem:[%s4331_s0 + $0x130] ss:$8 sps:$4 sm:$0xff]  }
  0x5a   :  { %980 = vmatprep.mubr.bf16.mxu0 %v3346_v33  ;;  %1236 = vmatprep.mubr.bf16.mxu1 %v3348_v34  ;;  %v3441_v32 = vld [vmem:[%s4331_s0 + $0x330] ss:$8 sps:$4 sm:$0xff]   ;;  %v3442_v33 = vld [vmem:[%s4331_s0 + $0x144] ss:$8 sps:$4 sm:$0xff]  }
  0x5b   :  { %v3444_v34 = vld [vmem:[%s4331_s0 + $0x344] ss:$8 sps:$4 sm:$0xff]  }
  0x61   :  { %981 = vmatmul.mubr.bf16.gmra.mxu0 %v3350_v35  ;;  %1237 = vmatmul.mubr.bf16.gmra.mxu1 %v3351_v36  ;;  %v3446_v35 = vld [vmem:[%s4331_s0 + $0x140] ss:$8 sps:$4 sm:$0xff]  }
  0x62   :  { %988 = vmatprep.mubr.bf16.mxu0 %v3352_v37  ;;  %1244 = vmatprep.mubr.bf16.mxu1 %v3354_v38  ;;  %v3447_v36 = vld [vmem:[%s4331_s0 + $0x340] ss:$8 sps:$4 sm:$0xff]   ;;  %v3448_v37 = vld [vmem:[%s4331_s0 + $0x154] ss:$8 sps:$4 sm:$0xff]  }
  0x63   :  { %v3450_v38 = vld [vmem:[%s4331_s0 + $0x354] ss:$8 sps:$4 sm:$0xff]  }
  0x69   :  { %989 = vmatmul.mubr.bf16.gmra.mxu0 %v3356_v39  ;;  %1245 = vmatmul.mubr.bf16.gmra.mxu1 %v3357_v40  ;;  %v3452_v39 = vld [vmem:[%s4331_s0 + $0x150] ss:$8 sps:$4 sm:$0xff]  }
  0x6a   :  { %996 = vmatprep.mubr.bf16.mxu0 %v3358_v41  ;;  %1252 = vmatprep.mubr.bf16.mxu1 %v3360_v42  ;;  %v3453_v40 = vld [vmem:[%s4331_s0 + $0x350] ss:$8 sps:$4 sm:$0xff]   ;;  %v3454_v41 = vld [vmem:[%s4331_s0 + $0x164] ss:$8 sps:$4 sm:$0xff]  }
  0x6b   :  { %v3456_v42 = vld [vmem:[%s4331_s0 + $0x364] ss:$8 sps:$4 sm:$0xff]  }
  0x71   :  { %997 = vmatmul.mubr.bf16.gmra.mxu0 %v3362_v43  ;;  %1253 = vmatmul.mubr.bf16.gmra.mxu1 %v3363_v44  ;;  %v3458_v43 = vld [vmem:[%s4331_s0 + $0x160] ss:$8 sps:$4 sm:$0xff]  }
  0x72   :  { %1004 = vmatprep.mubr.bf16.mxu0 %v3364_v45  ;;  %1260 = vmatprep.mubr.bf16.mxu1 %v3366_v46  ;;  %v3459_v44 = vld [vmem:[%s4331_s0 + $0x360] ss:$8 sps:$4 sm:$0xff]   ;;  %v3460_v45 = vld [vmem:[%s4331_s0 + $0x174] ss:$8 sps:$4 sm:$0xff]  }
  0x73   :  { %v3462_v46 = vld [vmem:[%s4331_s0 + $0x374] ss:$8 sps:$4 sm:$0xff]  }
  0x79   :  { %1005 = vmatmul.mubr.bf16.gmra.mxu0 %v3368_v47  ;;  %1261 = vmatmul.mubr.bf16.gmra.mxu1 %v3369_v48  ;;  %v3464_v47 = vld [vmem:[%s4331_s0 + $0x170] ss:$8 sps:$4 sm:$0xff]  }
  0x7a   :  { %1012 = vmatprep.mubr.bf16.mxu0 %v3370_v49  ;;  %1268 = vmatprep.mubr.bf16.mxu1 %v3372_v50  ;;  %v3465_v48 = vld [vmem:[%s4331_s0 + $0x370] ss:$8 sps:$4 sm:$0xff]   ;;  %v3466_v49 = vld [vmem:[%s4331_s0 + $0x184] ss:$8 sps:$4 sm:$0xff]  }
  0x7b   :  { %v3468_v50 = vld [vmem:[%s4331_s0 + $0x384] ss:$8 sps:$4 sm:$0xff]  }
  0x81   :  { %1013 = vmatmul.mubr.bf16.gmra.mxu0 %v3374_v51  ;;  %1269 = vmatmul.mubr.bf16.gmra.mxu1 %v3375_v52  ;;  %v3470_v51 = vld [vmem:[%s4331_s0 + $0x180] ss:$8 sps:$4 sm:$0xff]  }
  0x82   :  { %1020 = vmatprep.mubr.bf16.mxu0 %v3376_v53  ;;  %1276 = vmatprep.mubr.bf16.mxu1 %v3378_v54  ;;  %v3471_v52 = vld [vmem:[%s4331_s0 + $0x380] ss:$8 sps:$4 sm:$0xff]   ;;  %v3472_v53 = vld [vmem:[%s4331_s0 + $0x194] ss:$8 sps:$4 sm:$0xff]  }
  0x83   :  { %v3474_v54 = vld [vmem:[%s4331_s0 + $0x394] ss:$8 sps:$4 sm:$0xff]  }
  0x89   :  { %1021 = vmatmul.mubr.bf16.gmra.mxu0 %v3380_v55  ;;  %1277 = vmatmul.mubr.bf16.gmra.mxu1 %v3381_v56  ;;  %v3925_v55 = vld [vmem:[%s4332_s2] ss:$0 sm:$0xff] }
  0x8a   :  { %1028 = vmatprep.mubr.bf16.mxu0 %v3382_v57  ;;  %1284 = vmatprep.mubr.bf16.mxu1 %v3384_v58 }
  0x91   :  { %1029 = vmatmul.mubr.bf16.gmra.mxu0 %v3386_v59  ;;  %1285 = vmatmul.mubr.bf16.gmra.mxu1 %v3387_v60 }
  0x92   :  { %1036 = vmatprep.mubr.bf16.mxu0 %v3388_v61  ;;  %1292 = vmatprep.mubr.bf16.mxu1 %v3390_v62  ;;  %v3476_v62 = vld [vmem:[%s4331_s0 + $0x190] ss:$8 sps:$4 sm:$0xff]  }
  0x99   :  { %1037 = vmatmul.mubr.bf16.gmra.mxu0 %v3392_v63  ;;  %1293 = vmatmul.mubr.bf16.gmra.mxu1 %v3393_v0 }
  0x9a   :  { %1044 = vmatprep.mubr.bf16.mxu0 %v3394_v1  ;;  %1300 = vmatprep.mubr.bf16.mxu1 %v3396_v2 }
  0xa1   :  { %1045 = vmatmul.mubr.bf16.gmra.mxu0 %v3398_v3  ;;  %1301 = vmatmul.mubr.bf16.gmra.mxu1 %v3399_v4  ;;  %v3477_v3 = vld [vmem:[%s4331_s0 + $0x390] ss:$8 sps:$4 sm:$0xff]  }
  0xa2   :  { %1052 = vmatprep.mubr.bf16.mxu0 %v3400_v5  ;;  %1308 = vmatprep.mubr.bf16.mxu1 %v3402_v6  ;;  %v3478_v6 = vld [vmem:[%s4331_s0 + $0x1a4] ss:$8 sps:$4 sm:$0xff]  }
  0xa9   :  { %1053 = vmatmul.mubr.bf16.gmra.mxu0 %v3404_v7  ;;  %1309 = vmatmul.mubr.bf16.gmra.mxu1 %v3405_v8 }
  0xaa   :  { %1060 = vmatprep.mubr.bf16.mxu0 %v3406_v9  ;;  %1316 = vmatprep.mubr.bf16.mxu1 %v3408_v10  ;;  %v3480_v9 = vld [vmem:[%s4331_s0 + $0x3a4] ss:$8 sps:$4 sm:$0xff]  }
  0xb1   :  { %1061 = vmatmul.mubr.bf16.gmra.mxu0 %v3410_v11  ;;  %1317 = vmatmul.mubr.bf16.gmra.mxu1 %v3411_v12 }
  0xb2   :  { %1068 = vmatprep.mubr.bf16.mxu0 %v3412_v13  ;;  %1324 = vmatprep.mubr.bf16.mxu1 %v3414_v14 }
  0xb9   :  { %1069 = vmatmul.mubr.bf16.gmra.mxu0 %v3416_v15  ;;  %1325 = vmatmul.mubr.bf16.gmra.mxu1 %v3417_v16 }
  0xba   :  { %1076 = vmatprep.mubr.bf16.mxu0 %v3418_v17  ;;  %1332 = vmatprep.mubr.bf16.mxu1 %v3420_v18 }
  0xc1   :  { %1077 = vmatmul.mubr.bf16.gmra.mxu0 %v3422_v19  ;;  %1333 = vmatmul.mubr.bf16.gmra.mxu1 %v3423_v20 }
  0xc2   :  { %1084 = vmatprep.mubr.bf16.mxu0 %v3424_v21  ;;  %1340 = vmatprep.mubr.bf16.mxu1 %v3426_v22 }
  0xc9   :  { %1085 = vmatmul.mubr.bf16.gmra.mxu0 %v3428_v23  ;;  %1341 = vmatmul.mubr.bf16.gmra.mxu1 %v3429_v24  ;;  %v3482_v24 = vld [vmem:[%s4331_s0 + $0x1a0] ss:$8 sps:$4 sm:$0xff]  }
  0xca   :  { %1092 = vmatprep.mubr.bf16.mxu0 %v3430_v25  ;;  %1348 = vmatprep.mubr.bf16.mxu1 %v3432_v26 }
  0xd1   :  { %1093 = vmatmul.mubr.bf16.gmra.mxu0 %v3434_v27  ;;  %1349 = vmatmul.mubr.bf16.gmra.mxu1 %v3435_v28 }
  0xd2   :  { %1100 = vmatprep.mubr.bf16.mxu0 %v3436_v29  ;;  %1356 = vmatprep.mubr.bf16.mxu1 %v3438_v30  ;;  %v3483_v29 = vld [vmem:[%s4331_s0 + $0x3a0] ss:$8 sps:$4 sm:$0xff]  }
  0xd9   :  { %1101 = vmatmul.mubr.bf16.gmra.mxu0 %v3440_v31  ;;  %1357 = vmatmul.mubr.bf16.gmra.mxu1 %v3441_v32  ;;  %v3484_v32 = vld [vmem:[%s4331_s0 + $0x1b4] ss:$8 sps:$4 sm:$0xff]  }
  0xda   :  { %1108 = vmatprep.mubr.bf16.mxu0 %v3442_v33  ;;  %1364 = vmatprep.mubr.bf16.mxu1 %v3444_v34 }
  0xe1   :  { %1109 = vmatmul.mubr.bf16.gmra.mxu0 %v3446_v35  ;;  %1365 = vmatmul.mubr.bf16.gmra.mxu1 %v3447_v36  ;;  %v3486_v35 = vld [vmem:[%s4331_s0 + $0x3b4] ss:$8 sps:$4 sm:$0xff]  }
  0xe2   :  { %1116 = vmatprep.mubr.bf16.mxu0 %v3448_v37  ;;  %1372 = vmatprep.mubr.bf16.mxu1 %v3450_v38 }
  0xe9   :  { %1117 = vmatmul.mubr.bf16.gmra.mxu0 %v3452_v39  ;;  %1373 = vmatmul.mubr.bf16.gmra.mxu1 %v3453_v40 }
  0xea   :  { %1124 = vmatprep.mubr.bf16.mxu0 %v3454_v41  ;;  %1380 = vmatprep.mubr.bf16.mxu1 %v3456_v42 }
  0xf1   :  { %1125 = vmatmul.mubr.bf16.gmra.mxu0 %v3458_v43  ;;  %1381 = vmatmul.mubr.bf16.gmra.mxu1 %v3459_v44 }
  0xf2   :  { %1132 = vmatprep.mubr.bf16.mxu0 %v3460_v45  ;;  %1388 = vmatprep.mubr.bf16.mxu1 %v3462_v46 }
  0xf9   :  { %1133 = vmatmul.mubr.bf16.gmra.mxu0 %v3464_v47  ;;  %1389 = vmatmul.mubr.bf16.gmra.mxu1 %v3465_v48 }
  0xfa   :  { %1140 = vmatprep.mubr.bf16.mxu0 %v3466_v49  ;;  %1396 = vmatprep.mubr.bf16.mxu1 %v3468_v50  ;;  %v3488_v50 = vld [vmem:[%s4331_s0 + $0x1b0] ss:$8 sps:$4 sm:$0xff]  }
 0x101   :  { %v950_v56 = vpop.f32.mrf.mxu0  ;;  %1141 = vmatmul.mubr.bf16.gmra.mxu0 %v3470_v51  ;;  %v1206_v57 = vpop.f32.mrf.mxu1  ;;  %1397 = vmatmul.mubr.bf16.gmra.mxu1 %v3471_v52 }
 0x102   :  { %v951_v58 = vadd.f32 %v3925_v55, %v950_v56  ;;  %v1207_v59 = vadd.f32 %v3925_v55, %v1206_v57  ;;  %1148 = vmatprep.mubr.bf16.mxu0 %v3472_v53  ;;  %1404 = vmatprep.mubr.bf16.mxu1 %v3474_v54  ;;  %v3489_v56 = vld [vmem:[%s4331_s0 + $0x3b0] ss:$8 sps:$4 sm:$0xff]  }
 0x103   :  { %v952_v60 = vpop.f32.mrf.mxu0  ;;  %v1208_v61 = vpop.f32.mrf.mxu1 }
 0x104   :  { %v1589_v63 = vmul.f32 0.01, %v951_v58  ;;  %v1653_v0 = vmul.f32 0.01, %v1207_v59  ;;  %vm1461_vm0 = vcmp.gt.f32.partialorder %v951_v58, 0.0  ;;  %vm1525_vm1 = vcmp.gt.f32.partialorder %v1207_v59, 0.0 }
 0x105   :  { %v953_v1 = vpop.f32.mrf.mxu0  ;;  %v1209_v2 = vpop.f32.mrf.mxu1 }
 0x106   :  { %v954_v4 = vadd.f32 %v3925_v55, %v953_v1  ;;  %v1210_v5 = vadd.f32 %v3925_v55, %v1209_v2  ;;  %v1717_v12 = vsel %vm1461_vm0, %v951_v58, %v1589_v63  ;;  %v1781_v13 = vsel %vm1525_vm1, %v1207_v59, %v1653_v0  ;;  %v3492_v59 = vld [vmem:[%s4331_s0 + $0x1c4] ss:$8 sps:$4 sm:$0xff]  }
 0x107   :  { %v955_v7 = vpop.f32.mrf.mxu0  ;;  %v1211_v8 = vpop.f32.mrf.mxu1 }
 0x108   :  { %vm1462_vm2 = vcmp.gt.f32.partialorder %v954_v4, 0.0  ;;  %v1590_v10 = vmul.f32 0.01, %v954_v4  ;;  %vm1526_vm3 = vcmp.gt.f32.partialorder %v1210_v5, 0.0  ;;  %v1654_v11 = vmul.f32 0.01, %v1210_v5 }
 0x109   :  { %v958_v14 = vpop.f32.mrf.mxu0  ;;  %1149 = vmatmul.mubr.bf16.gmra.mxu0 %v3476_v62  ;;  %v1214_v15 = vpop.f32.mrf.mxu1  ;;  %1405 = vmatmul.mubr.bf16.gmra.mxu1 %v3477_v3  ;;  %v3495_v62 = vld [vmem:[%s4331_s0 + $0x3c4] ss:$8 sps:$4 sm:$0xff]  }
 0x10a   :  { %v1718_v16 = vsel %vm1462_vm2, %v954_v4, %v1590_v10  ;;  %v1782_v17 = vsel %vm1526_vm3, %v1210_v5, %v1654_v11  ;;  %v959_v18 = vadd.f32 %v3925_v55, %v958_v14  ;;  %v1215_v19 = vadd.f32 %v3925_v55, %v1214_v15  ;;  %1156 = vmatprep.mubr.bf16.mxu0 %v3478_v6 }
 0x10b   :  { %v2893_v20 = vpack.c.bf16 %v1718_v16, %v1717_v12  ;;  %v3053_v21 = vpack.c.bf16 %v1782_v17, %v1781_v13  ;;  %v960_v22 = vpop.f32.mrf.mxu0  ;;  %v1216_v23 = vpop.f32.mrf.mxu1  ;;  %1412 = vmatprep.mubr.bf16.mxu1 %v3480_v9  ;;  %v3490_v13 = vld [vmem:[%s4331_s0 + $0x1c0] ss:$8 sps:$4 sm:$0xff]  }
 0x10c   :  { %v1591_v25 = vmul.f32 0.01, %v959_v18  ;;  %v1655_v26 = vmul.f32 0.01, %v1215_v19  ;;  %vm1463_vm4 = vcmp.gt.f32.partialorder %v959_v18, 0.0  ;;  %vm1527_vm5 = vcmp.gt.f32.partialorder %v1215_v19, 0.0 }
 0x10d   :  { %2894 = vst [vmem:[%s4333_s3] sm:$0xff] %v2893_v20   ;;  %3241 = vst [vmem:[%s4333_s3 + $0x100] sm:$0xff] %v3053_v21   ;;  %v961_v27 = vpop.f32.mrf.mxu0  ;;  %v1217_v28 = vpop.f32.mrf.mxu1  ;;  %v3498_v21 = vld [vmem:[%s4331_s0 + $0x1d4] ss:$8 sps:$4 sm:$0xff]  }
 0x10e   :  { %v962_v30 = vadd.f32 %v3925_v55, %v961_v27  ;;  %v1218_v31 = vadd.f32 %v3925_v55, %v1217_v28  ;;  %v1719_v38 = vsel %vm1463_vm4, %v959_v18, %v1591_v25  ;;  %v1783_v39 = vsel %vm1527_vm5, %v1215_v19, %v1655_v26  ;;  %v3493_v18 = vld [vmem:[%s4331_s0 + $0x3c0] ss:$8 sps:$4 sm:$0xff]  }
 0x10f   :  { %v963_v33 = vpop.f32.mrf.mxu0  ;;  %v1219_v34 = vpop.f32.mrf.mxu1 }
 0x110   :  { %vm1464_vm6 = vcmp.gt.f32.partialorder %v962_v30, 0.0  ;;  %v1592_v36 = vmul.f32 0.01, %v962_v30  ;;  %vm1528_vm7 = vcmp.gt.f32.partialorder %v1218_v31, 0.0  ;;  %v1656_v37 = vmul.f32 0.01, %v1218_v31 }
 0x111   :  { %v966_v40 = vpop.f32.mrf.mxu0  ;;  %1157 = vmatmul.mubr.bf16.gmra.mxu0 %v3482_v24  ;;  %v1222_v41 = vpop.f32.mrf.mxu1  ;;  %1413 = vmatmul.mubr.bf16.gmra.mxu1 %v3483_v29  ;;  %v3501_v24 = vld [vmem:[%s4331_s0 + $0x3d4] ss:$8 sps:$4 sm:$0xff]  }
 0x112   :  { %v1720_v42 = vsel %vm1464_vm6, %v962_v30, %v1592_v36  ;;  %v1784_v43 = vsel %vm1528_vm7, %v1218_v31, %v1656_v37  ;;  %v967_v44 = vadd.f32 %v3925_v55, %v966_v40  ;;  %v1223_v45 = vadd.f32 %v3925_v55, %v1222_v41  ;;  %1164 = vmatprep.mubr.bf16.mxu0 %v3484_v32 }
 0x113   :  { %v2898_v46 = vpack.c.bf16 %v1720_v42, %v1719_v38  ;;  %v3058_v47 = vpack.c.bf16 %v1784_v43, %v1783_v39  ;;  %v968_v48 = vpop.f32.mrf.mxu0  ;;  %v1224_v49 = vpop.f32.mrf.mxu1  ;;  %1420 = vmatprep.mubr.bf16.mxu1 %v3486_v35  ;;  %v3496_v39 = vld [vmem:[%s4331_s0 + $0x1d0] ss:$8 sps:$4 sm:$0xff]  }
 0x114   :  { %v1593_v51 = vmul.f32 0.01, %v967_v44  ;;  %v1657_v52 = vmul.f32 0.01, %v1223_v45  ;;  %vm1465_vm8 = vcmp.gt.f32.partialorder %v967_v44, 0.0  ;;  %vm1529_vm9 = vcmp.gt.f32.partialorder %v1223_v45, 0.0 }
 0x115   :  { %3210 = vst [vmem:[%s4333_s3 + $0x8] sm:$0xff] %v2898_v46   ;;  %3242 = vst [vmem:[%s4333_s3 + $0x108] sm:$0xff] %v3058_v47   ;;  %v969_v53 = vpop.f32.mrf.mxu0  ;;  %v1225_v54 = vpop.f32.mrf.mxu1  ;;  %v3504_v47 = vld [vmem:[%s4331_s0 + $0x1e4] ss:$8 sps:$4 sm:$0xff]  }
 0x116   :  { %v970_v57 = vadd.f32 %v3925_v55, %v969_v53  ;;  %v1226_v58 = vadd.f32 %v3925_v55, %v1225_v54  ;;  %v1721_v1 = vsel %vm1465_vm8, %v967_v44, %v1593_v51  ;;  %v1785_v2 = vsel %vm1529_vm9, %v1223_v45, %v1657_v52  ;;  %v3499_v44 = vld [vmem:[%s4331_s0 + $0x3d0] ss:$8 sps:$4 sm:$0xff]  }
 0x117   :  { %v971_v60 = vpop.f32.mrf.mxu0  ;;  %v1227_v61 = vpop.f32.mrf.mxu1 }
 0x118   :  { %vm1466_vm10 = vcmp.gt.f32.partialorder %v970_v57, 0.0  ;;  %v1594_v63 = vmul.f32 0.01, %v970_v57  ;;  %vm1530_vm11 = vcmp.gt.f32.partialorder %v1226_v58, 0.0  ;;  %v1658_v0 = vmul.f32 0.01, %v1226_v58 }
 0x119   :  { %v974_v3 = vpop.f32.mrf.mxu0  ;;  %1165 = vmatmul.mubr.bf16.gmra.mxu0 %v3488_v50  ;;  %v1230_v4 = vpop.f32.mrf.mxu1  ;;  %1421 = vmatmul.mubr.bf16.gmra.mxu1 %v3489_v56  ;;  %v3507_v50 = vld [vmem:[%s4331_s0 + $0x3e4] ss:$8 sps:$4 sm:$0xff]  }
 0x11a   :  { %v1722_v5 = vsel %vm1466_vm10, %v970_v57, %v1594_v63  ;;  %v1786_v6 = vsel %vm1530_vm11, %v1226_v58, %v1658_v0  ;;  %v975_v7 = vadd.f32 %v3925_v55, %v974_v3  ;;  %v1231_v8 = vadd.f32 %v3925_v55, %v1230_v4  ;;  %1172 = vmatprep.mubr.bf16.mxu0 %v3492_v59 }
 0x11b   :  { %v2903_v9 = vpack.c.bf16 %v1722_v5, %v1721_v1  ;;  %v3063_v10 = vpack.c.bf16 %v1786_v6, %v1785_v2  ;;  %v976_v11 = vpop.f32.mrf.mxu0  ;;  %v1232_v12 = vpop.f32.mrf.mxu1  ;;  %1428 = vmatprep.mubr.bf16.mxu1 %v3495_v62  ;;  %v3502_v2 = vld [vmem:[%s4331_s0 + $0x1e0] ss:$8 sps:$4 sm:$0xff]  }
 0x11c   :  { %v1595_v14 = vmul.f32 0.01, %v975_v7  ;;  %v1659_v15 = vmul.f32 0.01, %v1231_v8  ;;  %vm1467_vm12 = vcmp.gt.f32.partialorder %v975_v7, 0.0  ;;  %vm1531_vm13 = vcmp.gt.f32.partialorder %v1231_v8, 0.0 }
 0x11d   :  { %3211 = vst [vmem:[%s4333_s3 + $0x10] sm:$0xff] %v2903_v9   ;;  %3243 = vst [vmem:[%s4333_s3 + $0x110] sm:$0xff] %v3063_v10   ;;  %v977_v16 = vpop.f32.mrf.mxu0  ;;  %v1233_v17 = vpop.f32.mrf.mxu1  ;;  %v3510_v10 = vld [vmem:[%s4331_s0 + $0x1f4] ss:$8 sps:$4 sm:$0xff]  }
 0x11e   :  { %v978_v19 = vadd.f32 %v3925_v55, %v977_v16  ;;  %v1234_v20 = vadd.f32 %v3925_v55, %v1233_v17  ;;  %v1723_v27 = vsel %vm1467_vm12, %v975_v7, %v1595_v14  ;;  %v1787_v28 = vsel %vm1531_vm13, %v1231_v8, %v1659_v15  ;;  %v3505_v7 = vld [vmem:[%s4331_s0 + $0x3e0] ss:$8 sps:$4 sm:$0xff]  }
 0x11f   :  { %v979_v22 = vpop.f32.mrf.mxu0  ;;  %v1235_v23 = vpop.f32.mrf.mxu1 }
 0x120   :  { %vm1468_vm14 = vcmp.gt.f32.partialorder %v978_v19, 0.0  ;;  %v1596_v25 = vmul.f32 0.01, %v978_v19  ;;  %vm1532_vm15 = vcmp.gt.f32.partialorder %v1234_v20, 0.0  ;;  %v1660_v26 = vmul.f32 0.01, %v1234_v20 }
 0x121   :  { %v982_v29 = vpop.f32.mrf.mxu0  ;;  %1173 = vmatmul.mubr.bf16.gmra.mxu0 %v3490_v13  ;;  %v1238_v30 = vpop.f32.mrf.mxu1  ;;  %1429 = vmatmul.mubr.bf16.gmra.mxu1 %v3493_v18  ;;  %v3513_v13 = vld [vmem:[%s4331_s0 + $0x3f4] ss:$8 sps:$4 sm:$0xff]  }
 0x122   :  { %v1724_v31 = vsel %vm1468_vm14, %v978_v19, %v1596_v25  ;;  %v1788_v32 = vsel %vm1532_vm15, %v1234_v20, %v1660_v26  ;;  %v983_v33 = vadd.f32 %v3925_v55, %v982_v29  ;;  %v1239_v34 = vadd.f32 %v3925_v55, %v1238_v30  ;;  %1180 = vmatprep.mubr.bf16.mxu0 %v3498_v21 }
 0x123   :  { %v2908_v35 = vpack.c.bf16 %v1724_v31, %v1723_v27  ;;  %v3068_v36 = vpack.c.bf16 %v1788_v32, %v1787_v28  ;;  %v984_v37 = vpop.f32.mrf.mxu0  ;;  %v1240_v38 = vpop.f32.mrf.mxu1  ;;  %1436 = vmatprep.mubr.bf16.mxu1 %v3501_v24  ;;  %v3508_v28 = vld [vmem:[%s4331_s0 + $0x1f0] ss:$8 sps:$4 sm:$0xff]  }
 0x124   :  { %v1597_v40 = vmul.f32 0.01, %v983_v33  ;;  %v1661_v41 = vmul.f32 0.01, %v1239_v34  ;;  %vm1469_vm0 = vcmp.gt.f32.partialorder %v983_v33, 0.0  ;;  %vm1533_vm1 = vcmp.gt.f32.partialorder %v1239_v34, 0.0 }
 0x125   :  { %3212 = vst [vmem:[%s4333_s3 + $0x18] sm:$0xff] %v2908_v35   ;;  %3244 = vst [vmem:[%s4333_s3 + $0x118] sm:$0xff] %v3068_v36   ;;  %v985_v42 = vpop.f32.mrf.mxu0  ;;  %v1241_v43 = vpop.f32.mrf.mxu1 }
 0x126   :  { %v986_v45 = vadd.f32 %v3925_v55, %v985_v42  ;;  %v1242_v46 = vadd.f32 %v3925_v55, %v1241_v43  ;;  %v1725_v53 = vsel %vm1469_vm0, %v983_v33, %v1597_v40  ;;  %v1789_v54 = vsel %vm1533_vm1, %v1239_v34, %v1661_v41  ;;  %v3511_v33 = vld [vmem:[%s4331_s0 + $0x3f0] ss:$8 sps:$4 sm:$0xff]  }
 0x127   :  { %v987_v48 = vpop.f32.mrf.mxu0  ;;  %v1243_v49 = vpop.f32.mrf.mxu1 }
 0x128   :  { %vm1470_vm2 = vcmp.gt.f32.partialorder %v986_v45, 0.0  ;;  %v1598_v51 = vmul.f32 0.01, %v986_v45  ;;  %vm1534_vm3 = vcmp.gt.f32.partialorder %v1242_v46, 0.0  ;;  %v1662_v52 = vmul.f32 0.01, %v1242_v46 }
 0x129   :  { %v990_v56 = vpop.f32.mrf.mxu0  ;;  %1181 = vmatmul.mubr.bf16.gmra.mxu0 %v3496_v39  ;;  %v1246_v57 = vpop.f32.mrf.mxu1  ;;  %1437 = vmatmul.mubr.bf16.gmra.mxu1 %v3499_v44 }
 0x12a   :  { %v1726_v58 = vsel %vm1470_vm2, %v986_v45, %v1598_v51  ;;  %v1790_v59 = vsel %vm1534_vm3, %v1242_v46, %v1662_v52  ;;  %v991_v60 = vadd.f32 %v3925_v55, %v990_v56  ;;  %v1247_v61 = vadd.f32 %v3925_v55, %v1246_v57  ;;  %1188 = vmatprep.mubr.bf16.mxu0 %v3504_v47 }
 0x12b   :  { %v2913_v62 = vpack.c.bf16 %v1726_v58, %v1725_v53  ;;  %v3073_v63 = vpack.c.bf16 %v1790_v59, %v1789_v54  ;;  %v992_v0 = vpop.f32.mrf.mxu0  ;;  %v1248_v1 = vpop.f32.mrf.mxu1  ;;  %1444 = vmatprep.mubr.bf16.mxu1 %v3507_v50 }
 0x12c   :  { %v1599_v3 = vmul.f32 0.01, %v991_v60  ;;  %v1663_v4 = vmul.f32 0.01, %v1247_v61  ;;  %vm1471_vm4 = vcmp.gt.f32.partialorder %v991_v60, 0.0  ;;  %vm1535_vm5 = vcmp.gt.f32.partialorder %v1247_v61, 0.0 }
 0x12d   :  { %3213 = vst [vmem:[%s4333_s3 + $0x20] sm:$0xff] %v2913_v62   ;;  %3245 = vst [vmem:[%s4333_s3 + $0x120] sm:$0xff] %v3073_v63   ;;  %v993_v5 = vpop.f32.mrf.mxu0  ;;  %v1249_v6 = vpop.f32.mrf.mxu1 }
 0x12e   :  { %v994_v8 = vadd.f32 %v3925_v55, %v993_v5  ;;  %v1250_v9 = vadd.f32 %v3925_v55, %v1249_v6  ;;  %v1727_v16 = vsel %vm1471_vm4, %v991_v60, %v1599_v3  ;;  %v1791_v17 = vsel %vm1535_vm5, %v1247_v61, %v1663_v4 }
 0x12f   :  { %v995_v11 = vpop.f32.mrf.mxu0  ;;  %v1251_v12 = vpop.f32.mrf.mxu1 }
 0x130   :  { %vm1472_vm6 = vcmp.gt.f32.partialorder %v994_v8, 0.0  ;;  %v1600_v14 = vmul.f32 0.01, %v994_v8  ;;  %vm1536_vm7 = vcmp.gt.f32.partialorder %v1250_v9, 0.0  ;;  %v1664_v15 = vmul.f32 0.01, %v1250_v9 }
 0x131   :  { %v998_v18 = vpop.f32.mrf.mxu0  ;;  %1189 = vmatmul.mubr.bf16.gmra.mxu0 %v3502_v2  ;;  %v1254_v19 = vpop.f32.mrf.mxu1  ;;  %1445 = vmatmul.mubr.bf16.gmra.mxu1 %v3505_v7 }
 0x132   :  { %v1728_v20 = vsel %vm1472_vm6, %v994_v8, %v1600_v14  ;;  %v1792_v21 = vsel %vm1536_vm7, %v1250_v9, %v1664_v15  ;;  %v999_v22 = vadd.f32 %v3925_v55, %v998_v18  ;;  %v1255_v23 = vadd.f32 %v3925_v55, %v1254_v19  ;;  %1196 = vmatprep.mubr.bf16.mxu0 %v3510_v10 }
 0x133   :  { %v2918_v24 = vpack.c.bf16 %v1728_v20, %v1727_v16  ;;  %v3078_v25 = vpack.c.bf16 %v1792_v21, %v1791_v17  ;;  %v1000_v26 = vpop.f32.mrf.mxu0  ;;  %v1256_v27 = vpop.f32.mrf.mxu1  ;;  %1452 = vmatprep.mubr.bf16.mxu1 %v3513_v13 }
 0x134   :  { %v1601_v29 = vmul.f32 0.01, %v999_v22  ;;  %v1665_v30 = vmul.f32 0.01, %v1255_v23  ;;  %vm1473_vm8 = vcmp.gt.f32.partialorder %v999_v22, 0.0  ;;  %vm1537_vm9 = vcmp.gt.f32.partialorder %v1255_v23, 0.0 }
 0x135   :  { %3214 = vst [vmem:[%s4333_s3 + $0x28] sm:$0xff] %v2918_v24   ;;  %3246 = vst [vmem:[%s4333_s3 + $0x128] sm:$0xff] %v3078_v25   ;;  %v1001_v31 = vpop.f32.mrf.mxu0  ;;  %v1257_v32 = vpop.f32.mrf.mxu1 }
 0x136   :  { %v1002_v34 = vadd.f32 %v3925_v55, %v1001_v31  ;;  %v1258_v35 = vadd.f32 %v3925_v55, %v1257_v32  ;;  %v1729_v40 = vsel %vm1473_vm8, %v999_v22, %v1601_v29  ;;  %v1793_v41 = vsel %vm1537_vm9, %v1255_v23, %v1665_v30 }
 0x137   :  { %v1003_v36 = vpop.f32.mrf.mxu0  ;;  %v1259_v37 = vpop.f32.mrf.mxu1 }
 0x138   :  { %vm1474_vm10 = vcmp.gt.f32.partialorder %v1002_v34, 0.0  ;;  %v1602_v38 = vmul.f32 0.01, %v1002_v34  ;;  %vm1538_vm11 = vcmp.gt.f32.partialorder %v1258_v35, 0.0  ;;  %v1666_v39 = vmul.f32 0.01, %v1258_v35 }
 0x139   :  { %v1006_v42 = vpop.f32.mrf.mxu0  ;;  %1197 = vmatmul.mubr.bf16.gmra.mxu0 %v3508_v28  ;;  %v1262_v43 = vpop.f32.mrf.mxu1  ;;  %1453 = vmatmul.mubr.bf16.gmra.mxu1 %v3511_v33 }
 0x13a   :  { %v1730_v44 = vsel %vm1474_vm10, %v1002_v34, %v1602_v38  ;;  %v1794_v45 = vsel %vm1538_vm11, %v1258_v35, %v1666_v39  ;;  %v1007_v46 = vadd.f32 %v3925_v55, %v1006_v42  ;;  %v1263_v47 = vadd.f32 %v3925_v55, %v1262_v43 }
 0x13b   :  { %v2923_v48 = vpack.c.bf16 %v1730_v44, %v1729_v40  ;;  %v3083_v49 = vpack.c.bf16 %v1794_v45, %v1793_v41  ;;  %v1008_v50 = vpop.f32.mrf.mxu0  ;;  %v1264_v51 = vpop.f32.mrf.mxu1 }
 0x13c   :  { %v1603_v52 = vmul.f32 0.01, %v1007_v46  ;;  %v1667_v53 = vmul.f32 0.01, %v1263_v47  ;;  %vm1475_vm12 = vcmp.gt.f32.partialorder %v1007_v46, 0.0  ;;  %vm1539_vm13 = vcmp.gt.f32.partialorder %v1263_v47, 0.0 }
 0x13d   :  { %3215 = vst [vmem:[%s4333_s3 + $0x30] sm:$0xff] %v2923_v48   ;;  %3247 = vst [vmem:[%s4333_s3 + $0x130] sm:$0xff] %v3083_v49   ;;  %v1009_v54 = vpop.f32.mrf.mxu0  ;;  %v1265_v56 = vpop.f32.mrf.mxu1 }
 0x13e   :  { %v1010_v57 = vadd.f32 %v3925_v55, %v1009_v54  ;;  %v1266_v58 = vadd.f32 %v3925_v55, %v1265_v56  ;;  %v1731_v63 = vsel %vm1475_vm12, %v1007_v46, %v1603_v52  ;;  %v1795_v0 = vsel %vm1539_vm13, %v1263_v47, %v1667_v53 }
 0x13f   :  { %v1011_v59 = vpop.f32.mrf.mxu0  ;;  %v1267_v60 = vpop.f32.mrf.mxu1 }
 0x140   :  { %vm1476_vm14 = vcmp.gt.f32.partialorder %v1010_v57, 0.0  ;;  %v1604_v61 = vmul.f32 0.01, %v1010_v57  ;;  %vm1540_vm15 = vcmp.gt.f32.partialorder %v1266_v58, 0.0  ;;  %v1668_v62 = vmul.f32 0.01, %v1266_v58 }
 0x141   :  { %v1014_v1 = vpop.f32.mrf.mxu0  ;;  %v1270_v2 = vpop.f32.mrf.mxu1 }
 0x142   :  { %v1732_v3 = vsel %vm1476_vm14, %v1010_v57, %v1604_v61  ;;  %v1796_v4 = vsel %vm1540_vm15, %v1266_v58, %v1668_v62  ;;  %v1015_v5 = vadd.f32 %v3925_v55, %v1014_v1  ;;  %v1271_v6 = vadd.f32 %v3925_v55, %v1270_v2 }
 0x143   :  { %v2928_v7 = vpack.c.bf16 %v1732_v3, %v1731_v63  ;;  %v3088_v8 = vpack.c.bf16 %v1796_v4, %v1795_v0  ;;  %v1016_v9 = vpop.f32.mrf.mxu0  ;;  %v1272_v10 = vpop.f32.mrf.mxu1 }
 0x144   :  { %v1605_v11 = vmul.f32 0.01, %v1015_v5  ;;  %v1669_v12 = vmul.f32 0.01, %v1271_v6  ;;  %vm1477_vm0 = vcmp.gt.f32.partialorder %v1015_v5, 0.0  ;;  %vm1541_vm1 = vcmp.gt.f32.partialorder %v1271_v6, 0.0 }
 0x145   :  { %3216 = vst [vmem:[%s4333_s3 + $0x38] sm:$0xff] %v2928_v7   ;;  %3248 = vst [vmem:[%s4333_s3 + $0x138] sm:$0xff] %v3088_v8   ;;  %v1017_v13 = vpop.f32.mrf.mxu0  ;;  %v1273_v14 = vpop.f32.mrf.mxu1 }
 0x146   :  { %v1018_v15 = vadd.f32 %v3925_v55, %v1017_v13  ;;  %v1274_v16 = vadd.f32 %v3925_v55, %v1273_v14  ;;  %v1733_v21 = vsel %vm1477_vm0, %v1015_v5, %v1605_v11  ;;  %v1797_v22 = vsel %vm1541_vm1, %v1271_v6, %v1669_v12 }
 0x147   :  { %v1019_v17 = vpop.f32.mrf.mxu0  ;;  %v1275_v18 = vpop.f32.mrf.mxu1 }
 0x148   :  { %vm1478_vm2 = vcmp.gt.f32.partialorder %v1018_v15, 0.0  ;;  %v1606_v19 = vmul.f32 0.01, %v1018_v15  ;;  %vm1542_vm3 = vcmp.gt.f32.partialorder %v1274_v16, 0.0  ;;  %v1670_v20 = vmul.f32 0.01, %v1274_v16 }
 0x149   :  { %v1022_v23 = vpop.f32.mrf.mxu0  ;;  %v1278_v24 = vpop.f32.mrf.mxu1 }
 0x14a   :  { %v1734_v25 = vsel %vm1478_vm2, %v1018_v15, %v1606_v19  ;;  %v1798_v26 = vsel %vm1542_vm3, %v1274_v16, %v1670_v20  ;;  %v1023_v27 = vadd.f32 %v3925_v55, %v1022_v23  ;;  %v1279_v28 = vadd.f32 %v3925_v55, %v1278_v24 }
 0x14b   :  { %v2933_v29 = vpack.c.bf16 %v1734_v25, %v1733_v21  ;;  %v3093_v30 = vpack.c.bf16 %v1798_v26, %v1797_v22  ;;  %v1024_v31 = vpop.f32.mrf.mxu0  ;;  %v1280_v32 = vpop.f32.mrf.mxu1 }
 0x14c   :  { %v1607_v33 = vmul.f32 0.01, %v1023_v27  ;;  %v1671_v34 = vmul.f32 0.01, %v1279_v28  ;;  %vm1479_vm4 = vcmp.gt.f32.partialorder %v1023_v27, 0.0  ;;  %vm1543_vm5 = vcmp.gt.f32.partialorder %v1279_v28, 0.0 }
 0x14d   :  { %3217 = vst [vmem:[%s4333_s3 + $0x40] sm:$0xff] %v2933_v29   ;;  %3249 = vst [vmem:[%s4333_s3 + $0x140] sm:$0xff] %v3093_v30   ;;  %v1025_v35 = vpop.f32.mrf.mxu0  ;;  %v1281_v36 = vpop.f32.mrf.mxu1 }
 0x14e   :  { %v1026_v37 = vadd.f32 %v3925_v55, %v1025_v35  ;;  %v1282_v38 = vadd.f32 %v3925_v55, %v1281_v36  ;;  %v1735_v43 = vsel %vm1479_vm4, %v1023_v27, %v1607_v33  ;;  %v1799_v44 = vsel %vm1543_vm5, %v1279_v28, %v1671_v34 }
 0x14f   :  { %v1027_v39 = vpop.f32.mrf.mxu0  ;;  %v1283_v40 = vpop.f32.mrf.mxu1 }
 0x150   :  { %vm1480_vm6 = vcmp.gt.f32.partialorder %v1026_v37, 0.0  ;;  %v1608_v41 = vmul.f32 0.01, %v1026_v37  ;;  %vm1544_vm7 = vcmp.gt.f32.partialorder %v1282_v38, 0.0  ;;  %v1672_v42 = vmul.f32 0.01, %v1282_v38 }
 0x151   :  { %v1030_v45 = vpop.f32.mrf.mxu0  ;;  %v1286_v46 = vpop.f32.mrf.mxu1 }
 0x152   :  { %v1736_v47 = vsel %vm1480_vm6, %v1026_v37, %v1608_v41  ;;  %v1800_v48 = vsel %vm1544_vm7, %v1282_v38, %v1672_v42  ;;  %v1031_v49 = vadd.f32 %v3925_v55, %v1030_v45  ;;  %v1287_v50 = vadd.f32 %v3925_v55, %v1286_v46 }
 0x153   :  { %v2938_v51 = vpack.c.bf16 %v1736_v47, %v1735_v43  ;;  %v3098_v52 = vpack.c.bf16 %v1800_v48, %v1799_v44  ;;  %v1032_v53 = vpop.f32.mrf.mxu0  ;;  %v1288_v54 = vpop.f32.mrf.mxu1 }
 0x154   :  { %v1609_v56 = vmul.f32 0.01, %v1031_v49  ;;  %v1673_v57 = vmul.f32 0.01, %v1287_v50  ;;  %vm1481_vm8 = vcmp.gt.f32.partialorder %v1031_v49, 0.0  ;;  %vm1545_vm9 = vcmp.gt.f32.partialorder %v1287_v50, 0.0 }
 0x155   :  { %3218 = vst [vmem:[%s4333_s3 + $0x48] sm:$0xff] %v2938_v51   ;;  %3250 = vst [vmem:[%s4333_s3 + $0x148] sm:$0xff] %v3098_v52   ;;  %v1033_v58 = vpop.f32.mrf.mxu0  ;;  %v1289_v59 = vpop.f32.mrf.mxu1 }
 0x156   :  { %v1034_v60 = vadd.f32 %v3925_v55, %v1033_v58  ;;  %v1290_v61 = vadd.f32 %v3925_v55, %v1289_v59  ;;  %v1737_v2 = vsel %vm1481_vm8, %v1031_v49, %v1609_v56  ;;  %v1801_v3 = vsel %vm1545_vm9, %v1287_v50, %v1673_v57 }
 0x157   :  { %v1035_v62 = vpop.f32.mrf.mxu0  ;;  %v1291_v63 = vpop.f32.mrf.mxu1 }
 0x158   :  { %vm1482_vm10 = vcmp.gt.f32.partialorder %v1034_v60, 0.0  ;;  %v1610_v0 = vmul.f32 0.01, %v1034_v60  ;;  %vm1546_vm11 = vcmp.gt.f32.partialorder %v1290_v61, 0.0  ;;  %v1674_v1 = vmul.f32 0.01, %v1290_v61 }
 0x159   :  { %v1038_v4 = vpop.f32.mrf.mxu0  ;;  %v1294_v5 = vpop.f32.mrf.mxu1 }
 0x15a   :  { %v1738_v6 = vsel %vm1482_vm10, %v1034_v60, %v1610_v0  ;;  %v1802_v7 = vsel %vm1546_vm11, %v1290_v61, %v1674_v1  ;;  %v1039_v8 = vadd.f32 %v3925_v55, %v1038_v4  ;;  %v1295_v9 = vadd.f32 %v3925_v55, %v1294_v5 }
 0x15b   :  { %v2943_v10 = vpack.c.bf16 %v1738_v6, %v1737_v2  ;;  %v3103_v11 = vpack.c.bf16 %v1802_v7, %v1801_v3  ;;  %v1040_v12 = vpop.f32.mrf.mxu0  ;;  %v1296_v13 = vpop.f32.mrf.mxu1 }
 0x15c   :  { %v1611_v14 = vmul.f32 0.01, %v1039_v8  ;;  %v1675_v15 = vmul.f32 0.01, %v1295_v9  ;;  %vm1483_vm12 = vcmp.gt.f32.partialorder %v1039_v8, 0.0  ;;  %vm1547_vm13 = vcmp.gt.f32.partialorder %v1295_v9, 0.0 }
 0x15d   :  { %3219 = vst [vmem:[%s4333_s3 + $0x50] sm:$0xff] %v2943_v10   ;;  %3251 = vst [vmem:[%s4333_s3 + $0x150] sm:$0xff] %v3103_v11   ;;  %v1041_v16 = vpop.f32.mrf.mxu0  ;;  %v1297_v17 = vpop.f32.mrf.mxu1 }
 0x15e   :  { %v1042_v18 = vadd.f32 %v3925_v55, %v1041_v16  ;;  %v1298_v19 = vadd.f32 %v3925_v55, %v1297_v17  ;;  %v1739_v24 = vsel %vm1483_vm12, %v1039_v8, %v1611_v14  ;;  %v1803_v25 = vsel %vm1547_vm13, %v1295_v9, %v1675_v15 }
 0x15f   :  { %v1043_v20 = vpop.f32.mrf.mxu0  ;;  %v1299_v21 = vpop.f32.mrf.mxu1 }
 0x160   :  { %vm1484_vm14 = vcmp.gt.f32.partialorder %v1042_v18, 0.0  ;;  %v1612_v22 = vmul.f32 0.01, %v1042_v18  ;;  %vm1548_vm15 = vcmp.gt.f32.partialorder %v1298_v19, 0.0  ;;  %v1676_v23 = vmul.f32 0.01, %v1298_v19 }
 0x161   :  { %v1046_v26 = vpop.f32.mrf.mxu0  ;;  %v1302_v27 = vpop.f32.mrf.mxu1 }
 0x162   :  { %v1740_v28 = vsel %vm1484_vm14, %v1042_v18, %v1612_v22  ;;  %v1804_v29 = vsel %vm1548_vm15, %v1298_v19, %v1676_v23  ;;  %v1047_v30 = vadd.f32 %v3925_v55, %v1046_v26  ;;  %v1303_v31 = vadd.f32 %v3925_v55, %v1302_v27 }
 0x163   :  { %v2948_v32 = vpack.c.bf16 %v1740_v28, %v1739_v24  ;;  %v3108_v33 = vpack.c.bf16 %v1804_v29, %v1803_v25  ;;  %v1048_v34 = vpop.f32.mrf.mxu0  ;;  %v1304_v35 = vpop.f32.mrf.mxu1 }
 0x164   :  { %v1613_v36 = vmul.f32 0.01, %v1047_v30  ;;  %v1677_v37 = vmul.f32 0.01, %v1303_v31  ;;  %vm1485_vm0 = vcmp.gt.f32.partialorder %v1047_v30, 0.0  ;;  %vm1549_vm1 = vcmp.gt.f32.partialorder %v1303_v31, 0.0 }
 0x165   :  { %3220 = vst [vmem:[%s4333_s3 + $0x58] sm:$0xff] %v2948_v32   ;;  %3252 = vst [vmem:[%s4333_s3 + $0x158] sm:$0xff] %v3108_v33   ;;  %v1049_v38 = vpop.f32.mrf.mxu0  ;;  %v1305_v39 = vpop.f32.mrf.mxu1 }
 0x166   :  { %v1050_v40 = vadd.f32 %v3925_v55, %v1049_v38  ;;  %v1306_v41 = vadd.f32 %v3925_v55, %v1305_v39  ;;  %v1741_v46 = vsel %vm1485_vm0, %v1047_v30, %v1613_v36  ;;  %v1805_v47 = vsel %vm1549_vm1, %v1303_v31, %v1677_v37 }
 0x167   :  { %v1051_v42 = vpop.f32.mrf.mxu0  ;;  %v1307_v43 = vpop.f32.mrf.mxu1 }
 0x168   :  { %vm1486_vm2 = vcmp.gt.f32.partialorder %v1050_v40, 0.0  ;;  %v1614_v44 = vmul.f32 0.01, %v1050_v40  ;;  %vm1550_vm3 = vcmp.gt.f32.partialorder %v1306_v41, 0.0  ;;  %v1678_v45 = vmul.f32 0.01, %v1306_v41 }
 0x169   :  { %v1054_v48 = vpop.f32.mrf.mxu0  ;;  %v1310_v49 = vpop.f32.mrf.mxu1 }
 0x16a   :  { %v1742_v50 = vsel %vm1486_vm2, %v1050_v40, %v1614_v44  ;;  %v1806_v51 = vsel %vm1550_vm3, %v1306_v41, %v1678_v45  ;;  %v1055_v52 = vadd.f32 %v3925_v55, %v1054_v48  ;;  %v1311_v53 = vadd.f32 %v3925_v55, %v1310_v49 }
 0x16b   :  { %v2953_v54 = vpack.c.bf16 %v1742_v50, %v1741_v46  ;;  %v3113_v56 = vpack.c.bf16 %v1806_v51, %v1805_v47  ;;  %v1056_v57 = vpop.f32.mrf.mxu0  ;;  %v1312_v58 = vpop.f32.mrf.mxu1 }
 0x16c   :  { %v1615_v59 = vmul.f32 0.01, %v1055_v52  ;;  %v1679_v60 = vmul.f32 0.01, %v1311_v53  ;;  %vm1487_vm4 = vcmp.gt.f32.partialorder %v1055_v52, 0.0  ;;  %vm1551_vm5 = vcmp.gt.f32.partialorder %v1311_v53, 0.0 }
 0x16d   :  { %3221 = vst [vmem:[%s4333_s3 + $0x60] sm:$0xff] %v2953_v54   ;;  %3253 = vst [vmem:[%s4333_s3 + $0x160] sm:$0xff] %v3113_v56   ;;  %v1057_v61 = vpop.f32.mrf.mxu0  ;;  %v1313_v62 = vpop.f32.mrf.mxu1 }
 0x16e   :  { %v1058_v63 = vadd.f32 %v3925_v55, %v1057_v61  ;;  %v1314_v0 = vadd.f32 %v3925_v55, %v1313_v62  ;;  %v1743_v5 = vsel %vm1487_vm4, %v1055_v52, %v1615_v59  ;;  %v1807_v6 = vsel %vm1551_vm5, %v1311_v53, %v1679_v60 }
 0x16f   :  { %v1059_v1 = vpop.f32.mrf.mxu0  ;;  %v1315_v2 = vpop.f32.mrf.mxu1 }
 0x170   :  { %vm1488_vm6 = vcmp.gt.f32.partialorder %v1058_v63, 0.0  ;;  %v1616_v3 = vmul.f32 0.01, %v1058_v63  ;;  %vm1552_vm7 = vcmp.gt.f32.partialorder %v1314_v0, 0.0  ;;  %v1680_v4 = vmul.f32 0.01, %v1314_v0 }
 0x171   :  { %v1062_v7 = vpop.f32.mrf.mxu0  ;;  %v1318_v8 = vpop.f32.mrf.mxu1 }
 0x172   :  { %v1744_v9 = vsel %vm1488_vm6, %v1058_v63, %v1616_v3  ;;  %v1808_v10 = vsel %vm1552_vm7, %v1314_v0, %v1680_v4  ;;  %v1063_v11 = vadd.f32 %v3925_v55, %v1062_v7  ;;  %v1319_v12 = vadd.f32 %v3925_v55, %v1318_v8 }
 0x173   :  { %v2958_v13 = vpack.c.bf16 %v1744_v9, %v1743_v5  ;;  %v3118_v14 = vpack.c.bf16 %v1808_v10, %v1807_v6  ;;  %v1064_v15 = vpop.f32.mrf.mxu0  ;;  %v1320_v16 = vpop.f32.mrf.mxu1 }
 0x174   :  { %v1617_v17 = vmul.f32 0.01, %v1063_v11  ;;  %v1681_v18 = vmul.f32 0.01, %v1319_v12  ;;  %vm1489_vm8 = vcmp.gt.f32.partialorder %v1063_v11, 0.0  ;;  %vm1553_vm9 = vcmp.gt.f32.partialorder %v1319_v12, 0.0 }
 0x175   :  { %3222 = vst [vmem:[%s4333_s3 + $0x68] sm:$0xff] %v2958_v13   ;;  %3254 = vst [vmem:[%s4333_s3 + $0x168] sm:$0xff] %v3118_v14   ;;  %v1065_v19 = vpop.f32.mrf.mxu0  ;;  %v1321_v20 = vpop.f32.mrf.mxu1 }
 0x176   :  { %v1066_v21 = vadd.f32 %v3925_v55, %v1065_v19  ;;  %v1322_v22 = vadd.f32 %v3925_v55, %v1321_v20  ;;  %v1745_v27 = vsel %vm1489_vm8, %v1063_v11, %v1617_v17  ;;  %v1809_v28 = vsel %vm1553_vm9, %v1319_v12, %v1681_v18 }
 0x177   :  { %v1067_v23 = vpop.f32.mrf.mxu0  ;;  %v1323_v24 = vpop.f32.mrf.mxu1 }
 0x178   :  { %vm1490_vm10 = vcmp.gt.f32.partialorder %v1066_v21, 0.0  ;;  %v1618_v25 = vmul.f32 0.01, %v1066_v21  ;;  %vm1554_vm11 = vcmp.gt.f32.partialorder %v1322_v22, 0.0  ;;  %v1682_v26 = vmul.f32 0.01, %v1322_v22 }
 0x179   :  { %v1070_v29 = vpop.f32.mrf.mxu0  ;;  %v1326_v30 = vpop.f32.mrf.mxu1 }
 0x17a   :  { %v1746_v31 = vsel %vm1490_vm10, %v1066_v21, %v1618_v25  ;;  %v1810_v32 = vsel %vm1554_vm11, %v1322_v22, %v1682_v26  ;;  %v1071_v33 = vadd.f32 %v3925_v55, %v1070_v29  ;;  %v1327_v34 = vadd.f32 %v3925_v55, %v1326_v30 }
 0x17b   :  { %v2963_v35 = vpack.c.bf16 %v1746_v31, %v1745_v27  ;;  %v3123_v36 = vpack.c.bf16 %v1810_v32, %v1809_v28  ;;  %v1072_v37 = vpop.f32.mrf.mxu0  ;;  %v1328_v38 = vpop.f32.mrf.mxu1 }
 0x17c   :  { %v1619_v39 = vmul.f32 0.01, %v1071_v33  ;;  %v1683_v40 = vmul.f32 0.01, %v1327_v34  ;;  %vm1491_vm12 = vcmp.gt.f32.partialorder %v1071_v33, 0.0  ;;  %vm1555_vm13 = vcmp.gt.f32.partialorder %v1327_v34, 0.0 }
 0x17d   :  { %3223 = vst [vmem:[%s4333_s3 + $0x70] sm:$0xff] %v2963_v35   ;;  %3255 = vst [vmem:[%s4333_s3 + $0x170] sm:$0xff] %v3123_v36   ;;  %v1073_v41 = vpop.f32.mrf.mxu0  ;;  %v1329_v42 = vpop.f32.mrf.mxu1 }
 0x17e   :  { %v1074_v43 = vadd.f32 %v3925_v55, %v1073_v41  ;;  %v1330_v44 = vadd.f32 %v3925_v55, %v1329_v42  ;;  %v1747_v49 = vsel %vm1491_vm12, %v1071_v33, %v1619_v39  ;;  %v1811_v50 = vsel %vm1555_vm13, %v1327_v34, %v1683_v40 }
 0x17f   :  { %v1075_v45 = vpop.f32.mrf.mxu0  ;;  %v1331_v46 = vpop.f32.mrf.mxu1 }
 0x180   :  { %vm1492_vm14 = vcmp.gt.f32.partialorder %v1074_v43, 0.0  ;;  %v1620_v47 = vmul.f32 0.01, %v1074_v43  ;;  %vm1556_vm15 = vcmp.gt.f32.partialorder %v1330_v44, 0.0  ;;  %v1684_v48 = vmul.f32 0.01, %v1330_v44 }
 0x181   :  { %v1078_v51 = vpop.f32.mrf.mxu0  ;;  %v1334_v52 = vpop.f32.mrf.mxu1 }
 0x182   :  { %v1748_v53 = vsel %vm1492_vm14, %v1074_v43, %v1620_v47  ;;  %v1812_v54 = vsel %vm1556_vm15, %v1330_v44, %v1684_v48  ;;  %v1079_v56 = vadd.f32 %v3925_v55, %v1078_v51  ;;  %v1335_v57 = vadd.f32 %v3925_v55, %v1334_v52  ;;  %v4170_v55 = vld [vmem:[%s4332_s2] ss:$0 sm:$0xff] }
 0x183   :  { %v2968_v58 = vpack.c.bf16 %v1748_v53, %v1747_v49  ;;  %v3128_v59 = vpack.c.bf16 %v1812_v54, %v1811_v50  ;;  %v1080_v60 = vpop.f32.mrf.mxu0  ;;  %v1336_v61 = vpop.f32.mrf.mxu1 }
 0x184   :  { %v1621_v62 = vmul.f32 0.01, %v1079_v56  ;;  %v1685_v63 = vmul.f32 0.01, %v1335_v57  ;;  %vm1493_vm0 = vcmp.gt.f32.partialorder %v1079_v56, 0.0  ;;  %vm1557_vm1 = vcmp.gt.f32.partialorder %v1335_v57, 0.0 }
 0x185   :  { %3224 = vst [vmem:[%s4333_s3 + $0x78] sm:$0xff] %v2968_v58   ;;  %3256 = vst [vmem:[%s4333_s3 + $0x178] sm:$0xff] %v3128_v59   ;;  %v1081_v0 = vpop.f32.mrf.mxu0  ;;  %v1337_v1 = vpop.f32.mrf.mxu1 }
 0x186   :  { %v1082_v2 = vadd.f32 %v4170_v55, %v1081_v0  ;;  %v1338_v3 = vadd.f32 %v4170_v55, %v1337_v1  ;;  %v1749_v8 = vsel %vm1493_vm0, %v1079_v56, %v1621_v62  ;;  %v1813_v9 = vsel %vm1557_vm1, %v1335_v57, %v1685_v63 }
 0x187   :  { %v1083_v4 = vpop.f32.mrf.mxu0  ;;  %v1339_v5 = vpop.f32.mrf.mxu1 }
 0x188   :  { %vm1494_vm2 = vcmp.gt.f32.partialorder %v1082_v2, 0.0  ;;  %v1622_v6 = vmul.f32 0.01, %v1082_v2  ;;  %vm1558_vm3 = vcmp.gt.f32.partialorder %v1338_v3, 0.0  ;;  %v1686_v7 = vmul.f32 0.01, %v1338_v3 }
 0x189   :  { %v1086_v10 = vpop.f32.mrf.mxu0  ;;  %v1342_v11 = vpop.f32.mrf.mxu1 }
 0x18a   :  { %v1750_v12 = vsel %vm1494_vm2, %v1082_v2, %v1622_v6  ;;  %v1814_v13 = vsel %vm1558_vm3, %v1338_v3, %v1686_v7  ;;  %v1087_v14 = vadd.f32 %v4170_v55, %v1086_v10  ;;  %v1343_v15 = vadd.f32 %v4170_v55, %v1342_v11 }
 0x18b   :  { %v2973_v16 = vpack.c.bf16 %v1750_v12, %v1749_v8  ;;  %v3133_v17 = vpack.c.bf16 %v1814_v13, %v1813_v9  ;;  %v1088_v18 = vpop.f32.mrf.mxu0  ;;  %v1344_v19 = vpop.f32.mrf.mxu1 }
 0x18c   :  { %v1623_v20 = vmul.f32 0.01, %v1087_v14  ;;  %v1687_v21 = vmul.f32 0.01, %v1343_v15  ;;  %vm1495_vm4 = vcmp.gt.f32.partialorder %v1087_v14, 0.0  ;;  %vm1559_vm5 = vcmp.gt.f32.partialorder %v1343_v15, 0.0 }
 0x18d   :  { %3225 = vst [vmem:[%s4333_s3 + $0x80] sm:$0xff] %v2973_v16   ;;  %3257 = vst [vmem:[%s4333_s3 + $0x180] sm:$0xff] %v3133_v17   ;;  %v1089_v22 = vpop.f32.mrf.mxu0  ;;  %v1345_v23 = vpop.f32.mrf.mxu1 }
 0x18e   :  { %v1090_v24 = vadd.f32 %v4170_v55, %v1089_v22  ;;  %v1346_v25 = vadd.f32 %v4170_v55, %v1345_v23  ;;  %v1751_v30 = vsel %vm1495_vm4, %v1087_v14, %v1623_v20  ;;  %v1815_v31 = vsel %vm1559_vm5, %v1343_v15, %v1687_v21 }
 0x18f   :  { %v1091_v26 = vpop.f32.mrf.mxu0  ;;  %v1347_v27 = vpop.f32.mrf.mxu1 }
 0x190   :  { %vm1496_vm6 = vcmp.gt.f32.partialorder %v1090_v24, 0.0  ;;  %v1624_v28 = vmul.f32 0.01, %v1090_v24  ;;  %vm1560_vm7 = vcmp.gt.f32.partialorder %v1346_v25, 0.0  ;;  %v1688_v29 = vmul.f32 0.01, %v1346_v25 }
 0x191   :  { %v1094_v32 = vpop.f32.mrf.mxu0  ;;  %v1350_v33 = vpop.f32.mrf.mxu1 }
 0x192   :  { %v1752_v34 = vsel %vm1496_vm6, %v1090_v24, %v1624_v28  ;;  %v1816_v35 = vsel %vm1560_vm7, %v1346_v25, %v1688_v29  ;;  %v1095_v36 = vadd.f32 %v4170_v55, %v1094_v32  ;;  %v1351_v37 = vadd.f32 %v4170_v55, %v1350_v33 }
 0x193   :  { %v2978_v38 = vpack.c.bf16 %v1752_v34, %v1751_v30  ;;  %v3138_v39 = vpack.c.bf16 %v1816_v35, %v1815_v31  ;;  %v1096_v40 = vpop.f32.mrf.mxu0  ;;  %v1352_v41 = vpop.f32.mrf.mxu1 }
 0x194   :  { %v1625_v42 = vmul.f32 0.01, %v1095_v36  ;;  %v1689_v43 = vmul.f32 0.01, %v1351_v37  ;;  %vm1497_vm8 = vcmp.gt.f32.partialorder %v1095_v36, 0.0  ;;  %vm1561_vm9 = vcmp.gt.f32.partialorder %v1351_v37, 0.0 }
 0x195   :  { %3226 = vst [vmem:[%s4333_s3 + $0x88] sm:$0xff] %v2978_v38   ;;  %3258 = vst [vmem:[%s4333_s3 + $0x188] sm:$0xff] %v3138_v39   ;;  %v1097_v44 = vpop.f32.mrf.mxu0  ;;  %v1353_v45 = vpop.f32.mrf.mxu1 }
 0x196   :  { %v1098_v46 = vadd.f32 %v4170_v55, %v1097_v44  ;;  %v1354_v47 = vadd.f32 %v4170_v55, %v1353_v45  ;;  %v1753_v52 = vsel %vm1497_vm8, %v1095_v36, %v1625_v42  ;;  %v1817_v53 = vsel %vm1561_vm9, %v1351_v37, %v1689_v43 }
 0x197   :  { %v1099_v48 = vpop.f32.mrf.mxu0  ;;  %v1355_v49 = vpop.f32.mrf.mxu1 }
 0x198   :  { %vm1498_vm10 = vcmp.gt.f32.partialorder %v1098_v46, 0.0  ;;  %v1626_v50 = vmul.f32 0.01, %v1098_v46  ;;  %vm1562_vm11 = vcmp.gt.f32.partialorder %v1354_v47, 0.0  ;;  %v1690_v51 = vmul.f32 0.01, %v1354_v47 }
 0x199   :  { %v1102_v54 = vpop.f32.mrf.mxu0  ;;  %v1358_v56 = vpop.f32.mrf.mxu1 }
 0x19a   :  { %v1754_v57 = vsel %vm1498_vm10, %v1098_v46, %v1626_v50  ;;  %v1818_v58 = vsel %vm1562_vm11, %v1354_v47, %v1690_v51  ;;  %v1103_v59 = vadd.f32 %v4170_v55, %v1102_v54  ;;  %v1359_v60 = vadd.f32 %v4170_v55, %v1358_v56 }
 0x19b   :  { %v2983_v61 = vpack.c.bf16 %v1754_v57, %v1753_v52  ;;  %v3143_v62 = vpack.c.bf16 %v1818_v58, %v1817_v53  ;;  %v1104_v63 = vpop.f32.mrf.mxu0  ;;  %v1360_v0 = vpop.f32.mrf.mxu1 }
 0x19c   :  { %v1627_v1 = vmul.f32 0.01, %v1103_v59  ;;  %v1691_v2 = vmul.f32 0.01, %v1359_v60  ;;  %vm1499_vm12 = vcmp.gt.f32.partialorder %v1103_v59, 0.0  ;;  %vm1563_vm13 = vcmp.gt.f32.partialorder %v1359_v60, 0.0 }
 0x19d   :  { %3227 = vst [vmem:[%s4333_s3 + $0x90] sm:$0xff] %v2983_v61   ;;  %3259 = vst [vmem:[%s4333_s3 + $0x190] sm:$0xff] %v3143_v62   ;;  %v1105_v3 = vpop.f32.mrf.mxu0  ;;  %v1361_v4 = vpop.f32.mrf.mxu1 }
 0x19e   :  { %v1106_v5 = vadd.f32 %v4170_v55, %v1105_v3  ;;  %v1362_v6 = vadd.f32 %v4170_v55, %v1361_v4  ;;  %v1755_v11 = vsel %vm1499_vm12, %v1103_v59, %v1627_v1  ;;  %v1819_v12 = vsel %vm1563_vm13, %v1359_v60, %v1691_v2 }
 0x19f   :  { %v1107_v7 = vpop.f32.mrf.mxu0  ;;  %v1363_v8 = vpop.f32.mrf.mxu1 }
 0x1a0   :  { %vm1500_vm14 = vcmp.gt.f32.partialorder %v1106_v5, 0.0  ;;  %v1628_v9 = vmul.f32 0.01, %v1106_v5  ;;  %vm1564_vm15 = vcmp.gt.f32.partialorder %v1362_v6, 0.0  ;;  %v1692_v10 = vmul.f32 0.01, %v1362_v6 }
 0x1a1   :  { %v1110_v13 = vpop.f32.mrf.mxu0  ;;  %v1366_v14 = vpop.f32.mrf.mxu1 }
 0x1a2   :  { %v1756_v15 = vsel %vm1500_vm14, %v1106_v5, %v1628_v9  ;;  %v1820_v16 = vsel %vm1564_vm15, %v1362_v6, %v1692_v10  ;;  %v1111_v17 = vadd.f32 %v4170_v55, %v1110_v13  ;;  %v1367_v18 = vadd.f32 %v4170_v55, %v1366_v14 }
 0x1a3   :  { %v2988_v19 = vpack.c.bf16 %v1756_v15, %v1755_v11  ;;  %v3148_v20 = vpack.c.bf16 %v1820_v16, %v1819_v12  ;;  %v1112_v21 = vpop.f32.mrf.mxu0  ;;  %v1368_v22 = vpop.f32.mrf.mxu1 }
 0x1a4   :  { %v1629_v23 = vmul.f32 0.01, %v1111_v17  ;;  %v1693_v24 = vmul.f32 0.01, %v1367_v18  ;;  %vm1501_vm0 = vcmp.gt.f32.partialorder %v1111_v17, 0.0  ;;  %vm1565_vm1 = vcmp.gt.f32.partialorder %v1367_v18, 0.0 }
 0x1a5   :  { %3228 = vst [vmem:[%s4333_s3 + $0x98] sm:$0xff] %v2988_v19   ;;  %3260 = vst [vmem:[%s4333_s3 + $0x198] sm:$0xff] %v3148_v20   ;;  %v1113_v25 = vpop.f32.mrf.mxu0  ;;  %v1369_v26 = vpop.f32.mrf.mxu1 }
 0x1a6   :  { %v1114_v27 = vadd.f32 %v4170_v55, %v1113_v25  ;;  %v1370_v28 = vadd.f32 %v4170_v55, %v1369_v26  ;;  %v1757_v33 = vsel %vm1501_vm0, %v1111_v17, %v1629_v23  ;;  %v1821_v34 = vsel %vm1565_vm1, %v1367_v18, %v1693_v24 }
 0x1a7   :  { %v1115_v29 = vpop.f32.mrf.mxu0  ;;  %v1371_v30 = vpop.f32.mrf.mxu1 }
 0x1a8   :  { %vm1502_vm2 = vcmp.gt.f32.partialorder %v1114_v27, 0.0  ;;  %v1630_v31 = vmul.f32 0.01, %v1114_v27  ;;  %vm1566_vm3 = vcmp.gt.f32.partialorder %v1370_v28, 0.0  ;;  %v1694_v32 = vmul.f32 0.01, %v1370_v28 }
 0x1a9   :  { %v1118_v35 = vpop.f32.mrf.mxu0  ;;  %v1374_v36 = vpop.f32.mrf.mxu1 }
 0x1aa   :  { %v1758_v37 = vsel %vm1502_vm2, %v1114_v27, %v1630_v31  ;;  %v1822_v38 = vsel %vm1566_vm3, %v1370_v28, %v1694_v32  ;;  %v1119_v39 = vadd.f32 %v4170_v55, %v1118_v35  ;;  %v1375_v40 = vadd.f32 %v4170_v55, %v1374_v36 }
 0x1ab   :  { %v2993_v41 = vpack.c.bf16 %v1758_v37, %v1757_v33  ;;  %v3153_v42 = vpack.c.bf16 %v1822_v38, %v1821_v34  ;;  %v1120_v43 = vpop.f32.mrf.mxu0  ;;  %v1376_v44 = vpop.f32.mrf.mxu1 }
 0x1ac   :  { %v1631_v45 = vmul.f32 0.01, %v1119_v39  ;;  %v1695_v46 = vmul.f32 0.01, %v1375_v40  ;;  %vm1503_vm4 = vcmp.gt.f32.partialorder %v1119_v39, 0.0  ;;  %vm1567_vm5 = vcmp.gt.f32.partialorder %v1375_v40, 0.0 }
 0x1ad   :  { %3229 = vst [vmem:[%s4333_s3 + $0xa0] sm:$0xff] %v2993_v41   ;;  %3261 = vst [vmem:[%s4333_s3 + $0x1a0] sm:$0xff] %v3153_v42   ;;  %v1121_v47 = vpop.f32.mrf.mxu0  ;;  %v1377_v48 = vpop.f32.mrf.mxu1 }
 0x1ae   :  { %v1122_v49 = vadd.f32 %v4170_v55, %v1121_v47  ;;  %v1378_v50 = vadd.f32 %v4170_v55, %v1377_v48  ;;  %v1759_v56 = vsel %vm1503_vm4, %v1119_v39, %v1631_v45  ;;  %v1823_v57 = vsel %vm1567_vm5, %v1375_v40, %v1695_v46 }
 0x1af   :  { %v1123_v51 = vpop.f32.mrf.mxu0  ;;  %v1379_v52 = vpop.f32.mrf.mxu1 }
 0x1b0   :  { %vm1504_vm6 = vcmp.gt.f32.partialorder %v1122_v49, 0.0  ;;  %v1632_v53 = vmul.f32 0.01, %v1122_v49  ;;  %vm1568_vm7 = vcmp.gt.f32.partialorder %v1378_v50, 0.0  ;;  %v1696_v54 = vmul.f32 0.01, %v1378_v50 }
 0x1b1   :  { %v1126_v58 = vpop.f32.mrf.mxu0  ;;  %v1382_v59 = vpop.f32.mrf.mxu1 }
 0x1b2   :  { %v1760_v60 = vsel %vm1504_vm6, %v1122_v49, %v1632_v53  ;;  %v1824_v61 = vsel %vm1568_vm7, %v1378_v50, %v1696_v54  ;;  %v1127_v62 = vadd.f32 %v4170_v55, %v1126_v58  ;;  %v1383_v63 = vadd.f32 %v4170_v55, %v1382_v59 }
 0x1b3   :  { %v2998_v0 = vpack.c.bf16 %v1760_v60, %v1759_v56  ;;  %v3158_v1 = vpack.c.bf16 %v1824_v61, %v1823_v57  ;;  %v1128_v2 = vpop.f32.mrf.mxu0  ;;  %v1384_v3 = vpop.f32.mrf.mxu1 }
 0x1b4   :  { %v1633_v4 = vmul.f32 0.01, %v1127_v62  ;;  %v1697_v5 = vmul.f32 0.01, %v1383_v63  ;;  %vm1505_vm8 = vcmp.gt.f32.partialorder %v1127_v62, 0.0  ;;  %vm1569_vm9 = vcmp.gt.f32.partialorder %v1383_v63, 0.0 }
 0x1b5   :  { %3230 = vst [vmem:[%s4333_s3 + $0xa8] sm:$0xff] %v2998_v0   ;;  %3262 = vst [vmem:[%s4333_s3 + $0x1a8] sm:$0xff] %v3158_v1   ;;  %v1129_v6 = vpop.f32.mrf.mxu0  ;;  %v1385_v7 = vpop.f32.mrf.mxu1 }
 0x1b6   :  { %v1130_v8 = vadd.f32 %v4170_v55, %v1129_v6  ;;  %v1386_v9 = vadd.f32 %v4170_v55, %v1385_v7  ;;  %v1761_v14 = vsel %vm1505_vm8, %v1127_v62, %v1633_v4  ;;  %v1825_v15 = vsel %vm1569_vm9, %v1383_v63, %v1697_v5 }
 0x1b7   :  { %v1131_v10 = vpop.f32.mrf.mxu0  ;;  %v1387_v11 = vpop.f32.mrf.mxu1 }
 0x1b8   :  { %vm1506_vm10 = vcmp.gt.f32.partialorder %v1130_v8, 0.0  ;;  %v1634_v12 = vmul.f32 0.01, %v1130_v8  ;;  %vm1570_vm11 = vcmp.gt.f32.partialorder %v1386_v9, 0.0  ;;  %v1698_v13 = vmul.f32 0.01, %v1386_v9 }
 0x1b9   :  { %v1134_v16 = vpop.f32.mrf.mxu0  ;;  %v1390_v17 = vpop.f32.mrf.mxu1 }
 0x1ba   :  { %v1762_v18 = vsel %vm1506_vm10, %v1130_v8, %v1634_v12  ;;  %v1826_v19 = vsel %vm1570_vm11, %v1386_v9, %v1698_v13  ;;  %v1135_v20 = vadd.f32 %v4170_v55, %v1134_v16  ;;  %v1391_v21 = vadd.f32 %v4170_v55, %v1390_v17 }
 0x1bb   :  { %v3003_v22 = vpack.c.bf16 %v1762_v18, %v1761_v14  ;;  %v3163_v23 = vpack.c.bf16 %v1826_v19, %v1825_v15  ;;  %v1136_v24 = vpop.f32.mrf.mxu0  ;;  %v1392_v25 = vpop.f32.mrf.mxu1 }
 0x1bc   :  { %v1635_v26 = vmul.f32 0.01, %v1135_v20  ;;  %v1699_v27 = vmul.f32 0.01, %v1391_v21  ;;  %vm1507_vm12 = vcmp.gt.f32.partialorder %v1135_v20, 0.0  ;;  %vm1571_vm13 = vcmp.gt.f32.partialorder %v1391_v21, 0.0 }
 0x1bd   :  { %3231 = vst [vmem:[%s4333_s3 + $0xb0] sm:$0xff] %v3003_v22   ;;  %3263 = vst [vmem:[%s4333_s3 + $0x1b0] sm:$0xff] %v3163_v23   ;;  %v1137_v28 = vpop.f32.mrf.mxu0  ;;  %v1393_v29 = vpop.f32.mrf.mxu1 }
 0x1be   :  { %v1138_v30 = vadd.f32 %v4170_v55, %v1137_v28  ;;  %v1394_v31 = vadd.f32 %v4170_v55, %v1393_v29  ;;  %v1763_v36 = vsel %vm1507_vm12, %v1135_v20, %v1635_v26  ;;  %v1827_v37 = vsel %vm1571_vm13, %v1391_v21, %v1699_v27 }
 0x1bf   :  { %v1139_v32 = vpop.f32.mrf.mxu0  ;;  %v1395_v33 = vpop.f32.mrf.mxu1 }
 0x1c0   :  { %vm1508_vm14 = vcmp.gt.f32.partialorder %v1138_v30, 0.0  ;;  %v1636_v34 = vmul.f32 0.01, %v1138_v30  ;;  %vm1572_vm15 = vcmp.gt.f32.partialorder %v1394_v31, 0.0  ;;  %v1700_v35 = vmul.f32 0.01, %v1394_v31 }
 0x1c1   :  { %v1142_v38 = vpop.f32.mrf.mxu0  ;;  %v1398_v39 = vpop.f32.mrf.mxu1 }
 0x1c2   :  { %v1764_v40 = vsel %vm1508_vm14, %v1138_v30, %v1636_v34  ;;  %v1828_v41 = vsel %vm1572_vm15, %v1394_v31, %v1700_v35  ;;  %v1143_v42 = vadd.f32 %v4170_v55, %v1142_v38  ;;  %v1399_v43 = vadd.f32 %v4170_v55, %v1398_v39 }
 0x1c3   :  { %v3008_v44 = vpack.c.bf16 %v1764_v40, %v1763_v36  ;;  %v3168_v45 = vpack.c.bf16 %v1828_v41, %v1827_v37  ;;  %v1144_v46 = vpop.f32.mrf.mxu0  ;;  %v1400_v47 = vpop.f32.mrf.mxu1 }
 0x1c4   :  { %v1637_v48 = vmul.f32 0.01, %v1143_v42  ;;  %v1701_v49 = vmul.f32 0.01, %v1399_v43  ;;  %vm1509_vm0 = vcmp.gt.f32.partialorder %v1143_v42, 0.0  ;;  %vm1573_vm1 = vcmp.gt.f32.partialorder %v1399_v43, 0.0 }
 0x1c5   :  { %3232 = vst [vmem:[%s4333_s3 + $0xb8] sm:$0xff] %v3008_v44   ;;  %3264 = vst [vmem:[%s4333_s3 + $0x1b8] sm:$0xff] %v3168_v45   ;;  %v1145_v50 = vpop.f32.mrf.mxu0  ;;  %v1401_v51 = vpop.f32.mrf.mxu1 }
 0x1c6   :  { %v1146_v52 = vadd.f32 %v4170_v55, %v1145_v50  ;;  %v1402_v53 = vadd.f32 %v4170_v55, %v1401_v51  ;;  %v1765_v59 = vsel %vm1509_vm0, %v1143_v42, %v1637_v48  ;;  %v1829_v60 = vsel %vm1573_vm1, %v1399_v43, %v1701_v49 }
 0x1c7   :  { %v1147_v54 = vpop.f32.mrf.mxu0  ;;  %v1403_v56 = vpop.f32.mrf.mxu1 }
 0x1c8   :  { %vm1510_vm2 = vcmp.gt.f32.partialorder %v1146_v52, 0.0  ;;  %v1638_v57 = vmul.f32 0.01, %v1146_v52  ;;  %vm1574_vm3 = vcmp.gt.f32.partialorder %v1402_v53, 0.0  ;;  %v1702_v58 = vmul.f32 0.01, %v1402_v53 }
 0x1c9   :  { %v1150_v61 = vpop.f32.mrf.mxu0  ;;  %v1406_v62 = vpop.f32.mrf.mxu1 }
 0x1ca   :  { %v1766_v63 = vsel %vm1510_vm2, %v1146_v52, %v1638_v57  ;;  %v1830_v0 = vsel %vm1574_vm3, %v1402_v53, %v1702_v58  ;;  %v1151_v1 = vadd.f32 %v4170_v55, %v1150_v61  ;;  %v1407_v2 = vadd.f32 %v4170_v55, %v1406_v62 }
 0x1cb   :  { %v3013_v3 = vpack.c.bf16 %v1766_v63, %v1765_v59  ;;  %v3173_v4 = vpack.c.bf16 %v1830_v0, %v1829_v60  ;;  %v1152_v5 = vpop.f32.mrf.mxu0  ;;  %v1408_v6 = vpop.f32.mrf.mxu1 }
 0x1cc   :  { %v1639_v7 = vmul.f32 0.01, %v1151_v1  ;;  %v1703_v8 = vmul.f32 0.01, %v1407_v2  ;;  %vm1511_vm4 = vcmp.gt.f32.partialorder %v1151_v1, 0.0  ;;  %vm1575_vm5 = vcmp.gt.f32.partialorder %v1407_v2, 0.0 }
 0x1cd   :  { %3233 = vst [vmem:[%s4333_s3 + $0xc0] sm:$0xff] %v3013_v3   ;;  %3265 = vst [vmem:[%s4333_s3 + $0x1c0] sm:$0xff] %v3173_v4   ;;  %v1153_v9 = vpop.f32.mrf.mxu0  ;;  %v1409_v10 = vpop.f32.mrf.mxu1 }
 0x1ce   :  { %v1154_v11 = vadd.f32 %v4170_v55, %v1153_v9  ;;  %v1410_v12 = vadd.f32 %v4170_v55, %v1409_v10  ;;  %v1767_v17 = vsel %vm1511_vm4, %v1151_v1, %v1639_v7  ;;  %v1831_v18 = vsel %vm1575_vm5, %v1407_v2, %v1703_v8 }
 0x1cf   :  { %v1155_v13 = vpop.f32.mrf.mxu0  ;;  %v1411_v14 = vpop.f32.mrf.mxu1 }
 0x1d0   :  { %vm1512_vm6 = vcmp.gt.f32.partialorder %v1154_v11, 0.0  ;;  %v1640_v15 = vmul.f32 0.01, %v1154_v11  ;;  %vm1576_vm7 = vcmp.gt.f32.partialorder %v1410_v12, 0.0  ;;  %v1704_v16 = vmul.f32 0.01, %v1410_v12 }
 0x1d1   :  { %v1158_v19 = vpop.f32.mrf.mxu0  ;;  %v1414_v20 = vpop.f32.mrf.mxu1 }
 0x1d2   :  { %v1768_v21 = vsel %vm1512_vm6, %v1154_v11, %v1640_v15  ;;  %v1832_v22 = vsel %vm1576_vm7, %v1410_v12, %v1704_v16  ;;  %v1159_v23 = vadd.f32 %v4170_v55, %v1158_v19  ;;  %v1415_v24 = vadd.f32 %v4170_v55, %v1414_v20 }
 0x1d3   :  { %v3018_v25 = vpack.c.bf16 %v1768_v21, %v1767_v17  ;;  %v3178_v26 = vpack.c.bf16 %v1832_v22, %v1831_v18  ;;  %v1160_v27 = vpop.f32.mrf.mxu0  ;;  %v1416_v28 = vpop.f32.mrf.mxu1 }
 0x1d4   :  { %v1641_v29 = vmul.f32 0.01, %v1159_v23  ;;  %v1705_v30 = vmul.f32 0.01, %v1415_v24  ;;  %vm1513_vm8 = vcmp.gt.f32.partialorder %v1159_v23, 0.0  ;;  %vm1577_vm9 = vcmp.gt.f32.partialorder %v1415_v24, 0.0 }
 0x1d5   :  { %3234 = vst [vmem:[%s4333_s3 + $0xc8] sm:$0xff] %v3018_v25   ;;  %3266 = vst [vmem:[%s4333_s3 + $0x1c8] sm:$0xff] %v3178_v26   ;;  %v1161_v31 = vpop.f32.mrf.mxu0  ;;  %v1417_v32 = vpop.f32.mrf.mxu1 }
 0x1d6   :  { %v1162_v33 = vadd.f32 %v4170_v55, %v1161_v31  ;;  %v1418_v34 = vadd.f32 %v4170_v55, %v1417_v32  ;;  %v1769_v39 = vsel %vm1513_vm8, %v1159_v23, %v1641_v29  ;;  %v1833_v40 = vsel %vm1577_vm9, %v1415_v24, %v1705_v30 }
 0x1d7   :  { %v1163_v35 = vpop.f32.mrf.mxu0  ;;  %v1419_v36 = vpop.f32.mrf.mxu1 }
 0x1d8   :  { %vm1514_vm10 = vcmp.gt.f32.partialorder %v1162_v33, 0.0  ;;  %v1642_v37 = vmul.f32 0.01, %v1162_v33  ;;  %vm1578_vm11 = vcmp.gt.f32.partialorder %v1418_v34, 0.0  ;;  %v1706_v38 = vmul.f32 0.01, %v1418_v34 }
 0x1d9   :  { %v1166_v41 = vpop.f32.mrf.mxu0  ;;  %v1422_v42 = vpop.f32.mrf.mxu1 }
 0x1da   :  { %v1770_v43 = vsel %vm1514_vm10, %v1162_v33, %v1642_v37  ;;  %v1834_v44 = vsel %vm1578_vm11, %v1418_v34, %v1706_v38  ;;  %v1167_v45 = vadd.f32 %v4170_v55, %v1166_v41  ;;  %v1423_v46 = vadd.f32 %v4170_v55, %v1422_v42 }
 0x1db   :  { %v3023_v47 = vpack.c.bf16 %v1770_v43, %v1769_v39  ;;  %v3183_v48 = vpack.c.bf16 %v1834_v44, %v1833_v40  ;;  %v1168_v49 = vpop.f32.mrf.mxu0  ;;  %v1424_v50 = vpop.f32.mrf.mxu1 }
 0x1dc   :  { %v1643_v51 = vmul.f32 0.01, %v1167_v45  ;;  %v1707_v52 = vmul.f32 0.01, %v1423_v46  ;;  %vm1515_vm12 = vcmp.gt.f32.partialorder %v1167_v45, 0.0  ;;  %vm1579_vm13 = vcmp.gt.f32.partialorder %v1423_v46, 0.0 }
 0x1dd   :  { %3235 = vst [vmem:[%s4333_s3 + $0xd0] sm:$0xff] %v3023_v47   ;;  %3267 = vst [vmem:[%s4333_s3 + $0x1d0] sm:$0xff] %v3183_v48   ;;  %v1169_v53 = vpop.f32.mrf.mxu0  ;;  %v1425_v54 = vpop.f32.mrf.mxu1 }
 0x1de   :  { %v1170_v56 = vadd.f32 %v4170_v55, %v1169_v53  ;;  %v1426_v57 = vadd.f32 %v4170_v55, %v1425_v54  ;;  %v1771_v62 = vsel %vm1515_vm12, %v1167_v45, %v1643_v51  ;;  %v1835_v63 = vsel %vm1579_vm13, %v1423_v46, %v1707_v52 }
 0x1df   :  { %v1171_v58 = vpop.f32.mrf.mxu0  ;;  %v1427_v59 = vpop.f32.mrf.mxu1 }
 0x1e0   :  { %vm1516_vm14 = vcmp.gt.f32.partialorder %v1170_v56, 0.0  ;;  %v1644_v60 = vmul.f32 0.01, %v1170_v56  ;;  %vm1580_vm15 = vcmp.gt.f32.partialorder %v1426_v57, 0.0  ;;  %v1708_v61 = vmul.f32 0.01, %v1426_v57 }
 0x1e1   :  { %v1174_v0 = vpop.f32.mrf.mxu0  ;;  %v1430_v1 = vpop.f32.mrf.mxu1 }
 0x1e2   :  { %v1772_v2 = vsel %vm1516_vm14, %v1170_v56, %v1644_v60  ;;  %v1836_v3 = vsel %vm1580_vm15, %v1426_v57, %v1708_v61  ;;  %v1175_v4 = vadd.f32 %v4170_v55, %v1174_v0  ;;  %v1431_v5 = vadd.f32 %v4170_v55, %v1430_v1 }
 0x1e3   :  { %v3028_v6 = vpack.c.bf16 %v1772_v2, %v1771_v62  ;;  %v3188_v7 = vpack.c.bf16 %v1836_v3, %v1835_v63  ;;  %v1176_v8 = vpop.f32.mrf.mxu0  ;;  %v1432_v9 = vpop.f32.mrf.mxu1 }
 0x1e4   :  { %v1645_v10 = vmul.f32 0.01, %v1175_v4  ;;  %v1709_v11 = vmul.f32 0.01, %v1431_v5  ;;  %vm1517_vm0 = vcmp.gt.f32.partialorder %v1175_v4, 0.0  ;;  %vm1581_vm1 = vcmp.gt.f32.partialorder %v1431_v5, 0.0 }
 0x1e5   :  { %3236 = vst [vmem:[%s4333_s3 + $0xd8] sm:$0xff] %v3028_v6   ;;  %3268 = vst [vmem:[%s4333_s3 + $0x1d8] sm:$0xff] %v3188_v7   ;;  %v1177_v12 = vpop.f32.mrf.mxu0  ;;  %v1433_v13 = vpop.f32.mrf.mxu1 }
 0x1e6   :  { %v1178_v14 = vadd.f32 %v4170_v55, %v1177_v12  ;;  %v1434_v15 = vadd.f32 %v4170_v55, %v1433_v13  ;;  %v1773_v20 = vsel %vm1517_vm0, %v1175_v4, %v1645_v10  ;;  %v1837_v21 = vsel %vm1581_vm1, %v1431_v5, %v1709_v11 }
 0x1e7   :  { %v1179_v16 = vpop.f32.mrf.mxu0  ;;  %v1435_v17 = vpop.f32.mrf.mxu1 }
 0x1e8   :  { %vm1518_vm2 = vcmp.gt.f32.partialorder %v1178_v14, 0.0  ;;  %v1646_v18 = vmul.f32 0.01, %v1178_v14  ;;  %vm1582_vm3 = vcmp.gt.f32.partialorder %v1434_v15, 0.0  ;;  %v1710_v19 = vmul.f32 0.01, %v1434_v15 }
 0x1e9   :  { %v1182_v22 = vpop.f32.mrf.mxu0  ;;  %v1438_v23 = vpop.f32.mrf.mxu1 }
 0x1ea   :  { %v1774_v24 = vsel %vm1518_vm2, %v1178_v14, %v1646_v18  ;;  %v1838_v25 = vsel %vm1582_vm3, %v1434_v15, %v1710_v19  ;;  %v1183_v26 = vadd.f32 %v4170_v55, %v1182_v22  ;;  %v1439_v27 = vadd.f32 %v4170_v55, %v1438_v23 }
 0x1eb   :  { %v3033_v28 = vpack.c.bf16 %v1774_v24, %v1773_v20  ;;  %v3193_v29 = vpack.c.bf16 %v1838_v25, %v1837_v21  ;;  %v1184_v30 = vpop.f32.mrf.mxu0  ;;  %v1440_v31 = vpop.f32.mrf.mxu1 }
 0x1ec   :  { %v1647_v32 = vmul.f32 0.01, %v1183_v26  ;;  %v1711_v33 = vmul.f32 0.01, %v1439_v27  ;;  %vm1519_vm4 = vcmp.gt.f32.partialorder %v1183_v26, 0.0  ;;  %vm1583_vm5 = vcmp.gt.f32.partialorder %v1439_v27, 0.0 }
 0x1ed   :  { %3237 = vst [vmem:[%s4333_s3 + $0xe0] sm:$0xff] %v3033_v28   ;;  %3269 = vst [vmem:[%s4333_s3 + $0x1e0] sm:$0xff] %v3193_v29   ;;  %v1185_v34 = vpop.f32.mrf.mxu0  ;;  %v1441_v35 = vpop.f32.mrf.mxu1 }
 0x1ee   :  { %v1186_v36 = vadd.f32 %v4170_v55, %v1185_v34  ;;  %v1442_v37 = vadd.f32 %v4170_v55, %v1441_v35  ;;  %v1775_v42 = vsel %vm1519_vm4, %v1183_v26, %v1647_v32  ;;  %v1839_v43 = vsel %vm1583_vm5, %v1439_v27, %v1711_v33 }
 0x1ef   :  { %v1187_v38 = vpop.f32.mrf.mxu0  ;;  %v1443_v39 = vpop.f32.mrf.mxu1 }
 0x1f0   :  { %vm1520_vm6 = vcmp.gt.f32.partialorder %v1186_v36, 0.0  ;;  %v1648_v40 = vmul.f32 0.01, %v1186_v36  ;;  %vm1584_vm7 = vcmp.gt.f32.partialorder %v1442_v37, 0.0  ;;  %v1712_v41 = vmul.f32 0.01, %v1442_v37 }
 0x1f1   :  { %v1190_v44 = vpop.f32.mrf.mxu0  ;;  %v1446_v45 = vpop.f32.mrf.mxu1 }
 0x1f2   :  { %v1776_v46 = vsel %vm1520_vm6, %v1186_v36, %v1648_v40  ;;  %v1840_v47 = vsel %vm1584_vm7, %v1442_v37, %v1712_v41  ;;  %v1191_v48 = vadd.f32 %v4170_v55, %v1190_v44  ;;  %v1447_v49 = vadd.f32 %v4170_v55, %v1446_v45 }
 0x1f3   :  { %v3038_v50 = vpack.c.bf16 %v1776_v46, %v1775_v42  ;;  %v3198_v51 = vpack.c.bf16 %v1840_v47, %v1839_v43  ;;  %v1192_v52 = vpop.f32.mrf.mxu0  ;;  %v1448_v53 = vpop.f32.mrf.mxu1 }
 0x1f4   :  { %v1649_v54 = vmul.f32 0.01, %v1191_v48  ;;  %v1713_v56 = vmul.f32 0.01, %v1447_v49  ;;  %vm1521_vm8 = vcmp.gt.f32.partialorder %v1191_v48, 0.0  ;;  %vm1585_vm9 = vcmp.gt.f32.partialorder %v1447_v49, 0.0 }
 0x1f5   :  { %3238 = vst [vmem:[%s4333_s3 + $0xe8] sm:$0xff] %v3038_v50   ;;  %3270 = vst [vmem:[%s4333_s3 + $0x1e8] sm:$0xff] %v3198_v51   ;;  %v1193_v57 = vpop.f32.mrf.mxu0  ;;  %v1449_v58 = vpop.f32.mrf.mxu1 }
 0x1f6   :  { %v1194_v59 = vadd.f32 %v4170_v55, %v1193_v57  ;;  %v1450_v60 = vadd.f32 %v4170_v55, %v1449_v58  ;;  %v1777_v1 = vsel %vm1521_vm8, %v1191_v48, %v1649_v54  ;;  %v1841_v2 = vsel %vm1585_vm9, %v1447_v49, %v1713_v56 }
 0x1f7   :  { %v1195_v61 = vpop.f32.mrf.mxu0  ;;  %v1451_v62 = vpop.f32.mrf.mxu1 }
 0x1f8   :  { %vm1522_vm10 = vcmp.gt.f32.partialorder %v1194_v59, 0.0  ;;  %v1650_v63 = vmul.f32 0.01, %v1194_v59  ;;  %vm1586_vm11 = vcmp.gt.f32.partialorder %v1450_v60, 0.0  ;;  %v1714_v0 = vmul.f32 0.01, %v1450_v60 }
 0x1f9   :  { %v1198_v3 = vpop.f32.mrf.mxu0  ;;  %v1454_v4 = vpop.f32.mrf.mxu1 }
 0x1fa   :  { %v1778_v5 = vsel %vm1522_vm10, %v1194_v59, %v1650_v63  ;;  %v1842_v6 = vsel %vm1586_vm11, %v1450_v60, %v1714_v0  ;;  %v1199_v7 = vadd.f32 %v4170_v55, %v1198_v3  ;;  %v1455_v8 = vadd.f32 %v4170_v55, %v1454_v4 }
 0x1fb   :  { %v3043_v9 = vpack.c.bf16 %v1778_v5, %v1777_v1  ;;  %v3203_v10 = vpack.c.bf16 %v1842_v6, %v1841_v2  ;;  %v1200_v11 = vpop.f32.mrf.mxu0  ;;  %v1456_v12 = vpop.f32.mrf.mxu1 }
 0x1fc   :  { %v1651_v15 = vmul.f32 0.01, %v1199_v7  ;;  %v1715_v16 = vmul.f32 0.01, %v1455_v8  ;;  %vm1523_vm12 = vcmp.gt.f32.partialorder %v1199_v7, 0.0  ;;  %vm1587_vm13 = vcmp.gt.f32.partialorder %v1455_v8, 0.0 }
 0x1fd   :  { %3239 = vst [vmem:[%s4333_s3 + $0xf0] sm:$0xff] %v3043_v9   ;;  %3271 = vst [vmem:[%s4333_s3 + $0x1f0] sm:$0xff] %v3203_v10   ;;  %v1201_v13 = vpop.f32.mrf.mxu0  ;;  %v1457_v14 = vpop.f32.mrf.mxu1 }
 0x1fe   :  { %v1202_v17 = vadd.f32 %v4170_v55, %v1201_v13  ;;  %v1458_v18 = vadd.f32 %v4170_v55, %v1457_v14  ;;  %v1779_v23 = vsel %vm1523_vm12, %v1199_v7, %v1651_v15  ;;  %v1843_v24 = vsel %vm1587_vm13, %v1455_v8, %v1715_v16 }
 0x1ff   :  { %v1203_v19 = vpop.f32.mrf.mxu0  ;;  %v1459_v20 = vpop.f32.mrf.mxu1 }
 0x200   :  { %vm1524_vm14 = vcmp.gt.f32.partialorder %v1202_v17, 0.0  ;;  %v1652_v21 = vmul.f32 0.01, %v1202_v17  ;;  %vm1588_vm15 = vcmp.gt.f32.partialorder %v1458_v18, 0.0  ;;  %v1716_v22 = vmul.f32 0.01, %v1458_v18 }
 0x202   :  { %v1780_v25 = vsel %vm1524_vm14, %v1202_v17, %v1652_v21  ;;  %v1844_v26 = vsel %vm1588_vm15, %v1458_v18, %v1716_v22 }
 0x203   :  { %v3048_v27 = vpack.c.bf16 %v1780_v25, %v1779_v23  ;;  %v3208_v28 = vpack.c.bf16 %v1844_v26, %v1843_v24 }
 0x205   :  { %3240 = vst [vmem:[%s4333_s3 + $0xf8] sm:$0xff] %v3048_v27   ;;  %3272 = vst [vmem:[%s4333_s3 + $0x1f8] sm:$0xff] %v3208_v28  }

// kernel: discriminator_forward.4
= control target key start
LH: loop header
LB: loop body
LE: loop exit
PB: predicated region body
PF: predicated region fallthrough
CT: control target
= control target key end

     0   :  { %s5716_s1 = inlined_call_operand.vmem [shape: bf16[1280,128], index: 1, kind: input, shape index: {}]   ;;  %s5717_s0 = inlined_call_operand.vmem [shape: bf16[256,1280], index: 0, kind: input, shape index: {}]   ;;  %s5718_s2 = inlined_call_operand.vmem [shape: f32[8,128], index: 2, kind: input, shape index: {}]   ;;  %s5719_s3 = inlined_call_operand.vmem [shape: bf16[256,128], index: 3, kind: output, shape index: {}]  }
   0x1   :  { %v3913_v0 = vld [vmem:[%s5716_s1 + $0x78] sm:$0xff]   ;;  %v3915_v2 = vld [vmem:[%s5716_s1 + $0x70] sm:$0xff]   ;;  %v3917_v4 = vld [vmem:[%s5716_s1 + $0x68] sm:$0xff]  }
   0x2   :  { %v3914_v1 = vld [vmem:[%s5716_s1 + $0x38] sm:$0xff]   ;;  %3337 = vmatprep.subr.bf16.mxu0 %v3913_v0  ;;  %3897 = vmatprep.subr.bf16.mxu1 %v3913_v0  ;;  %v3916_v3 = vld [vmem:[%s5716_s1 + $0x30] sm:$0xff]   ;;  %v3918_v5 = vld [vmem:[%s5716_s1 + $0x28] sm:$0xff]  }
   0x3   :  { %3338 = vmatpush3.bf16.msra.mxu0 %v3914_v1  ;;  %3905 = vmatpush3.bf16.msra.mxu1 %v3914_v1  ;;  %v3919_v6 = vld [vmem:[%s5716_s1 + $0x60] sm:$0xff]   ;;  %v3921_v8 = vld [vmem:[%s5716_s1 + $0x58] sm:$0xff]   ;;  %v3923_v10 = vld [vmem:[%s5716_s1 + $0x50] sm:$0xff]  }
   0x4   :  { %3339 = vmatprep.subr.bf16.mxu0 %v3915_v2  ;;  %3898 = vmatprep.subr.bf16.mxu1 %v3915_v2  ;;  %v3920_v7 = vld [vmem:[%s5716_s1 + $0x20] sm:$0xff]   ;;  %v3922_v9 = vld [vmem:[%s5716_s1 + $0x18] sm:$0xff]   ;;  %v3924_v13 = vld [vmem:[%s5716_s1 + $0x10] sm:$0xff]  }
   0x5   :  { %v3931_v11 = vld [vmem:[%s5717_s0 + $0x4] ss:$40 sps:$4 sm:$0xff]   ;;  %v3935_v18 = vld [vmem:[%s5716_s1 + $0xf8] sm:$0xff]   ;;  %v3929_v19 = vld [vmem:[%s5717_s0] ss:$40 sps:$4 sm:$0xff]  }
   0x6   :  { %v3934_v12 = vld [vmem:[%s5717_s0 + $0x284] ss:$40 sps:$4 sm:$0xff]   ;;  %1652 = vmatprep.mubr.bf16.mxu0 %v3931_v11  ;;  %v3937_v20 = vld [vmem:[%s5716_s1 + $0x178] sm:$0xff]   ;;  %v3932_v21 = vld [vmem:[%s5717_s0 + $0x280] ss:$40 sps:$4 sm:$0xff]  }
   0x7   :  { %3340 = vmatpush3.bf16.msra.mxu0 %v3916_v3  ;;  %3906 = vmatpush3.bf16.msra.mxu1 %v3916_v3  ;;  %v3925_v14 = vld [vmem:[%s5716_s1 + $0x48] sm:$0xff]   ;;  %v3927_v16 = vld [vmem:[%s5716_s1 + $0x40] sm:$0xff]   ;;  %v3936_v22 = vld [vmem:[%s5716_s1 + $0xb8] sm:$0xff]  }
   0x8   :  { %3341 = vmatprep.subr.bf16.mxu0 %v3917_v4  ;;  %3899 = vmatprep.subr.bf16.mxu1 %v3917_v4  ;;  %v3926_v15 = vld [vmem:[%s5716_s1 + $0x8] sm:$0xff]   ;;  %v3928_v17 = vld [vmem:[%s5716_s1] sm:$0xff]   ;;  %v3938_v23 = vld [vmem:[%s5716_s1 + $0x138] sm:$0xff]  }
   0x9   :  { %1716 = vmatprep.mubr.bf16.mxu1 %v3934_v12  ;;  %v3939_v24 = vld [vmem:[%s5717_s0 + $0x54] ss:$40 sps:$4 sm:$0xff]   ;;  %v3955_v30 = vld [vmem:[%s5716_s1 + $0xe8] sm:$0xff]   ;;  %v3943_v31 = vld [vmem:[%s5717_s0 + $0x50] ss:$40 sps:$4 sm:$0xff]  }
   0xa   :  { %v3941_v25 = vld [vmem:[%s5717_s0 + $0x2d4] ss:$40 sps:$4 sm:$0xff]   ;;  %v3944_v32 = vld [vmem:[%s5717_s0 + $0x2d0] ss:$40 sps:$4 sm:$0xff]   ;;  %v3957_v33 = vld [vmem:[%s5716_s1 + $0x168] sm:$0xff]  }
   0xb   :  { %3342 = vmatpush3.bf16.msra.mxu0 %v3918_v5  ;;  %3907 = vmatpush3.bf16.msra.mxu1 %v3918_v5  ;;  %v3945_v26 = vld [vmem:[%s5716_s1 + $0xf0] sm:$0xff]   ;;  %v3949_v34 = vld [vmem:[%s5717_s0 + $0xa4] ss:$40 sps:$4 sm:$0xff]   ;;  %v3953_v40 = vld [vmem:[%s5717_s0 + $0xa0] ss:$40 sps:$4 sm:$0xff]  }
   0xc   :  { %3343 = vmatprep.subr.bf16.mxu0 %v3919_v6  ;;  %3900 = vmatprep.subr.bf16.mxu1 %v3919_v6  ;;  %v3946_v27 = vld [vmem:[%s5716_s1 + $0xb0] sm:$0xff]   ;;  %v3951_v35 = vld [vmem:[%s5717_s0 + $0x324] ss:$40 sps:$4 sm:$0xff]   ;;  %v3954_v41 = vld [vmem:[%s5717_s0 + $0x320] ss:$40 sps:$4 sm:$0xff]  }
   0xd   :  { %v3947_v28 = vld [vmem:[%s5716_s1 + $0x170] sm:$0xff]   ;;  %v3956_v36 = vld [vmem:[%s5716_s1 + $0xa8] sm:$0xff]   ;;  %v3965_v38 = vld [vmem:[%s5716_s1 + $0xe0] sm:$0xff]  }
   0xe   :  { %v3948_v29 = vld [vmem:[%s5716_s1 + $0x130] sm:$0xff]   ;;  %v3958_v37 = vld [vmem:[%s5716_s1 + $0x128] sm:$0xff]   ;;  %v3967_v39 = vld [vmem:[%s5716_s1 + $0x160] sm:$0xff]  }
   0xf   :  { %3344 = vmatpush3.bf16.msra.mxu0 %v3920_v7  ;;  %3908 = vmatpush3.bf16.msra.mxu1 %v3920_v7  ;;  %v3966_v42 = vld [vmem:[%s5716_s1 + $0xa0] sm:$0xff]   ;;  %v3959_v44 = vld [vmem:[%s5717_s0 + $0xf4] ss:$40 sps:$4 sm:$0xff]   ;;  %v3963_v50 = vld [vmem:[%s5717_s0 + $0xf0] ss:$40 sps:$4 sm:$0xff]  }
  0x10   :  { %3345 = vmatprep.subr.bf16.mxu0 %v3921_v8  ;;  %3901 = vmatprep.subr.bf16.mxu1 %v3921_v8  ;;  %v3968_v43 = vld [vmem:[%s5716_s1 + $0x120] sm:$0xff]   ;;  %v3961_v45 = vld [vmem:[%s5717_s0 + $0x374] ss:$40 sps:$4 sm:$0xff]   ;;  %v3964_v51 = vld [vmem:[%s5717_s0 + $0x370] ss:$40 sps:$4 sm:$0xff]  }
  0x11   :  { %v3975_v46 = vld [vmem:[%s5716_s1 + $0xd8] sm:$0xff]   ;;  %v3985_v52 = vld [vmem:[%s5716_s1 + $0xd0] sm:$0xff]   ;;  %v3969_v53 = vld [vmem:[%s5717_s0 + $0x144] ss:$40 sps:$4 sm:$0xff]  }
  0x12   :  { %v3976_v47 = vld [vmem:[%s5716_s1 + $0x98] sm:$0xff]   ;;  %v3971_v54 = vld [vmem:[%s5717_s0 + $0x3c4] ss:$40 sps:$4 sm:$0xff]   ;;  %v3986_v55 = vld [vmem:[%s5716_s1 + $0x90] sm:$0xff]  }
  0x13   :  { %3346 = vmatpush3.bf16.msra.mxu0 %v3922_v9  ;;  %3909 = vmatpush3.bf16.msra.mxu1 %v3922_v9  ;;  %v3977_v48 = vld [vmem:[%s5716_s1 + $0x158] sm:$0xff]   ;;  %v3987_v56 = vld [vmem:[%s5716_s1 + $0x150] sm:$0xff]   ;;  %v3995_v58 = vld [vmem:[%s5716_s1 + $0xc8] sm:$0xff]  }
  0x14   :  { %3347 = vmatprep.subr.bf16.mxu0 %v3923_v10  ;;  %3902 = vmatprep.subr.bf16.mxu1 %v3923_v10  ;;  %v3978_v49 = vld [vmem:[%s5716_s1 + $0x118] sm:$0xff]   ;;  %v3988_v57 = vld [vmem:[%s5716_s1 + $0x110] sm:$0xff]   ;;  %v3973_v59 = vld [vmem:[%s5717_s0 + $0x140] ss:$40 sps:$4 sm:$0xff]  }
  0x15   :  { %v3974_v60 = vld [vmem:[%s5717_s0 + $0x3c0] ss:$40 sps:$4 sm:$0xff]   ;;  %v3979_v62 = vld [vmem:[%s5717_s0 + $0x194] ss:$40 sps:$4 sm:$0xff]   ;;  %v3983_v6 = vld [vmem:[%s5717_s0 + $0x190] ss:$40 sps:$4 sm:$0xff]  }
  0x16   :  { %v3996_v61 = vld [vmem:[%s5716_s1 + $0x88] sm:$0xff]   ;;  %v3981_v1 = vld [vmem:[%s5717_s0 + $0x414] ss:$40 sps:$4 sm:$0xff]   ;;  %v4005_v2 = vld [vmem:[%s5716_s1 + $0xc0] sm:$0xff]  }
  0x17   :  { %3348 = vmatpush3.bf16.msra.mxu0 %v3924_v13  ;;  %3910 = vmatpush3.bf16.msra.mxu1 %v3924_v13  ;;  %v3997_v63 = vld [vmem:[%s5716_s1 + $0x148] sm:$0xff]   ;;  %v4006_v3 = vld [vmem:[%s5716_s1 + $0x80] sm:$0xff]   ;;  %v3984_v7 = vld [vmem:[%s5717_s0 + $0x410] ss:$40 sps:$4 sm:$0xff]  }
  0x18   :  { %3349 = vmatprep.subr.bf16.mxu0 %v3925_v14  ;;  %3903 = vmatprep.subr.bf16.mxu1 %v3925_v14  ;;  %v3998_v0 = vld [vmem:[%s5716_s1 + $0x108] sm:$0xff]   ;;  %v4007_v4 = vld [vmem:[%s5716_s1 + $0x140] sm:$0xff]   ;;  %v4015_v10 = vld [vmem:[%s5716_s1 + $0x1f8] sm:$0xff]  }
  0x19   :  { %v4008_v5 = vld [vmem:[%s5716_s1 + $0x100] sm:$0xff]   ;;  %v4017_v11 = vld [vmem:[%s5716_s1 + $0x278] sm:$0xff]  }
  0x1a   :  { %v3989_v8 = vld [vmem:[%s5717_s0 + $0x1e4] ss:$40 sps:$4 sm:$0xff]   ;;  %v3993_v12 = vld [vmem:[%s5717_s0 + $0x1e0] ss:$40 sps:$4 sm:$0xff]   ;;  %v3999_v14 = vld [vmem:[%s5717_s0 + $0x234] ss:$40 sps:$4 sm:$0xff]  }
  0x1b   :  { %3350 = vmatpush3.bf16.msra.mxu0 %v3926_v15  ;;  %3911 = vmatpush3.bf16.msra.mxu1 %v3926_v15  ;;  %v3991_v9 = vld [vmem:[%s5717_s0 + $0x464] ss:$40 sps:$4 sm:$0xff]   ;;  %v3994_v13 = vld [vmem:[%s5717_s0 + $0x460] ss:$40 sps:$4 sm:$0xff]   ;;  %v4001_v15 = vld [vmem:[%s5717_s0 + $0x4b4] ss:$40 sps:$4 sm:$0xff]  }
  0x1c   :  { %3351 = vmatprep.subr.bf16.mxu0 %v3927_v16  ;;  %3904 = vmatprep.subr.bf16.mxu1 %v3927_v16  ;;  %v4003_v16 = vld [vmem:[%s5717_s0 + $0x230] ss:$40 sps:$4 sm:$0xff]  }
  0x1f   :  { %3352 = vmatpush3.bf16.msra.mxu0 %v3928_v17  ;;  %3912 = vmatpush3.bf16.msra.mxu1 %v3928_v17  ;;  %v4004_v17 = vld [vmem:[%s5717_s0 + $0x4b0] ss:$40 sps:$4 sm:$0xff]  }
  0x20   :  { %3449 = vmatprep.subr.bf16.mxu1 %v3935_v18  ;;  %3561 = vmatprep.subr.bf16.mxu0 %v3937_v20  ;;  %v4011_v18 = vld [vmem:[%s5717_s0 + $0xc] ss:$40 sps:$4 sm:$0xff]   ;;  %v4009_v20 = vld [vmem:[%s5717_s0 + $0x8] ss:$40 sps:$4 sm:$0xff]  }
  0x22   :  { %1653 = vmatmul.mubr.bf16.vlgmr.msra.gmra.mxu0 %v3929_v19  ;;  %1717 = vmatmul.mubr.bf16.vlgmr.msra.gmra.mxu1 %v3932_v21  ;;  %v4014_v19 = vld [vmem:[%s5717_s0 + $0x14] ss:$40 sps:$4 sm:$0xff]   ;;  %v4012_v21 = vld [vmem:[%s5717_s0 + $0x10] ss:$40 sps:$4 sm:$0xff]  }
  0x23   :  { %3450 = vmatpush3.bf16.msra.mxu1 %v3936_v22  ;;  %3562 = vmatpush3.bf16.msra.mxu0 %v3938_v23  ;;  %v4016_v22 = vld [vmem:[%s5716_s1 + $0x1b8] sm:$0xff]  }
  0x24   :  { %1660 = vmatprep.mubr.bf16.mxu0 %v3939_v24  ;;  %1724 = vmatprep.mubr.bf16.mxu1 %v3941_v25  ;;  %v4018_v23 = vld [vmem:[%s5716_s1 + $0x238] sm:$0xff]   ;;  %v4021_v25 = vld [vmem:[%s5717_s0 + $0x64] ss:$40 sps:$4 sm:$0xff]  }
  0x25   :  { %3451 = vmatprep.subr.bf16.mxu1 %v3945_v26  ;;  %3563 = vmatprep.subr.bf16.mxu0 %v3947_v28  ;;  %v4019_v24 = vld [vmem:[%s5717_s0 + $0x5c] ss:$40 sps:$4 sm:$0xff]   ;;  %v4031_v26 = vld [vmem:[%s5716_s1 + $0x1f0] sm:$0xff]  }
  0x26   :  { %v4032_v28 = vld [vmem:[%s5716_s1 + $0x1b0] sm:$0xff]  }
  0x27   :  { %3452 = vmatpush3.bf16.msra.mxu1 %v3946_v27  ;;  %3564 = vmatpush3.bf16.msra.mxu0 %v3948_v29  ;;  %v4033_v27 = vld [vmem:[%s5716_s1 + $0x270] sm:$0xff]  }
  0x28   :  { %3453 = vmatprep.subr.bf16.mxu1 %v3955_v30  ;;  %3565 = vmatprep.subr.bf16.mxu0 %v3957_v33  ;;  %v4034_v29 = vld [vmem:[%s5716_s1 + $0x230] sm:$0xff]   ;;  %v4047_v30 = vld [vmem:[%s5716_s1 + $0x1e8] sm:$0xff]  }
  0x29   :  { %v4049_v33 = vld [vmem:[%s5716_s1 + $0x268] sm:$0xff]  }
  0x2a   :  { %1661 = vmatmul.mubr.bf16.gmra.mxu0 %v3943_v31  ;;  %1725 = vmatmul.mubr.bf16.gmra.mxu1 %v3944_v32  ;;  %v4023_v31 = vld [vmem:[%s5717_s0 + $0x58] ss:$40 sps:$4 sm:$0xff]  }
  0x2b   :  { %1668 = vmatprep.mubr.bf16.mxu0 %v3949_v34  ;;  %1732 = vmatprep.mubr.bf16.mxu1 %v3951_v35  ;;  %v4024_v32 = vld [vmem:[%s5717_s0 + $0x60] ss:$40 sps:$4 sm:$0xff]   ;;  %v4025_v34 = vld [vmem:[%s5717_s0 + $0xac] ss:$40 sps:$4 sm:$0xff]  }
  0x2c   :  { %3454 = vmatpush3.bf16.msra.mxu1 %v3956_v36  ;;  %3566 = vmatpush3.bf16.msra.mxu0 %v3958_v37  ;;  %v4027_v35 = vld [vmem:[%s5717_s0 + $0xb4] ss:$40 sps:$4 sm:$0xff]   ;;  %v4048_v36 = vld [vmem:[%s5716_s1 + $0x1a8] sm:$0xff]  }
  0x2d   :  { %3455 = vmatprep.subr.bf16.mxu1 %v3965_v38  ;;  %3567 = vmatprep.subr.bf16.mxu0 %v3967_v39  ;;  %v4050_v37 = vld [vmem:[%s5716_s1 + $0x228] sm:$0xff]   ;;  %v4063_v38 = vld [vmem:[%s5716_s1 + $0x1e0] sm:$0xff]  }
  0x2e   :  { %v4065_v39 = vld [vmem:[%s5716_s1 + $0x260] sm:$0xff]  }
  0x30   :  { %3456 = vmatpush3.bf16.msra.mxu1 %v3966_v42  ;;  %3568 = vmatpush3.bf16.msra.mxu0 %v3968_v43  ;;  %v4064_v42 = vld [vmem:[%s5716_s1 + $0x1a0] sm:$0xff]  }
  0x31   :  { %3457 = vmatprep.subr.bf16.mxu1 %v3975_v46  ;;  %3569 = vmatprep.subr.bf16.mxu0 %v3977_v48  ;;  %v4066_v43 = vld [vmem:[%s5716_s1 + $0x220] sm:$0xff]   ;;  %v4079_v46 = vld [vmem:[%s5716_s1 + $0x1d8] sm:$0xff]  }
  0x32   :  { %1669 = vmatmul.mubr.bf16.gmra.mxu0 %v3953_v40  ;;  %1733 = vmatmul.mubr.bf16.gmra.mxu1 %v3954_v41  ;;  %v4029_v40 = vld [vmem:[%s5717_s0 + $0xa8] ss:$40 sps:$4 sm:$0xff]   ;;  %v4081_v48 = vld [vmem:[%s5716_s1 + $0x258] sm:$0xff]  }
  0x33   :  { %1676 = vmatprep.mubr.bf16.mxu0 %v3959_v44  ;;  %1740 = vmatprep.mubr.bf16.mxu1 %v3961_v45  ;;  %v4030_v41 = vld [vmem:[%s5717_s0 + $0xb0] ss:$40 sps:$4 sm:$0xff]   ;;  %v4035_v44 = vld [vmem:[%s5717_s0 + $0xfc] ss:$40 sps:$4 sm:$0xff]  }
  0x34   :  { %3458 = vmatpush3.bf16.msra.mxu1 %v3976_v47  ;;  %3570 = vmatpush3.bf16.msra.mxu0 %v3978_v49  ;;  %v4037_v45 = vld [vmem:[%s5717_s0 + $0x104] ss:$40 sps:$4 sm:$0xff]   ;;  %v4080_v47 = vld [vmem:[%s5716_s1 + $0x198] sm:$0xff]  }
  0x35   :  { %3459 = vmatprep.subr.bf16.mxu1 %v3985_v52  ;;  %3571 = vmatprep.subr.bf16.mxu0 %v3987_v56  ;;  %v4082_v49 = vld [vmem:[%s5716_s1 + $0x218] sm:$0xff]   ;;  %v4041_v52 = vld [vmem:[%s5717_s0 + $0x14c] ss:$40 sps:$4 sm:$0xff]  }
  0x36   :  { %v4097_v56 = vld [vmem:[%s5716_s1 + $0x250] sm:$0xff]  }
  0x38   :  { %3460 = vmatpush3.bf16.msra.mxu1 %v3986_v55  ;;  %3572 = vmatpush3.bf16.msra.mxu0 %v3988_v57  ;;  %v4096_v55 = vld [vmem:[%s5716_s1 + $0x190] sm:$0xff]  }
  0x39   :  { %3461 = vmatprep.subr.bf16.mxu1 %v3995_v58  ;;  %3573 = vmatprep.subr.bf16.mxu0 %v3997_v63  ;;  %v4098_v57 = vld [vmem:[%s5716_s1 + $0x210] sm:$0xff]   ;;  %v4112_v63 = vld [vmem:[%s5716_s1 + $0x188] sm:$0xff]  }
  0x3a   :  { %1677 = vmatmul.mubr.bf16.gmra.mxu0 %v3963_v50  ;;  %1741 = vmatmul.mubr.bf16.gmra.mxu1 %v3964_v51  ;;  %v4039_v50 = vld [vmem:[%s5717_s0 + $0xf8] ss:$40 sps:$4 sm:$0xff]   ;;  %v4045_v58 = vld [vmem:[%s5717_s0 + $0x148] ss:$40 sps:$4 sm:$0xff]  }
  0x3b   :  { %1684 = vmatprep.mubr.bf16.mxu0 %v3969_v53  ;;  %1748 = vmatprep.mubr.bf16.mxu1 %v3971_v54  ;;  %v4040_v51 = vld [vmem:[%s5717_s0 + $0x100] ss:$40 sps:$4 sm:$0xff]   ;;  %v4043_v53 = vld [vmem:[%s5717_s0 + $0x154] ss:$40 sps:$4 sm:$0xff]  }
  0x3c   :  { %3462 = vmatpush3.bf16.msra.mxu1 %v3996_v61  ;;  %3574 = vmatpush3.bf16.msra.mxu0 %v3998_v0  ;;  %v4095_v54 = vld [vmem:[%s5716_s1 + $0x1d0] sm:$0xff]   ;;  %v4053_v61 = vld [vmem:[%s5717_s0 + $0x1a4] ss:$40 sps:$4 sm:$0xff]  }
  0x3d   :  { %3463 = vmatprep.subr.bf16.mxu1 %v4005_v2  ;;  %3575 = vmatprep.subr.bf16.mxu0 %v4007_v4  ;;  %v4113_v0 = vld [vmem:[%s5716_s1 + $0x248] sm:$0xff]   ;;  %v4055_v2 = vld [vmem:[%s5717_s0 + $0x198] ss:$40 sps:$4 sm:$0xff]  }
  0x3e   :  { %v4057_v4 = vld [vmem:[%s5717_s0 + $0x1ec] ss:$40 sps:$4 sm:$0xff]  }
  0x40   :  { %3464 = vmatpush3.bf16.msra.mxu1 %v4006_v3  ;;  %3576 = vmatpush3.bf16.msra.mxu0 %v4008_v5  ;;  %v4056_v3 = vld [vmem:[%s5717_s0 + $0x1a0] ss:$40 sps:$4 sm:$0xff]   ;;  %v4059_v5 = vld [vmem:[%s5717_s0 + $0x1f4] ss:$40 sps:$4 sm:$0xff]  }
  0x41   :  { %3673 = vmatprep.subr.bf16.mxu1 %v4015_v10  ;;  %3785 = vmatprep.subr.bf16.mxu0 %v4017_v11  ;;  %v4130_v10 = vld [vmem:[%s5716_s1 + $0x200] sm:$0xff]   ;;  %v4062_v11 = vld [vmem:[%s5717_s0 + $0x1f0] ss:$40 sps:$4 sm:$0xff]  }
  0x42   :  { %1685 = vmatmul.mubr.bf16.gmra.mxu0 %v3973_v59  ;;  %1749 = vmatmul.mubr.bf16.gmra.mxu1 %v3974_v60  ;;  %v4046_v59 = vld [vmem:[%s5717_s0 + $0x150] ss:$40 sps:$4 sm:$0xff]   ;;  %v4051_v60 = vld [vmem:[%s5717_s0 + $0x19c] ss:$40 sps:$4 sm:$0xff]  }
  0x43   :  { %1692 = vmatprep.mubr.bf16.mxu0 %v3979_v62  ;;  %1756 = vmatprep.mubr.bf16.mxu1 %v3981_v1  ;;  %v4111_v62 = vld [vmem:[%s5716_s1 + $0x1c8] sm:$0xff]  }
  0x44   :  { %v4114_v1 = vld [vmem:[%s5716_s1 + $0x208] sm:$0xff]  }
  0x4a   :  { %1693 = vmatmul.mubr.bf16.gmra.mxu0 %v3983_v6  ;;  %1757 = vmatmul.mubr.bf16.gmra.mxu1 %v3984_v7  ;;  %v4127_v6 = vld [vmem:[%s5716_s1 + $0x1c0] sm:$0xff]  }
  0x4b   :  { %1700 = vmatprep.mubr.bf16.mxu0 %v3989_v8  ;;  %1764 = vmatprep.mubr.bf16.mxu1 %v3991_v9  ;;  %v4128_v7 = vld [vmem:[%s5716_s1 + $0x180] sm:$0xff]   ;;  %v4061_v8 = vld [vmem:[%s5717_s0 + $0x1e8] ss:$40 sps:$4 sm:$0xff]  }
  0x4c   :  { %v4129_v9 = vld [vmem:[%s5716_s1 + $0x240] sm:$0xff]  }
  0x52   :  { %1701 = vmatmul.mubr.bf16.gmra.mxu0 %v3993_v12  ;;  %1765 = vmatmul.mubr.bf16.gmra.mxu1 %v3994_v13  ;;  %v4067_v12 = vld [vmem:[%s5717_s0 + $0x23c] ss:$40 sps:$4 sm:$0xff]  }
  0x53   :  { %1708 = vmatprep.mubr.bf16.mxu0 %v3999_v14  ;;  %1772 = vmatprep.mubr.bf16.mxu1 %v4001_v15  ;;  %v4069_v13 = vld [vmem:[%s5717_s0 + $0x244] ss:$40 sps:$4 sm:$0xff]   ;;  %v4071_v14 = vld [vmem:[%s5717_s0 + $0x238] ss:$40 sps:$4 sm:$0xff]  }
  0x54   :  { %v4072_v15 = vld [vmem:[%s5717_s0 + $0x240] ss:$40 sps:$4 sm:$0xff]  }
  0x5a   :  { %1709 = vmatmul.mubr.bf16.gmra.mxu0 %v4003_v16  ;;  %1773 = vmatmul.mubr.bf16.gmra.mxu1 %v4004_v17  ;;  %v4073_v16 = vld [vmem:[%s5717_s0 + $0x28c] ss:$40 sps:$4 sm:$0xff]  }
  0x5b   :  { %1813 = vmatprep.mubr.bf16.mxu1 %v4011_v18  ;;  %1974 = vmatprep.mubr.bf16.mxu0 %v4014_v19  ;;  %v4075_v17 = vld [vmem:[%s5717_s0 + $0x294] ss:$40 sps:$4 sm:$0xff]   ;;  %v4077_v18 = vld [vmem:[%s5717_s0 + $0x288] ss:$40 sps:$4 sm:$0xff]  }
  0x5c   :  { %v4078_v19 = vld [vmem:[%s5717_s0 + $0x290] ss:$40 sps:$4 sm:$0xff]  }
  0x62   :  { %1814 = vmatmul.mubr.bf16.vlgmr.msra.gmra.mxu1 %v4009_v20  ;;  %1975 = vmatmul.mubr.bf16.vlgmr.msra.gmra.mxu0 %v4012_v21  ;;  %v4083_v20 = vld [vmem:[%s5717_s0 + $0x2dc] ss:$40 sps:$4 sm:$0xff]  }
  0x63   :  { %3674 = vmatpush3.bf16.msra.mxu1 %v4016_v22  ;;  %3786 = vmatpush3.bf16.msra.mxu0 %v4018_v23  ;;  %v4085_v21 = vld [vmem:[%s5717_s0 + $0x2e4] ss:$40 sps:$4 sm:$0xff]   ;;  %v4087_v22 = vld [vmem:[%s5717_s0 + $0x2d8] ss:$40 sps:$4 sm:$0xff]  }
  0x64   :  { %1821 = vmatprep.mubr.bf16.mxu1 %v4019_v24  ;;  %1982 = vmatprep.mubr.bf16.mxu0 %v4021_v25  ;;  %v4088_v23 = vld [vmem:[%s5717_s0 + $0x2e0] ss:$40 sps:$4 sm:$0xff]   ;;  %v4089_v24 = vld [vmem:[%s5717_s0 + $0x32c] ss:$40 sps:$4 sm:$0xff]  }
  0x65   :  { %3675 = vmatprep.subr.bf16.mxu1 %v4031_v26  ;;  %3787 = vmatprep.subr.bf16.mxu0 %v4033_v27  ;;  %v4091_v25 = vld [vmem:[%s5717_s0 + $0x334] ss:$40 sps:$4 sm:$0xff]   ;;  %v4093_v26 = vld [vmem:[%s5717_s0 + $0x328] ss:$40 sps:$4 sm:$0xff]  }
  0x66   :  { %v4094_v27 = vld [vmem:[%s5717_s0 + $0x330] ss:$40 sps:$4 sm:$0xff]  }
  0x67   :  { %3676 = vmatpush3.bf16.msra.mxu1 %v4032_v28  ;;  %3788 = vmatpush3.bf16.msra.mxu0 %v4034_v29  ;;  %v4099_v28 = vld [vmem:[%s5717_s0 + $0x37c] ss:$40 sps:$4 sm:$0xff]  }
  0x68   :  { %3677 = vmatprep.subr.bf16.mxu1 %v4047_v30  ;;  %3789 = vmatprep.subr.bf16.mxu0 %v4049_v33  ;;  %v4101_v29 = vld [vmem:[%s5717_s0 + $0x384] ss:$40 sps:$4 sm:$0xff]   ;;  %v4103_v30 = vld [vmem:[%s5717_s0 + $0x378] ss:$40 sps:$4 sm:$0xff]   ;;  %v4107_v33 = vld [vmem:[%s5717_s0 + $0x3d4] ss:$40 sps:$4 sm:$0xff]  }
  0x6a   :  { %1822 = vmatmul.mubr.bf16.gmra.mxu1 %v4023_v31  ;;  %1983 = vmatmul.mubr.bf16.gmra.mxu0 %v4024_v32  ;;  %v4104_v31 = vld [vmem:[%s5717_s0 + $0x380] ss:$40 sps:$4 sm:$0xff]   ;;  %v4105_v32 = vld [vmem:[%s5717_s0 + $0x3cc] ss:$40 sps:$4 sm:$0xff]  }
  0x6b   :  { %1829 = vmatprep.mubr.bf16.mxu1 %v4025_v34  ;;  %1990 = vmatprep.mubr.bf16.mxu0 %v4027_v35  ;;  %v4109_v34 = vld [vmem:[%s5717_s0 + $0x3c8] ss:$40 sps:$4 sm:$0xff]  }
  0x6c   :  { %3678 = vmatpush3.bf16.msra.mxu1 %v4048_v36  ;;  %3790 = vmatpush3.bf16.msra.mxu0 %v4050_v37  ;;  %v4110_v35 = vld [vmem:[%s5717_s0 + $0x3d0] ss:$40 sps:$4 sm:$0xff]   ;;  %v4115_v36 = vld [vmem:[%s5717_s0 + $0x41c] ss:$40 sps:$4 sm:$0xff]  }
  0x6d   :  { %3679 = vmatprep.subr.bf16.mxu1 %v4063_v38  ;;  %3791 = vmatprep.subr.bf16.mxu0 %v4065_v39  ;;  %v4117_v37 = vld [vmem:[%s5717_s0 + $0x424] ss:$40 sps:$4 sm:$0xff]   ;;  %v4119_v38 = vld [vmem:[%s5717_s0 + $0x418] ss:$40 sps:$4 sm:$0xff]  }
  0x6e   :  { %v4120_v39 = vld [vmem:[%s5717_s0 + $0x420] ss:$40 sps:$4 sm:$0xff]  }
  0x70   :  { %3680 = vmatpush3.bf16.msra.mxu1 %v4064_v42  ;;  %3792 = vmatpush3.bf16.msra.mxu0 %v4066_v43  ;;  %v4125_v42 = vld [vmem:[%s5717_s0 + $0x468] ss:$40 sps:$4 sm:$0xff]  }
  0x71   :  { %3681 = vmatprep.subr.bf16.mxu1 %v4079_v46  ;;  %3793 = vmatprep.subr.bf16.mxu0 %v4081_v48  ;;  %v4126_v43 = vld [vmem:[%s5717_s0 + $0x470] ss:$40 sps:$4 sm:$0xff]   ;;  %v4139_v48 = vld [vmem:[%s5717_s0 + $0x1c] ss:$40 sps:$4 sm:$0xff]  }
  0x72   :  { %1830 = vmatmul.mubr.bf16.gmra.mxu1 %v4029_v40  ;;  %1991 = vmatmul.mubr.bf16.gmra.mxu0 %v4030_v41  ;;  %v4121_v40 = vld [vmem:[%s5717_s0 + $0x46c] ss:$40 sps:$4 sm:$0xff]   ;;  %v4135_v46 = vld [vmem:[%s5717_s0 + $0x4b8] ss:$40 sps:$4 sm:$0xff]  }
  0x73   :  { %1837 = vmatprep.mubr.bf16.mxu1 %v4035_v44  ;;  %1998 = vmatprep.mubr.bf16.mxu0 %v4037_v45  ;;  %v4123_v41 = vld [vmem:[%s5717_s0 + $0x474] ss:$40 sps:$4 sm:$0xff]   ;;  %v4133_v45 = vld [vmem:[%s5717_s0 + $0x4c4] ss:$40 sps:$4 sm:$0xff]  }
  0x74   :  { %3682 = vmatpush3.bf16.msra.mxu1 %v4080_v47  ;;  %3794 = vmatpush3.bf16.msra.mxu0 %v4082_v49  ;;  %v4131_v44 = vld [vmem:[%s5717_s0 + $0x4bc] ss:$40 sps:$4 sm:$0xff]   ;;  %v4136_v47 = vld [vmem:[%s5717_s0 + $0x4c0] ss:$40 sps:$4 sm:$0xff]  }
  0x75   :  { %3683 = vmatprep.subr.bf16.mxu1 %v4095_v54  ;;  %3795 = vmatprep.subr.bf16.mxu0 %v4097_v56  ;;  %v4142_v49 = vld [vmem:[%s5717_s0 + $0x24] ss:$40 sps:$4 sm:$0xff]  }
  0x78   :  { %3684 = vmatpush3.bf16.msra.mxu1 %v4096_v55  ;;  %3796 = vmatpush3.bf16.msra.mxu0 %v4098_v57 }
  0x79   :  { %3685 = vmatprep.subr.bf16.mxu1 %v4111_v62  ;;  %3797 = vmatprep.subr.bf16.mxu0 %v4113_v0  ;;  %v4147_v62 = vld [vmem:[%s5717_s0 + $0x68] ss:$40 sps:$4 sm:$0xff]   ;;  %v4149_v0 = vld [vmem:[%s5717_s0 + $0xbc] ss:$40 sps:$4 sm:$0xff]  }
  0x7a   :  { %1838 = vmatmul.mubr.bf16.gmra.mxu1 %v4039_v50  ;;  %1999 = vmatmul.mubr.bf16.gmra.mxu0 %v4040_v51  ;;  %v4137_v50 = vld [vmem:[%s5717_s0 + $0x18] ss:$40 sps:$4 sm:$0xff]  }
  0x7b   :  { %1845 = vmatprep.mubr.bf16.mxu1 %v4041_v52  ;;  %2006 = vmatprep.mubr.bf16.mxu0 %v4043_v53  ;;  %v4140_v51 = vld [vmem:[%s5717_s0 + $0x20] ss:$40 sps:$4 sm:$0xff]   ;;  %v4143_v52 = vld [vmem:[%s5717_s0 + $0x6c] ss:$40 sps:$4 sm:$0xff]  }
  0x7c   :  { %3686 = vmatpush3.bf16.msra.mxu1 %v4112_v63  ;;  %3798 = vmatpush3.bf16.msra.mxu0 %v4114_v1  ;;  %v4145_v53 = vld [vmem:[%s5717_s0 + $0x74] ss:$40 sps:$4 sm:$0xff]   ;;  %v4148_v63 = vld [vmem:[%s5717_s0 + $0x70] ss:$40 sps:$4 sm:$0xff]   ;;  %v4151_v1 = vld [vmem:[%s5717_s0 + $0xc4] ss:$40 sps:$4 sm:$0xff]  }
  0x7d   :  { %3687 = vmatprep.subr.bf16.mxu1 %v4127_v6  ;;  %3799 = vmatprep.subr.bf16.mxu0 %v4129_v9 }
  0x80   :  { %3688 = vmatpush3.bf16.msra.mxu1 %v4128_v7  ;;  %3800 = vmatpush3.bf16.msra.mxu0 %v4130_v10 }
  0x82   :  { %1846 = vmatmul.mubr.bf16.gmra.mxu1 %v4045_v58  ;;  %2007 = vmatmul.mubr.bf16.gmra.mxu0 %v4046_v59 }
  0x83   :  { %1853 = vmatprep.mubr.bf16.mxu1 %v4051_v60  ;;  %2014 = vmatprep.mubr.bf16.mxu0 %v4053_v61 }
  0x8a   :  { %1854 = vmatmul.mubr.bf16.gmra.mxu1 %v4055_v2  ;;  %2015 = vmatmul.mubr.bf16.gmra.mxu0 %v4056_v3 }
  0x8b   :  { %1861 = vmatprep.mubr.bf16.mxu1 %v4057_v4  ;;  %2022 = vmatprep.mubr.bf16.mxu0 %v4059_v5 }
  0x92   :  { %1862 = vmatmul.mubr.bf16.gmra.mxu1 %v4061_v8  ;;  %2023 = vmatmul.mubr.bf16.gmra.mxu0 %v4062_v11 }
  0x93   :  { %1869 = vmatprep.mubr.bf16.mxu1 %v4067_v12  ;;  %2030 = vmatprep.mubr.bf16.mxu0 %v4069_v13 }
  0x9a   :  { %1870 = vmatmul.mubr.bf16.gmra.mxu1 %v4071_v14  ;;  %2031 = vmatmul.mubr.bf16.gmra.mxu0 %v4072_v15  ;;  %v4153_v14 = vld [vmem:[%s5717_s0 + $0xb8] ss:$40 sps:$4 sm:$0xff]  }
  0x9b   :  { %1877 = vmatprep.mubr.bf16.mxu1 %v4073_v16  ;;  %2038 = vmatprep.mubr.bf16.mxu0 %v4075_v17  ;;  %v4154_v15 = vld [vmem:[%s5717_s0 + $0xc0] ss:$40 sps:$4 sm:$0xff]   ;;  %v4155_v16 = vld [vmem:[%s5717_s0 + $0x10c] ss:$40 sps:$4 sm:$0xff]  }
  0x9c   :  { %v4157_v17 = vld [vmem:[%s5717_s0 + $0x114] ss:$40 sps:$4 sm:$0xff]  }
  0xa2   :  { %1878 = vmatmul.mubr.bf16.gmra.mxu1 %v4077_v18  ;;  %2039 = vmatmul.mubr.bf16.gmra.mxu0 %v4078_v19 }
  0xa3   :  { %1885 = vmatprep.mubr.bf16.mxu1 %v4083_v20  ;;  %2046 = vmatprep.mubr.bf16.mxu0 %v4085_v21 }
  0xaa   :  { %1886 = vmatmul.mubr.bf16.gmra.mxu1 %v4087_v22  ;;  %2047 = vmatmul.mubr.bf16.gmra.mxu0 %v4088_v23 }
  0xab   :  { %1893 = vmatprep.mubr.bf16.mxu1 %v4089_v24  ;;  %2054 = vmatprep.mubr.bf16.mxu0 %v4091_v25 }
  0xb2   :  { %1894 = vmatmul.mubr.bf16.gmra.mxu1 %v4093_v26  ;;  %2055 = vmatmul.mubr.bf16.gmra.mxu0 %v4094_v27 }
  0xb3   :  { %1901 = vmatprep.mubr.bf16.mxu1 %v4099_v28  ;;  %2062 = vmatprep.mubr.bf16.mxu0 %v4101_v29 }
  0xba   :  { %1902 = vmatmul.mubr.bf16.gmra.mxu1 %v4103_v30  ;;  %2063 = vmatmul.mubr.bf16.gmra.mxu0 %v4104_v31  ;;  %v4159_v30 = vld [vmem:[%s5717_s0 + $0x108] ss:$40 sps:$4 sm:$0xff]  }
  0xbb   :  { %1909 = vmatprep.mubr.bf16.mxu1 %v4105_v32  ;;  %2070 = vmatprep.mubr.bf16.mxu0 %v4107_v33  ;;  %v4160_v31 = vld [vmem:[%s5717_s0 + $0x110] ss:$40 sps:$4 sm:$0xff]   ;;  %v4163_v32 = vld [vmem:[%s5717_s0 + $0x15c] ss:$40 sps:$4 sm:$0xff]  }
  0xbc   :  { %v4166_v33 = vld [vmem:[%s5717_s0 + $0x164] ss:$40 sps:$4 sm:$0xff]  }
  0xc2   :  { %1910 = vmatmul.mubr.bf16.gmra.mxu1 %v4109_v34  ;;  %2071 = vmatmul.mubr.bf16.gmra.mxu0 %v4110_v35 }
  0xc3   :  { %1917 = vmatprep.mubr.bf16.mxu1 %v4115_v36  ;;  %2078 = vmatprep.mubr.bf16.mxu0 %v4117_v37 }
  0xca   :  { %1918 = vmatmul.mubr.bf16.gmra.mxu1 %v4119_v38  ;;  %2079 = vmatmul.mubr.bf16.gmra.mxu0 %v4120_v39 }
  0xcb   :  { %1925 = vmatprep.mubr.bf16.mxu1 %v4121_v40  ;;  %2086 = vmatprep.mubr.bf16.mxu0 %v4123_v41 }
  0xd2   :  { %1926 = vmatmul.mubr.bf16.gmra.mxu1 %v4125_v42  ;;  %2087 = vmatmul.mubr.bf16.gmra.mxu0 %v4126_v43 }
  0xd3   :  { %1933 = vmatprep.mubr.bf16.mxu1 %v4131_v44  ;;  %2094 = vmatprep.mubr.bf16.mxu0 %v4133_v45 }
  0xda   :  { %1934 = vmatmul.mubr.bf16.gmra.mxu1 %v4135_v46  ;;  %2095 = vmatmul.mubr.bf16.gmra.mxu0 %v4136_v47  ;;  %v4161_v46 = vld [vmem:[%s5717_s0 + $0x158] ss:$40 sps:$4 sm:$0xff]  }
  0xdb   :  { %2135 = vmatprep.mubr.bf16.mxu1 %v4139_v48  ;;  %2296 = vmatprep.mubr.bf16.mxu0 %v4142_v49  ;;  %v4164_v47 = vld [vmem:[%s5717_s0 + $0x160] ss:$40 sps:$4 sm:$0xff]   ;;  %v4169_v48 = vld [vmem:[%s5717_s0 + $0x1ac] ss:$40 sps:$4 sm:$0xff]  }
  0xdc   :  { %v4172_v49 = vld [vmem:[%s5717_s0 + $0x1b4] ss:$40 sps:$4 sm:$0xff]  }
  0xe2   :  { %v3353_v54 = vpop.f32.mrf.mxu0  ;;  %v3401_v55 = vpop.f32.mrf.mxu1  ;;  %2136 = vmatmul.mubr.bf16.vlgmr.msra.gmra.mxu1 %v4137_v50  ;;  %2297 = vmatmul.mubr.bf16.vlgmr.msra.gmra.mxu0 %v4140_v51 }
  0xe3   :  { %2143 = vmatprep.mubr.bf16.mxu1 %v4143_v52  ;;  %2304 = vmatprep.mubr.bf16.mxu0 %v4145_v53 }
  0xe4   :  { %v3354_v56 = vpop.f32.mrf.mxu0  ;;  %v3402_v57 = vpop.f32.mrf.mxu1 }
  0xe5   :  { %v4801_v58 = vadd.f32 %v3354_v56, %v3353_v54  ;;  %v4803_v59 = vadd.f32 %v3402_v57, %v3401_v55 }
  0xe6   :  { %v3356_v60 = vpop.f32.mrf.mxu0  ;;  %v3404_v61 = vpop.f32.mrf.mxu1 }
  0xe8   :  { %v3357_v2 = vpop.f32.mrf.mxu0  ;;  %v3405_v3 = vpop.f32.mrf.mxu1 }
  0xe9   :  { %v4817_v4 = vadd.f32 %v3357_v2, %v3356_v60  ;;  %v4819_v5 = vadd.f32 %v3405_v3, %v3404_v61  ;;  %v4175_v2 = vld [vmem:[%s5717_s0 + $0x1fc] ss:$40 sps:$4 sm:$0xff]  }
  0xea   :  { %v3359_v6 = vpop.f32.mrf.mxu0  ;;  %v3407_v7 = vpop.f32.mrf.mxu1  ;;  %2144 = vmatmul.mubr.bf16.gmra.mxu1 %v4147_v62  ;;  %2305 = vmatmul.mubr.bf16.gmra.mxu0 %v4148_v63  ;;  %v4178_v3 = vld [vmem:[%s5717_s0 + $0x204] ss:$40 sps:$4 sm:$0xff]  }
  0xeb   :  { %2151 = vmatprep.mubr.bf16.mxu1 %v4149_v0  ;;  %2312 = vmatprep.mubr.bf16.mxu0 %v4151_v1  ;;  %v4167_v0 = vld [vmem:[%s5717_s0 + $0x1a8] ss:$40 sps:$4 sm:$0xff]  }
  0xec   :  { %v3360_v8 = vpop.f32.mrf.mxu0  ;;  %v3408_v9 = vpop.f32.mrf.mxu1  ;;  %v4170_v1 = vld [vmem:[%s5717_s0 + $0x1b0] ss:$40 sps:$4 sm:$0xff]  }
  0xed   :  { %v4821_v10 = vadd.f32 %v3360_v8, %v3359_v6  ;;  %v4823_v11 = vadd.f32 %v3408_v9, %v3407_v7 }
  0xee   :  { %v3362_v12 = vpop.f32.mrf.mxu0  ;;  %v3410_v13 = vpop.f32.mrf.mxu1 }
  0xf0   :  { %v3363_v18 = vpop.f32.mrf.mxu0  ;;  %v3411_v19 = vpop.f32.mrf.mxu1 }
  0xf1   :  { %v4837_v20 = vadd.f32 %v3363_v18, %v3362_v12  ;;  %v4839_v21 = vadd.f32 %v3411_v19, %v3410_v13 }
  0xf2   :  { %v3365_v22 = vpop.f32.mrf.mxu0  ;;  %v3413_v23 = vpop.f32.mrf.mxu1  ;;  %2152 = vmatmul.mubr.bf16.gmra.mxu1 %v4153_v14  ;;  %2313 = vmatmul.mubr.bf16.gmra.mxu0 %v4154_v15 }
  0xf3   :  { %2159 = vmatprep.mubr.bf16.mxu1 %v4155_v16  ;;  %2320 = vmatprep.mubr.bf16.mxu0 %v4157_v17 }
  0xf4   :  { %v3366_v24 = vpop.f32.mrf.mxu0  ;;  %v3414_v25 = vpop.f32.mrf.mxu1 }
  0xf5   :  { %v4841_v26 = vadd.f32 %v3366_v24, %v3365_v22  ;;  %v4843_v27 = vadd.f32 %v3414_v25, %v3413_v23  ;;  %v4173_v22 = vld [vmem:[%s5717_s0 + $0x1f8] ss:$40 sps:$4 sm:$0xff]   ;;  %v4181_v24 = vld [vmem:[%s5717_s0 + $0x24c] ss:$40 sps:$4 sm:$0xff]  }
  0xf6   :  { %v3368_v28 = vpop.f32.mrf.mxu0  ;;  %v3416_v29 = vpop.f32.mrf.mxu1  ;;  %v4176_v23 = vld [vmem:[%s5717_s0 + $0x200] ss:$40 sps:$4 sm:$0xff]   ;;  %v4184_v25 = vld [vmem:[%s5717_s0 + $0x254] ss:$40 sps:$4 sm:$0xff]  }
  0xf8   :  { %v3369_v34 = vpop.f32.mrf.mxu0  ;;  %v3417_v35 = vpop.f32.mrf.mxu1 }
  0xf9   :  { %v4857_v36 = vadd.f32 %v3369_v34, %v3368_v28  ;;  %v4859_v37 = vadd.f32 %v3417_v35, %v3416_v29 }
  0xfa   :  { %v3371_v38 = vpop.f32.mrf.mxu0  ;;  %v3419_v39 = vpop.f32.mrf.mxu1  ;;  %2160 = vmatmul.mubr.bf16.gmra.mxu1 %v4159_v30  ;;  %2321 = vmatmul.mubr.bf16.gmra.mxu0 %v4160_v31 }
  0xfb   :  { %2167 = vmatprep.mubr.bf16.mxu1 %v4163_v32  ;;  %2328 = vmatprep.mubr.bf16.mxu0 %v4166_v33 }
  0xfc   :  { %v3372_v40 = vpop.f32.mrf.mxu0  ;;  %v3420_v41 = vpop.f32.mrf.mxu1 }
  0xfd   :  { %v4861_v42 = vadd.f32 %v3372_v40, %v3371_v38  ;;  %v4863_v43 = vadd.f32 %v3420_v41, %v3419_v39 }
  0xfe   :  { %v3374_v44 = vpop.f32.mrf.mxu0  ;;  %v3422_v45 = vpop.f32.mrf.mxu1 }
 0x100   :  { %v3375_v50 = vpop.f32.mrf.mxu0  ;;  %v3423_v51 = vpop.f32.mrf.mxu1 }
 0x101   :  { %v4877_v52 = vadd.f32 %v3375_v50, %v3374_v44  ;;  %v4879_v53 = vadd.f32 %v3423_v51, %v3422_v45  ;;  %v4179_v44 = vld [vmem:[%s5717_s0 + $0x248] ss:$40 sps:$4 sm:$0xff]  }
 0x102   :  { %v3377_v54 = vpop.f32.mrf.mxu0  ;;  %v3425_v55 = vpop.f32.mrf.mxu1  ;;  %2168 = vmatmul.mubr.bf16.gmra.mxu1 %v4161_v46  ;;  %2329 = vmatmul.mubr.bf16.gmra.mxu0 %v4164_v47  ;;  %v4182_v45 = vld [vmem:[%s5717_s0 + $0x250] ss:$40 sps:$4 sm:$0xff]   ;;  %v4187_v46 = vld [vmem:[%s5717_s0 + $0x29c] ss:$40 sps:$4 sm:$0xff]  }
 0x103   :  { %2175 = vmatprep.mubr.bf16.mxu1 %v4169_v48  ;;  %2336 = vmatprep.mubr.bf16.mxu0 %v4172_v49  ;;  %v4190_v47 = vld [vmem:[%s5717_s0 + $0x2a4] ss:$40 sps:$4 sm:$0xff]  }
 0x104   :  { %v3378_v56 = vpop.f32.mrf.mxu0  ;;  %v3426_v57 = vpop.f32.mrf.mxu1 }
 0x105   :  { %v4881_v60 = vadd.f32 %v3378_v56, %v3377_v54  ;;  %v4883_v61 = vadd.f32 %v3426_v57, %v3425_v55 }
 0x106   :  { %v3380_v62 = vpop.f32.mrf.mxu0  ;;  %v3428_v63 = vpop.f32.mrf.mxu1 }
 0x108   :  { %v3381_v6 = vpop.f32.mrf.mxu0  ;;  %v3429_v7 = vpop.f32.mrf.mxu1 }
 0x109   :  { %v4897_v8 = vadd.f32 %v3381_v6, %v3380_v62  ;;  %v4899_v9 = vadd.f32 %v3429_v7, %v3428_v63  ;;  %v4193_v6 = vld [vmem:[%s5717_s0 + $0x2ec] ss:$40 sps:$4 sm:$0xff]  }
 0x10a   :  { %v3383_v12 = vpop.f32.mrf.mxu0  ;;  %v3431_v13 = vpop.f32.mrf.mxu1  ;;  %2176 = vmatmul.mubr.bf16.gmra.mxu1 %v4167_v0  ;;  %2337 = vmatmul.mubr.bf16.gmra.mxu0 %v4170_v1  ;;  %v4196_v7 = vld [vmem:[%s5717_s0 + $0x2f4] ss:$40 sps:$4 sm:$0xff]  }
 0x10b   :  { %2183 = vmatprep.mubr.bf16.mxu1 %v4175_v2  ;;  %2344 = vmatprep.mubr.bf16.mxu0 %v4178_v3  ;;  %v4185_v2 = vld [vmem:[%s5717_s0 + $0x298] ss:$40 sps:$4 sm:$0xff]  }
 0x10c   :  { %v3384_v14 = vpop.f32.mrf.mxu0  ;;  %v3432_v15 = vpop.f32.mrf.mxu1  ;;  %v4188_v3 = vld [vmem:[%s5717_s0 + $0x2a0] ss:$40 sps:$4 sm:$0xff]  }
 0x10d   :  { %v4901_v16 = vadd.f32 %v3384_v14, %v3383_v12  ;;  %v4903_v17 = vadd.f32 %v3432_v15, %v3431_v13 }
 0x10e   :  { %v3386_v18 = vpop.f32.mrf.mxu0  ;;  %v3434_v19 = vpop.f32.mrf.mxu1 }
 0x110   :  { %v3387_v28 = vpop.f32.mrf.mxu0  ;;  %v3435_v29 = vpop.f32.mrf.mxu1 }
 0x111   :  { %v4917_v30 = vadd.f32 %v3387_v28, %v3386_v18  ;;  %v4919_v31 = vadd.f32 %v3435_v29, %v3434_v19  ;;  %v4964_v18 = vld [vmem:[%s5718_s2] ss:$0 sm:$0xff] }
 0x112   :  { %v3389_v32 = vpop.f32.mrf.mxu0  ;;  %v3437_v33 = vpop.f32.mrf.mxu1  ;;  %2184 = vmatmul.mubr.bf16.gmra.mxu1 %v4173_v22  ;;  %2345 = vmatmul.mubr.bf16.gmra.mxu0 %v4176_v23 }
 0x113   :  { %2191 = vmatprep.mubr.bf16.mxu1 %v4181_v24  ;;  %2352 = vmatprep.mubr.bf16.mxu0 %v4184_v25  ;;  %v1655_v25 = vadd.f32 %v4801_v58, %v4964_v18  ;;  %v4202_v58 = vld [vmem:[%s5717_s0 + $0x344] ss:$40 sps:$4 sm:$0xff]  }
 0x114   :  { %v3390_v34 = vpop.f32.mrf.mxu0  ;;  %v3438_v35 = vpop.f32.mrf.mxu1 }
 0x115   :  { %v4921_v38 = vadd.f32 %v3390_v34, %v3389_v32  ;;  %v4923_v39 = vadd.f32 %v3438_v35, %v3437_v33  ;;  %v4191_v34 = vld [vmem:[%s5717_s0 + $0x2e8] ss:$40 sps:$4 sm:$0xff]  }
 0x116   :  { %v3392_v40 = vpop.f32.mrf.mxu0  ;;  %v3440_v41 = vpop.f32.mrf.mxu1  ;;  %v4194_v35 = vld [vmem:[%s5717_s0 + $0x2f0] ss:$40 sps:$4 sm:$0xff]  }
 0x118   :  { %v3393_v48 = vpop.f32.mrf.mxu0  ;;  %v3441_v49 = vpop.f32.mrf.mxu1 }
 0x119   :  { %v4937_v50 = vadd.f32 %v3393_v48, %v3392_v40  ;;  %v4939_v51 = vadd.f32 %v3441_v49, %v3440_v41  ;;  %v4199_v41 = vld [vmem:[%s5717_s0 + $0x33c] ss:$40 sps:$4 sm:$0xff]  }
 0x11a   :  { %v3395_v54 = vpop.f32.mrf.mxu0  ;;  %v3443_v55 = vpop.f32.mrf.mxu1  ;;  %2192 = vmatmul.mubr.bf16.gmra.mxu1 %v4179_v44  ;;  %2353 = vmatmul.mubr.bf16.gmra.mxu0 %v4182_v45 }
 0x11b   :  { %2199 = vmatprep.mubr.bf16.mxu1 %v4187_v46  ;;  %2360 = vmatprep.mubr.bf16.mxu0 %v4190_v47  ;;  %v1658_v46 = vadd.f32 %v4817_v4, %v4964_v18 }
 0x11c   :  { %v3396_v56 = vpop.f32.mrf.mxu0  ;;  %v3444_v57 = vpop.f32.mrf.mxu1 }
 0x11d   :  { %v4941_v62 = vadd.f32 %v3396_v56, %v3395_v54  ;;  %v4943_v63 = vadd.f32 %v3444_v57, %v3443_v55 }
 0x11e   :  { %v3398_v0 = vpop.f32.mrf.mxu0  ;;  %v3446_v1 = vpop.f32.mrf.mxu1 }
 0x120   :  { %v3399_v12 = vpop.f32.mrf.mxu0  ;;  %v3447_v13 = vpop.f32.mrf.mxu1 }
 0x121   :  { %v4957_v14 = vadd.f32 %v3399_v12, %v3398_v0  ;;  %v4959_v15 = vadd.f32 %v3447_v13, %v3446_v1  ;;  %v1663_v1 = vadd.f32 %v4821_v10, %v4964_v18  ;;  %v4197_v12 = vld [vmem:[%s5717_s0 + $0x338] ss:$40 sps:$4 sm:$0xff]   ;;  %v4208_v10 = vld [vmem:[%s5717_s0 + $0x394] ss:$40 sps:$4 sm:$0xff]  }
 0x122   :  { %v3465_v19 = vpop.f32.mrf.mxu1  ;;  %v3577_v22 = vpop.f32.mrf.mxu0  ;;  %2200 = vmatmul.mubr.bf16.gmra.mxu1 %v4185_v2  ;;  %2361 = vmatmul.mubr.bf16.gmra.mxu0 %v4188_v3  ;;  %v4200_v13 = vld [vmem:[%s5717_s0 + $0x340] ss:$40 sps:$4 sm:$0xff]  }
 0x123   :  { %2207 = vmatprep.mubr.bf16.mxu1 %v4193_v6  ;;  %2368 = vmatprep.mubr.bf16.mxu0 %v4196_v7 }
 0x124   :  { %v3466_v23 = vpop.f32.mrf.mxu1  ;;  %v3578_v24 = vpop.f32.mrf.mxu0 }
 0x125   :  { %v3467_v28 = vadd.f32 %v3466_v23, %v3465_v19  ;;  %v3579_v29 = vadd.f32 %v3578_v24, %v3577_v22  ;;  %v4205_v22 = vld [vmem:[%s5717_s0 + $0x38c] ss:$40 sps:$4 sm:$0xff]  }
 0x126   :  { %v3468_v32 = vpop.f32.mrf.mxu1  ;;  %v3580_v33 = vpop.f32.mrf.mxu0 }
 0x127   :  { %v1816_v40 = vadd.f32 %v3467_v28, %v1655_v25  ;;  %v1666_v25 = vadd.f32 %v4837_v20, %v4964_v18 }
 0x128   :  { %v3469_v44 = vpop.f32.mrf.mxu1  ;;  %v3581_v45 = vpop.f32.mrf.mxu0 }
 0x129   :  { %v4982_v47 = vadd.f32 %v3579_v29, %v1816_v40  ;;  %v3470_v48 = vadd.f32 %v3469_v44, %v3468_v32  ;;  %v3582_v49 = vadd.f32 %v3581_v45, %v3580_v33 }
 0x12a   :  { %v3471_v54 = vpop.f32.mrf.mxu1  ;;  %v3583_v55 = vpop.f32.mrf.mxu0  ;;  %2208 = vmatmul.mubr.bf16.gmra.mxu1 %v4191_v34  ;;  %2369 = vmatmul.mubr.bf16.gmra.mxu0 %v4194_v35 }
 0x12b   :  { %v1819_v56 = vadd.f32 %v3470_v48, %v1658_v46  ;;  %2215 = vmatprep.mubr.bf16.mxu1 %v4199_v41  ;;  %2376 = vmatprep.mubr.bf16.mxu0 %v4202_v58  ;;  %v1671_v58 = vadd.f32 %v4841_v26, %v4964_v18  ;;  %v4214_v26 = vld [vmem:[%s5717_s0 + $0x3e4] ss:$40 sps:$4 sm:$0xff]  }
 0x12c   :  { %v3472_v57 = vpop.f32.mrf.mxu1  ;;  %v3584_v0 = vpop.f32.mrf.mxu0 }
 0x12d   :  { %v4986_v2 = vadd.f32 %v3582_v49, %v1819_v56  ;;  %v3473_v3 = vadd.f32 %v3472_v57, %v3471_v54  ;;  %v3585_v4 = vadd.f32 %v3584_v0, %v3583_v55  ;;  %v4203_v49 = vld [vmem:[%s5717_s0 + $0x388] ss:$40 sps:$4 sm:$0xff]   ;;  %v4211_v56 = vld [vmem:[%s5717_s0 + $0x3dc] ss:$40 sps:$4 sm:$0xff]  }
 0x12e   :  { %v3474_v6 = vpop.f32.mrf.mxu1  ;;  %v3586_v7 = vpop.f32.mrf.mxu0  ;;  %v4206_v54 = vld [vmem:[%s5717_s0 + $0x390] ss:$40 sps:$4 sm:$0xff]  }
 0x12f   :  { %v1824_v19 = vadd.f32 %v3473_v3, %v1663_v1  ;;  %v1674_v1 = vadd.f32 %v4857_v36, %v4964_v18 }
 0x130   :  { %v3475_v23 = vpop.f32.mrf.mxu1  ;;  %v3587_v24 = vpop.f32.mrf.mxu0 }
 0x131   :  { %v5002_v28 = vadd.f32 %v3585_v4, %v1824_v19  ;;  %v3476_v29 = vadd.f32 %v3475_v23, %v3474_v6  ;;  %v3588_v32 = vadd.f32 %v3587_v24, %v3586_v7 }
 0x132   :  { %v3477_v33 = vpop.f32.mrf.mxu1  ;;  %v3589_v34 = vpop.f32.mrf.mxu0  ;;  %2216 = vmatmul.mubr.bf16.gmra.mxu1 %v4197_v12  ;;  %2377 = vmatmul.mubr.bf16.gmra.mxu0 %v4200_v13 }
 0x133   :  { %v1827_v35 = vadd.f32 %v3476_v29, %v1666_v25  ;;  %2223 = vmatprep.mubr.bf16.mxu1 %v4205_v22  ;;  %2384 = vmatprep.mubr.bf16.mxu0 %v4208_v10  ;;  %v1679_v10 = vadd.f32 %v4861_v42, %v4964_v18  ;;  %v4220_v42 = vld [vmem:[%s5717_s0 + $0x434] ss:$40 sps:$4 sm:$0xff]  }
 0x134   :  { %v3478_v40 = vpop.f32.mrf.mxu1  ;;  %v3590_v41 = vpop.f32.mrf.mxu0 }
 0x135   :  { %v5006_v44 = vadd.f32 %v3588_v32, %v1827_v35  ;;  %v3479_v45 = vadd.f32 %v3478_v40, %v3477_v33  ;;  %v3591_v20 = vadd.f32 %v3590_v41, %v3589_v34  ;;  %v4209_v32 = vld [vmem:[%s5717_s0 + $0x3d8] ss:$40 sps:$4 sm:$0xff]   ;;  %v4217_v35 = vld [vmem:[%s5717_s0 + $0x42c] ss:$40 sps:$4 sm:$0xff]  }
 0x136   :  { %v3480_v46 = vpop.f32.mrf.mxu1  ;;  %v3592_v48 = vpop.f32.mrf.mxu0  ;;  %v4212_v33 = vld [vmem:[%s5717_s0 + $0x3e0] ss:$40 sps:$4 sm:$0xff]  }
 0x137   :  { %v1832_v55 = vadd.f32 %v3479_v45, %v1671_v58  ;;  %v1682_v58 = vadd.f32 %v4877_v52, %v4964_v18 }
 0x138   :  { %v3481_v57 = vpop.f32.mrf.mxu1  ;;  %v3593_v0 = vpop.f32.mrf.mxu0 }
 0x139   :  { %v5022_v3 = vadd.f32 %v3591_v20, %v1832_v55  ;;  %v3482_v4 = vadd.f32 %v3481_v57, %v3480_v46  ;;  %v3594_v6 = vadd.f32 %v3593_v0, %v3592_v48 }
 0x13a   :  { %v3483_v7 = vpop.f32.mrf.mxu1  ;;  %v3595_v12 = vpop.f32.mrf.mxu0  ;;  %2224 = vmatmul.mubr.bf16.gmra.mxu1 %v4203_v49  ;;  %2385 = vmatmul.mubr.bf16.gmra.mxu0 %v4206_v54 }
 0x13b   :  { %v1835_v13 = vadd.f32 %v3482_v4, %v1674_v1  ;;  %2231 = vmatprep.mubr.bf16.mxu1 %v4211_v56  ;;  %2392 = vmatprep.mubr.bf16.mxu0 %v4214_v26  ;;  %v1687_v26 = vadd.f32 %v4881_v60, %v4964_v18  ;;  %v4226_v60 = vld [vmem:[%s5717_s0 + $0x484] ss:$40 sps:$4 sm:$0xff]  }
 0x13c   :  { %v3484_v19 = vpop.f32.mrf.mxu1  ;;  %v3596_v22 = vpop.f32.mrf.mxu0 }
 0x13d   :  { %v5026_v23 = vadd.f32 %v3594_v6, %v1835_v13  ;;  %v3485_v24 = vadd.f32 %v3484_v19, %v3483_v7  ;;  %v3597_v36 = vadd.f32 %v3596_v22, %v3595_v12  ;;  %v4215_v6 = vld [vmem:[%s5717_s0 + $0x428] ss:$40 sps:$4 sm:$0xff]   ;;  %v4223_v13 = vld [vmem:[%s5717_s0 + $0x47c] ss:$40 sps:$4 sm:$0xff]  }
 0x13e   :  { %v3486_v25 = vpop.f32.mrf.mxu1  ;;  %v3598_v29 = vpop.f32.mrf.mxu0  ;;  %v4218_v7 = vld [vmem:[%s5717_s0 + $0x430] ss:$40 sps:$4 sm:$0xff]  }
 0x13f   :  { %v1840_v34 = vadd.f32 %v3485_v24, %v1679_v10  ;;  %v1690_v10 = vadd.f32 %v4897_v8, %v4964_v18 }
 0x140   :  { %v3487_v40 = vpop.f32.mrf.mxu1  ;;  %v3599_v41 = vpop.f32.mrf.mxu0 }
 0x141   :  { %v5042_v45 = vadd.f32 %v3597_v36, %v1840_v34  ;;  %v3488_v20 = vadd.f32 %v3487_v40, %v3486_v25  ;;  %v3600_v46 = vadd.f32 %v3599_v41, %v3598_v29 }
 0x142   :  { %v3489_v48 = vpop.f32.mrf.mxu1  ;;  %v3601_v49 = vpop.f32.mrf.mxu0  ;;  %2232 = vmatmul.mubr.bf16.gmra.mxu1 %v4209_v32  ;;  %2393 = vmatmul.mubr.bf16.gmra.mxu0 %v4212_v33 }
 0x143   :  { %v1843_v54 = vadd.f32 %v3488_v20, %v1682_v58  ;;  %2239 = vmatprep.mubr.bf16.mxu1 %v4217_v35  ;;  %2400 = vmatprep.mubr.bf16.mxu0 %v4220_v42  ;;  %v1695_v42 = vadd.f32 %v4901_v16, %v4964_v18  ;;  %v4232_v16 = vld [vmem:[%s5717_s0 + $0x4d4] ss:$40 sps:$4 sm:$0xff]  }
 0x144   :  { %v3490_v55 = vpop.f32.mrf.mxu1  ;;  %v3602_v56 = vpop.f32.mrf.mxu0 }
 0x145   :  { %v5046_v57 = vadd.f32 %v3600_v46, %v1843_v54  ;;  %v3491_v0 = vadd.f32 %v3490_v55, %v3489_v48  ;;  %v3603_v52 = vadd.f32 %v3602_v56, %v3601_v49  ;;  %v4221_v46 = vld [vmem:[%s5717_s0 + $0x478] ss:$40 sps:$4 sm:$0xff]   ;;  %v4229_v54 = vld [vmem:[%s5717_s0 + $0x4cc] ss:$40 sps:$4 sm:$0xff]  }
 0x146   :  { %v3492_v1 = vpop.f32.mrf.mxu1  ;;  %v3604_v4 = vpop.f32.mrf.mxu0  ;;  %v4224_v48 = vld [vmem:[%s5717_s0 + $0x480] ss:$40 sps:$4 sm:$0xff]  }
 0x147   :  { %v1848_v12 = vadd.f32 %v3491_v0, %v1687_v26  ;;  %v1698_v26 = vadd.f32 %v4917_v30, %v4964_v18 }
 0x148   :  { %v3493_v19 = vpop.f32.mrf.mxu1  ;;  %v3605_v22 = vpop.f32.mrf.mxu0 }
 0x149   :  { %v5062_v24 = vadd.f32 %v3603_v52, %v1848_v12  ;;  %v3494_v36 = vadd.f32 %v3493_v19, %v3492_v1  ;;  %v3606_v25 = vadd.f32 %v3605_v22, %v3604_v4 }
 0x14a   :  { %v3495_v29 = vpop.f32.mrf.mxu1  ;;  %v3607_v32 = vpop.f32.mrf.mxu0  ;;  %2240 = vmatmul.mubr.bf16.gmra.mxu1 %v4215_v6  ;;  %2401 = vmatmul.mubr.bf16.gmra.mxu0 %v4218_v7 }
 0x14b   :  { %v1851_v33 = vadd.f32 %v3494_v36, %v1690_v10  ;;  %2247 = vmatprep.mubr.bf16.mxu1 %v4223_v13  ;;  %2408 = vmatprep.mubr.bf16.mxu0 %v4226_v60  ;;  %v1703_v60 = vadd.f32 %v4921_v38, %v4964_v18  ;;  %v1706_v38 = vadd.f32 %v4937_v50, %v4964_v18 }
 0x14c   :  { %v3496_v34 = vpop.f32.mrf.mxu1  ;;  %v3608_v35 = vpop.f32.mrf.mxu0 }
 0x14d   :  { %v5066_v40 = vadd.f32 %v3606_v25, %v1851_v33  ;;  %v3497_v41 = vadd.f32 %v3496_v34, %v3495_v29  ;;  %v3609_v8 = vadd.f32 %v3608_v35, %v3607_v32  ;;  %v4227_v25 = vld [vmem:[%s5717_s0 + $0x4c8] ss:$40 sps:$4 sm:$0xff]  }
 0x14e   :  { %v3498_v58 = vpop.f32.mrf.mxu1  ;;  %v3610_v20 = vpop.f32.mrf.mxu0  ;;  %v4230_v29 = vld [vmem:[%s5717_s0 + $0x4d0] ss:$40 sps:$4 sm:$0xff]  }
 0x14f   :  { %v1856_v49 = vadd.f32 %v3497_v41, %v1695_v42 }
 0x150   :  { %v3499_v55 = vpop.f32.mrf.mxu1  ;;  %v3611_v56 = vpop.f32.mrf.mxu0 }
 0x151   :  { %v5082_v0 = vadd.f32 %v3609_v8, %v1856_v49  ;;  %v3500_v52 = vadd.f32 %v3499_v55, %v3498_v58  ;;  %v3612_v1 = vadd.f32 %v3611_v56, %v3610_v20  ;;  %v1711_v49 = vadd.f32 %v4941_v62, %v4964_v18 }
 0x152   :  { %v3501_v4 = vpop.f32.mrf.mxu1  ;;  %v3613_v6 = vpop.f32.mrf.mxu0  ;;  %2248 = vmatmul.mubr.bf16.gmra.mxu1 %v4221_v46  ;;  %2409 = vmatmul.mubr.bf16.gmra.mxu0 %v4224_v48 }
 0x153   :  { %v1859_v7 = vadd.f32 %v3500_v52, %v1698_v26  ;;  %2255 = vmatprep.mubr.bf16.mxu1 %v4229_v54  ;;  %2416 = vmatprep.mubr.bf16.mxu0 %v4232_v16 }
 0x154   :  { %v3502_v12 = vpop.f32.mrf.mxu1  ;;  %v3614_v13 = vpop.f32.mrf.mxu0 }
 0x155   :  { %v5086_v19 = vadd.f32 %v3612_v1, %v1859_v7  ;;  %v3503_v22 = vadd.f32 %v3502_v12, %v3501_v4  ;;  %v3615_v30 = vadd.f32 %v3614_v13, %v3613_v6  ;;  %v1714_v4 = vadd.f32 %v4957_v14, %v4964_v18 }
 0x156   :  { %v3504_v10 = vpop.f32.mrf.mxu1  ;;  %v3616_v36 = vpop.f32.mrf.mxu0 }
 0x157   :  { %v1864_v32 = vadd.f32 %v3503_v22, %v1703_v60 }
 0x158   :  { %v3505_v33 = vpop.f32.mrf.mxu1  ;;  %v3617_v34 = vpop.f32.mrf.mxu0 }
 0x159   :  { %v5096_v35 = vadd.f32 %v3615_v30, %v1864_v32  ;;  %v3506_v42 = vadd.f32 %v3505_v33, %v3504_v10  ;;  %v3618_v41 = vadd.f32 %v3617_v34, %v3616_v36  ;;  %v1719_v10 = vadd.f32 %v4803_v59, %v4964_v18 }
 0x15a   :  { %v3507_v8 = vpop.f32.mrf.mxu1  ;;  %v3619_v58 = vpop.f32.mrf.mxu0  ;;  %2256 = vmatmul.mubr.bf16.gmra.mxu1 %v4227_v25  ;;  %2417 = vmatmul.mubr.bf16.gmra.mxu0 %v4230_v29 }
 0x15b   :  { %v1867_v20 = vadd.f32 %v3506_v42, %v1706_v38  ;;  %v1722_v42 = vadd.f32 %v4819_v5, %v4964_v18 }
 0x15c   :  { %v3508_v46 = vpop.f32.mrf.mxu1  ;;  %v3620_v48 = vpop.f32.mrf.mxu0 }
 0x15d   :  { %v5100_v54 = vadd.f32 %v3618_v41, %v1867_v20  ;;  %v3509_v16 = vadd.f32 %v3508_v46, %v3507_v8  ;;  %v3621_v55 = vadd.f32 %v3620_v48, %v3619_v58 }
 0x15e   :  { %v3510_v56 = vpop.f32.mrf.mxu1  ;;  %v3622_v50 = vpop.f32.mrf.mxu0 }
 0x15f   :  { %v1872_v26 = vadd.f32 %v3509_v16, %v1711_v49  ;;  %v1727_v16 = vadd.f32 %v4823_v11, %v4964_v18 }
 0x160   :  { %v3511_v52 = vpop.f32.mrf.mxu1  ;;  %v3623_v1 = vpop.f32.mrf.mxu0 }
 0x161   :  { %v5104_v6 = vadd.f32 %v3621_v55, %v1872_v26  ;;  %v3512_v7 = vadd.f32 %v3511_v52, %v3510_v56  ;;  %v3624_v12 = vadd.f32 %v3623_v1, %v3622_v50 }
 0x162   :  { %v3513_v13 = vpop.f32.mrf.mxu1  ;;  %v3625_v60 = vpop.f32.mrf.mxu0 }
 0x163   :  { %v1875_v22 = vadd.f32 %v3512_v7, %v1714_v4  ;;  %v1730_v7 = vadd.f32 %v4839_v21, %v4964_v18 }
 0x164   :  { %v3514_v62 = vpop.f32.mrf.mxu1  ;;  %v3626_v30 = vpop.f32.mrf.mxu0 }
 0x165   :  { %v5108_v36 = vadd.f32 %v3624_v12, %v1875_v22  ;;  %v3515_v25 = vadd.f32 %v3514_v62, %v3513_v13  ;;  %v3627_v29 = vadd.f32 %v3626_v30, %v3625_v60 }
 0x166   :  { %v3516_v32 = vpop.f32.mrf.mxu1  ;;  %v3628_v33 = vpop.f32.mrf.mxu0 }
 0x167   :  { %v1880_v34 = vadd.f32 %v3515_v25, %v1719_v10  ;;  %v1735_v25 = vadd.f32 %v4843_v27, %v4964_v18 }
 0x168   :  { %v3517_v14 = vpop.f32.mrf.mxu1  ;;  %v3629_v38 = vpop.f32.mrf.mxu0 }
 0x169   :  { %v5112_v41 = vadd.f32 %v3627_v29, %v1880_v34  ;;  %v3518_v8 = vadd.f32 %v3517_v14, %v3516_v32  ;;  %v3630_v58 = vadd.f32 %v3629_v38, %v3628_v33 }
 0x16a   :  { %v3519_v20 = vpop.f32.mrf.mxu1  ;;  %v3631_v46 = vpop.f32.mrf.mxu0 }
 0x16b   :  { %v1883_v48 = vadd.f32 %v3518_v8, %v1722_v42  ;;  %v1738_v8 = vadd.f32 %v4859_v37, %v4964_v18 }
 0x16c   :  { %v3520_v59 = vpop.f32.mrf.mxu1  ;;  %v3632_v49 = vpop.f32.mrf.mxu0 }
 0x16d   :  { %v5116_v55 = vadd.f32 %v3630_v58, %v1883_v48  ;;  %v3521_v56 = vadd.f32 %v3520_v59, %v3519_v20  ;;  %v3633_v50 = vadd.f32 %v3632_v49, %v3631_v46 }
 0x16e   :  { %v3522_v26 = vpop.f32.mrf.mxu1  ;;  %v3634_v52 = vpop.f32.mrf.mxu0 }
 0x16f   :  { %v1888_v1 = vadd.f32 %v3521_v56, %v1727_v16  ;;  %v1743_v56 = vadd.f32 %v4863_v43, %v4964_v18 }
 0x170   :  { %v3523_v5 = vpop.f32.mrf.mxu1  ;;  %v3635_v4 = vpop.f32.mrf.mxu0 }
 0x171   :  { %v5120_v12 = vadd.f32 %v3633_v50, %v1888_v1  ;;  %v3524_v13 = vadd.f32 %v3523_v5, %v3522_v26  ;;  %v3636_v60 = vadd.f32 %v3635_v4, %v3634_v52 }
 0x172   :  { %v3525_v22 = vpop.f32.mrf.mxu1  ;;  %v3637_v62 = vpop.f32.mrf.mxu0 }
 0x173   :  { %v1891_v30 = vadd.f32 %v3524_v13, %v1730_v7  ;;  %v1746_v13 = vadd.f32 %v4879_v53, %v4964_v18 }
 0x174   :  { %v3526_v11 = vpop.f32.mrf.mxu1  ;;  %v3638_v10 = vpop.f32.mrf.mxu0 }
 0x175   :  { %v5124_v29 = vadd.f32 %v3636_v60, %v1891_v30  ;;  %v3527_v32 = vadd.f32 %v3526_v11, %v3525_v22  ;;  %v3639_v33 = vadd.f32 %v3638_v10, %v3637_v62 }
 0x176   :  { %v3528_v34 = vpop.f32.mrf.mxu1  ;;  %v3640_v14 = vpop.f32.mrf.mxu0 }
 0x177   :  { %5720 = vst [vmem:[#allocation2_spill] sm:$0xff] %v5124_v29  ;;  %v1896_v38 = vadd.f32 %v3527_v32, %v1735_v25  ;;  %v1751_v32 = vadd.f32 %v4883_v61, %v4964_v18 }
 0x178   :  { %v3529_v21 = vpop.f32.mrf.mxu1  ;;  %v3641_v42 = vpop.f32.mrf.mxu0 }
 0x179   :  { %v5128_v58 = vadd.f32 %v3639_v33, %v1896_v38  ;;  %v3530_v20 = vadd.f32 %v3529_v21, %v3528_v34  ;;  %v3642_v46 = vadd.f32 %v3641_v42, %v3640_v14 }
 0x17a   :  { %v3531_v48 = vpop.f32.mrf.mxu1  ;;  %v3643_v59 = vpop.f32.mrf.mxu0 }
 0x17b   :  { %5721 = vst [vmem:[#allocation3_spill] sm:$0xff] %v5128_v58  ;;  %v1899_v49 = vadd.f32 %v3530_v20, %v1738_v8  ;;  %v1754_v20 = vadd.f32 %v4899_v9, %v4964_v18 }
 0x17c   :  { %v3532_v27 = vpop.f32.mrf.mxu1  ;;  %v3644_v16 = vpop.f32.mrf.mxu0 }
 0x17d   :  { %v5132_v50 = vadd.f32 %v3642_v46, %v1899_v49  ;;  %v3533_v26 = vadd.f32 %v3532_v27, %v3531_v48  ;;  %v3645_v52 = vadd.f32 %v3644_v16, %v3643_v59 }
 0x17e   :  { %v3534_v1 = vpop.f32.mrf.mxu1  ;;  %v3646_v5 = vpop.f32.mrf.mxu0 }
 0x17f   :  { %5722 = vst [vmem:[#allocation4_spill] sm:$0xff] %v5132_v50  ;;  %v1904_v4 = vadd.f32 %v3533_v26, %v1743_v56  ;;  %v1759_v26 = vadd.f32 %v4903_v17, %v4964_v18 }
 0x180   :  { %v3535_v37 = vpop.f32.mrf.mxu1  ;;  %v3647_v7 = vpop.f32.mrf.mxu0 }
 0x181   :  { %v5136_v60 = vadd.f32 %v3645_v52, %v1904_v4  ;;  %v3536_v22 = vadd.f32 %v3535_v37, %v3534_v1  ;;  %v3648_v62 = vadd.f32 %v3647_v7, %v3646_v5 }
 0x182   :  { %v3537_v30 = vpop.f32.mrf.mxu1  ;;  %v3649_v11 = vpop.f32.mrf.mxu0 }
 0x183   :  { %5723 = vst [vmem:[#allocation5_spill] sm:$0xff] %v5136_v60  ;;  %v1907_v10 = vadd.f32 %v3536_v22, %v1746_v13  ;;  %v1762_v22 = vadd.f32 %v4919_v31, %v4964_v18 }
 0x184   :  { %v3538_v43 = vpop.f32.mrf.mxu1  ;;  %v3650_v25 = vpop.f32.mrf.mxu0 }
 0x185   :  { %v5140_v33 = vadd.f32 %v3648_v62, %v1907_v10  ;;  %v3539_v34 = vadd.f32 %v3538_v43, %v3537_v30  ;;  %v3651_v14 = vadd.f32 %v3650_v25, %v3649_v11 }
 0x186   :  { %v3540_v38 = vpop.f32.mrf.mxu1  ;;  %v3652_v21 = vpop.f32.mrf.mxu0 }
 0x187   :  { %5724 = vst [vmem:[#allocation6_spill] sm:$0xff] %v5140_v33  ;;  %v1912_v42 = vadd.f32 %v3539_v34, %v1751_v32  ;;  %v1767_v34 = vadd.f32 %v4923_v39, %v4964_v18 }
 0x188   :  { %v3541_v53 = vpop.f32.mrf.mxu1  ;;  %v3653_v8 = vpop.f32.mrf.mxu0 }
 0x189   :  { %v5144_v46 = vadd.f32 %v3651_v14, %v1912_v42  ;;  %v3542_v48 = vadd.f32 %v3541_v53, %v3540_v38  ;;  %v3654_v59 = vadd.f32 %v3653_v8, %v3652_v21 }
 0x18a   :  { %v3543_v49 = vpop.f32.mrf.mxu1  ;;  %v3655_v27 = vpop.f32.mrf.mxu0 }
 0x18b   :  { %5725 = vst [vmem:[#allocation7_spill] sm:$0xff] %v5144_v46  ;;  %v1915_v16 = vadd.f32 %v3542_v48, %v1754_v20  ;;  %v1770_v48 = vadd.f32 %v4939_v51, %v4964_v18 }
 0x18c   :  { %v3544_v61 = vpop.f32.mrf.mxu1  ;;  %v3656_v56 = vpop.f32.mrf.mxu0 }
 0x18d   :  { %v5148_v52 = vadd.f32 %v3654_v59, %v1915_v16  ;;  %v3545_v1 = vadd.f32 %v3544_v61, %v3543_v49  ;;  %v3657_v5 = vadd.f32 %v3656_v56, %v3655_v27 }
 0x18e   :  { %v3546_v4 = vpop.f32.mrf.mxu1  ;;  %v3658_v37 = vpop.f32.mrf.mxu0 }
 0x18f   :  { %5726 = vst [vmem:[#allocation8_spill] sm:$0xff] %v5148_v52  ;;  %v1920_v7 = vadd.f32 %v3545_v1, %v1759_v26  ;;  %v1775_v1 = vadd.f32 %v4943_v63, %v4964_v18 }
 0x190   :  { %v3547_v9 = vpop.f32.mrf.mxu1  ;;  %v3659_v13 = vpop.f32.mrf.mxu0 }
 0x191   :  { %v5152_v62 = vadd.f32 %v3657_v5, %v1920_v7  ;;  %v3548_v30 = vadd.f32 %v3547_v9, %v3546_v4  ;;  %v3660_v11 = vadd.f32 %v3659_v13, %v3658_v37 }
 0x192   :  { %v3549_v10 = vpop.f32.mrf.mxu1  ;;  %v3661_v43 = vpop.f32.mrf.mxu0 }
 0x193   :  { %5727 = vst [vmem:[#allocation9_spill] sm:$0xff] %v5152_v62  ;;  %v1923_v25 = vadd.f32 %v3548_v30, %v1762_v22  ;;  %v1778_v30 = vadd.f32 %v4959_v15, %v4964_v18 }
 0x194   :  { %v3550_v17 = vpop.f32.mrf.mxu1  ;;  %v3662_v32 = vpop.f32.mrf.mxu0 }
 0x195   :  { %v5156_v14 = vadd.f32 %v3660_v11, %v1923_v25  ;;  %v3551_v38 = vadd.f32 %v3550_v17, %v3549_v10  ;;  %v3663_v21 = vadd.f32 %v3662_v32, %v3661_v43 }
 0x196   :  { %v3552_v42 = vpop.f32.mrf.mxu1  ;;  %v3664_v53 = vpop.f32.mrf.mxu0 }
 0x197   :  { %5728 = vst [vmem:[#allocation10_spill] sm:$0xff] %v5156_v14  ;;  %v1928_v8 = vadd.f32 %v3551_v38, %v1767_v34 }
 0x198   :  { %v3553_v31 = vpop.f32.mrf.mxu1  ;;  %v3665_v20 = vpop.f32.mrf.mxu0 }
 0x199   :  { %v5160_v59 = vadd.f32 %v3663_v21, %v1928_v8  ;;  %v3554_v49 = vadd.f32 %v3553_v31, %v3552_v42  ;;  %v3666_v27 = vadd.f32 %v3665_v20, %v3664_v53 }
 0x19a   :  { %v3555_v16 = vpop.f32.mrf.mxu1  ;;  %v3667_v61 = vpop.f32.mrf.mxu0 }
 0x19b   :  { %5729 = vst [vmem:[#allocation11_spill] sm:$0xff] %v5160_v59  ;;  %v1931_v56 = vadd.f32 %v3554_v49, %v1770_v48 }
 0x19c   :  { %v3556_v39 = vpop.f32.mrf.mxu1  ;;  %v3668_v26 = vpop.f32.mrf.mxu0 }
 0x19d   :  { %v5164_v5 = vadd.f32 %v3666_v27, %v1931_v56  ;;  %v3557_v4 = vadd.f32 %v3556_v39, %v3555_v16  ;;  %v3669_v37 = vadd.f32 %v3668_v26, %v3667_v61 }
 0x19e   :  { %v3558_v7 = vpop.f32.mrf.mxu1  ;;  %v3670_v9 = vpop.f32.mrf.mxu0 }
 0x19f   :  { %5730 = vst [vmem:[#allocation12_spill] sm:$0xff] %v5164_v5  ;;  %v1936_v13 = vadd.f32 %v3557_v4, %v1775_v1 }
 0x1a0   :  { %v3559_v51 = vpop.f32.mrf.mxu1  ;;  %v3671_v22 = vpop.f32.mrf.mxu0 }
 0x1a1   :  { %v5168_v11 = vadd.f32 %v3669_v37, %v1936_v13  ;;  %v3560_v10 = vadd.f32 %v3559_v51, %v3558_v7  ;;  %v3672_v43 = vadd.f32 %v3671_v22, %v3670_v9 }
 0x1a2   :  { %v3689_v25 = vpop.f32.mrf.mxu1  ;;  %v3801_v17 = vpop.f32.mrf.mxu0 }
 0x1a3   :  { %5731 = vst [vmem:[#allocation13_spill] sm:$0xff] %v5168_v11  ;;  %v1939_v32 = vadd.f32 %v3560_v10, %v1778_v30 }
 0x1a4   :  { %v3690_v63 = vpop.f32.mrf.mxu1  ;;  %v3802_v34 = vpop.f32.mrf.mxu0 }
 0x1a5   :  { %v5170_v38 = vadd.f32 %v3672_v43, %v1939_v32  ;;  %v3691_v21 = vadd.f32 %v3690_v63, %v3689_v25  ;;  %v3803_v42 = vadd.f32 %v3802_v34, %v3801_v17 }
 0x1a6   :  { %v3692_v53 = vpop.f32.mrf.mxu1  ;;  %v3804_v8 = vpop.f32.mrf.mxu0 }
 0x1a7   :  { %5732 = vst [vmem:[#allocation14_spill] sm:$0xff] %v5170_v38  ;;  %v2138_v31 = vadd.f32 %v3691_v21, %v4982_v47 }
 0x1a8   :  { %v3693_v20 = vpop.f32.mrf.mxu1  ;;  %v3805_v48 = vpop.f32.mrf.mxu0 }
 0x1a9   :  { %v5173_v15 = vadd.f32 %v3803_v42, %v2138_v31  ;;  %v3694_v32 = vadd.f32 %v3693_v20, %v3692_v53  ;;  %v3806_v14 = vadd.f32 %v3805_v48, %v3804_v8 }
 0x1aa   :  { %v3695_v18 = vpop.f32.mrf.mxu1  ;;  %v3807_v49 = vpop.f32.mrf.mxu0 }
 0x1ab   :  { %v2141_v38 = vadd.f32 %v3694_v32, %v4986_v2 }
 0x1ac   :  { %v3696_v27 = vpop.f32.mrf.mxu1  ;;  %v3808_v16 = vpop.f32.mrf.mxu0 }
 0x1ad   :  { %v3697_v21 = vadd.f32 %v3696_v27, %v3695_v18  ;;  %v5177_v60 = vadd.f32 %v3806_v14, %v2141_v38  ;;  %v3809_v50 = vadd.f32 %v3808_v16, %v3807_v49 }
 0x1ae   :  { %v3698_v61 = vpop.f32.mrf.mxu1  ;;  %v3810_v56 = vpop.f32.mrf.mxu0 }
 0x1af   :  { %v2146_v62 = vadd.f32 %v3697_v21, %v5002_v28  ;;  %v2464_v28 = vmul.f32 %v5177_v60, %v5177_v60 }
 0x1b0   :  { %v3699_v39 = vpop.f32.mrf.mxu1  ;;  %v3811_v26 = vpop.f32.mrf.mxu0 }
 0x1b1   :  { %v3700_v59 = vadd.f32 %v3699_v39, %v3698_v61  ;;  %v5180_v58 = vadd.f32 %v3809_v50, %v2146_v62  ;;  %v3812_v29 = vadd.f32 %v3811_v26, %v3810_v56  ;;  %v2463_v50 = vmul.f32 %v5173_v15, %v5173_v15 }
 0x1b2   :  { %v3701_v1 = vpop.f32.mrf.mxu1  ;;  %v3813_v4 = vpop.f32.mrf.mxu0 }
 0x1b3   :  { %v2149_v18 = vadd.f32 %v3700_v59, %v5006_v44  ;;  %v2465_v62 = vmul.f32 %v5180_v58, %v5180_v58 }
 0x1b4   :  { %v3702_v37 = vpop.f32.mrf.mxu1  ;;  %v3814_v7 = vpop.f32.mrf.mxu0 }
 0x1b5   :  { %v3703_v33 = vadd.f32 %v3702_v37, %v3701_v1  ;;  %v5185_v38 = vadd.f32 %v3812_v29, %v2149_v18  ;;  %v3815_v49 = vadd.f32 %v3814_v7, %v3813_v4  ;;  %v2425_v29 = vadd.f32 %v5177_v60, %v5173_v15 }
 0x1b6   :  { %v3704_v9 = vpop.f32.mrf.mxu1  ;;  %v3816_v13 = vpop.f32.mrf.mxu0  ;;  %v2495_v1 = vadd.f32 %v2464_v28, %v2463_v50 }
 0x1b7   :  { %v2154_v8 = vadd.f32 %v3703_v33, %v5022_v3  ;;  %v2466_v37 = vmul.f32 %v5185_v38, %v5185_v38 }
 0x1b8   :  { %v3705_v51 = vpop.f32.mrf.mxu1  ;;  %v3817_v47 = vpop.f32.mrf.mxu0 }
 0x1b9   :  { %v3706_v27 = vadd.f32 %v3705_v51, %v3704_v9  ;;  %v5192_v33 = vadd.f32 %v3815_v49, %v2154_v8  ;;  %v3818_v56 = vadd.f32 %v3817_v47, %v3816_v13  ;;  %v2496_v13 = vadd.f32 %v2495_v1, %v2465_v62 }
 0x1ba   :  { %v3707_v22 = vpop.f32.mrf.mxu1  ;;  %v3819_v30 = vpop.f32.mrf.mxu0 }
 0x1bb   :  { %v2157_v16 = vadd.f32 %v3706_v27, %v5026_v23 }
 0x1bc   :  { %v3708_v10 = vpop.f32.mrf.mxu1  ;;  %v3820_v43 = vpop.f32.mrf.mxu0 }
 0x1bd   :  { %v3709_v48 = vadd.f32 %v3708_v10, %v3707_v22  ;;  %v5199_v7 = vadd.f32 %v3818_v56, %v2157_v16  ;;  %v3821_v9 = vadd.f32 %v3820_v43, %v3819_v30  ;;  %v2426_v22 = vadd.f32 %v2425_v29, %v5180_v58 }
 0x1be   :  { %v3710_v25 = vpop.f32.mrf.mxu1  ;;  %v3822_v17 = vpop.f32.mrf.mxu0  ;;  %v2467_v10 = vmul.f32 %v5192_v33, %v5192_v33 }
 0x1bf   :  { %v2162_v39 = vadd.f32 %v3709_v48, %v5042_v45  ;;  %v2468_v27 = vmul.f32 %v5199_v7, %v5199_v7 }
 0x1c0   :  { %v3711_v63 = vpop.f32.mrf.mxu1  ;;  %v3823_v34 = vpop.f32.mrf.mxu0 }
 0x1c1   :  { %v3712_v44 = vadd.f32 %v3711_v63, %v3710_v25  ;;  %v5205_v25 = vadd.f32 %v3821_v9, %v2162_v39  ;;  %v3824_v63 = vadd.f32 %v3823_v34, %v3822_v17 }
 0x1c2   :  { %v3713_v42 = vpop.f32.mrf.mxu1  ;;  %v3825_v31 = vpop.f32.mrf.mxu0 }
 0x1c3   :  { %v2165_v51 = vadd.f32 %v3712_v44, %v5046_v57  ;;  %v2497_v57 = vadd.f32 %v2496_v13, %v2466_v37  ;;  %v2469_v34 = vmul.f32 %v5205_v25, %v5205_v25 }
 0x1c4   :  { %v3714_v11 = vpop.f32.mrf.mxu1  ;;  %v3826_v5 = vpop.f32.mrf.mxu0 }
 0x1c5   :  { %v3715_v26 = vadd.f32 %v3714_v11, %v3713_v42  ;;  %v2427_v42 = vadd.f32 %v2426_v22, %v5185_v38 }
 0x1c6   :  { %v3716_v52 = vpop.f32.mrf.mxu1  ;;  %v3828_v46 = vpop.f32.mrf.mxu0 }
 0x1c7   :  { %v2170_v21 = vadd.f32 %v3715_v26, %v5062_v24  ;;  %v2428_v17 = vadd.f32 %v2427_v42, %v5192_v33  ;;  %v2498_v24 = vadd.f32 %v2497_v57, %v2467_v10 }
 0x1c8   :  { %v3717_v53 = vpop.f32.mrf.mxu1  ;;  %v3829_v20 = vpop.f32.mrf.mxu0 }
 0x1c9   :  { %v3718_v47 = vadd.f32 %v3717_v53, %v3716_v52  ;;  %v5211_v52 = vadd.f32 %v3824_v63, %v2165_v51  ;;  %v3827_v53 = vadd.f32 %v3826_v5, %v3825_v31  ;;  %v2429_v5 = vadd.f32 %v2428_v17, %v5199_v7 }
 0x1ca   :  { %v3719_v2 = vpop.f32.mrf.mxu1  ;;  %v3831_v32 = vpop.f32.mrf.mxu0 }
 0x1cb   :  { %v2173_v8 = vadd.f32 %v3718_v47, %v5066_v40  ;;  %v2499_v40 = vadd.f32 %v2498_v24, %v2468_v27  ;;  %v2470_v31 = vmul.f32 %v5211_v52, %v5211_v52 }
 0x1cc   :  { %v3720_v61 = vpop.f32.mrf.mxu1  ;;  %v3832_v14 = vpop.f32.mrf.mxu0 }
 0x1cd   :  { %v3721_v18 = vadd.f32 %v3720_v61, %v3719_v2  ;;  %v5217_v2 = vadd.f32 %v3827_v53, %v2170_v21  ;;  %v3830_v61 = vadd.f32 %v3829_v20, %v3828_v46  ;;  %v3833_v56 = vadd.f32 %v3832_v14, %v3831_v32 }
 0x1ce   :  { %v3722_v59 = vpop.f32.mrf.mxu1  ;;  %v3834_v3 = vpop.f32.mrf.mxu0  ;;  %v2430_v46 = vadd.f32 %v2429_v5, %v5205_v25 }
 0x1cf   :  { %v2178_v16 = vadd.f32 %v3721_v18, %v5082_v0  ;;  %v2500_v0 = vadd.f32 %v2499_v40, %v2469_v34  ;;  %v2471_v20 = vmul.f32 %v5217_v2, %v5217_v2 }
 0x1d0   :  { %v3723_v23 = vpop.f32.mrf.mxu1  ;;  %v3835_v4 = vpop.f32.mrf.mxu0  ;;  %v2431_v32 = vadd.f32 %v2430_v46, %v5211_v52 }
 0x1d1   :  { %v3724_v48 = vadd.f32 %v3723_v23, %v3722_v59  ;;  %v5223_v59 = vadd.f32 %v3830_v61, %v2173_v8  ;;  %v5229_v23 = vadd.f32 %v3833_v56, %v2178_v16  ;;  %v3836_v37 = vadd.f32 %v3835_v4, %v3834_v3 }
 0x1d2   :  { %v3725_v45 = vpop.f32.mrf.mxu1  ;;  %v3837_v11 = vpop.f32.mrf.mxu0  ;;  %v2501_v14 = vadd.f32 %v2500_v0, %v2470_v31  ;;  %v2432_v3 = vadd.f32 %v2431_v32, %v5217_v2 }
 0x1d3   :  { %v2181_v39 = vadd.f32 %v3724_v48, %v5086_v19  ;;  %v2472_v13 = vmul.f32 %v5223_v59, %v5223_v59 }
 0x1d4   :  { %v3726_v30 = vpop.f32.mrf.mxu1  ;;  %v3838_v43 = vpop.f32.mrf.mxu0  ;;  %v2502_v4 = vadd.f32 %v2501_v14, %v2471_v20  ;;  %v2433_v53 = vadd.f32 %v2432_v3, %v5223_v59 }
 0x1d5   :  { %v3727_v44 = vadd.f32 %v3726_v30, %v3725_v45  ;;  %v5235_v47 = vadd.f32 %v3836_v37, %v2181_v39  ;;  %v3839_v45 = vadd.f32 %v3838_v43, %v3837_v11 }
 0x1d6   :  { %v3728_v28 = vpop.f32.mrf.mxu1  ;;  %v3840_v49 = vpop.f32.mrf.mxu0  ;;  %v2503_v43 = vadd.f32 %v2502_v4, %v2472_v13  ;;  %v2434_v24 = vadd.f32 %v2433_v53, %v5229_v23 }
 0x1d7   :  { %v2186_v9 = vadd.f32 %v3727_v44, %v5096_v35  ;;  %v2473_v35 = vmul.f32 %v5229_v23, %v5229_v23 }
 0x1d8   :  { %v3729_v50 = vpop.f32.mrf.mxu1  ;;  %v3841_v62 = vpop.f32.mrf.mxu0 }
 0x1d9   :  { %v3730_v26 = vadd.f32 %v3729_v50, %v3728_v28  ;;  %v5241_v42 = vadd.f32 %v3839_v45, %v2186_v9  ;;  %v3842_v18 = vadd.f32 %v3841_v62, %v3840_v49  ;;  %v2504_v34 = vadd.f32 %v2503_v43, %v2473_v35 }
 0x1da   :  { %v3731_v29 = vpop.f32.mrf.mxu1  ;;  %v3843_v1 = vpop.f32.mrf.mxu0  ;;  %v2435_v62 = vadd.f32 %v2434_v24, %v5235_v47 }
 0x1db   :  { %v2189_v10 = vadd.f32 %v3730_v26, %v5100_v54  ;;  %v2474_v54 = vmul.f32 %v5235_v47, %v5235_v47 }
 0x1dc   :  { %v3732_v51 = vpop.f32.mrf.mxu1  ;;  %v3844_v22 = vpop.f32.mrf.mxu0  ;;  %v2436_v26 = vadd.f32 %v2435_v62, %v5241_v42 }
 0x1dd   :  { %v3733_v19 = vadd.f32 %v3732_v51, %v3731_v29  ;;  %v5247_v8 = vadd.f32 %v3842_v18, %v2189_v10  ;;  %v3845_v48 = vadd.f32 %v3844_v22, %v3843_v1  ;;  %v2505_v40 = vadd.f32 %v2504_v34, %v2474_v54 }
 0x1de   :  { %v3734_v63 = vpop.f32.mrf.mxu1  ;;  %v3846_v21 = vpop.f32.mrf.mxu0 }
 0x1df   :  { %v2194_v30 = vadd.f32 %v3733_v19, %v5104_v6  ;;  %v2475_v6 = vmul.f32 %v5241_v42, %v5241_v42  ;;  %v2476_v31 = vmul.f32 %v5247_v8, %v5247_v8  ;;  %v2437_v9 = vadd.f32 %v2436_v26, %v5247_v8 }
 0x1e0   :  { %v3735_v57 = vpop.f32.mrf.mxu1  ;;  %v3847_v27 = vpop.f32.mrf.mxu0 }
 0x1e1   :  { %v3736_v11 = vadd.f32 %v3735_v57, %v3734_v63  ;;  %v5253_v61 = vadd.f32 %v3845_v48, %v2194_v30  ;;  %v3848_v16 = vadd.f32 %v3847_v27, %v3846_v21  ;;  %v2506_v46 = vadd.f32 %v2505_v40, %v2475_v6 }
 0x1e2   :  { %v3737_v28 = vpop.f32.mrf.mxu1  ;;  %v3849_v17 = vpop.f32.mrf.mxu0 }
 0x1e3   :  { %v2197_v49 = vadd.f32 %v3736_v11, %v5108_v36  ;;  %v2477_v0 = vmul.f32 %v5253_v61, %v5253_v61  ;;  %v2507_v32 = vadd.f32 %v2506_v46, %v2476_v31 }
 0x1e4   :  { %v3738_v44 = vpop.f32.mrf.mxu1  ;;  %v3850_v50 = vpop.f32.mrf.mxu0 }
 0x1e5   :  { %v3739_v5 = vadd.f32 %v3738_v44, %v3737_v28  ;;  %v5258_v56 = vadd.f32 %v3848_v16, %v2197_v49  ;;  %v3851_v1 = vadd.f32 %v3850_v50, %v3849_v17  ;;  %v2508_v63 = vadd.f32 %v2507_v32, %v2477_v0 }
 0x1e6   :  { %v3740_v39 = vpop.f32.mrf.mxu1  ;;  %v3852_v36 = vpop.f32.mrf.mxu0 }
 0x1e7   :  { %v2202_v29 = vadd.f32 %v3739_v5, %v5112_v41  ;;  %v2478_v14 = vmul.f32 %v5258_v56, %v5258_v56  ;;  %v2438_v41 = vadd.f32 %v2437_v9, %v5253_v61  ;;  %v5733_v5 = vld [vmem:[#allocation2_spill] sm:$0xff] }
 0x1e8   :  { %v3741_v20 = vpop.f32.mrf.mxu1  ;;  %v3853_v37 = vpop.f32.mrf.mxu0 }
 0x1e9   :  { %v5265_v51 = vadd.f32 %v3851_v1, %v2202_v29  ;;  %v3742_v22 = vadd.f32 %v3741_v20, %v3740_v39  ;;  %v3854_v10 = vadd.f32 %v3853_v37, %v3852_v36  ;;  %v2439_v35 = vadd.f32 %v2438_v41, %v5258_v56  ;;  %v5734_v37 = vld [vmem:[#allocation3_spill] sm:$0xff] }
 0x1ea   :  { %v3743_v19 = vpop.f32.mrf.mxu1  ;;  %v3855_v13 = vpop.f32.mrf.mxu0  ;;  %v2509_v57 = vadd.f32 %v2508_v63, %v2478_v14 }
 0x1eb   :  { %v2205_v45 = vadd.f32 %v3742_v22, %v5116_v55  ;;  %v2479_v21 = vmul.f32 %v5265_v51, %v5265_v51  ;;  %v2440_v11 = vadd.f32 %v2439_v35, %v5265_v51 }
 0x1ec   :  { %v3744_v3 = vpop.f32.mrf.mxu1  ;;  %v3856_v4 = vpop.f32.mrf.mxu0 }
 0x1ed   :  { %v5274_v18 = vadd.f32 %v3854_v10, %v2205_v45  ;;  %v3745_v30 = vadd.f32 %v3744_v3, %v3743_v19  ;;  %v3857_v54 = vadd.f32 %v3856_v4, %v3855_v13  ;;  %v2510_v48 = vadd.f32 %v2509_v57, %v2479_v21  ;;  %v5735_v3 = vld [vmem:[#allocation4_spill] sm:$0xff] }
 0x1ee   :  { %v3746_v27 = vpop.f32.mrf.mxu1  ;;  %v3858_v53 = vpop.f32.mrf.mxu0 }
 0x1ef   :  { %v2480_v55 = vmul.f32 %v5274_v18, %v5274_v18  ;;  %v2210_v43 = vadd.f32 %v3745_v30, %v5120_v12  ;;  %v2441_v24 = vadd.f32 %v2440_v11, %v5274_v18 }
 0x1f0   :  { %v3747_v28 = vpop.f32.mrf.mxu1  ;;  %v3859_v17 = vpop.f32.mrf.mxu0 }
 0x1f1   :  { %v5281_v49 = vadd.f32 %v3857_v54, %v2210_v43  ;;  %v3748_v34 = vadd.f32 %v3747_v28, %v3746_v27  ;;  %v2511_v6 = vadd.f32 %v2510_v48, %v2480_v55  ;;  %v3860_v12 = vadd.f32 %v3859_v17, %v3858_v53  ;;  %v5736_v28 = vld [vmem:[#allocation5_spill] sm:$0xff] }
 0x1f2   :  { %v3749_v16 = vpop.f32.mrf.mxu1  ;;  %v3861_v44 = vpop.f32.mrf.mxu0 }
 0x1f3   :  { %v2442_v50 = vadd.f32 %v2441_v24, %v5281_v49  ;;  %v2481_v62 = vmul.f32 %v5281_v49, %v5281_v49  ;;  %v2213_v40 = vadd.f32 %v3748_v34, %v5733_v5 }
 0x1f4   :  { %v3750_v31 = vpop.f32.mrf.mxu1  ;;  %v3862_v39 = vpop.f32.mrf.mxu0 }
 0x1f5   :  { %v2512_v36 = vadd.f32 %v2511_v6, %v2481_v62  ;;  %v5287_v26 = vadd.f32 %v3860_v12, %v2213_v40  ;;  %v3751_v29 = vadd.f32 %v3750_v31, %v3749_v16  ;;  %v3863_v22 = vadd.f32 %v3862_v39, %v3861_v44  ;;  %v5737_v31 = vld [vmem:[#allocation6_spill] sm:$0xff] }
 0x1f6   :  { %v3752_v1 = vpop.f32.mrf.mxu1  ;;  %v3864_v46 = vpop.f32.mrf.mxu0 }
 0x1f7   :  { %v2443_v0 = vadd.f32 %v2442_v50, %v5287_v26  ;;  %v2482_v20 = vmul.f32 %v5287_v26, %v5287_v26  ;;  %v2218_v9 = vadd.f32 %v3751_v29, %v5734_v37 }
 0x1f8   :  { %v3753_v32 = vpop.f32.mrf.mxu1  ;;  %v3865_v14 = vpop.f32.mrf.mxu0 }
 0x1f9   :  { %v2513_v19 = vadd.f32 %v2512_v36, %v2482_v20  ;;  %v5293_v13 = vadd.f32 %v3863_v22, %v2218_v9  ;;  %v3754_v41 = vadd.f32 %v3753_v32, %v3752_v1  ;;  %v3866_v35 = vadd.f32 %v3865_v14, %v3864_v46  ;;  %v5738_v14 = vld [vmem:[#allocation7_spill] sm:$0xff] }
 0x1fa   :  { %v3755_v45 = vpop.f32.mrf.mxu1  ;;  %v3867_v10 = vpop.f32.mrf.mxu0 }
 0x1fb   :  { %v2444_v63 = vadd.f32 %v2443_v0, %v5293_v13  ;;  %v2483_v21 = vmul.f32 %v5293_v13, %v5293_v13  ;;  %v2221_v4 = vadd.f32 %v3754_v41, %v5735_v3 }
 0x1fc   :  { %v3756_v30 = vpop.f32.mrf.mxu1  ;;  %v3868_v57 = vpop.f32.mrf.mxu0 }
 0x1fd   :  { %v2514_v27 = vadd.f32 %v2513_v19, %v2483_v21  ;;  %v5299_v53 = vadd.f32 %v3866_v35, %v2221_v4  ;;  %v3757_v11 = vadd.f32 %v3756_v30, %v3755_v45  ;;  %v3869_v24 = vadd.f32 %v3868_v57, %v3867_v10 }
 0x1fe   :  { %v3758_v55 = vpop.f32.mrf.mxu1  ;;  %v3870_v43 = vpop.f32.mrf.mxu0 }
 0x1ff   :  { %v2445_v54 = vadd.f32 %v2444_v63, %v5299_v53  ;;  %v2484_v48 = vmul.f32 %v5299_v53, %v5299_v53  ;;  %v2226_v17 = vadd.f32 %v3757_v11, %v5736_v28 }
 0x200   :  { %v3759_v34 = vpop.f32.mrf.mxu1  ;;  %v3871_v6 = vpop.f32.mrf.mxu0 }
 0x201   :  { %v2515_v16 = vadd.f32 %v2514_v27, %v2484_v48  ;;  %v5305_v44 = vadd.f32 %v3869_v24, %v2226_v17  ;;  %v3760_v50 = vadd.f32 %v3759_v34, %v3758_v55  ;;  %v3872_v36 = vadd.f32 %v3871_v6, %v3870_v43  ;;  %v5739_v27 = vld [vmem:[#allocation8_spill] sm:$0xff] }
 0x202   :  { %v3761_v62 = vpop.f32.mrf.mxu1  ;;  %v3873_v5 = vpop.f32.mrf.mxu0 }
 0x203   :  { %v2446_v40 = vadd.f32 %v2445_v54, %v5305_v44  ;;  %v2485_v12 = vmul.f32 %v5305_v44, %v5305_v44  ;;  %v2229_v39 = vadd.f32 %v3760_v50, %v5737_v31  ;;  %v5740_v50 = vld [vmem:[#allocation9_spill] sm:$0xff] }
 0x204   :  { %v3762_v29 = vpop.f32.mrf.mxu1  ;;  %v3874_v1 = vpop.f32.mrf.mxu0 }
 0x205   :  { %v2516_v46 = vadd.f32 %v2515_v16, %v2485_v12  ;;  %v5311_v0 = vadd.f32 %v3872_v36, %v2229_v39  ;;  %v3763_v20 = vadd.f32 %v3762_v29, %v3761_v62  ;;  %v3875_v41 = vadd.f32 %v3874_v1, %v3873_v5 }
 0x206   :  { %v3764_v37 = vpop.f32.mrf.mxu1  ;;  %v3876_v9 = vpop.f32.mrf.mxu0 }
 0x207   :  { %v2447_v22 = vadd.f32 %v2446_v40, %v5311_v0  ;;  %v2486_v32 = vmul.f32 %v5311_v0, %v5311_v0  ;;  %v2234_v19 = vadd.f32 %v3763_v20, %v5738_v14 }
 0x208   :  { %v3765_v45 = vpop.f32.mrf.mxu1  ;;  %v3877_v10 = vpop.f32.mrf.mxu0 }
 0x209   :  { %v2517_v63 = vadd.f32 %v2516_v46, %v2486_v32  ;;  %v5317_v21 = vadd.f32 %v3875_v41, %v2234_v19  ;;  %v3766_v3 = vadd.f32 %v3765_v45, %v3764_v37  ;;  %v3878_v55 = vadd.f32 %v3877_v10, %v3876_v9  ;;  %v5741_v37 = vld [vmem:[#allocation10_spill] sm:$0xff] }
 0x20a   :  { %v3767_v4 = vpop.f32.mrf.mxu1  ;;  %v3879_v35 = vpop.f32.mrf.mxu0 }
 0x20b   :  { %v2448_v30 = vadd.f32 %v2447_v22, %v5317_v21  ;;  %v2487_v57 = vmul.f32 %v5317_v21, %v5317_v21  ;;  %v2237_v11 = vadd.f32 %v3766_v3, %v5739_v27 }
 0x20c   :  { %v3768_v43 = vpop.f32.mrf.mxu1  ;;  %v3880_v54 = vpop.f32.mrf.mxu0 }
 0x20d   :  { %v2518_v48 = vadd.f32 %v2517_v63, %v2487_v57  ;;  %v5323_v28 = vadd.f32 %v3878_v55, %v2237_v11  ;;  %v3769_v17 = vadd.f32 %v3768_v43, %v3767_v4  ;;  %v3881_v5 = vadd.f32 %v3880_v54, %v3879_v35  ;;  %v5742_v35 = vld [vmem:[#allocation11_spill] sm:$0xff] }
 0x20e   :  { %v3770_v24 = vpop.f32.mrf.mxu1  ;;  %v3882_v34 = vpop.f32.mrf.mxu0 }
 0x20f   :  { %v2449_v6 = vadd.f32 %v2448_v30, %v5323_v28  ;;  %v2488_v16 = vmul.f32 %v5323_v28, %v5323_v28  ;;  %v2242_v62 = vadd.f32 %v3769_v17, %v5740_v50 }
 0x210   :  { %v3771_v40 = vpop.f32.mrf.mxu1  ;;  %v3883_v12 = vpop.f32.mrf.mxu0 }
 0x211   :  { %v2519_v31 = vadd.f32 %v2518_v48, %v2488_v16  ;;  %v5329_v39 = vadd.f32 %v3881_v5, %v2242_v62  ;;  %v3772_v36 = vadd.f32 %v3771_v40, %v3770_v24  ;;  %v3884_v22 = vadd.f32 %v3883_v12, %v3882_v34 }
 0x212   :  { %v3773_v29 = vpop.f32.mrf.mxu1  ;;  %v3885_v1 = vpop.f32.mrf.mxu0 }
 0x213   :  { %v2450_v46 = vadd.f32 %v2449_v6, %v5329_v39  ;;  %v2489_v20 = vmul.f32 %v5329_v39, %v5329_v39  ;;  %v2245_v9 = vadd.f32 %v3772_v36, %v5741_v37  ;;  %v5743_v6 = vld [vmem:[#allocation12_spill] sm:$0xff] }
 0x214   :  { %v3774_v32 = vpop.f32.mrf.mxu1  ;;  %v3886_v14 = vpop.f32.mrf.mxu0 }
 0x215   :  { %v2520_v19 = vadd.f32 %v2519_v31, %v2489_v20  ;;  %v5335_v41 = vadd.f32 %v3884_v22, %v2245_v9  ;;  %v3775_v45 = vadd.f32 %v3774_v32, %v3773_v29  ;;  %v3887_v57 = vadd.f32 %v3886_v14, %v3885_v1  ;;  %v5744_v20 = vld [vmem:[#allocation13_spill] sm:$0xff] }
 0x216   :  { %v3776_v10 = vpop.f32.mrf.mxu1  ;;  %v3888_v63 = vpop.f32.mrf.mxu0 }
 0x217   :  { %v2451_v3 = vadd.f32 %v2450_v46, %v5335_v41  ;;  %v2490_v4 = vmul.f32 %v5335_v41, %v5335_v41  ;;  %v2250_v30 = vadd.f32 %v3775_v45, %v5742_v35 }
 0x218   :  { %v3777_v27 = vpop.f32.mrf.mxu1  ;;  %v3889_v11 = vpop.f32.mrf.mxu0 }
 0x219   :  { %v2521_v55 = vadd.f32 %v2520_v19, %v2490_v4  ;;  %v5341_v43 = vadd.f32 %v3887_v57, %v2250_v30  ;;  %v3778_v54 = vadd.f32 %v3777_v27, %v3776_v10  ;;  %v3890_v50 = vadd.f32 %v3889_v11, %v3888_v63 }
 0x21a   :  { %v3779_v48 = vpop.f32.mrf.mxu1  ;;  %v3891_v17 = vpop.f32.mrf.mxu0 }
 0x21b   :  { %v2452_v24 = vadd.f32 %v2451_v3, %v5341_v43  ;;  %v2491_v34 = vmul.f32 %v5341_v43, %v5341_v43  ;;  %v2253_v16 = vadd.f32 %v3778_v54, %v5743_v6  ;;  %v5745_v3 = vld [vmem:[#allocation14_spill] sm:$0xff] }
 0x21c   :  { %v3780_v62 = vpop.f32.mrf.mxu1  ;;  %v3892_v5 = vpop.f32.mrf.mxu0 }
 0x21d   :  { %v2522_v40 = vadd.f32 %v2521_v55, %v2491_v34  ;;  %v5347_v12 = vadd.f32 %v3890_v50, %v2253_v16  ;;  %v3781_v31 = vadd.f32 %v3780_v62, %v3779_v48  ;;  %v3893_v9 = vadd.f32 %v3892_v5, %v3891_v17 }
 0x21e   :  { %v3782_v36 = vpop.f32.mrf.mxu1  ;;  %v3894_v29 = vpop.f32.mrf.mxu0 }
 0x21f   :  { %v2453_v1 = vadd.f32 %v2452_v24, %v5347_v12  ;;  %v2492_v46 = vmul.f32 %v5347_v12, %v5347_v12  ;;  %v2258_v37 = vadd.f32 %v3781_v31, %v5744_v20 }
 0x220   :  { %v3783_v22 = vpop.f32.mrf.mxu1  ;;  %v3895_v32 = vpop.f32.mrf.mxu0 }
 0x221   :  { %v2523_v14 = vadd.f32 %v2522_v40, %v2492_v46  ;;  %v5353_v19 = vadd.f32 %v3893_v9, %v2258_v37  ;;  %v3784_v45 = vadd.f32 %v3783_v22, %v3782_v36  ;;  %v3896_v35 = vadd.f32 %v3895_v32, %v3894_v29 }
 0x223   :  { %v2454_v10 = vadd.f32 %v2453_v1, %v5353_v19  ;;  %v2493_v63 = vmul.f32 %v5353_v19, %v5353_v19  ;;  %v2261_v4 = vadd.f32 %v3784_v45, %v5745_v3 }
 0x225   :  { %v2524_v30 = vadd.f32 %v2523_v14, %v2493_v63  ;;  %v5359_v57 = vadd.f32 %v3896_v35, %v2261_v4 }
 0x227   :  { %v2455_v27 = vadd.f32 %v2454_v10, %v5359_v57  ;;  %v2494_v11 = vmul.f32 %v5359_v57, %v5359_v57 }
 0x229   :  { %v2456_v55 = vrot.slane %v2455_v27, 4  ;;  %v2525_v54 = vadd.f32 %v2524_v30, %v2494_v11 }
 0x22b   :  { %v2457_v48 = vadd.f32 %v2456_v55, %v2455_v27  ;;  %v2526_v17 = vrot.slane %v2525_v54, 4 }
 0x22d   :  { %v2458_v24 = vrot.slane %v2457_v48, 2  ;;  %v2527_v34 = vadd.f32 %v2526_v17, %v2525_v54 }
 0x22f   :  { %v2459_v6 = vadd.f32 %v2458_v24, %v2457_v48  ;;  %v2528_v16 = vrot.slane %v2527_v34, 2 }
 0x231   :  { %v2460_v50 = vrot.slane %v2459_v6, 1  ;;  %v2529_v62 = vadd.f32 %v2528_v16, %v2527_v34 }
 0x233   :  { %v2461_v5 = vadd.f32 %v2460_v50, %v2459_v6  ;;  %v2530_v40 = vrot.slane %v2529_v62, 1 }
 0x235   :  { %v5364_v31 = vmul.f32 0.00390625, %v2461_v5  ;;  %v2531_v36 = vadd.f32 %v2530_v40, %v2529_v62 }
 0x237   :  { %v2532_v29 = vmul.f32 0.00390625, %v2531_v36  ;;  %v2533_v1 = vmul.f32 %v5364_v31, %v5364_v31  ;;  %v2552_v20 = vsub.f32 %v5274_v18, %v5364_v31  ;;  %v2553_v37 = vsub.f32 %v5281_v49, %v5364_v31 }
 0x238   :  { %v2554_v9 = vsub.f32 %v5287_v26, %v5364_v31  ;;  %v2555_v22 = vsub.f32 %v5293_v13, %v5364_v31  ;;  %v2556_v32 = vsub.f32 %v5299_v53, %v5364_v31  ;;  %v2557_v14 = vsub.f32 %v5305_v44, %v5364_v31 }
 0x239   :  { %v2534_v46 = vsub.f32 %v2532_v29, %v2533_v1  ;;  %v2558_v45 = vsub.f32 %v5311_v0, %v5364_v31  ;;  %v2559_v18 = vsub.f32 %v5317_v21, %v5364_v31  ;;  %v2560_v49 = vsub.f32 %v5323_v28, %v5364_v31 }
 0x23a   :  { %v2561_v26 = vsub.f32 %v5329_v39, %v5364_v31  ;;  %v2562_v13 = vsub.f32 %v5335_v41, %v5364_v31  ;;  %v2563_v53 = vsub.f32 %v5341_v43, %v5364_v31  ;;  %v2564_v44 = vsub.f32 %v5347_v12, %v5364_v31 }
 0x23b   :  { %v2565_v0 = vsub.f32 %v5353_v19, %v5364_v31  ;;  %v2566_v21 = vsub.f32 %v5359_v57, %v5364_v31  ;;  %v2567_v10 = vadd.f32 1e-05, %v2534_v46  ;;  %v2535_v28 = vsub.f32 %v5173_v15, %v5364_v31 }
 0x23c   :  { %v2536_v39 = vsub.f32 %v5177_v60, %v5364_v31  ;;  %v2537_v41 = vsub.f32 %v5180_v58, %v5364_v31  ;;  %v2538_v43 = vsub.f32 %v5185_v38, %v5364_v31  ;;  %v2539_v12 = vsub.f32 %v5192_v33, %v5364_v31 }
 0x23d   :  { %4233 = vrsqrt.f32 %v2567_v10  ;;  %v2540_v19 = vsub.f32 %v5199_v7, %v5364_v31  ;;  %v2541_v63 = vsub.f32 %v5205_v25, %v5364_v31  ;;  %v2542_v15 = vsub.f32 %v5211_v52, %v5364_v31 }
 0x23e   :  { %v2543_v60 = vsub.f32 %v5217_v2, %v5364_v31  ;;  %v2544_v58 = vsub.f32 %v5223_v59, %v5364_v31  ;;  %v2545_v38 = vsub.f32 %v5229_v23, %v5364_v31  ;;  %v2546_v33 = vsub.f32 %v5235_v47, %v5364_v31 }
 0x23f   :  { %v2547_v7 = vsub.f32 %v5241_v42, %v5364_v31  ;;  %v2548_v25 = vsub.f32 %v5247_v8, %v5364_v31  ;;  %v2549_v52 = vsub.f32 %v5253_v61, %v5364_v31  ;;  %v2550_v2 = vsub.f32 %v5258_v56, %v5364_v31 }
 0x240   :  { %v2551_v59 = vsub.f32 %v5265_v51, %v5364_v31 }
 0x24a   :  { %v4234_v3 = vpop.eup %4233 }
 0x24b   :  { %v2569_v23 = vmul.f32 %v4234_v3, %v2535_v28  ;;  %v2570_v4 = vmul.f32 %v4234_v3, %v2536_v39  ;;  %v2571_v35 = vmul.f32 %v4234_v3, %v2537_v41  ;;  %v2572_v47 = vmul.f32 %v4234_v3, %v2538_v43  ;;  %v3176_v39 = vld [vmem:[%s5718_s2 + $0x1] ss:$0 sm:$0xff] }
 0x24c   :  { %v2573_v30 = vmul.f32 %v4234_v3, %v2539_v12  ;;  %v2574_v57 = vmul.f32 %v4234_v3, %v2540_v19  ;;  %v2575_v42 = vmul.f32 %v4234_v3, %v2541_v63  ;;  %v2576_v27 = vmul.f32 %v4234_v3, %v2542_v15 }
 0x24d   :  { %v2577_v11 = vmul.f32 %v4234_v3, %v2543_v60  ;;  %v2578_v55 = vmul.f32 %v4234_v3, %v2544_v58  ;;  %v2579_v8 = vmul.f32 %v4234_v3, %v2545_v38  ;;  %v2580_v54 = vmul.f32 %v4234_v3, %v2546_v33  ;;  %v3177_v33 = vld [vmem:[%s5718_s2 + $0x2] ss:$0 sm:$0xff] }
 0x24e   :  { %v2581_v48 = vmul.f32 %v4234_v3, %v2547_v7  ;;  %v2582_v61 = vmul.f32 %v4234_v3, %v2548_v25  ;;  %v2583_v17 = vmul.f32 %v4234_v3, %v2549_v52  ;;  %v2584_v24 = vmul.f32 %v4234_v3, %v2550_v2 }
 0x24f   :  { %v2585_v56 = vmul.f32 %v4234_v3, %v2551_v59  ;;  %v2586_v34 = vmul.f32 %v4234_v3, %v2552_v20  ;;  %v2587_v6 = vmul.f32 %v4234_v3, %v2553_v37  ;;  %v2588_v51 = vmul.f32 %v4234_v3, %v2554_v9 }
 0x250   :  { %v2589_v16 = vmul.f32 %v4234_v3, %v2555_v22  ;;  %v2590_v50 = vmul.f32 %v4234_v3, %v2556_v32  ;;  %v2591_v62 = vmul.f32 %v4234_v3, %v2557_v14  ;;  %v2592_v5 = vmul.f32 %v4234_v3, %v2558_v45 }
 0x251   :  { %v2593_v40 = vmul.f32 %v4234_v3, %v2559_v18  ;;  %v2594_v31 = vmul.f32 %v4234_v3, %v2560_v49  ;;  %v2595_v36 = vmul.f32 %v4234_v3, %v2561_v26  ;;  %v2596_v29 = vmul.f32 %v4234_v3, %v2562_v13 }
 0x252   :  { %v2597_v1 = vmul.f32 %v4234_v3, %v2563_v53  ;;  %v2598_v46 = vmul.f32 %v4234_v3, %v2564_v44  ;;  %v2599_v10 = vmul.f32 %v4234_v3, %v2565_v0  ;;  %v2600_v28 = vmul.f32 %v4234_v3, %v2566_v21 }
 0x253   :  { %v2606_v41 = vmul.f32 %v3176_v39, %v2569_v23  ;;  %v2607_v20 = vmul.f32 %v3176_v39, %v2570_v4  ;;  %v2608_v37 = vmul.f32 %v3176_v39, %v2571_v35  ;;  %v2609_v9 = vmul.f32 %v3176_v39, %v2572_v47 }
 0x254   :  { %v2610_v22 = vmul.f32 %v3176_v39, %v2573_v30  ;;  %v2611_v32 = vmul.f32 %v3176_v39, %v2574_v57  ;;  %v2612_v14 = vmul.f32 %v3176_v39, %v2575_v42  ;;  %v2613_v45 = vmul.f32 %v3176_v39, %v2576_v27 }
 0x255   :  { %v2614_v18 = vmul.f32 %v3176_v39, %v2577_v11  ;;  %v2615_v49 = vmul.f32 %v3176_v39, %v2578_v55  ;;  %v2616_v26 = vmul.f32 %v3176_v39, %v2579_v8  ;;  %v2617_v13 = vmul.f32 %v3176_v39, %v2580_v54 }
 0x256   :  { %v2618_v53 = vmul.f32 %v3176_v39, %v2581_v48  ;;  %v2619_v44 = vmul.f32 %v3176_v39, %v2582_v61  ;;  %v2620_v0 = vmul.f32 %v3176_v39, %v2583_v17  ;;  %v2621_v21 = vmul.f32 %v3176_v39, %v2584_v24 }
 0x257   :  { %v2622_v43 = vmul.f32 %v3176_v39, %v2585_v56  ;;  %v2623_v12 = vmul.f32 %v3176_v39, %v2586_v34  ;;  %v2624_v19 = vmul.f32 %v3176_v39, %v2587_v6  ;;  %v2625_v63 = vmul.f32 %v3176_v39, %v2588_v51 }
 0x258   :  { %v2626_v15 = vmul.f32 %v3176_v39, %v2589_v16  ;;  %v2627_v60 = vmul.f32 %v3176_v39, %v2590_v50  ;;  %v2628_v58 = vmul.f32 %v3176_v39, %v2591_v62  ;;  %v2629_v38 = vmul.f32 %v3176_v39, %v2592_v5 }
 0x259   :  { %v2630_v7 = vmul.f32 %v3176_v39, %v2593_v40  ;;  %v2631_v3 = vmul.f32 %v3176_v39, %v2594_v31  ;;  %v2632_v25 = vmul.f32 %v3176_v39, %v2595_v36  ;;  %v2633_v52 = vmul.f32 %v3176_v39, %v2596_v29 }
 0x25a   :  { %v2634_v2 = vmul.f32 %v3176_v39, %v2597_v1  ;;  %v2635_v59 = vmul.f32 %v3176_v39, %v2598_v46  ;;  %v2636_v23 = vmul.f32 %v3176_v39, %v2599_v10  ;;  %v2637_v4 = vmul.f32 %v3176_v39, %v2600_v28 }
 0x25b   :  { %v5438_v35 = vadd.f32 %v3177_v33, %v2606_v41  ;;  %v5440_v47 = vadd.f32 %v3177_v33, %v2607_v20  ;;  %v5442_v30 = vadd.f32 %v3177_v33, %v2608_v37  ;;  %v5444_v57 = vadd.f32 %v3177_v33, %v2609_v9 }
 0x25c   :  { %v5446_v42 = vadd.f32 %v3177_v33, %v2610_v22  ;;  %v5448_v27 = vadd.f32 %v3177_v33, %v2611_v32  ;;  %v5450_v11 = vadd.f32 %v3177_v33, %v2612_v14  ;;  %v5452_v55 = vadd.f32 %v3177_v33, %v2613_v45 }
 0x25d   :  { %v5454_v8 = vadd.f32 %v3177_v33, %v2614_v18  ;;  %v5456_v54 = vadd.f32 %v3177_v33, %v2615_v49  ;;  %v5458_v48 = vadd.f32 %v3177_v33, %v2616_v26  ;;  %v5460_v61 = vadd.f32 %v3177_v33, %v2617_v13 }
 0x25e   :  { %v5462_v17 = vadd.f32 %v3177_v33, %v2618_v53  ;;  %v5464_v24 = vadd.f32 %v3177_v33, %v2619_v44  ;;  %v5466_v56 = vadd.f32 %v3177_v33, %v2620_v0  ;;  %v5468_v34 = vadd.f32 %v3177_v33, %v2621_v21 }
 0x25f   :  { %v5470_v6 = vadd.f32 %v3177_v33, %v2622_v43  ;;  %v5472_v51 = vadd.f32 %v3177_v33, %v2623_v12  ;;  %v5474_v16 = vadd.f32 %v3177_v33, %v2624_v19  ;;  %v5476_v50 = vadd.f32 %v3177_v33, %v2625_v63 }
 0x260   :  { %v5478_v62 = vadd.f32 %v3177_v33, %v2626_v15  ;;  %v5480_v5 = vadd.f32 %v3177_v33, %v2627_v60  ;;  %v5482_v40 = vadd.f32 %v3177_v33, %v2628_v58  ;;  %v5484_v31 = vadd.f32 %v3177_v33, %v2629_v38 }
 0x261   :  { %v5486_v36 = vadd.f32 %v3177_v33, %v2630_v7  ;;  %v5488_v29 = vadd.f32 %v3177_v33, %v2631_v3  ;;  %v5490_v1 = vadd.f32 %v3177_v33, %v2632_v25  ;;  %v5492_v46 = vadd.f32 %v3177_v33, %v2633_v52 }
 0x262   :  { %v5494_v10 = vadd.f32 %v3177_v33, %v2634_v2  ;;  %v5496_v28 = vadd.f32 %v3177_v33, %v2635_v59  ;;  %vm2675_vm0 = vcmp.gt.f32.partialorder %v5438_v35, 0.0  ;;  %vm2676_vm1 = vcmp.gt.f32.partialorder %v5440_v47, 0.0 }
 0x263   :  { %vm2677_vm2 = vcmp.gt.f32.partialorder %v5442_v30, 0.0  ;;  %vm2678_vm3 = vcmp.gt.f32.partialorder %v5444_v57, 0.0  ;;  %vm2679_vm4 = vcmp.gt.f32.partialorder %v5446_v42, 0.0  ;;  %vm2680_vm5 = vcmp.gt.f32.partialorder %v5448_v27, 0.0 }
 0x264   :  { %vm2681_vm6 = vcmp.gt.f32.partialorder %v5450_v11, 0.0  ;;  %vm2682_vm7 = vcmp.gt.f32.partialorder %v5452_v55, 0.0  ;;  %vm2683_vm8 = vcmp.gt.f32.partialorder %v5454_v8, 0.0  ;;  %v5508_v39 = vadd.f32 %v3177_v33, %v2636_v23 }
 0x265   :  { %v2707_v41 = vmul.f32 0.01, %v5438_v35  ;;  %v2708_v20 = vmul.f32 0.01, %v5440_v47  ;;  %v2709_v37 = vmul.f32 0.01, %v5442_v30  ;;  %v5517_v9 = vadd.f32 %v3177_v33, %v2637_v4 }
 0x266   :  { %vm2690_vm15 = vcmp.gt.f32.partialorder %v5468_v34, 0.0  ;;  %vm2691_vm10 = vcmp.gt.f32.partialorder %v5470_v6, 0.0  ;;  %v2710_v22 = vmul.f32 0.01, %v5444_v57  ;;  %v2711_v32 = vmul.f32 0.01, %v5446_v42 }
 0x267   :  { %v2712_v14 = vmul.f32 0.01, %v5448_v27  ;;  %vm2696_vm14 = vcmp.gt.f32.partialorder %v5480_v5, 0.0  ;;  %v2713_v45 = vmul.f32 0.01, %v5450_v11  ;;  %v5536_v26 = vsel %vm2675_vm0, %v5438_v35, %v2707_v41 }
 0x268   :  { %v2714_v18 = vmul.f32 0.01, %v5452_v55  ;;  %v2715_v49 = vmul.f32 0.01, %v5454_v8  ;;  %vm2700_vm9 = vcmp.gt.f32.partialorder %v5488_v29, 0.0  ;;  %v5548_v0 = vsel %vm2676_vm1, %v5440_v47, %v2708_v20 }
 0x269   :  { %v2716_v13 = vmul.f32 0.01, %v5456_v54  ;;  %v2717_v53 = vmul.f32 0.01, %v5458_v48  ;;  %v2718_v44 = vmul.f32 0.01, %v5460_v61  ;;  %v2741_v19 = vsel %vm2677_vm2, %v5442_v30, %v2709_v37 }
 0x26a   :  { %vm2702_vm11 = vcmp.gt.f32.partialorder %v5492_v46, 0.0  ;;  %vm2703_vm13 = vcmp.gt.f32.partialorder %v5494_v10, 0.0  ;;  %vm2704_vm12 = vcmp.gt.f32.partialorder %v5496_v28, 0.0  ;;  %v2719_v21 = vmul.f32 0.01, %v5462_v17 }
 0x26b   :  { %v2720_v43 = vmul.f32 0.01, %v5464_v24  ;;  %v2721_v12 = vmul.f32 0.01, %v5466_v56  ;;  %vm2705_vm1 = vcmp.gt.f32.partialorder %v5508_v39, 0.0  ;;  %vm2706_vm0 = vcmp.gt.f32.partialorder %v5517_v9, 0.0 }
 0x26c   :  { %v2722_v63 = vmul.f32 0.01, %v5468_v34  ;;  %v2723_v15 = vmul.f32 0.01, %v5470_v6  ;;  %v2724_v60 = vmul.f32 0.01, %v5472_v51  ;;  %v2742_v58 = vsel %vm2678_vm3, %v5444_v57, %v2710_v22 }
 0x26d   :  { %v2725_v38 = vmul.f32 0.01, %v5474_v16  ;;  %v2726_v33 = vmul.f32 0.01, %v5476_v50  ;;  %v2727_v7 = vmul.f32 0.01, %v5478_v62  ;;  %v2743_v3 = vsel %vm2679_vm4, %v5446_v42, %v2711_v32 }
 0x26e   :  { %v2728_v25 = vmul.f32 0.01, %v5480_v5  ;;  %v2729_v52 = vmul.f32 0.01, %v5482_v40  ;;  %v2730_v2 = vmul.f32 0.01, %v5484_v31  ;;  %v2744_v59 = vsel %vm2680_vm5, %v5448_v27, %v2712_v14 }
 0x26f   :  { %v2731_v23 = vmul.f32 0.01, %v5486_v36  ;;  %v2732_v4 = vmul.f32 0.01, %v5488_v29  ;;  %v2733_v35 = vmul.f32 0.01, %v5490_v1  ;;  %v2745_v47 = vsel %vm2681_vm6, %v5450_v11, %v2713_v45 }
 0x270   :  { %v2734_v30 = vmul.f32 0.01, %v5492_v46  ;;  %v2735_v57 = vmul.f32 0.01, %v5494_v10  ;;  %v2736_v42 = vmul.f32 0.01, %v5496_v28  ;;  %v2746_v27 = vsel %vm2682_vm7, %v5452_v55, %v2714_v18 }
 0x271   :  { %v2737_v41 = vmul.f32 0.01, %v5508_v39  ;;  %v2738_v20 = vmul.f32 0.01, %v5517_v9  ;;  %v2747_v37 = vsel %vm2683_vm8, %v5454_v8, %v2715_v49  ;;  %vm5746_vm2 = vcmp.gt.f32.partialorder %v5456_v54, 0.0 }
 0x272   :  { %v2748_v11 = vsel %vm5746_vm2, %v5456_v54, %v2716_v13  ;;  %vm5747_vm3 = vcmp.gt.f32.partialorder %v5458_v48, 0.0  ;;  %vm5748_vm4 = vcmp.gt.f32.partialorder %v5460_v61, 0.0  ;;  %vm5749_vm5 = vcmp.gt.f32.partialorder %v5462_v17, 0.0 }
 0x273   :  { %v2749_v22 = vsel %vm5747_vm3, %v5458_v48, %v2717_v53  ;;  %v2750_v55 = vsel %vm5748_vm4, %v5460_v61, %v2718_v44  ;;  %v2751_v32 = vsel %vm5749_vm5, %v5462_v17, %v2719_v21  ;;  %vm5750_vm6 = vcmp.gt.f32.partialorder %v5464_v24, 0.0 }
 0x274   :  { %v2752_v8 = vsel %vm5750_vm6, %v5464_v24, %v2720_v43  ;;  %vm5751_vm7 = vcmp.gt.f32.partialorder %v5466_v56, 0.0  ;;  %v2754_v48 = vsel %vm2690_vm15, %v5468_v34, %v2722_v63  ;;  %v2755_v61 = vsel %vm2691_vm10, %v5470_v6, %v2723_v15 }
 0x275   :  { %v2753_v54 = vsel %vm5751_vm7, %v5466_v56, %v2721_v12  ;;  %vm5752_vm8 = vcmp.gt.f32.partialorder %v5472_v51, 0.0  ;;  %vm5753_vm2 = vcmp.gt.f32.partialorder %v5474_v16, 0.0  ;;  %vm5754_vm3 = vcmp.gt.f32.partialorder %v5476_v50, 0.0 }
 0x276   :  { %v2756_v17 = vsel %vm5752_vm8, %v5472_v51, %v2724_v60  ;;  %v2757_v24 = vsel %vm5753_vm2, %v5474_v16, %v2725_v38  ;;  %v2758_v56 = vsel %vm5754_vm3, %v5476_v50, %v2726_v33  ;;  %vm5755_vm4 = vcmp.gt.f32.partialorder %v5478_v62, 0.0 }
 0x277   :  { %v2759_v34 = vsel %vm5755_vm4, %v5478_v62, %v2727_v7  ;;  %v2760_v6 = vsel %vm2696_vm14, %v5480_v5, %v2728_v25  ;;  %vm5756_vm10 = vcmp.gt.f32.partialorder %v5482_v40, 0.0  ;;  %vm5757_vm15 = vcmp.gt.f32.partialorder %v5484_v31, 0.0 }
 0x278   :  { %v2761_v51 = vsel %vm5756_vm10, %v5482_v40, %v2729_v52  ;;  %v2762_v16 = vsel %vm5757_vm15, %v5484_v31, %v2730_v2  ;;  %vm5758_vm5 = vcmp.gt.f32.partialorder %v5486_v36, 0.0  ;;  %v2764_v62 = vsel %vm2700_vm9, %v5488_v29, %v2732_v4 }
 0x279   :  { %v2763_v50 = vsel %vm5758_vm5, %v5486_v36, %v2731_v23  ;;  %vm5759_vm6 = vcmp.gt.f32.partialorder %v5490_v1, 0.0  ;;  %v2766_v40 = vsel %vm2702_vm11, %v5492_v46, %v2734_v30  ;;  %v2767_v31 = vsel %vm2703_vm13, %v5494_v10, %v2735_v57 }
 0x27a   :  { %v2765_v5 = vsel %vm5759_vm6, %v5490_v1, %v2733_v35  ;;  %v2768_v36 = vsel %vm2704_vm12, %v5496_v28, %v2736_v42  ;;  %v2769_v29 = vsel %vm2705_vm1, %v5508_v39, %v2737_v41  ;;  %v2770_v1 = vsel %vm2706_vm0, %v5517_v9, %v2738_v20 }
 0x27b   :  { %v3245_v14 = vpack.c.bf16 %v5548_v0, %v5536_v26  ;;  %v3250_v46 = vpack.c.bf16 %v2742_v58, %v2741_v19  ;;  %v3255_v45 = vpack.c.bf16 %v2744_v59, %v2743_v3  ;;  %v3260_v18 = vpack.c.bf16 %v2746_v27, %v2745_v47 }
 0x27c   :  { %v3265_v49 = vpack.c.bf16 %v2748_v11, %v2747_v37  ;;  %v3270_v10 = vpack.c.bf16 %v2750_v55, %v2749_v22  ;;  %v3275_v28 = vpack.c.bf16 %v2752_v8, %v2751_v32  ;;  %v3280_v39 = vpack.c.bf16 %v2754_v48, %v2753_v54 }
 0x27d   :  { %3246 = vst [vmem:[%s5719_s3] sm:$0xff] %v3245_v14   ;;  %3322 = vst [vmem:[%s5719_s3 + $0x8] sm:$0xff] %v3250_v46   ;;  %v3285_v13 = vpack.c.bf16 %v2756_v17, %v2755_v61  ;;  %v3290_v9 = vpack.c.bf16 %v2758_v56, %v2757_v24  ;;  %v3295_v26 = vpack.c.bf16 %v2760_v6, %v2759_v34 }
 0x27e   :  { %3323 = vst [vmem:[%s5719_s3 + $0x10] sm:$0xff] %v3255_v45   ;;  %3324 = vst [vmem:[%s5719_s3 + $0x18] sm:$0xff] %v3260_v18   ;;  %v3300_v53 = vpack.c.bf16 %v2762_v16, %v2761_v51  ;;  %v3305_v44 = vpack.c.bf16 %v2764_v62, %v2763_v50  ;;  %v3310_v0 = vpack.c.bf16 %v2766_v40, %v2765_v5 }
 0x27f   :  { %3325 = vst [vmem:[%s5719_s3 + $0x20] sm:$0xff] %v3265_v49   ;;  %3326 = vst [vmem:[%s5719_s3 + $0x28] sm:$0xff] %v3270_v10   ;;  %v3315_v21 = vpack.c.bf16 %v2768_v36, %v2767_v31  ;;  %v3320_v43 = vpack.c.bf16 %v2770_v1, %v2769_v29 }
 0x280   :  { %3327 = vst [vmem:[%s5719_s3 + $0x30] sm:$0xff] %v3275_v28   ;;  %3328 = vst [vmem:[%s5719_s3 + $0x38] sm:$0xff] %v3280_v39  }
 0x281   :  { %3329 = vst [vmem:[%s5719_s3 + $0x40] sm:$0xff] %v3285_v13   ;;  %3330 = vst [vmem:[%s5719_s3 + $0x48] sm:$0xff] %v3290_v9  }
 0x282   :  { %3331 = vst [vmem:[%s5719_s3 + $0x50] sm:$0xff] %v3295_v26   ;;  %3332 = vst [vmem:[%s5719_s3 + $0x58] sm:$0xff] %v3300_v53  }
 0x283   :  { %3333 = vst [vmem:[%s5719_s3 + $0x60] sm:$0xff] %v3305_v44   ;;  %3334 = vst [vmem:[%s5719_s3 + $0x68] sm:$0xff] %v3310_v0  }
 0x284   :  { %3335 = vst [vmem:[%s5719_s3 + $0x70] sm:$0xff] %v3315_v21   ;;  %3336 = vst [vmem:[%s5719_s3 + $0x78] sm:$0xff] %v3320_v43  }

// kernel: discriminator_forward.5
= control target key start
LH: loop header
LB: loop body
LE: loop exit
PB: predicated region body
PF: predicated region fallthrough
CT: control target
= control target key end

     0   :  { %s4605_s18 = smov 0   ;;  %s4607_s19 = smov 0   ;;  %s5741_s0 = inlined_call_operand.vmem [shape: bf16[16,8320], index: 0, kind: input, shape index: {}]   ;;  %s5742_s1 = inlined_call_operand.vmem [shape: s8[8320,1024], index: 1, kind: input, shape index: {}]   ;;  %s5743_s2 = inlined_call_operand.vmem [shape: f32[8,1024], index: 2, kind: input, shape index: {}]   ;;  %s5744_s3 = inlined_call_operand.vmem [shape: bf16[1024,128], index: 3, kind: input, shape index: {}]   ;;  %s5745_s4 = inlined_call_operand.vmem [shape: f32[16,128], index: 4, kind: input, shape index: {}]   ;;  %s5746_s5 = inlined_call_operand.vmem [shape: f32[16,128], index: 5, kind: output, shape index: {}]  }
   0x1   :  { %s4609_s20 = smov 0  }
   0x2 LB: > { %s4621_s21 = sadd.s32 4294967295, %s4571_s20   ;;  %s4624_s22 = sadd.s32 1, %s4571_s20   ;;  %s4571_s20 = sphi %s4609_s20, %s5749_s20   ;;  %s4567_s19 = sphi %s4607_s19, %s5748_s19   ;;  %s4563_s18 = sphi %s4605_s18, %s5747_s18  }
   0x3   : > { %s19_s23 = ssub.s32 %s4571_s20, %s4624_s22  ;;  %s22_s24 = sadd.s32 1, %s4567_s19 }
   0x4   : > { %p20_p0 = scmp.eq.s32.totalorder %s19_s23, 0  ;;  %p29_p1 = scmp.ne.s32.totalorder %s4567_s19, %s4563_s18 }
   0x5   : > { %p30_p2 = scmp.eq.s32.totalorder %s4571_s20, 0  ;;  %p4189_p4 = scmp.ge.s32.totalorder %s4571_s20, 5 }
   0x6   : > { %s4633_s25 = scalar_select %p20_p0, %s4567_s19, %s22_s24  }
   0x7   : > { %p31_p3 = por %p30_p2, %p29_p1  ;;  %174 = sbr.rel (%p4189_p4) target bundleno = 24 (0x18), region = 28 }
   0xc   : > { %177 = sbr.rel (!%p31_p3) target bundleno = 24 (0x18), region = 32  ;;  %s179_s26 = sand.u32 (%p31_p3), 1, %s4567_s19  }
   0xd   : > { %s4287_s27 = smul.u32 (%p31_p3), 52, %s4571_s20 }
   0xe   : > { %s4377_s28 = smul.u32 (%p31_p3), 104, %s179_s26 }
   0xf   : > { %s184_s6 = scalar_lea.vmem (%p31_p3), %s5741_s0, %s4287_s27 }
  0x10   : > { %v199_v0 = vld [vmem:[%s184_s6] sm:$0xff] (%p31_p3)  ;;  %v201_v1 = vld [vmem:[%s184_s6 + $0x8] sm:$0xff] (%p31_p3)  ;;  %v203_v2 = vld [vmem:[%s184_s6 + $0x10] sm:$0xff] (%p31_p3)  ;;  %s181_s7 = scalar_lea.vmem (%p31_p3), [#allocation3], %s4377_s28 }
  0x11   : > { %200 = vst [vmem:[%s181_s7] sm:$0xff] %v199_v0  ;;  %202 = vst [vmem:[%s181_s7 + $0x8] sm:$0xff] %v201_v1  ;;  %v205_v3 = vld [vmem:[%s184_s6 + $0x18] sm:$0xff]  ;;  %v207_v4 = vld [vmem:[%s184_s6 + $0x20] sm:$0xff] }
  0x12   : > { %204 = vst [vmem:[%s181_s7 + $0x10] sm:$0xff] %v203_v2  ;;  %v209_v5 = vld [vmem:[%s184_s6 + $0x28] sm:$0xff]  ;;  %206 = vst [vmem:[%s181_s7 + $0x18] sm:$0xff] %v205_v3  ;;  %v215_v8 = vld [vmem:[%s184_s6 + $0x114] sm:$0xff] }
  0x13   : > { %208 = vst [vmem:[%s181_s7 + $0x20] sm:$0xff] %v207_v4  ;;  %210 = vst [vmem:[%s181_s7 + $0x28] sm:$0xff] %v209_v5  ;;  %v211_v6 = vld [vmem:[%s184_s6 + $0x104] sm:$0xff]  ;;  %v213_v7 = vld [vmem:[%s184_s6 + $0x10c] sm:$0xff] }
  0x14   : > { %212 = vst [vmem:[%s181_s7 + $0x34] sm:$0xff] %v211_v6  ;;  %214 = vst [vmem:[%s181_s7 + $0x3c] sm:$0xff] %v213_v7  ;;  %v217_v9 = vld [vmem:[%s184_s6 + $0x11c] sm:$0xff]  ;;  %v219_v10 = vld [vmem:[%s184_s6 + $0x124] sm:$0xff] }
  0x15   : > { %216 = vst [vmem:[%s181_s7 + $0x44] sm:$0xff] %v215_v8  ;;  %v221_v11 = vld [vmem:[%s184_s6 + $0x12c] sm:$0xff]  ;;  %218 = vst [vmem:[%s181_s7 + $0x4c] sm:$0xff] %v217_v9  ;;  %v4193_v13 = vld [vmem:[%s184_s6 + $0x134] sm:$0xf] }
  0x16   : > { %220 = vst [vmem:[%s181_s7 + $0x54] sm:$0xff] %v219_v10  ;;  %222 = vst [vmem:[%s181_s7 + $0x5c] sm:$0xff] %v221_v11  ;;  %v4191_v12 = vld [vmem:[%s184_s6 + $0x30] sm:$0xf] }
  0x17   : > { %4192 = vst [vmem:[%s181_s7 + $0x30] sm:$0xf] %v4191_v12  ;;  %4194 = vst [vmem:[%s181_s7 + $0x64] sm:$0xf] %v4193_v13 }
  0x18 PF: > { %p4195_p5 = scmp.ge.s32.totalorder %s4571_s20, 1  ;;  %p249_p6 = scmp.lt.s32.totalorder %s4571_s20, 6 }
  0x1a   : > { %p250_p7 = pnand %p4195_p5, %p249_p6 }
  0x1b   : > { %s256_s8 = sand.u32 (!%p250_p7), 1, %s4563_s18   ;;  %s285_s9 = smul.u32 (!%p250_p7), 52, %s4621_s21 }
  0x1c   : > { %253 = sbr.rel (%p250_p7) target bundleno = 1452 (0x5ac), region = 62  ;;  %p4198_p9 = scmp.ne.s32.totalorder (!%p250_p7), %s4621_s21, 0 }
  0x1d   : > { %s4378_s10 = smul.u32 (!%p250_p7), 104, %s256_s8  ;;  %p286_p8 = scmp.lt.s32.totalorder (!%p250_p7), %s285_s9, 259 }
  0x1f   : > { %s4650_s15 = scalar_lea.vmem (!%p250_p7), [#allocation3], %s4378_s10 }
  0x21   : > { %s5751_s9 = smov (!%p286_p8, %s285_s9), 259  ;;  %296 = sbr.rel (%p4198_p9) target bundleno = 47 (0x2f), region = 70 }
  0x22   : > { %s4288_s11 = sshll.u32 %s5751_s9, 6 }
  0x23   : > { %s4648_s14 = scalar_lea.vmem %s5742_s1, %s4288_s11 }
  0x26   : > { %v4573_v14 = vmov 0.0  }
  0x27   : > { %297 = vst [vmem:[#allocation2 + $0x30] sm:$0xff] %v4573_v14  ;;  %298 = vst [vmem:[#allocation2] sm:$0xff] %v4573_v14 }
  0x28   : > { %299 = vst [vmem:[#allocation2 + $0x58] sm:$0xff] %v4573_v14  ;;  %300 = vst [vmem:[#allocation2 + $0x18] sm:$0xff] %v4573_v14 }
  0x29   : > { %301 = vst [vmem:[#allocation2 + $0x50] sm:$0xff] %v4573_v14  ;;  %302 = vst [vmem:[#allocation2 + $0x68] sm:$0xff] %v4573_v14 }
  0x2a   : > { %303 = vst [vmem:[#allocation2 + $0x8] sm:$0xff] %v4573_v14  ;;  %304 = vst [vmem:[#allocation2 + $0x48] sm:$0xff] %v4573_v14 }
  0x2b   : > { %305 = vst [vmem:[#allocation2 + $0x40] sm:$0xff] %v4573_v14  ;;  %306 = vst [vmem:[#allocation2 + $0x20] sm:$0xff] %v4573_v14 }
  0x2c   : > { %307 = vst [vmem:[#allocation2 + $0x10] sm:$0xff] %v4573_v14  ;;  %308 = vst [vmem:[#allocation2 + $0x38] sm:$0xff] %v4573_v14 }
  0x2d   : > { %309 = vst [vmem:[#allocation2 + $0x60] sm:$0xff] %v4573_v14  ;;  %310 = vst [vmem:[#allocation2 + $0x70] sm:$0xff] %v4573_v14 }
  0x2e   : > { %311 = vst [vmem:[#allocation2 + $0x78] sm:$0xff] %v4573_v14  ;;  %312 = vst [vmem:[#allocation2 + $0x28] sm:$0xff] %v4573_v14 }
  0x2f PF: > { %v338_v15 = vld [vmem:[%s4648_s14 + $0xc8] sm:$0xff]  ;;  %v337_v17 = vld [vmem:[%s4648_s14 + $0xc0] sm:$0xff]  ;;  %p4212_p10 = scmp.ne.s32.totalorder %s4621_s21, 4 }
  0x30   : > { %v402_v16 = vld [vmem:[%s4648_s14 + $0x2c8] sm:$0xff]  ;;  %v778_v18 = vunpack.c.l.s8.bf16 %v338_v15  ;;  %v786_v19 = vunpack.c.h.s8.bf16 %v338_v15  ;;  %v401_v22 = vld [vmem:[%s4648_s14 + $0x2c0] sm:$0xff]  ;;  %v785_v23 = vunpack.c.h.s8.bf16 %v337_v17  ;;  %v777_v27 = vunpack.c.l.s8.bf16 %v337_v17 }
  0x31   : > { %v906_v20 = vunpack.c.l.s8.bf16 %v402_v16  ;;  %v914_v21 = vunpack.c.h.s8.bf16 %v402_v16  ;;  %v913_v24 = vunpack.c.h.s8.bf16 %v401_v22  ;;  %v330_v25 = vld [vmem:[%s4648_s14 + $0x88] sm:$0xff]  ;;  %v905_v28 = vunpack.c.l.s8.bf16 %v401_v22  ;;  %v329_v31 = vld [vmem:[%s4648_s14 + $0x80] sm:$0xff] }
  0x32   : > { %v394_v26 = vld [vmem:[%s4648_s14 + $0x288] sm:$0xff]  ;;  %1657 = vmatprep.subr.bf16.mxu0 %v786_v19  ;;  %v770_v29 = vunpack.c.h.s8.bf16 %v330_v25  ;;  %v393_v32 = vld [vmem:[%s4648_s14 + $0x280] sm:$0xff]  ;;  %v769_v33 = vunpack.c.h.s8.bf16 %v329_v31  ;;  %v762_v35 = vunpack.c.l.s8.bf16 %v330_v25  ;;  %v761_v40 = vunpack.c.l.s8.bf16 %v329_v31 }
  0x33   : > { %1700 = vmatprep.subr.bf16.mxu1 %v914_v21  ;;  %1658 = vmatpush1.bf16.msra.mxu0 %v785_v23  ;;  %v898_v30 = vunpack.c.h.s8.bf16 %v394_v26  ;;  %v897_v34 = vunpack.c.h.s8.bf16 %v393_v32  ;;  %v890_v36 = vunpack.c.l.s8.bf16 %v394_v26  ;;  %v322_v37 = vld [vmem:[%s4648_s14 + $0x48] sm:$0xff]  ;;  %v889_v41 = vunpack.c.l.s8.bf16 %v393_v32  ;;  %v321_v45 = vld [vmem:[%s4648_s14 + $0x40] sm:$0xff] }
  0x34   : > { %1701 = vmatpush1.bf16.msra.mxu1 %v913_v24  ;;  %1659 = vmatprep.subr.bf16.mxu0 %v778_v18  ;;  %v386_v38 = vld [vmem:[%s4648_s14 + $0x248] sm:$0xff]  ;;  %v754_v43 = vunpack.c.h.s8.bf16 %v322_v37  ;;  %v385_v46 = vld [vmem:[%s4648_s14 + $0x240] sm:$0xff]  ;;  %v753_v47 = vunpack.c.h.s8.bf16 %v321_v45  ;;  %v746_v49 = vunpack.c.l.s8.bf16 %v322_v37  ;;  %v745_v53 = vunpack.c.l.s8.bf16 %v321_v45 }
  0x35   : > { %1702 = vmatprep.subr.bf16.mxu1 %v906_v20  ;;  %v4664_v39 = vld [vmem:[%s4650_s15 + $0x4] ss:$52 sps:$4 sm:$0xff]   ;;  %v4407_v42 = vld [vmem:[%s4650_s15 + $0xc] ss:$52 sps:$4 sm:$0xff]   ;;  %v882_v44 = vunpack.c.h.s8.bf16 %v386_v38  ;;  %v881_v48 = vunpack.c.h.s8.bf16 %v385_v46  ;;  %v874_v50 = vunpack.c.l.s8.bf16 %v386_v38  ;;  %v873_v54 = vunpack.c.l.s8.bf16 %v385_v46 }
  0x36   : > { %1689 = vmatprep.mubr.bf16.mxu0 %v4664_v39  ;;  %1732 = vmatprep.mubr.bf16.mxu1 %v4407_v42  ;;  %v314_v51 = vld [vmem:[%s4648_s14 + $0x8] sm:$0xff]  ;;  %v313_v57 = vld [vmem:[%s4648_s14] sm:$0xff] }
  0x37   : > { %1660 = vmatpush1.bf16.msra.mxu0 %v777_v27  ;;  %v378_v52 = vld [vmem:[%s4648_s14 + $0x208] sm:$0xff]  ;;  %v738_v55 = vunpack.c.h.s8.bf16 %v314_v51  ;;  %v377_v58 = vld [vmem:[%s4648_s14 + $0x200] sm:$0xff]  ;;  %v737_v59 = vunpack.c.h.s8.bf16 %v313_v57  ;;  %v730_v61 = vunpack.c.l.s8.bf16 %v314_v51  ;;  %v729_v1 = vunpack.c.l.s8.bf16 %v313_v57 }
  0x38   : > { %1703 = vmatpush1.bf16.msra.mxu1 %v905_v28  ;;  %1661 = vmatprep.subr.bf16.mxu0 %v770_v29  ;;  %v866_v56 = vunpack.c.h.s8.bf16 %v378_v52  ;;  %v865_v60 = vunpack.c.h.s8.bf16 %v377_v58  ;;  %v858_v62 = vunpack.c.l.s8.bf16 %v378_v52  ;;  %v370_v63 = vld [vmem:[%s4648_s14 + $0x1c8] sm:$0xff]  ;;  %v857_v2 = vunpack.c.l.s8.bf16 %v377_v58  ;;  %v369_v5 = vld [vmem:[%s4648_s14 + $0x1c0] sm:$0xff] }
  0x39   : > { %1704 = vmatprep.subr.bf16.mxu1 %v898_v30  ;;  %v434_v0 = vld [vmem:[%s4648_s14 + $0x3c8] sm:$0xff]  ;;  %v850_v3 = vunpack.c.h.s8.bf16 %v370_v63  ;;  %v433_v6 = vld [vmem:[%s4648_s14 + $0x3c0] sm:$0xff]  ;;  %v849_v7 = vunpack.c.h.s8.bf16 %v369_v5  ;;  %v842_v9 = vunpack.c.l.s8.bf16 %v370_v63  ;;  %v841_v13 = vunpack.c.l.s8.bf16 %v369_v5 }
  0x3a   : > { %v978_v4 = vunpack.c.h.s8.bf16 %v434_v0  ;;  %v977_v8 = vunpack.c.h.s8.bf16 %v433_v6  ;;  %v970_v10 = vunpack.c.l.s8.bf16 %v434_v0  ;;  %v362_v11 = vld [vmem:[%s4648_s14 + $0x188] sm:$0xff]  ;;  %v969_v14 = vunpack.c.l.s8.bf16 %v433_v6  ;;  %v361_v17 = vld [vmem:[%s4648_s14 + $0x180] sm:$0xff] }
  0x3b   : > { %1662 = vmatpush1.bf16.msra.mxu0 %v769_v33  ;;  %v426_v12 = vld [vmem:[%s4648_s14 + $0x388] sm:$0xff]  ;;  %v834_v15 = vunpack.c.h.s8.bf16 %v362_v11  ;;  %v425_v18 = vld [vmem:[%s4648_s14 + $0x380] sm:$0xff]  ;;  %v833_v19 = vunpack.c.h.s8.bf16 %v361_v17  ;;  %v826_v21 = vunpack.c.l.s8.bf16 %v362_v11  ;;  %v825_v25 = vunpack.c.l.s8.bf16 %v361_v17 }
  0x3c   : > { %1705 = vmatpush1.bf16.msra.mxu1 %v897_v34  ;;  %1663 = vmatprep.subr.bf16.mxu0 %v762_v35  ;;  %v962_v16 = vunpack.c.h.s8.bf16 %v426_v12  ;;  %v961_v20 = vunpack.c.h.s8.bf16 %v425_v18  ;;  %v954_v22 = vunpack.c.l.s8.bf16 %v426_v12  ;;  %v354_v23 = vld [vmem:[%s4648_s14 + $0x148] sm:$0xff]  ;;  %v953_v26 = vunpack.c.l.s8.bf16 %v425_v18  ;;  %v353_v29 = vld [vmem:[%s4648_s14 + $0x140] sm:$0xff] }
  0x3d   : > { %1706 = vmatprep.subr.bf16.mxu1 %v890_v36  ;;  %v418_v24 = vld [vmem:[%s4648_s14 + $0x348] sm:$0xff]  ;;  %v818_v27 = vunpack.c.h.s8.bf16 %v354_v23  ;;  %v417_v30 = vld [vmem:[%s4648_s14 + $0x340] sm:$0xff]  ;;  %v817_v31 = vunpack.c.h.s8.bf16 %v353_v29  ;;  %v810_v33 = vunpack.c.l.s8.bf16 %v354_v23  ;;  %v809_v37 = vunpack.c.l.s8.bf16 %v353_v29 }
  0x3e   : > { %v946_v28 = vunpack.c.h.s8.bf16 %v418_v24  ;;  %v945_v32 = vunpack.c.h.s8.bf16 %v417_v30  ;;  %v938_v34 = vunpack.c.l.s8.bf16 %v418_v24  ;;  %v346_v35 = vld [vmem:[%s4648_s14 + $0x108] sm:$0xff]  ;;  %v937_v38 = vunpack.c.l.s8.bf16 %v417_v30  ;;  %v345_v42 = vld [vmem:[%s4648_s14 + $0x100] sm:$0xff] }
  0x3f   : > { %1664 = vmatpush1.bf16.msra.mxu0 %v761_v40  ;;  %v410_v36 = vld [vmem:[%s4648_s14 + $0x308] sm:$0xff]  ;;  %v802_v40 = vunpack.c.h.s8.bf16 %v346_v35  ;;  %v794_v46 = vunpack.c.l.s8.bf16 %v346_v35  ;;  %v457_v6 = vld [vmem:[%s4648_s14 + $0x480] sm:$0xff] }
  0x40   : > { %1707 = vmatpush1.bf16.msra.mxu1 %v889_v41  ;;  %1665 = vmatprep.subr.bf16.mxu0 %v754_v43  ;;  %v930_v41 = vunpack.c.h.s8.bf16 %v410_v36  ;;  %v409_v43 = vld [vmem:[%s4648_s14 + $0x300] sm:$0xff]  ;;  %v522_v63 = vld [vmem:[%s4648_s14 + $0x688] sm:$0xff] }
  0x41   : > { %1708 = vmatprep.subr.bf16.mxu1 %v882_v44  ;;  %v801_v44 = vunpack.c.h.s8.bf16 %v345_v42  ;;  %v929_v45 = vunpack.c.h.s8.bf16 %v409_v43  ;;  %v921_v51 = vunpack.c.l.s8.bf16 %v409_v43  ;;  %v4410_v57 = vld [vmem:[%s4650_s15 + $0x8] ss:$52 sps:$4 sm:$0xff]   ;;  %v1154_v5 = vunpack.c.h.s8.bf16 %v522_v63 }
  0x42   : > { %v4411_v0 = vld [vmem:[%s4650_s15 + $0x14] ss:$52 sps:$4 sm:$0xff]   ;;  %v1146_v11 = vunpack.c.l.s8.bf16 %v522_v63  ;;  %v449_v18 = vld [vmem:[%s4648_s14 + $0x440] sm:$0xff] }
  0x43   : > { %1666 = vmatpush1.bf16.msra.mxu0 %v753_v47  ;;  %v922_v47 = vunpack.c.l.s8.bf16 %v410_v36  ;;  %v450_v12 = vld [vmem:[%s4648_s14 + $0x448] sm:$0xff]  ;;  %v441_v30 = vld [vmem:[%s4648_s14 + $0x400] sm:$0xff] }
  0x44   : > { %1709 = vmatpush1.bf16.msra.mxu1 %v881_v48  ;;  %1667 = vmatprep.subr.bf16.mxu0 %v746_v49  ;;  %v466_v48 = vld [vmem:[%s4648_s14 + $0x4c8] sm:$0xff]  ;;  %v497_v43 = vld [vmem:[%s4648_s14 + $0x5c0] sm:$0xff] }
  0x45   : > { %1710 = vmatprep.subr.bf16.mxu1 %v874_v50  ;;  %v530_v49 = vld [vmem:[%s4648_s14 + $0x6c8] sm:$0xff]  ;;  %v793_v50 = vunpack.c.l.s8.bf16 %v345_v42  ;;  %v1042_v52 = vunpack.c.h.s8.bf16 %v466_v48 }
  0x46   : > { %v442_v24 = vld [vmem:[%s4648_s14 + $0x408] sm:$0xff] }
  0x47   : > { %1668 = vmatpush1.bf16.msra.mxu0 %v745_v53  ;;  %v1170_v53 = vunpack.c.h.s8.bf16 %v530_v49  ;;  %v498_v36 = vld [vmem:[%s4648_s14 + $0x5c8] sm:$0xff] }
  0x48   : > { %1711 = vmatpush1.bf16.msra.mxu1 %v873_v54  ;;  %1669 = vmatprep.subr.bf16.mxu0 %v738_v55  ;;  %v465_v54 = vld [vmem:[%s4648_s14 + $0x4c0] sm:$0xff] }
  0x49   : > { %1712 = vmatprep.subr.bf16.mxu1 %v866_v56  ;;  %v529_v55 = vld [vmem:[%s4648_s14 + $0x6c0] sm:$0xff]  ;;  %v1041_v58 = vunpack.c.h.s8.bf16 %v465_v54 }
  0x4a   : > { %v4409_v56 = vld [vmem:[%s4650_s15] ss:$52 sps:$4 sm:$0xff]  }
  0x4b   : > { %1670 = vmatpush1.bf16.msra.mxu0 %v737_v59  ;;  %v1169_v59 = vunpack.c.h.s8.bf16 %v529_v55 }
  0x4c   : > { %1713 = vmatpush1.bf16.msra.mxu1 %v865_v60  ;;  %1671 = vmatprep.subr.bf16.mxu0 %v730_v61  ;;  %v1034_v60 = vunpack.c.l.s8.bf16 %v466_v48  ;;  %v1162_v61 = vunpack.c.l.s8.bf16 %v530_v49  ;;  %v490_v49 = vld [vmem:[%s4648_s14 + $0x588] sm:$0xff] }
  0x4d   : > { %1714 = vmatprep.subr.bf16.mxu1 %v858_v62  ;;  %v458_v62 = vld [vmem:[%s4648_s14 + $0x488] sm:$0xff] }
  0x4f   : > { %1672 = vmatpush1.bf16.msra.mxu0 %v729_v1  ;;  %v4413_v1 = vld [vmem:[%s4650_s15 + $0x1c] ss:$52 sps:$4 sm:$0xff]  }
  0x50   : > { %1715 = vmatpush1.bf16.msra.mxu1 %v857_v2  ;;  %1673 = vmatprep.subr.bf16.mxu0 %v850_v3  ;;  %v1033_v2 = vunpack.c.l.s8.bf16 %v465_v54  ;;  %v1161_v3 = vunpack.c.l.s8.bf16 %v529_v55  ;;  %v489_v55 = vld [vmem:[%s4648_s14 + $0x580] sm:$0xff] }
  0x51   : > { %1716 = vmatprep.subr.bf16.mxu1 %v978_v4  ;;  %v1026_v4 = vunpack.c.h.s8.bf16 %v458_v62  ;;  %v1081_v63 = vunpack.c.l.s8.bf16 %v489_v55 }
  0x53   : > { %1674 = vmatpush2.bf16.msra.mxu0 %v849_v7  ;;  %v521_v7 = vld [vmem:[%s4648_s14 + $0x680] sm:$0xff] }
  0x54   : > { %1717 = vmatpush2.bf16.msra.mxu1 %v977_v8  ;;  %1675 = vmatprep.subr.bf16.mxu0 %v842_v9  ;;  %v1025_v8 = vunpack.c.h.s8.bf16 %v457_v6  ;;  %v1153_v9 = vunpack.c.h.s8.bf16 %v521_v7 }
  0x55   : > { %1718 = vmatprep.subr.bf16.mxu1 %v970_v10  ;;  %v1018_v10 = vunpack.c.l.s8.bf16 %v458_v62  ;;  %v546_v62 = vld [vmem:[%s4648_s14 + $0x748] sm:$0xff] }
  0x57   : > { %1676 = vmatpush2.bf16.msra.mxu0 %v841_v13  ;;  %v514_v13 = vld [vmem:[%s4648_s14 + $0x648] sm:$0xff] }
  0x58   : > { %1719 = vmatpush2.bf16.msra.mxu1 %v969_v14  ;;  %1677 = vmatprep.subr.bf16.mxu0 %v834_v15  ;;  %v1017_v14 = vunpack.c.l.s8.bf16 %v457_v6  ;;  %v1145_v15 = vunpack.c.l.s8.bf16 %v521_v7  ;;  %v1138_v17 = vunpack.c.h.s8.bf16 %v514_v13  ;;  %v1130_v23 = vunpack.c.l.s8.bf16 %v514_v13 }
  0x59   : > { %1720 = vmatprep.subr.bf16.mxu1 %v962_v16  ;;  %v1010_v16 = vunpack.c.h.s8.bf16 %v450_v12 }
  0x5b   : > { %1678 = vmatpush2.bf16.msra.mxu0 %v833_v19  ;;  %v513_v19 = vld [vmem:[%s4648_s14 + $0x640] sm:$0xff] }
  0x5c   : > { %1721 = vmatpush2.bf16.msra.mxu1 %v961_v20  ;;  %1679 = vmatprep.subr.bf16.mxu0 %v826_v21  ;;  %v1009_v20 = vunpack.c.h.s8.bf16 %v449_v18  ;;  %v1137_v21 = vunpack.c.h.s8.bf16 %v513_v19 }
  0x5d   : > { %1722 = vmatprep.subr.bf16.mxu1 %v954_v22  ;;  %v1002_v22 = vunpack.c.l.s8.bf16 %v450_v12 }
  0x5f   : > { %1680 = vmatpush2.bf16.msra.mxu0 %v825_v25  ;;  %v506_v25 = vld [vmem:[%s4648_s14 + $0x608] sm:$0xff] }
  0x60   : > { %1723 = vmatpush2.bf16.msra.mxu1 %v953_v26  ;;  %1681 = vmatprep.subr.bf16.mxu0 %v818_v27  ;;  %v1001_v26 = vunpack.c.l.s8.bf16 %v449_v18  ;;  %v1129_v27 = vunpack.c.l.s8.bf16 %v513_v19  ;;  %v1122_v29 = vunpack.c.h.s8.bf16 %v506_v25  ;;  %v1114_v35 = vunpack.c.l.s8.bf16 %v506_v25 }
  0x61   : > { %1724 = vmatprep.subr.bf16.mxu1 %v946_v28  ;;  %v994_v28 = vunpack.c.h.s8.bf16 %v442_v24 }
  0x63   : > { %1682 = vmatpush2.bf16.msra.mxu0 %v817_v31  ;;  %v505_v31 = vld [vmem:[%s4648_s14 + $0x600] sm:$0xff] }
  0x64   : > { %1725 = vmatpush2.bf16.msra.mxu1 %v945_v32  ;;  %1683 = vmatprep.subr.bf16.mxu0 %v810_v33  ;;  %v993_v32 = vunpack.c.h.s8.bf16 %v441_v30  ;;  %v1121_v33 = vunpack.c.h.s8.bf16 %v505_v31 }
  0x65   : > { %1726 = vmatprep.subr.bf16.mxu1 %v938_v34  ;;  %v986_v34 = vunpack.c.l.s8.bf16 %v442_v24 }
  0x67   : > { %1684 = vmatpush2.bf16.msra.mxu0 %v809_v37  ;;  %v562_v37 = vld [vmem:[%s4648_s14 + $0x7c8] sm:$0xff] }
  0x68   : > { %1727 = vmatpush2.bf16.msra.mxu1 %v937_v38  ;;  %1685 = vmatprep.subr.bf16.mxu0 %v802_v40  ;;  %v985_v38 = vunpack.c.l.s8.bf16 %v441_v30  ;;  %v1113_v40 = vunpack.c.l.s8.bf16 %v505_v31  ;;  %v1234_v42 = vunpack.c.h.s8.bf16 %v562_v37  ;;  %v1226_v48 = vunpack.c.l.s8.bf16 %v562_v37  ;;  %v4416_v30 = vld [vmem:[%s4650_s15 + $0x18] ss:$52 sps:$4 sm:$0xff]  }
  0x69   : > { %1728 = vmatprep.subr.bf16.mxu1 %v930_v41  ;;  %v1106_v41 = vunpack.c.h.s8.bf16 %v498_v36  ;;  %v4735_v37 = vld [vmem:[%s4650_s15 + $0x24] ss:$52 sps:$4 sm:$0xff]  }
  0x6b   : > { %1686 = vmatpush2.bf16.msra.mxu0 %v801_v44  ;;  %v561_v44 = vld [vmem:[%s4648_s14 + $0x7c0] sm:$0xff] }
  0x6c   : > { %1729 = vmatpush2.bf16.msra.mxu1 %v929_v45  ;;  %1687 = vmatprep.subr.bf16.mxu0 %v794_v46  ;;  %v1105_v45 = vunpack.c.h.s8.bf16 %v497_v43  ;;  %v1233_v46 = vunpack.c.h.s8.bf16 %v561_v44 }
  0x6d   : > { %1730 = vmatprep.subr.bf16.mxu1 %v922_v47  ;;  %v1098_v47 = vunpack.c.l.s8.bf16 %v498_v36  ;;  %v650_v36 = vld [vmem:[%s4648_s14 + $0xa88] sm:$0xff] }
  0x6f   : > { %1688 = vmatpush2.bf16.msra.mxu0 %v793_v50  ;;  %v554_v50 = vld [vmem:[%s4648_s14 + $0x788] sm:$0xff] }
  0x70   : > { %1731 = vmatpush2.bf16.msra.mxu1 %v921_v51  ;;  %1743 = vmatprep.subr.bf16.mxu0 %v1042_v52  ;;  %v1097_v51 = vunpack.c.l.s8.bf16 %v497_v43  ;;  %v1225_v52 = vunpack.c.l.s8.bf16 %v561_v44  ;;  %v1218_v54 = vunpack.c.h.s8.bf16 %v554_v50  ;;  %v1410_v43 = vunpack.c.h.s8.bf16 %v650_v36  ;;  %v585_v44 = vld [vmem:[%s4648_s14 + $0x880] sm:$0xff] }
  0x71   : > { %1786 = vmatprep.subr.bf16.mxu1 %v1170_v53  ;;  %v1090_v53 = vunpack.c.h.s8.bf16 %v490_v49 }
  0x72   : > { %1690 = vmatmul.mubr.bf16.vlgmr.msra.gmra.mxu0 %v4409_v56  ;;  %v553_v56 = vld [vmem:[%s4648_s14 + $0x780] sm:$0xff] }
  0x73   : > { %1733 = vmatmul.mubr.bf16.vlgmr.msra.gmra.mxu1 %v4410_v57  ;;  %1744 = vmatpush1.bf16.msra.mxu0 %v1041_v58  ;;  %v1089_v57 = vunpack.c.h.s8.bf16 %v489_v55  ;;  %v1217_v58 = vunpack.c.h.s8.bf16 %v553_v56 }
  0x74   : > { %1787 = vmatpush1.bf16.msra.mxu1 %v1169_v59  ;;  %1745 = vmatprep.subr.bf16.mxu0 %v1034_v60  ;;  %v1082_v59 = vunpack.c.l.s8.bf16 %v490_v49  ;;  %v1210_v60 = vunpack.c.l.s8.bf16 %v554_v50  ;;  %v1402_v49 = vunpack.c.l.s8.bf16 %v650_v36  ;;  %v578_v50 = vld [vmem:[%s4648_s14 + $0x848] sm:$0xff] }
  0x75   : > { %1788 = vmatprep.subr.bf16.mxu1 %v1162_v61  ;;  %1775 = vmatprep.mubr.bf16.mxu0 %v4411_v0  ;;  %v482_v61 = vld [vmem:[%s4648_s14 + $0x548] sm:$0xff]  ;;  %v1209_v0 = vunpack.c.l.s8.bf16 %v553_v56  ;;  %v577_v56 = vld [vmem:[%s4648_s14 + $0x840] sm:$0xff] }
  0x76   : > { %1818 = vmatprep.mubr.bf16.mxu1 %v4413_v1  ;;  %v1074_v1 = vunpack.c.h.s8.bf16 %v482_v61  ;;  %v1066_v7 = vunpack.c.l.s8.bf16 %v482_v61 }
  0x77   : > { %1746 = vmatpush1.bf16.msra.mxu0 %v1033_v2  ;;  %v1202_v2 = vunpack.c.h.s8.bf16 %v546_v62 }
  0x78   : > { %1789 = vmatpush1.bf16.msra.mxu1 %v1161_v3  ;;  %1747 = vmatprep.subr.bf16.mxu0 %v1026_v4  ;;  %v481_v3 = vld [vmem:[%s4648_s14 + $0x540] sm:$0xff] }
  0x79   : > { %1790 = vmatprep.subr.bf16.mxu1 %v1154_v5  ;;  %v545_v4 = vld [vmem:[%s4648_s14 + $0x740] sm:$0xff]  ;;  %v1073_v5 = vunpack.c.h.s8.bf16 %v481_v3 }
  0x7a   : > { %v1201_v6 = vunpack.c.h.s8.bf16 %v545_v4  ;;  %v1193_v12 = vunpack.c.l.s8.bf16 %v545_v4  ;;  %v569_v4 = vld [vmem:[%s4648_s14 + $0x800] sm:$0xff] }
  0x7b   : > { %1748 = vmatpush1.bf16.msra.mxu0 %v1025_v8  ;;  %v1194_v8 = vunpack.c.l.s8.bf16 %v546_v62  ;;  %v570_v62 = vld [vmem:[%s4648_s14 + $0x808] sm:$0xff] }
  0x7c   : > { %1791 = vmatpush1.bf16.msra.mxu1 %v1153_v9  ;;  %1749 = vmatprep.subr.bf16.mxu0 %v1018_v10  ;;  %v474_v9 = vld [vmem:[%s4648_s14 + $0x508] sm:$0xff] }
  0x7d   : > { %1792 = vmatprep.subr.bf16.mxu1 %v1146_v11  ;;  %v538_v10 = vld [vmem:[%s4648_s14 + $0x708] sm:$0xff]  ;;  %v1065_v11 = vunpack.c.l.s8.bf16 %v481_v3  ;;  %v1058_v13 = vunpack.c.h.s8.bf16 %v474_v9  ;;  %v1050_v19 = vunpack.c.l.s8.bf16 %v474_v9 }
  0x7f   : > { %1750 = vmatpush1.bf16.msra.mxu0 %v1017_v14  ;;  %v1186_v14 = vunpack.c.h.s8.bf16 %v538_v10 }
  0x80   : > { %1793 = vmatpush1.bf16.msra.mxu1 %v1145_v15  ;;  %1751 = vmatprep.subr.bf16.mxu0 %v1010_v16  ;;  %v473_v15 = vld [vmem:[%s4648_s14 + $0x500] sm:$0xff] }
  0x81   : > { %1794 = vmatprep.subr.bf16.mxu1 %v1138_v17  ;;  %v537_v16 = vld [vmem:[%s4648_s14 + $0x700] sm:$0xff]  ;;  %v1057_v17 = vunpack.c.h.s8.bf16 %v473_v15 }
  0x82   : > { %v1185_v18 = vunpack.c.h.s8.bf16 %v537_v16  ;;  %v1177_v24 = vunpack.c.l.s8.bf16 %v537_v16  ;;  %v625_v16 = vld [vmem:[%s4648_s14 + $0x9c0] sm:$0xff] }
  0x83   : > { %1752 = vmatpush1.bf16.msra.mxu0 %v1009_v20  ;;  %v1178_v20 = vunpack.c.l.s8.bf16 %v538_v10  ;;  %v626_v10 = vld [vmem:[%s4648_s14 + $0x9c8] sm:$0xff] }
  0x84   : > { %1795 = vmatpush1.bf16.msra.mxu1 %v1137_v21  ;;  %1753 = vmatprep.subr.bf16.mxu0 %v1002_v22  ;;  %v594_v21 = vld [vmem:[%s4648_s14 + $0x8c8] sm:$0xff] }
  0x85   : > { %1796 = vmatprep.subr.bf16.mxu1 %v1130_v23  ;;  %v658_v22 = vld [vmem:[%s4648_s14 + $0xac8] sm:$0xff]  ;;  %v1049_v23 = vunpack.c.l.s8.bf16 %v473_v15  ;;  %v1298_v25 = vunpack.c.h.s8.bf16 %v594_v21 }
  0x87   : > { %1754 = vmatpush1.bf16.msra.mxu0 %v1001_v26  ;;  %v1426_v26 = vunpack.c.h.s8.bf16 %v658_v22 }
  0x88   : > { %1797 = vmatpush1.bf16.msra.mxu1 %v1129_v27  ;;  %1755 = vmatprep.subr.bf16.mxu0 %v994_v28  ;;  %v593_v27 = vld [vmem:[%s4648_s14 + $0x8c0] sm:$0xff] }
  0x89   : > { %1798 = vmatprep.subr.bf16.mxu1 %v1122_v29  ;;  %v657_v28 = vld [vmem:[%s4648_s14 + $0xac0] sm:$0xff]  ;;  %v1297_v31 = vunpack.c.h.s8.bf16 %v593_v27 }
  0x8a   : > { %v4415_v29 = vld [vmem:[%s4650_s15 + $0x10] ss:$52 sps:$4 sm:$0xff]  }
  0x8b   : > { %1756 = vmatpush1.bf16.msra.mxu0 %v993_v32  ;;  %v1425_v32 = vunpack.c.h.s8.bf16 %v657_v28 }
  0x8c   : > { %1799 = vmatpush1.bf16.msra.mxu1 %v1121_v33  ;;  %1757 = vmatprep.subr.bf16.mxu0 %v986_v34  ;;  %v1290_v33 = vunpack.c.l.s8.bf16 %v594_v21  ;;  %v1418_v34 = vunpack.c.l.s8.bf16 %v658_v22  ;;  %v618_v22 = vld [vmem:[%s4648_s14 + $0x988] sm:$0xff] }
  0x8d   : > { %1800 = vmatprep.subr.bf16.mxu1 %v1114_v35  ;;  %v586_v35 = vld [vmem:[%s4648_s14 + $0x888] sm:$0xff] }
  0x8f   : > { %1758 = vmatpush1.bf16.msra.mxu0 %v985_v38  ;;  %v4419_v38 = vld [vmem:[%s4650_s15 + $0x2c] ss:$52 sps:$4 sm:$0xff]  }
  0x90   : > { %1801 = vmatpush1.bf16.msra.mxu1 %v1113_v40  ;;  %1759 = vmatprep.subr.bf16.mxu0 %v1106_v41  ;;  %v1289_v40 = vunpack.c.l.s8.bf16 %v593_v27  ;;  %v1417_v41 = vunpack.c.l.s8.bf16 %v657_v28  ;;  %v617_v28 = vld [vmem:[%s4648_s14 + $0x980] sm:$0xff] }
  0x91   : > { %1802 = vmatprep.subr.bf16.mxu1 %v1234_v42  ;;  %v1282_v42 = vunpack.c.h.s8.bf16 %v586_v35  ;;  %v1337_v36 = vunpack.c.l.s8.bf16 %v617_v28 }
  0x93   : > { %1760 = vmatpush2.bf16.msra.mxu0 %v1105_v45  ;;  %v649_v45 = vld [vmem:[%s4648_s14 + $0xa80] sm:$0xff] }
  0x94   : > { %1803 = vmatpush2.bf16.msra.mxu1 %v1233_v46  ;;  %1761 = vmatprep.subr.bf16.mxu0 %v1098_v47  ;;  %v1281_v46 = vunpack.c.h.s8.bf16 %v585_v44  ;;  %v1409_v47 = vunpack.c.h.s8.bf16 %v649_v45 }
  0x95   : > { %1804 = vmatprep.subr.bf16.mxu1 %v1226_v48  ;;  %v1274_v48 = vunpack.c.l.s8.bf16 %v586_v35  ;;  %v674_v35 = vld [vmem:[%s4648_s14 + $0xb48] sm:$0xff] }
  0x97   : > { %1762 = vmatpush2.bf16.msra.mxu0 %v1097_v51  ;;  %v642_v51 = vld [vmem:[%s4648_s14 + $0xa48] sm:$0xff] }
  0x98   : > { %1805 = vmatpush2.bf16.msra.mxu1 %v1225_v52  ;;  %1763 = vmatprep.subr.bf16.mxu0 %v1090_v53  ;;  %v1273_v52 = vunpack.c.l.s8.bf16 %v585_v44  ;;  %v1401_v53 = vunpack.c.l.s8.bf16 %v649_v45  ;;  %v1394_v55 = vunpack.c.h.s8.bf16 %v642_v51  ;;  %v1386_v61 = vunpack.c.l.s8.bf16 %v642_v51 }
  0x99   : > { %1806 = vmatprep.subr.bf16.mxu1 %v1218_v54  ;;  %v1266_v54 = vunpack.c.h.s8.bf16 %v578_v50 }
  0x9b   : > { %1764 = vmatpush2.bf16.msra.mxu0 %v1089_v57  ;;  %v641_v57 = vld [vmem:[%s4648_s14 + $0xa40] sm:$0xff] }
  0x9c   : > { %1807 = vmatpush2.bf16.msra.mxu1 %v1217_v58  ;;  %1765 = vmatprep.subr.bf16.mxu0 %v1082_v59  ;;  %v1265_v58 = vunpack.c.h.s8.bf16 %v577_v56  ;;  %v1393_v59 = vunpack.c.h.s8.bf16 %v641_v57 }
  0x9d   : > { %1808 = vmatprep.subr.bf16.mxu1 %v1210_v60  ;;  %v1258_v60 = vunpack.c.l.s8.bf16 %v578_v50 }
  0x9f   : > { %1766 = vmatpush2.bf16.msra.mxu0 %v1081_v63  ;;  %v634_v63 = vld [vmem:[%s4648_s14 + $0xa08] sm:$0xff] }
  0xa0   : > { %1809 = vmatpush2.bf16.msra.mxu1 %v1209_v0  ;;  %1767 = vmatprep.subr.bf16.mxu0 %v1074_v1  ;;  %v1257_v0 = vunpack.c.l.s8.bf16 %v577_v56  ;;  %v1385_v1 = vunpack.c.l.s8.bf16 %v641_v57  ;;  %v1378_v3 = vunpack.c.h.s8.bf16 %v634_v63  ;;  %v1370_v9 = vunpack.c.l.s8.bf16 %v634_v63 }
  0xa1   : > { %1810 = vmatprep.subr.bf16.mxu1 %v1202_v2  ;;  %v1250_v2 = vunpack.c.h.s8.bf16 %v570_v62 }
  0xa3   : > { %1768 = vmatpush2.bf16.msra.mxu0 %v1073_v5  ;;  %v633_v5 = vld [vmem:[%s4648_s14 + $0xa00] sm:$0xff] }
  0xa4   : > { %1811 = vmatpush2.bf16.msra.mxu1 %v1201_v6  ;;  %1769 = vmatprep.subr.bf16.mxu0 %v1066_v7  ;;  %v1249_v6 = vunpack.c.h.s8.bf16 %v569_v4  ;;  %v1377_v7 = vunpack.c.h.s8.bf16 %v633_v5 }
  0xa5   : > { %1812 = vmatprep.subr.bf16.mxu1 %v1194_v8  ;;  %v1242_v8 = vunpack.c.l.s8.bf16 %v570_v62 }
  0xa7   : > { %1770 = vmatpush2.bf16.msra.mxu0 %v1065_v11  ;;  %v690_v11 = vld [vmem:[%s4648_s14 + $0xbc8] sm:$0xff] }
  0xa8   : > { %1813 = vmatpush2.bf16.msra.mxu1 %v1193_v12  ;;  %1771 = vmatprep.subr.bf16.mxu0 %v1058_v13  ;;  %v1241_v12 = vunpack.c.l.s8.bf16 %v569_v4  ;;  %v1369_v13 = vunpack.c.l.s8.bf16 %v633_v5  ;;  %v1490_v15 = vunpack.c.h.s8.bf16 %v690_v11  ;;  %v1482_v21 = vunpack.c.l.s8.bf16 %v690_v11  ;;  %v4421_v4 = vld [vmem:[%s4650_s15 + $0x20] ss:$52 sps:$4 sm:$0xff]   ;;  %v4422_v5 = vld [vmem:[%s4650_s15 + $0x28] ss:$52 sps:$4 sm:$0xff]  }
  0xa9   : > { %1814 = vmatprep.subr.bf16.mxu1 %v1186_v14  ;;  %v1362_v14 = vunpack.c.h.s8.bf16 %v626_v10  ;;  %v332_v11 = vld [vmem:[%s4648_s14 + $0x98] sm:$0xff] }
  0xab   : > { %1772 = vmatpush2.bf16.msra.mxu0 %v1057_v17  ;;  %v689_v17 = vld [vmem:[%s4648_s14 + $0xbc0] sm:$0xff] }
  0xac   : > { %1815 = vmatpush2.bf16.msra.mxu1 %v1185_v18  ;;  %1773 = vmatprep.subr.bf16.mxu0 %v1050_v19  ;;  %v1361_v18 = vunpack.c.h.s8.bf16 %v625_v16  ;;  %v1489_v19 = vunpack.c.h.s8.bf16 %v689_v17 }
  0xad   : > { %1816 = vmatprep.subr.bf16.mxu1 %v1178_v20  ;;  %v1354_v20 = vunpack.c.l.s8.bf16 %v626_v10  ;;  %v714_v10 = vld [vmem:[%s4648_s14 + $0xc88] sm:$0xff] }
  0xaf   : > { %1774 = vmatpush2.bf16.msra.mxu0 %v1049_v23  ;;  %v682_v23 = vld [vmem:[%s4648_s14 + $0xb88] sm:$0xff] }
  0xb0   : > { %1817 = vmatpush2.bf16.msra.mxu1 %v1177_v24  ;;  %1829 = vmatprep.subr.bf16.mxu0 %v1298_v25  ;;  %v1353_v24 = vunpack.c.l.s8.bf16 %v625_v16  ;;  %v1481_v25 = vunpack.c.l.s8.bf16 %v689_v17  ;;  %v1474_v27 = vunpack.c.h.s8.bf16 %v682_v23  ;;  %v713_v16 = vld [vmem:[%s4648_s14 + $0xc80] sm:$0xff]  ;;  %v331_v17 = vld [vmem:[%s4648_s14 + $0x90] sm:$0xff] }
  0xb1   : > { %1872 = vmatprep.subr.bf16.mxu1 %v1426_v26  ;;  %v1346_v26 = vunpack.c.h.s8.bf16 %v618_v22 }
  0xb2   : > { %1776 = vmatmul.mubr.bf16.vlgmr.msra.gmra.mxu0 %v4415_v29  ;;  %v681_v29 = vld [vmem:[%s4648_s14 + $0xb80] sm:$0xff] }
  0xb3   : > { %1819 = vmatmul.mubr.bf16.vlgmr.msra.gmra.mxu1 %v4416_v30  ;;  %1830 = vmatpush1.bf16.msra.mxu0 %v1297_v31  ;;  %v1345_v30 = vunpack.c.h.s8.bf16 %v617_v28  ;;  %v1473_v31 = vunpack.c.h.s8.bf16 %v681_v29  ;;  %v705_v28 = vld [vmem:[%s4648_s14 + $0xc40] sm:$0xff] }
  0xb4   : > { %1873 = vmatpush1.bf16.msra.mxu1 %v1425_v32  ;;  %1831 = vmatprep.subr.bf16.mxu0 %v1290_v33  ;;  %v1338_v32 = vunpack.c.l.s8.bf16 %v618_v22  ;;  %v1466_v33 = vunpack.c.l.s8.bf16 %v682_v23  ;;  %v764_v22 = vunpack.c.l.s8.bf16 %v332_v11  ;;  %v706_v23 = vld [vmem:[%s4648_s14 + $0xc48] sm:$0xff] }
  0xb5   : > { %1874 = vmatprep.subr.bf16.mxu1 %v1418_v34  ;;  %1861 = vmatprep.mubr.bf16.mxu0 %v4735_v37  ;;  %v610_v34 = vld [vmem:[%s4648_s14 + $0x948] sm:$0xff] }
  0xb6   : > { %1904 = vmatprep.mubr.bf16.mxu1 %v4419_v38  ;;  %v1465_v38 = vunpack.c.l.s8.bf16 %v681_v29  ;;  %v323_v29 = vld [vmem:[%s4648_s14 + $0x50] sm:$0xff] }
  0xb7   : > { %1832 = vmatpush1.bf16.msra.mxu0 %v1289_v40  ;;  %v1330_v40 = vunpack.c.h.s8.bf16 %v610_v34 }
  0xb8   : > { %1875 = vmatpush1.bf16.msra.mxu1 %v1417_v41  ;;  %1833 = vmatprep.subr.bf16.mxu0 %v1282_v42  ;;  %v1458_v41 = vunpack.c.h.s8.bf16 %v674_v35  ;;  %v609_v42 = vld [vmem:[%s4648_s14 + $0x940] sm:$0xff] }
  0xb9   : > { %1876 = vmatprep.subr.bf16.mxu1 %v1410_v43  ;;  %v673_v43 = vld [vmem:[%s4648_s14 + $0xb40] sm:$0xff]  ;;  %v1329_v44 = vunpack.c.h.s8.bf16 %v609_v42  ;;  %v1321_v50 = vunpack.c.l.s8.bf16 %v609_v42 }
  0xba   : > { %v1457_v45 = vunpack.c.h.s8.bf16 %v673_v43  ;;  %v1449_v51 = vunpack.c.l.s8.bf16 %v673_v43  ;;  %v697_v42 = vld [vmem:[%s4648_s14 + $0xc00] sm:$0xff]  ;;  %v315_v43 = vld [vmem:[%s4648_s14 + $0x10] sm:$0xff] }
  0xbb   : > { %1834 = vmatpush1.bf16.msra.mxu0 %v1281_v46  ;;  %v1322_v46 = vunpack.c.l.s8.bf16 %v610_v34  ;;  %v698_v34 = vld [vmem:[%s4648_s14 + $0xc08] sm:$0xff] }
  0xbc   : > { %1877 = vmatpush1.bf16.msra.mxu1 %v1409_v47  ;;  %1835 = vmatprep.subr.bf16.mxu0 %v1274_v48  ;;  %v1450_v47 = vunpack.c.l.s8.bf16 %v674_v35  ;;  %v602_v48 = vld [vmem:[%s4648_s14 + $0x908] sm:$0xff]  ;;  %v316_v35 = vld [vmem:[%s4648_s14 + $0x18] sm:$0xff] }
  0xbd   : > { %1878 = vmatprep.subr.bf16.mxu1 %v1402_v49  ;;  %v666_v49 = vld [vmem:[%s4648_s14 + $0xb08] sm:$0xff] }
  0xbf   : > { %1836 = vmatpush1.bf16.msra.mxu0 %v1273_v52  ;;  %v1314_v52 = vunpack.c.h.s8.bf16 %v602_v48 }
  0xc0   : > { %1879 = vmatpush1.bf16.msra.mxu1 %v1401_v53  ;;  %1837 = vmatprep.subr.bf16.mxu0 %v1266_v54  ;;  %v1442_v53 = vunpack.c.h.s8.bf16 %v666_v49  ;;  %v601_v54 = vld [vmem:[%s4648_s14 + $0x900] sm:$0xff] }
  0xc1   : > { %1880 = vmatprep.subr.bf16.mxu1 %v1394_v55  ;;  %v665_v55 = vld [vmem:[%s4648_s14 + $0xb00] sm:$0xff]  ;;  %v1313_v56 = vunpack.c.h.s8.bf16 %v601_v54  ;;  %v1305_v62 = vunpack.c.l.s8.bf16 %v601_v54  ;;  %v371_v54 = vld [vmem:[%s4648_s14 + $0x1d0] sm:$0xff] }
  0xc2   : > { %v1441_v57 = vunpack.c.h.s8.bf16 %v665_v55  ;;  %v1433_v63 = vunpack.c.l.s8.bf16 %v665_v55  ;;  %v403_v55 = vld [vmem:[%s4648_s14 + $0x2d0] sm:$0xff] }
  0xc3   : > { %1838 = vmatpush1.bf16.msra.mxu0 %v1265_v58  ;;  %v1306_v58 = vunpack.c.l.s8.bf16 %v602_v48  ;;  %v372_v48 = vld [vmem:[%s4648_s14 + $0x1d8] sm:$0xff] }
  0xc4   : > { %1881 = vmatpush1.bf16.msra.mxu1 %v1393_v59  ;;  %1839 = vmatprep.subr.bf16.mxu0 %v1258_v60  ;;  %v1434_v59 = vunpack.c.l.s8.bf16 %v666_v49  ;;  %v722_v60 = vld [vmem:[%s4648_s14 + $0xcc8] sm:$0xff]  ;;  %v404_v49 = vld [vmem:[%s4648_s14 + $0x2d8] sm:$0xff] }
  0xc5   : > { %1882 = vmatprep.subr.bf16.mxu1 %v1386_v61  ;;  %v340_v61 = vld [vmem:[%s4648_s14 + $0xd8] sm:$0xff] }
  0xc7   : > { %1840 = vmatpush1.bf16.msra.mxu0 %v1257_v0  ;;  %v1554_v0 = vunpack.c.h.s8.bf16 %v722_v60 }
  0xc8   : > { %1883 = vmatpush1.bf16.msra.mxu1 %v1385_v1  ;;  %1841 = vmatprep.subr.bf16.mxu0 %v1250_v2  ;;  %v788_v1 = vunpack.c.h.s8.bf16 %v340_v61  ;;  %v721_v2 = vld [vmem:[%s4648_s14 + $0xcc0] sm:$0xff] }
  0xc9   : > { %1884 = vmatprep.subr.bf16.mxu1 %v1378_v3  ;;  %v339_v3 = vld [vmem:[%s4648_s14 + $0xd0] sm:$0xff] }
  0xcb   : > { %1842 = vmatpush1.bf16.msra.mxu0 %v1249_v6  ;;  %v1553_v6 = vunpack.c.h.s8.bf16 %v721_v2 }
  0xcc   : > { %1885 = vmatpush1.bf16.msra.mxu1 %v1377_v7  ;;  %1843 = vmatprep.subr.bf16.mxu0 %v1242_v8  ;;  %v787_v7 = vunpack.c.h.s8.bf16 %v339_v3  ;;  %v1546_v8 = vunpack.c.l.s8.bf16 %v722_v60  ;;  %v908_v60 = vunpack.c.l.s8.bf16 %v404_v49 }
  0xcd   : > { %1886 = vmatprep.subr.bf16.mxu1 %v1370_v9  ;;  %v780_v9 = vunpack.c.l.s8.bf16 %v340_v61  ;;  %v364_v61 = vld [vmem:[%s4648_s14 + $0x198] sm:$0xff] }
  0xcf   : > { %1844 = vmatpush1.bf16.msra.mxu0 %v1241_v12  ;;  %v1545_v12 = vunpack.c.l.s8.bf16 %v721_v2 }
  0xd0   : > { %1887 = vmatpush1.bf16.msra.mxu1 %v1369_v13  ;;  %1845 = vmatprep.subr.bf16.mxu0 %v1362_v14  ;;  %v779_v13 = vunpack.c.l.s8.bf16 %v339_v3  ;;  %v1538_v14 = vunpack.c.h.s8.bf16 %v714_v10  ;;  %v363_v3 = vld [vmem:[%s4648_s14 + $0x190] sm:$0xff] }
  0xd1   : > { %1888 = vmatprep.subr.bf16.mxu1 %v1490_v15  ;;  %v772_v15 = vunpack.c.h.s8.bf16 %v332_v11  ;;  %v388_v11 = vld [vmem:[%s4648_s14 + $0x258] sm:$0xff] }
  0xd3   : > { %1846 = vmatpush2.bf16.msra.mxu0 %v1361_v18  ;;  %v4574_v18 = vmov 0  }
  0xd4   : > { %1889 = vmatpush2.bf16.msra.mxu1 %v1489_v19  ;;  %1847 = vmatprep.subr.bf16.mxu0 %v1354_v20  ;;  %v1537_v19 = vunpack.c.h.s8.bf16 %v713_v16  ;;  %v771_v20 = vunpack.c.h.s8.bf16 %v331_v17 }
  0xd5   : > { %1890 = vmatprep.subr.bf16.mxu1 %v1482_v21  ;;  %v1530_v21 = vunpack.c.l.s8.bf16 %v714_v10  ;;  %v356_v10 = vld [vmem:[%s4648_s14 + $0x158] sm:$0xff] }
  0xd7   : > { %1848 = vmatpush2.bf16.msra.mxu0 %v1353_v24  ;;  %v324_v24 = vld [vmem:[%s4648_s14 + $0x58] sm:$0xff] }
  0xd8   : > { %1891 = vmatpush2.bf16.msra.mxu1 %v1481_v25  ;;  %1849 = vmatprep.subr.bf16.mxu0 %v1346_v26  ;;  %v1529_v25 = vunpack.c.l.s8.bf16 %v713_v16  ;;  %v763_v26 = vunpack.c.l.s8.bf16 %v331_v17  ;;  %v355_v16 = vld [vmem:[%s4648_s14 + $0x150] sm:$0xff] }
  0xd9   : > { %1892 = vmatprep.subr.bf16.mxu1 %v1474_v27  ;;  %v756_v27 = vunpack.c.h.s8.bf16 %v324_v24  ;;  %v387_v17 = vld [vmem:[%s4648_s14 + $0x250] sm:$0xff] }
  0xdb   : > { %1850 = vmatpush2.bf16.msra.mxu0 %v1345_v30  ;;  %v1521_v30 = vunpack.c.h.s8.bf16 %v705_v28 }
  0xdc   : > { %1893 = vmatpush2.bf16.msra.mxu1 %v1473_v31  ;;  %1851 = vmatprep.subr.bf16.mxu0 %v1338_v32  ;;  %v755_v31 = vunpack.c.h.s8.bf16 %v323_v29  ;;  %v1514_v32 = vunpack.c.l.s8.bf16 %v706_v23 }
  0xdd   : > { %1894 = vmatprep.subr.bf16.mxu1 %v1466_v33  ;;  %v748_v33 = vunpack.c.l.s8.bf16 %v324_v24  ;;  %v380_v24 = vld [vmem:[%s4648_s14 + $0x218] sm:$0xff] }
  0xdf   : > { %1852 = vmatpush2.bf16.msra.mxu0 %v1337_v36  ;;  %v1513_v36 = vunpack.c.l.s8.bf16 %v705_v28  ;;  %v347_v28 = vld [vmem:[%s4648_s14 + $0x110] sm:$0xff] }
  0xe0   : > { %1895 = vmatpush2.bf16.msra.mxu1 %v1465_v38  ;;  %1853 = vmatprep.subr.bf16.mxu0 %v1330_v40  ;;  %v747_v38 = vunpack.c.l.s8.bf16 %v323_v29  ;;  %v1506_v40 = vunpack.c.h.s8.bf16 %v698_v34  ;;  %v379_v29 = vld [vmem:[%s4648_s14 + $0x210] sm:$0xff] }
  0xe1   : > { %1896 = vmatprep.subr.bf16.mxu1 %v1458_v41  ;;  %v740_v41 = vunpack.c.h.s8.bf16 %v316_v35 }
  0xe3   : > { %1854 = vmatpush2.bf16.msra.mxu0 %v1329_v44  ;;  %v1505_v44 = vunpack.c.h.s8.bf16 %v697_v42 }
  0xe4   : > { %1897 = vmatpush2.bf16.msra.mxu1 %v1457_v45  ;;  %1855 = vmatprep.subr.bf16.mxu0 %v1322_v46  ;;  %v739_v45 = vunpack.c.h.s8.bf16 %v315_v43  ;;  %v1498_v46 = vunpack.c.l.s8.bf16 %v698_v34  ;;  %v436_v34 = vld [vmem:[%s4648_s14 + $0x3d8] sm:$0xff] }
  0xe5   : > { %1898 = vmatprep.subr.bf16.mxu1 %v1450_v47  ;;  %v732_v47 = vunpack.c.l.s8.bf16 %v316_v35  ;;  %v468_v35 = vld [vmem:[%s4648_s14 + $0x4d8] sm:$0xff] }
  0xe7   : > { %1856 = vmatpush2.bf16.msra.mxu0 %v1321_v50  ;;  %v1497_v50 = vunpack.c.l.s8.bf16 %v697_v42  ;;  %v435_v42 = vld [vmem:[%s4648_s14 + $0x3d0] sm:$0xff] }
  0xe8   : > { %1899 = vmatpush2.bf16.msra.mxu1 %v1449_v51  ;;  %1857 = vmatprep.subr.bf16.mxu0 %v1314_v52  ;;  %v731_v51 = vunpack.c.l.s8.bf16 %v315_v43  ;;  %v852_v52 = vunpack.c.h.s8.bf16 %v372_v48  ;;  %v467_v43 = vld [vmem:[%s4648_s14 + $0x4d0] sm:$0xff] }
  0xe9   : > { %1900 = vmatprep.subr.bf16.mxu1 %v1442_v53  ;;  %v916_v53 = vunpack.c.h.s8.bf16 %v404_v49  ;;  %v460_v49 = vld [vmem:[%s4648_s14 + $0x498] sm:$0xff] }
  0xeb   : > { %1858 = vmatpush2.bf16.msra.mxu0 %v1313_v56  ;;  %v4423_v56 = vld [vmem:[%s4650_s15 + $0x30] ss:$52 sps:$4 sm:$0xff]  }
  0xec   : > { %1901 = vmatpush2.bf16.msra.mxu1 %v1441_v57  ;;  %1859 = vmatprep.subr.bf16.mxu0 %v1306_v58  ;;  %v851_v57 = vunpack.c.h.s8.bf16 %v371_v54  ;;  %v915_v58 = vunpack.c.h.s8.bf16 %v403_v55 }
  0xed   : > { %1902 = vmatprep.subr.bf16.mxu1 %v1434_v59  ;;  %v844_v59 = vunpack.c.l.s8.bf16 %v372_v48  ;;  %v428_v48 = vld [vmem:[%s4648_s14 + $0x398] sm:$0xff] }
  0xef   : > { %1860 = vmatpush2.bf16.msra.mxu0 %v1305_v62  ;;  %v396_v62 = vld [vmem:[%s4648_s14 + $0x298] sm:$0xff] }
  0xf0   : > { %1903 = vmatpush2.bf16.msra.mxu1 %v1433_v63  ;;  %1915 = vmatprep.subr.bf16.mxu0 %v1554_v0  ;;  %v843_v63 = vunpack.c.l.s8.bf16 %v371_v54  ;;  %v907_v0 = vunpack.c.l.s8.bf16 %v403_v55  ;;  %v900_v2 = vunpack.c.h.s8.bf16 %v396_v62  ;;  %v1028_v54 = vunpack.c.h.s8.bf16 %v460_v49  ;;  %v427_v55 = vld [vmem:[%s4648_s14 + $0x390] sm:$0xff] }
  0xf1   : > { %1958 = vmatprep.subr.bf16.mxu1 %v788_v1  ;;  %v836_v1 = vunpack.c.h.s8.bf16 %v364_v61 }
  0xf2   : > { %1862 = vmatmul.mubr.bf16.vlgmr.msra.gmra.mxu0 %v4421_v4  ;;  %v395_v4 = vld [vmem:[%s4648_s14 + $0x290] sm:$0xff] }
  0xf3   : > { %1905 = vmatmul.mubr.bf16.vlgmr.msra.gmra.mxu1 %v4422_v5  ;;  %1916 = vmatpush1.bf16.msra.mxu0 %v1553_v6  ;;  %v4424_v5 = vld [vmem:[%s4650_s15 + $0xc] ss:$52 sps:$4 sm:$0xff]   ;;  %v835_v6 = vunpack.c.h.s8.bf16 %v363_v3 }
  0xf4   : > { %1959 = vmatpush1.bf16.msra.mxu1 %v787_v7  ;;  %1917 = vmatprep.subr.bf16.mxu0 %v1546_v8  ;;  %v899_v7 = vunpack.c.h.s8.bf16 %v395_v4  ;;  %v828_v8 = vunpack.c.l.s8.bf16 %v364_v61  ;;  %v1020_v61 = vunpack.c.l.s8.bf16 %v460_v49 }
  0xf5   : > { %1960 = vmatprep.subr.bf16.mxu1 %v780_v9  ;;  %1947 = vmatprep.mubr.bf16.mxu0 %v4574_v18  ;;  %v892_v9 = vunpack.c.l.s8.bf16 %v396_v62  ;;  %v420_v62 = vld [vmem:[%s4648_s14 + $0x358] sm:$0xff] }
  0xf6   : > { %1990 = vmatprep.mubr.bf16.mxu1 %v4664_v39  ;;  %v1522_v39 = vunpack.c.h.s8.bf16 %v706_v23  ;;  %v348_v23 = vld [vmem:[%s4648_s14 + $0x118] sm:$0xff] }
  0xf7   : > { %1918 = vmatpush1.bf16.msra.mxu0 %v1545_v12  ;;  %v827_v12 = vunpack.c.l.s8.bf16 %v363_v3 }
  0xf8   : > { %1961 = vmatpush1.bf16.msra.mxu1 %v779_v13  ;;  %1919 = vmatprep.subr.bf16.mxu0 %v1538_v14  ;;  %v891_v13 = vunpack.c.l.s8.bf16 %v395_v4  ;;  %v820_v14 = vunpack.c.h.s8.bf16 %v356_v10  ;;  %v419_v4 = vld [vmem:[%s4648_s14 + $0x350] sm:$0xff] }
  0xf9   : > { %1962 = vmatprep.subr.bf16.mxu1 %v772_v15  ;;  %v884_v15 = vunpack.c.h.s8.bf16 %v388_v11 }
  0xfb   : > { %1920 = vmatpush1.bf16.msra.mxu0 %v1537_v19  ;;  %v819_v19 = vunpack.c.h.s8.bf16 %v355_v16 }
  0xfc   : > { %1963 = vmatpush1.bf16.msra.mxu1 %v771_v20  ;;  %1921 = vmatprep.subr.bf16.mxu0 %v1530_v21  ;;  %v883_v20 = vunpack.c.h.s8.bf16 %v387_v17  ;;  %v812_v21 = vunpack.c.l.s8.bf16 %v356_v10  ;;  %v412_v10 = vld [vmem:[%s4648_s14 + $0x318] sm:$0xff] }
  0xfd   : > { %1964 = vmatprep.subr.bf16.mxu1 %v764_v22  ;;  %v876_v22 = vunpack.c.l.s8.bf16 %v388_v11  ;;  %v444_v11 = vld [vmem:[%s4648_s14 + $0x418] sm:$0xff] }
  0xff   : > { %1922 = vmatpush1.bf16.msra.mxu0 %v1529_v25  ;;  %v811_v25 = vunpack.c.l.s8.bf16 %v355_v16  ;;  %v411_v16 = vld [vmem:[%s4648_s14 + $0x310] sm:$0xff] }
 0x100   : > { %1965 = vmatpush1.bf16.msra.mxu1 %v763_v26  ;;  %1923 = vmatprep.subr.bf16.mxu0 %v1522_v39  ;;  %v875_v26 = vunpack.c.l.s8.bf16 %v387_v17  ;;  %v804_v39 = vunpack.c.h.s8.bf16 %v348_v23  ;;  %v443_v17 = vld [vmem:[%s4648_s14 + $0x410] sm:$0xff] }
 0x101   : > { %1966 = vmatprep.subr.bf16.mxu1 %v756_v27  ;;  %v868_v27 = vunpack.c.h.s8.bf16 %v380_v24 }
 0x103   : > { %1924 = vmatpush1.bf16.msra.mxu0 %v1521_v30  ;;  %v803_v30 = vunpack.c.h.s8.bf16 %v347_v28 }
 0x104   : > { %1967 = vmatpush1.bf16.msra.mxu1 %v755_v31  ;;  %1925 = vmatprep.subr.bf16.mxu0 %v1514_v32  ;;  %v867_v31 = vunpack.c.h.s8.bf16 %v379_v29  ;;  %v796_v32 = vunpack.c.l.s8.bf16 %v348_v23  ;;  %v500_v23 = vld [vmem:[%s4648_s14 + $0x5d8] sm:$0xff] }
 0x105   : > { %1968 = vmatprep.subr.bf16.mxu1 %v748_v33  ;;  %v860_v33 = vunpack.c.l.s8.bf16 %v380_v24  ;;  %v532_v24 = vld [vmem:[%s4648_s14 + $0x6d8] sm:$0xff] }
 0x107   : > { %1926 = vmatpush1.bf16.msra.mxu0 %v1513_v36  ;;  %v795_v36 = vunpack.c.l.s8.bf16 %v347_v28  ;;  %v499_v28 = vld [vmem:[%s4648_s14 + $0x5d0] sm:$0xff] }
 0x108   : > { %1969 = vmatpush1.bf16.msra.mxu1 %v747_v38  ;;  %1927 = vmatprep.subr.bf16.mxu0 %v1506_v40  ;;  %v859_v38 = vunpack.c.l.s8.bf16 %v379_v29  ;;  %v980_v40 = vunpack.c.h.s8.bf16 %v436_v34  ;;  %v531_v29 = vld [vmem:[%s4648_s14 + $0x6d0] sm:$0xff] }
 0x109   : > { %1970 = vmatprep.subr.bf16.mxu1 %v740_v41  ;;  %v1044_v41 = vunpack.c.h.s8.bf16 %v468_v35 }
 0x10b   : > { %1928 = vmatpush1.bf16.msra.mxu0 %v1505_v44  ;;  %v979_v44 = vunpack.c.h.s8.bf16 %v435_v42 }
 0x10c   : > { %1971 = vmatpush1.bf16.msra.mxu1 %v739_v45  ;;  %1929 = vmatprep.subr.bf16.mxu0 %v1498_v46  ;;  %v1043_v45 = vunpack.c.h.s8.bf16 %v467_v43  ;;  %v972_v46 = vunpack.c.l.s8.bf16 %v436_v34  ;;  %v492_v34 = vld [vmem:[%s4648_s14 + $0x598] sm:$0xff] }
 0x10d   : > { %1972 = vmatprep.subr.bf16.mxu1 %v732_v47  ;;  %v1036_v47 = vunpack.c.l.s8.bf16 %v468_v35  ;;  %v524_v35 = vld [vmem:[%s4648_s14 + $0x698] sm:$0xff] }
 0x10e   : > { %v1148_v49 = vunpack.c.l.s8.bf16 %v524_v35 }
 0x10f   : > { %1930 = vmatpush1.bf16.msra.mxu0 %v1497_v50  ;;  %v4425_v50 = vld [vmem:[%s4650_s15] ss:$52 sps:$4 sm:$0xff]  }
 0x110   : > { %1973 = vmatpush1.bf16.msra.mxu1 %v731_v51  ;;  %2001 = vmatprep.subr.bf16.mxu0 %v916_v53  ;;  %v971_v51 = vunpack.c.l.s8.bf16 %v435_v42  ;;  %v964_v53 = vunpack.c.h.s8.bf16 %v428_v48  ;;  %v1156_v42 = vunpack.c.h.s8.bf16 %v524_v35  ;;  %v548_v35 = vld [vmem:[%s4648_s14 + $0x758] sm:$0xff] }
 0x111   : > { %1974 = vmatprep.subr.bf16.mxu1 %v852_v52  ;;  %v1035_v52 = vunpack.c.l.s8.bf16 %v467_v43  ;;  %v491_v43 = vld [vmem:[%s4648_s14 + $0x590] sm:$0xff] }
 0x112   : > { %1948 = vmatmul.mubr.bf16.vlgmr.msra.gmra.mxu0 %v4423_v56  ;;  %v459_v56 = vld [vmem:[%s4648_s14 + $0x490] sm:$0xff] }
 0x113   : > { %2002 = vmatpush1.bf16.msra.mxu0 %v915_v58  ;;  %2033 = vmatprep.mubr.bf16.mxu0 %v4424_v5  ;;  %v963_v58 = vunpack.c.h.s8.bf16 %v427_v55  ;;  %v451_v5 = vld [vmem:[%s4648_s14 + $0x450] sm:$0xff] }
 0x114   : > { %1975 = vmatpush2.bf16.msra.mxu1 %v851_v57  ;;  %2003 = vmatprep.subr.bf16.mxu0 %v908_v60  ;;  %v4426_v57 = vld [vmem:[%s4650_s15 + $0x14] ss:$52 sps:$4 sm:$0xff]   ;;  %v956_v60 = vunpack.c.l.s8.bf16 %v428_v48  ;;  %v1084_v48 = vunpack.c.l.s8.bf16 %v492_v34 }
 0x115   : > { %1976 = vmatprep.subr.bf16.mxu1 %v844_v59  ;;  %v1027_v59 = vunpack.c.h.s8.bf16 %v459_v56 }
 0x117   : > { %2004 = vmatpush1.bf16.msra.mxu0 %v907_v0  ;;  %v955_v0 = vunpack.c.l.s8.bf16 %v427_v55 }
 0x118   : > { %1977 = vmatpush2.bf16.msra.mxu1 %v843_v63  ;;  %2005 = vmatprep.subr.bf16.mxu0 %v900_v2  ;;  %v452_v63 = vld [vmem:[%s4648_s14 + $0x458] sm:$0xff]  ;;  %v948_v2 = vunpack.c.h.s8.bf16 %v420_v62 }
 0x119   : > { %1978 = vmatprep.subr.bf16.mxu1 %v836_v1  ;;  %v1019_v1 = vunpack.c.l.s8.bf16 %v459_v56  ;;  %v1012_v3 = vunpack.c.h.s8.bf16 %v452_v63  ;;  %v483_v56 = vld [vmem:[%s4648_s14 + $0x550] sm:$0xff] }
 0x11b   : > { %2006 = vmatpush1.bf16.msra.mxu0 %v899_v7  ;;  %v1011_v7 = vunpack.c.h.s8.bf16 %v451_v5 }
 0x11c   : > { %1979 = vmatpush2.bf16.msra.mxu1 %v835_v6  ;;  %2007 = vmatprep.subr.bf16.mxu0 %v892_v9  ;;  %v947_v6 = vunpack.c.h.s8.bf16 %v419_v4  ;;  %v1004_v9 = vunpack.c.l.s8.bf16 %v452_v63  ;;  %v508_v63 = vld [vmem:[%s4648_s14 + $0x618] sm:$0xff] }
 0x11d   : > { %1980 = vmatprep.subr.bf16.mxu1 %v828_v8  ;;  %v940_v8 = vunpack.c.l.s8.bf16 %v420_v62  ;;  %v476_v62 = vld [vmem:[%s4648_s14 + $0x518] sm:$0xff] }
 0x11f   : > { %2008 = vmatpush1.bf16.msra.mxu0 %v891_v13  ;;  %v1003_v13 = vunpack.c.l.s8.bf16 %v451_v5  ;;  %v507_v5 = vld [vmem:[%s4648_s14 + $0x610] sm:$0xff] }
 0x120   : > { %1981 = vmatpush2.bf16.msra.mxu1 %v827_v12  ;;  %2009 = vmatprep.subr.bf16.mxu0 %v884_v15  ;;  %v939_v12 = vunpack.c.l.s8.bf16 %v419_v4  ;;  %v996_v15 = vunpack.c.h.s8.bf16 %v444_v11  ;;  %v475_v4 = vld [vmem:[%s4648_s14 + $0x510] sm:$0xff] }
 0x121   : > { %1982 = vmatprep.subr.bf16.mxu1 %v820_v14  ;;  %v932_v14 = vunpack.c.h.s8.bf16 %v412_v10 }
 0x123   : > { %2010 = vmatpush1.bf16.msra.mxu0 %v883_v20  ;;  %v995_v20 = vunpack.c.h.s8.bf16 %v443_v17 }
 0x124   : > { %1983 = vmatpush2.bf16.msra.mxu1 %v819_v19  ;;  %2011 = vmatprep.subr.bf16.mxu0 %v876_v22  ;;  %v931_v19 = vunpack.c.h.s8.bf16 %v411_v16  ;;  %v988_v22 = vunpack.c.l.s8.bf16 %v444_v11  ;;  %v596_v11 = vld [vmem:[%s4648_s14 + $0x8d8] sm:$0xff] }
 0x125   : > { %1984 = vmatprep.subr.bf16.mxu1 %v812_v21  ;;  %v924_v21 = vunpack.c.l.s8.bf16 %v412_v10  ;;  %v564_v10 = vld [vmem:[%s4648_s14 + $0x7d8] sm:$0xff] }
 0x127   : > { %2012 = vmatpush1.bf16.msra.mxu0 %v875_v26  ;;  %v987_v26 = vunpack.c.l.s8.bf16 %v443_v17  ;;  %v595_v17 = vld [vmem:[%s4648_s14 + $0x8d0] sm:$0xff] }
 0x128   : > { %1985 = vmatpush2.bf16.msra.mxu1 %v811_v25  ;;  %2013 = vmatprep.subr.bf16.mxu0 %v868_v27  ;;  %v923_v25 = vunpack.c.l.s8.bf16 %v411_v16  ;;  %v1172_v27 = vunpack.c.h.s8.bf16 %v532_v24  ;;  %v563_v16 = vld [vmem:[%s4648_s14 + $0x7d0] sm:$0xff] }
 0x129   : > { %1986 = vmatprep.subr.bf16.mxu1 %v804_v39  ;;  %v1108_v39 = vunpack.c.h.s8.bf16 %v500_v23 }
 0x12b   : > { %2014 = vmatpush1.bf16.msra.mxu0 %v867_v31  ;;  %v1171_v31 = vunpack.c.h.s8.bf16 %v531_v29 }
 0x12c   : > { %1987 = vmatpush2.bf16.msra.mxu1 %v803_v30  ;;  %2015 = vmatprep.subr.bf16.mxu0 %v860_v33  ;;  %v1107_v30 = vunpack.c.h.s8.bf16 %v499_v28  ;;  %v1164_v33 = vunpack.c.l.s8.bf16 %v532_v24  ;;  %v588_v24 = vld [vmem:[%s4648_s14 + $0x898] sm:$0xff] }
 0x12d   : > { %1988 = vmatprep.subr.bf16.mxu1 %v796_v32  ;;  %v1100_v32 = vunpack.c.l.s8.bf16 %v500_v23  ;;  %v556_v23 = vld [vmem:[%s4648_s14 + $0x798] sm:$0xff] }
 0x12f   : > { %2016 = vmatpush1.bf16.msra.mxu0 %v859_v38  ;;  %v1099_v38 = vunpack.c.l.s8.bf16 %v499_v28  ;;  %v1284_v28 = vunpack.c.h.s8.bf16 %v588_v24 }
 0x130   : > { %1989 = vmatpush2.bf16.msra.mxu1 %v795_v36  ;;  %2017 = vmatprep.subr.bf16.mxu0 %v980_v40  ;;  %v4427_v36 = vld [vmem:[%s4650_s15 + $0x8] ss:$52 sps:$4 sm:$0xff]   ;;  %v1163_v40 = vunpack.c.l.s8.bf16 %v531_v29 }
 0x131   : > { %2044 = vmatprep.subr.bf16.mxu1 %v1044_v41  ;;  %v1092_v41 = vunpack.c.h.s8.bf16 %v492_v34  ;;  %v555_v29 = vld [vmem:[%s4648_s14 + $0x790] sm:$0xff]  ;;  %v1276_v34 = vunpack.c.l.s8.bf16 %v588_v24  ;;  %v644_v24 = vld [vmem:[%s4648_s14 + $0xa58] sm:$0xff] }
 0x133   : > { %1991 = vmatmul.mubr.bf16.vlgmr.msra.gmra.mxu1 %v4425_v50  ;;  %2018 = vmatpush2.bf16.msra.mxu0 %v979_v44  ;;  %v523_v44 = vld [vmem:[%s4648_s14 + $0x690] sm:$0xff]  ;;  %v484_v50 = vld [vmem:[%s4648_s14 + $0x558] sm:$0xff] }
 0x134   : > { %2045 = vmatpush1.bf16.msra.mxu1 %v1043_v45  ;;  %2019 = vmatprep.subr.bf16.mxu0 %v972_v46  ;;  %v4428_v45 = vld [vmem:[%s4650_s15 + $0x1c] ss:$52 sps:$4 sm:$0xff]   ;;  %v1091_v46 = vunpack.c.h.s8.bf16 %v491_v43 }
 0x135   : > { %2046 = vmatprep.subr.bf16.mxu1 %v1036_v47  ;;  %2076 = vmatprep.mubr.bf16.mxu1 %v4426_v57  ;;  %v1155_v47 = vunpack.c.h.s8.bf16 %v523_v44  ;;  %v515_v57 = vld [vmem:[%s4648_s14 + $0x650] sm:$0xff] }
 0x137   : > { %2020 = vmatpush2.bf16.msra.mxu0 %v971_v51  ;;  %v516_v51 = vld [vmem:[%s4648_s14 + $0x658] sm:$0xff] }
 0x138   : > { %2047 = vmatpush1.bf16.msra.mxu1 %v1035_v52  ;;  %2021 = vmatprep.subr.bf16.mxu0 %v964_v53  ;;  %v1083_v52 = vunpack.c.l.s8.bf16 %v491_v43  ;;  %v1147_v53 = vunpack.c.l.s8.bf16 %v523_v44  ;;  %v1140_v55 = vunpack.c.h.s8.bf16 %v516_v51  ;;  %v579_v43 = vld [vmem:[%s4648_s14 + $0x850] sm:$0xff] }
 0x139   : > { %2048 = vmatprep.subr.bf16.mxu1 %v1028_v54  ;;  %v1076_v54 = vunpack.c.h.s8.bf16 %v484_v50 }
 0x13b   : > { %2022 = vmatpush2.bf16.msra.mxu0 %v963_v58  ;;  %v1075_v58 = vunpack.c.h.s8.bf16 %v483_v56 }
 0x13c   : > { %2049 = vmatpush1.bf16.msra.mxu1 %v1027_v59  ;;  %2023 = vmatprep.subr.bf16.mxu0 %v956_v60  ;;  %v1139_v59 = vunpack.c.h.s8.bf16 %v515_v57  ;;  %v1068_v60 = vunpack.c.l.s8.bf16 %v484_v50 }
 0x13d   : > { %2050 = vmatprep.subr.bf16.mxu1 %v1020_v61  ;;  %v1132_v61 = vunpack.c.l.s8.bf16 %v516_v51  ;;  %v1259_v51 = vunpack.c.l.s8.bf16 %v579_v43 }
 0x13f   : > { %2024 = vmatpush2.bf16.msra.mxu0 %v955_v0  ;;  %v1067_v0 = vunpack.c.l.s8.bf16 %v483_v56 }
 0x140   : > { %2051 = vmatpush1.bf16.msra.mxu1 %v1019_v1  ;;  %2025 = vmatprep.subr.bf16.mxu0 %v948_v2  ;;  %v1131_v1 = vunpack.c.l.s8.bf16 %v515_v57  ;;  %v1060_v2 = vunpack.c.h.s8.bf16 %v476_v62 }
 0x141   : > { %2052 = vmatprep.subr.bf16.mxu1 %v1012_v3  ;;  %v1124_v3 = vunpack.c.h.s8.bf16 %v508_v63 }
 0x143   : > { %2026 = vmatpush2.bf16.msra.mxu0 %v947_v6  ;;  %v1059_v6 = vunpack.c.h.s8.bf16 %v475_v4 }
 0x144   : > { %2053 = vmatpush1.bf16.msra.mxu1 %v1011_v7  ;;  %2027 = vmatprep.subr.bf16.mxu0 %v940_v8  ;;  %v1123_v7 = vunpack.c.h.s8.bf16 %v507_v5  ;;  %v1052_v8 = vunpack.c.l.s8.bf16 %v476_v62 }
 0x145   : > { %2054 = vmatprep.subr.bf16.mxu1 %v1004_v9  ;;  %v1116_v9 = vunpack.c.l.s8.bf16 %v508_v63 }
 0x147   : > { %2028 = vmatpush2.bf16.msra.mxu0 %v939_v12  ;;  %v1051_v12 = vunpack.c.l.s8.bf16 %v475_v4 }
 0x148   : > { %2055 = vmatpush1.bf16.msra.mxu1 %v1003_v13  ;;  %2029 = vmatprep.subr.bf16.mxu0 %v932_v14  ;;  %v1115_v13 = vunpack.c.l.s8.bf16 %v507_v5  ;;  %v1236_v14 = vunpack.c.h.s8.bf16 %v564_v10 }
 0x149   : > { %2056 = vmatprep.subr.bf16.mxu1 %v996_v15  ;;  %v1300_v15 = vunpack.c.h.s8.bf16 %v596_v11 }
 0x14b   : > { %2030 = vmatpush2.bf16.msra.mxu0 %v931_v19  ;;  %v1235_v19 = vunpack.c.h.s8.bf16 %v563_v16 }
 0x14c   : > { %2057 = vmatpush1.bf16.msra.mxu1 %v995_v20  ;;  %2031 = vmatprep.subr.bf16.mxu0 %v924_v21  ;;  %v1299_v20 = vunpack.c.h.s8.bf16 %v595_v17  ;;  %v1228_v21 = vunpack.c.l.s8.bf16 %v564_v10  ;;  %v4430_v10 = vld [vmem:[%s4650_s15 + $0x18] ss:$52 sps:$4 sm:$0xff]  }
 0x14d   : > { %2058 = vmatprep.subr.bf16.mxu1 %v988_v22  ;;  %v1292_v22 = vunpack.c.l.s8.bf16 %v596_v11 }
 0x14f   : > { %2032 = vmatpush2.bf16.msra.mxu0 %v923_v25  ;;  %v4429_v25 = vld [vmem:[%s4650_s15 + $0x10] ss:$52 sps:$4 sm:$0xff]  }
 0x150   : > { %2059 = vmatpush1.bf16.msra.mxu1 %v987_v26  ;;  %2087 = vmatprep.subr.bf16.mxu0 %v1172_v27  ;;  %v1227_v26 = vunpack.c.l.s8.bf16 %v563_v16  ;;  %v1220_v27 = vunpack.c.h.s8.bf16 %v556_v23  ;;  %v651_v16 = vld [vmem:[%s4648_s14 + $0xa90] sm:$0xff] }
 0x151   : > { %2060 = vmatprep.subr.bf16.mxu1 %v1108_v39  ;;  %v1291_v39 = vunpack.c.l.s8.bf16 %v595_v17  ;;  %v4431_v17 = vld [vmem:[%s4650_s15 + $0x2c] ss:$52 sps:$4 sm:$0xff]  }
 0x152   : > { %2034 = vmatmul.mubr.bf16.vlgmr.msra.gmra.mxu0 %v4427_v36  ;;  %v580_v36 = vld [vmem:[%s4648_s14 + $0x858] sm:$0xff] }
 0x153   : > { %2088 = vmatpush1.bf16.msra.mxu0 %v1171_v31  ;;  %2119 = vmatprep.mubr.bf16.mxu0 %v4428_v45  ;;  %v1219_v31 = vunpack.c.h.s8.bf16 %v555_v29  ;;  %v1267_v45 = vunpack.c.h.s8.bf16 %v579_v43 }
 0x154   : > { %2061 = vmatpush2.bf16.msra.mxu1 %v1107_v30  ;;  %2089 = vmatprep.subr.bf16.mxu0 %v1164_v33  ;;  %v587_v30 = vld [vmem:[%s4648_s14 + $0x890] sm:$0xff]  ;;  %v1212_v33 = vunpack.c.l.s8.bf16 %v556_v23  ;;  %v612_v23 = vld [vmem:[%s4648_s14 + $0x958] sm:$0xff] }
 0x155   : > { %2062 = vmatprep.subr.bf16.mxu1 %v1100_v32  ;;  %v1283_v32 = vunpack.c.h.s8.bf16 %v587_v30 }
 0x157   : > { %2090 = vmatpush1.bf16.msra.mxu0 %v1163_v40  ;;  %v1275_v40 = vunpack.c.l.s8.bf16 %v587_v30 }
 0x158   : > { %2063 = vmatpush2.bf16.msra.mxu1 %v1099_v38  ;;  %2091 = vmatprep.subr.bf16.mxu0 %v1156_v42  ;;  %v1211_v38 = vunpack.c.l.s8.bf16 %v555_v29  ;;  %v547_v42 = vld [vmem:[%s4648_s14 + $0x750] sm:$0xff] }
 0x159   : > { %2064 = vmatprep.subr.bf16.mxu1 %v1092_v41  ;;  %v1268_v41 = vunpack.c.h.s8.bf16 %v580_v36  ;;  %v1203_v44 = vunpack.c.h.s8.bf16 %v547_v42  ;;  %v1195_v50 = vunpack.c.l.s8.bf16 %v547_v42  ;;  %v643_v29 = vld [vmem:[%s4648_s14 + $0xa50] sm:$0xff] }
 0x15a   : > { %v635_v42 = vld [vmem:[%s4648_s14 + $0xa10] sm:$0xff] }
 0x15b   : > { %2092 = vmatpush1.bf16.msra.mxu0 %v1155_v47  ;;  %v1260_v47 = vunpack.c.l.s8.bf16 %v580_v36 }
 0x15c   : > { %2065 = vmatpush2.bf16.msra.mxu1 %v1091_v46  ;;  %2093 = vmatprep.subr.bf16.mxu0 %v1148_v49  ;;  %v1196_v46 = vunpack.c.l.s8.bf16 %v548_v35  ;;  %v572_v49 = vld [vmem:[%s4648_s14 + $0x818] sm:$0xff] }
 0x15d   : > { %2066 = vmatprep.subr.bf16.mxu1 %v1084_v48  ;;  %v540_v48 = vld [vmem:[%s4648_s14 + $0x718] sm:$0xff] }
 0x15f   : > { %2094 = vmatpush1.bf16.msra.mxu0 %v1147_v53  ;;  %v1252_v53 = vunpack.c.h.s8.bf16 %v572_v49 }
 0x160   : > { %2067 = vmatpush2.bf16.msra.mxu1 %v1083_v52  ;;  %2095 = vmatprep.subr.bf16.mxu0 %v1140_v55  ;;  %v1188_v52 = vunpack.c.h.s8.bf16 %v540_v48  ;;  %v571_v55 = vld [vmem:[%s4648_s14 + $0x810] sm:$0xff] }
 0x161   : > { %2068 = vmatprep.subr.bf16.mxu1 %v1076_v54  ;;  %v539_v54 = vld [vmem:[%s4648_s14 + $0x710] sm:$0xff]  ;;  %v1251_v57 = vunpack.c.h.s8.bf16 %v571_v55  ;;  %v1243_v63 = vunpack.c.l.s8.bf16 %v571_v55 }
 0x162   : > { %v1187_v56 = vunpack.c.h.s8.bf16 %v539_v54  ;;  %v1179_v62 = vunpack.c.l.s8.bf16 %v539_v54  ;;  %v691_v55 = vld [vmem:[%s4648_s14 + $0xbd0] sm:$0xff] }
 0x163   : > { %2096 = vmatpush1.bf16.msra.mxu0 %v1139_v59  ;;  %v1244_v59 = vunpack.c.l.s8.bf16 %v572_v49  ;;  %v724_v49 = vld [vmem:[%s4648_s14 + $0xcd8] sm:$0xff] }
 0x164   : > { %2069 = vmatpush2.bf16.msra.mxu1 %v1075_v58  ;;  %2097 = vmatprep.subr.bf16.mxu0 %v1132_v61  ;;  %v1180_v58 = vunpack.c.l.s8.bf16 %v540_v48  ;;  %v660_v61 = vld [vmem:[%s4648_s14 + $0xad8] sm:$0xff]  ;;  %v1556_v54 = vunpack.c.h.s8.bf16 %v724_v49 }
 0x165   : > { %2070 = vmatprep.subr.bf16.mxu1 %v1068_v60  ;;  %v628_v60 = vld [vmem:[%s4648_s14 + $0x9d8] sm:$0xff] }
 0x166   : > { %v692_v48 = vld [vmem:[%s4648_s14 + $0xbd8] sm:$0xff] }
 0x167   : > { %2098 = vmatpush1.bf16.msra.mxu0 %v1131_v1  ;;  %v1428_v1 = vunpack.c.h.s8.bf16 %v660_v61 }
 0x168   : > { %2071 = vmatpush2.bf16.msra.mxu1 %v1067_v0  ;;  %2099 = vmatprep.subr.bf16.mxu0 %v1124_v3  ;;  %v1364_v0 = vunpack.c.h.s8.bf16 %v628_v60  ;;  %v659_v3 = vld [vmem:[%s4648_s14 + $0xad0] sm:$0xff] }
 0x169   : > { %2072 = vmatprep.subr.bf16.mxu1 %v1060_v2  ;;  %v627_v2 = vld [vmem:[%s4648_s14 + $0x9d0] sm:$0xff]  ;;  %v1427_v5 = vunpack.c.h.s8.bf16 %v659_v3 }
 0x16a   : > { %v1363_v4 = vunpack.c.h.s8.bf16 %v627_v2  ;;  %v1355_v11 = vunpack.c.l.s8.bf16 %v627_v2  ;;  %v4432_v2 = vld [vmem:[%s4650_s15 + $0x20] ss:$52 sps:$4 sm:$0xff]  }
 0x16b   : > { %2100 = vmatpush1.bf16.msra.mxu0 %v1123_v7  ;;  %v1420_v7 = vunpack.c.l.s8.bf16 %v660_v61  ;;  %v1484_v61 = vunpack.c.l.s8.bf16 %v692_v48 }
 0x16c   : > { %2073 = vmatpush2.bf16.msra.mxu1 %v1059_v6  ;;  %2101 = vmatprep.subr.bf16.mxu0 %v1116_v9  ;;  %v1356_v6 = vunpack.c.l.s8.bf16 %v628_v60  ;;  %v652_v9 = vld [vmem:[%s4648_s14 + $0xa98] sm:$0xff] }
 0x16d   : > { %2074 = vmatprep.subr.bf16.mxu1 %v1052_v8  ;;  %v620_v8 = vld [vmem:[%s4648_s14 + $0x998] sm:$0xff] }
 0x16f   : > { %2102 = vmatpush1.bf16.msra.mxu0 %v1115_v13  ;;  %v1348_v13 = vunpack.c.h.s8.bf16 %v620_v8 }
 0x170   : > { %2075 = vmatpush2.bf16.msra.mxu1 %v1051_v12  ;;  %2103 = vmatprep.subr.bf16.mxu0 %v1236_v14  ;;  %v1419_v12 = vunpack.c.l.s8.bf16 %v659_v3  ;;  %v1412_v14 = vunpack.c.h.s8.bf16 %v652_v9  ;;  %v1483_v3 = vunpack.c.l.s8.bf16 %v691_v55 }
 0x171   : > { %2130 = vmatprep.subr.bf16.mxu1 %v1300_v15  ;;  %v619_v15 = vld [vmem:[%s4648_s14 + $0x990] sm:$0xff] }
 0x173   : > { %2077 = vmatmul.mubr.bf16.vlgmr.msra.gmra.mxu1 %v4429_v25  ;;  %2104 = vmatpush2.bf16.msra.mxu0 %v1235_v19  ;;  %v1347_v19 = vunpack.c.h.s8.bf16 %v619_v15  ;;  %v1339_v25 = vunpack.c.l.s8.bf16 %v619_v15 }
 0x174   : > { %2131 = vmatpush1.bf16.msra.mxu1 %v1299_v20  ;;  %2105 = vmatprep.subr.bf16.mxu0 %v1228_v21  ;;  %v1411_v20 = vunpack.c.h.s8.bf16 %v651_v16  ;;  %v1340_v21 = vunpack.c.l.s8.bf16 %v620_v8  ;;  %v683_v8 = vld [vmem:[%s4648_s14 + $0xb90] sm:$0xff] }
 0x175   : > { %2132 = vmatprep.subr.bf16.mxu1 %v1292_v22  ;;  %2162 = vmatprep.mubr.bf16.mxu1 %v4735_v37  ;;  %v1204_v37 = vunpack.c.h.s8.bf16 %v548_v35  ;;  %v1404_v22 = vunpack.c.l.s8.bf16 %v652_v9  ;;  %v636_v35 = vld [vmem:[%s4648_s14 + $0xa18] sm:$0xff]  ;;  %v715_v9 = vld [vmem:[%s4648_s14 + $0xc90] sm:$0xff] }
 0x177   : > { %2106 = vmatpush2.bf16.msra.mxu0 %v1227_v26  ;;  %v1403_v26 = vunpack.c.l.s8.bf16 %v651_v16  ;;  %v676_v16 = vld [vmem:[%s4648_s14 + $0xb58] sm:$0xff] }
 0x178   : > { %2133 = vmatpush1.bf16.msra.mxu1 %v1291_v39  ;;  %2107 = vmatprep.subr.bf16.mxu0 %v1220_v27  ;;  %v1332_v39 = vunpack.c.h.s8.bf16 %v612_v23  ;;  %v1396_v27 = vunpack.c.h.s8.bf16 %v644_v24 }
 0x179   : > { %2134 = vmatprep.subr.bf16.mxu1 %v1284_v28  ;;  %v611_v28 = vld [vmem:[%s4648_s14 + $0x950] sm:$0xff] }
 0x17a   : > { %v1331_v30 = vunpack.c.h.s8.bf16 %v611_v28  ;;  %v1323_v36 = vunpack.c.l.s8.bf16 %v611_v28 }
 0x17b   : > { %2108 = vmatpush2.bf16.msra.mxu0 %v1219_v31  ;;  %v1395_v31 = vunpack.c.h.s8.bf16 %v643_v29 }
 0x17c   : > { %2135 = vmatpush1.bf16.msra.mxu1 %v1283_v32  ;;  %2109 = vmatprep.subr.bf16.mxu0 %v1212_v33  ;;  %v1324_v32 = vunpack.c.l.s8.bf16 %v612_v23  ;;  %v1388_v33 = vunpack.c.l.s8.bf16 %v644_v24  ;;  %v1460_v24 = vunpack.c.h.s8.bf16 %v676_v16 }
 0x17d   : > { %2136 = vmatprep.subr.bf16.mxu1 %v1276_v34  ;;  %v604_v34 = vld [vmem:[%s4648_s14 + $0x918] sm:$0xff] }
 0x17f   : > { %2110 = vmatpush2.bf16.msra.mxu0 %v1211_v38  ;;  %v1387_v38 = vunpack.c.l.s8.bf16 %v643_v29 }
 0x180   : > { %2137 = vmatpush1.bf16.msra.mxu1 %v1275_v40  ;;  %2111 = vmatprep.subr.bf16.mxu0 %v1204_v37  ;;  %v1316_v40 = vunpack.c.h.s8.bf16 %v604_v34  ;;  %v1380_v37 = vunpack.c.h.s8.bf16 %v636_v35 }
 0x181   : > { %2138 = vmatprep.subr.bf16.mxu1 %v1268_v41  ;;  %v603_v41 = vld [vmem:[%s4648_s14 + $0x910] sm:$0xff] }
 0x182   : > { %v1315_v43 = vunpack.c.h.s8.bf16 %v603_v41 }
 0x183   : > { %2112 = vmatpush2.bf16.msra.mxu0 %v1203_v44  ;;  %v1379_v44 = vunpack.c.h.s8.bf16 %v635_v42 }
 0x184   : > { %2139 = vmatpush1.bf16.msra.mxu1 %v1267_v45  ;;  %2113 = vmatprep.subr.bf16.mxu0 %v1196_v46  ;;  %v4875_v45 = vpop.f32.mrf.mxu0  ;;  %v1308_v46 = vunpack.c.l.s8.bf16 %v604_v34  ;;  %v700_v34 = vld [vmem:[%s4648_s14 + $0xc18] sm:$0xff] }
 0x185   : > { %2140 = vmatprep.subr.bf16.mxu1 %v1260_v47  ;;  %v1372_v47 = vunpack.c.l.s8.bf16 %v636_v35 }
 0x187   : > { %2114 = vmatpush2.bf16.msra.mxu0 %v1195_v50  ;;  %v1307_v50 = vunpack.c.l.s8.bf16 %v603_v41 }
 0x188   : > { %2141 = vmatpush1.bf16.msra.mxu1 %v1259_v51  ;;  %2115 = vmatprep.subr.bf16.mxu0 %v1188_v52  ;;  %v1371_v51 = vunpack.c.l.s8.bf16 %v635_v42  ;;  %v4879_v52 = vpop.f32.mrf.mxu0  ;;  %v1508_v42 = vunpack.c.h.s8.bf16 %v700_v34 }
 0x189   : > { %2142 = vmatprep.subr.bf16.mxu1 %v1252_v53  ;;  %v1492_v53 = vunpack.c.h.s8.bf16 %v692_v48 }
 0x18a   : > { %v4885_v60 = vpop.f32.mrf.mxu0 }
 0x18b   : > { %2116 = vmatpush2.bf16.msra.mxu0 %v1187_v56  ;;  %v723_v56 = vld [vmem:[%s4648_s14 + $0xcd0] sm:$0xff] }
 0x18c   : > { %2143 = vmatpush1.bf16.msra.mxu1 %v1251_v57  ;;  %2117 = vmatprep.subr.bf16.mxu0 %v1180_v58  ;;  %v4883_v57 = vpop.f32.mrf.mxu1  ;;  %v1491_v58 = vunpack.c.h.s8.bf16 %v691_v55  ;;  %v1500_v55 = vunpack.c.l.s8.bf16 %v700_v34 }
 0x18d   : > { %2144 = vmatprep.subr.bf16.mxu1 %v1244_v59  ;;  %v1555_v59 = vunpack.c.h.s8.bf16 %v723_v56 }
 0x18f   : > { %2118 = vmatpush2.bf16.msra.mxu0 %v1179_v62  ;;  %v1548_v62 = vunpack.c.l.s8.bf16 %v724_v49 }
 0x190   : > { %2145 = vmatpush1.bf16.msra.mxu1 %v1243_v63  ;;  %2173 = vmatprep.subr.bf16.mxu0 %v1428_v1  ;;  %v684_v63 = vld [vmem:[%s4648_s14 + $0xb98] sm:$0xff]  ;;  %v4889_v1 = vpop.f32.mrf.mxu1 }
 0x191   : > { %2146 = vmatprep.subr.bf16.mxu1 %v1364_v0  ;;  %v716_v0 = vld [vmem:[%s4648_s14 + $0xc98] sm:$0xff] }
 0x192   : > { %2120 = vmatmul.mubr.bf16.vlgmr.msra.gmra.mxu0 %v4430_v10  ;;  %v4897_v10 = vpop.f32.mrf.mxu1  ;;  %v1532_v15 = vunpack.c.l.s8.bf16 %v716_v0 }
 0x193   : > { %2174 = vmatpush1.bf16.msra.mxu0 %v1427_v5  ;;  %2205 = vmatprep.mubr.bf16.mxu0 %v4431_v17  ;;  %v4892_v5 = vpop.f32.mrf.mxu0  ;;  %v708_v17 = vld [vmem:[%s4648_s14 + $0xc58] sm:$0xff] }
 0x194   : > { %2147 = vmatpush2.bf16.msra.mxu1 %v1363_v4  ;;  %2175 = vmatprep.subr.bf16.mxu0 %v1420_v7  ;;  %v1547_v4 = vunpack.c.l.s8.bf16 %v723_v56  ;;  %v1540_v7 = vunpack.c.h.s8.bf16 %v716_v0  ;;  %v1739_v56 = vadd.f32 %v4897_v10, %v4885_v60  ;;  %v341_v60 = vld [vmem:[%s4648_s14 + $0xe0] sm:$0xff] }
 0x195   : > { %2148 = vmatprep.subr.bf16.mxu1 %v1356_v6  ;;  %v1476_v6 = vunpack.c.h.s8.bf16 %v684_v63 }
 0x197   : > { %2176 = vmatpush1.bf16.msra.mxu0 %v1419_v12  ;;  %v1475_v12 = vunpack.c.h.s8.bf16 %v683_v8 }
 0x198   : > { %2149 = vmatpush2.bf16.msra.mxu1 %v1355_v11  ;;  %2177 = vmatprep.subr.bf16.mxu0 %v1412_v14  ;;  %v1777_v11 = vpop.f32.mrf.mxu0  ;;  %v1468_v14 = vunpack.c.l.s8.bf16 %v684_v63 }
 0x199   : > { %2150 = vmatprep.subr.bf16.mxu1 %v1348_v13  ;;  %v1539_v13 = vunpack.c.h.s8.bf16 %v715_v9 }
 0x19b   : > { %2178 = vmatpush1.bf16.msra.mxu0 %v1411_v20  ;;  %v1779_v20 = vpop.f32.mrf.mxu0 }
 0x19c   : > { %2151 = vmatpush2.bf16.msra.mxu1 %v1347_v19  ;;  %2179 = vmatprep.subr.bf16.mxu0 %v1404_v22  ;;  %v1740_v19 = vpop.f32.mrf.mxu1  ;;  %v1531_v22 = vunpack.c.l.s8.bf16 %v715_v9 }
 0x19d   : > { %2152 = vmatprep.subr.bf16.mxu1 %v1340_v21  ;;  %v1467_v21 = vunpack.c.l.s8.bf16 %v683_v8 }
 0x19e   : > { %v1820_v23 = vpop.f32.mrf.mxu1 }
 0x19f   : > { %2180 = vmatpush1.bf16.msra.mxu0 %v1403_v26  ;;  %v675_v26 = vld [vmem:[%s4648_s14 + $0xb50] sm:$0xff] }
 0x1a0   : > { %2153 = vmatpush2.bf16.msra.mxu1 %v1339_v25  ;;  %2181 = vmatprep.subr.bf16.mxu0 %v1396_v27  ;;  %v1524_v25 = vunpack.c.h.s8.bf16 %v708_v17  ;;  %v1781_v27 = vpop.f32.mrf.mxu0  ;;  %v1459_v28 = vunpack.c.h.s8.bf16 %v675_v26 }
 0x1a1   : > { %2154 = vmatprep.subr.bf16.mxu1 %v1332_v39  ;;  %v707_v39 = vld [vmem:[%s4648_s14 + $0xc50] sm:$0xff] }
 0x1a2   : > { %v1523_v29 = vunpack.c.h.s8.bf16 %v707_v39  ;;  %v1783_v35 = vpop.f32.mrf.mxu0 }
 0x1a3   : > { %2182 = vmatpush1.bf16.msra.mxu0 %v1395_v31  ;;  %v1452_v31 = vunpack.c.l.s8.bf16 %v676_v16 }
 0x1a4   : > { %2155 = vmatpush2.bf16.msra.mxu1 %v1331_v30  ;;  %2183 = vmatprep.subr.bf16.mxu0 %v1388_v33  ;;  %v1822_v30 = vpop.f32.mrf.mxu1  ;;  %v668_v33 = vld [vmem:[%s4648_s14 + $0xb18] sm:$0xff] }
 0x1a5   : > { %2156 = vmatprep.subr.bf16.mxu1 %v1324_v32  ;;  %v1516_v32 = vunpack.c.l.s8.bf16 %v708_v17  ;;  %v1444_v41 = vunpack.c.h.s8.bf16 %v668_v33 }
 0x1a7   : > { %2184 = vmatpush1.bf16.msra.mxu0 %v1387_v38  ;;  %v1515_v38 = vunpack.c.l.s8.bf16 %v707_v39  ;;  %v781_v39 = vunpack.c.l.s8.bf16 %v341_v60 }
 0x1a8   : > { %2157 = vmatpush2.bf16.msra.mxu1 %v1323_v36  ;;  %2185 = vmatprep.subr.bf16.mxu0 %v1380_v37  ;;  %v1451_v36 = vunpack.c.l.s8.bf16 %v675_v26  ;;  %v4434_v26 = vld [vmem:[%s4650_s15 + $0x30] ss:$52 sps:$4 sm:$0xff]  }
 0x1a9   : > { %2158 = vmatprep.subr.bf16.mxu1 %v1316_v40  ;;  %v1824_v40 = vpop.f32.mrf.mxu1 }
 0x1ab   : > { %2186 = vmatpush1.bf16.msra.mxu0 %v1379_v44  ;;  %v699_v44 = vld [vmem:[%s4648_s14 + $0xc10] sm:$0xff] }
 0x1ac   : > { %2159 = vmatpush2.bf16.msra.mxu1 %v1315_v43  ;;  %2187 = vmatprep.subr.bf16.mxu0 %v1372_v47  ;;  %v667_v43 = vld [vmem:[%s4648_s14 + $0xb10] sm:$0xff]  ;;  %v1737_v47 = vadd.f32 %v4889_v1, %v4879_v52  ;;  %v1741_v52 = vadd.f32 %v1740_v19, %v4892_v5  ;;  %v1499_v0 = vunpack.c.l.s8.bf16 %v699_v44 }
 0x1ad   : > { %2160 = vmatprep.subr.bf16.mxu1 %v1308_v46  ;;  %v1735_v46 = vadd.f32 %v4883_v57, %v4875_v45  ;;  %v1443_v49 = vunpack.c.h.s8.bf16 %v667_v43  ;;  %v342_v45 = vld [vmem:[%s4648_s14 + $0xe8] sm:$0xff]  ;;  %v1435_v63 = vunpack.c.l.s8.bf16 %v667_v43 }
 0x1ae   : > { %v406_v57 = vld [vmem:[%s4648_s14 + $0x2e8] sm:$0xff] }
 0x1af   : > { %2188 = vmatpush1.bf16.msra.mxu0 %v1371_v51  ;;  %v1778_v48 = vadd.f32 %v1777_v11, %v1735_v46  ;;  %v1826_v51 = vpop.f32.mrf.mxu1  ;;  %v789_v11 = vunpack.c.h.s8.bf16 %v341_v60 }
 0x1b0   : > { %2161 = vmatpush2.bf16.msra.mxu1 %v1307_v50  ;;  %2189 = vmatprep.subr.bf16.mxu0 %v1492_v53  ;;  %v1507_v50 = vunpack.c.h.s8.bf16 %v699_v44  ;;  %v1569_v44 = vld [vmem:[#allocation2 + $0x40] sm:$0xff] }
 0x1b1   : > { %2216 = vmatprep.subr.bf16.mxu1 %v1556_v54  ;;  %v1436_v54 = vunpack.c.l.s8.bf16 %v668_v33 }
 0x1b2   : > { %v1863_v37 = vpop.f32.mrf.mxu0 }
 0x1b3   : > { %2163 = vmatmul.mubr.bf16.vlgmr.msra.gmra.mxu1 %v4432_v2  ;;  %2190 = vmatpush2.bf16.msra.mxu0 %v1491_v58  ;;  %v1780_v58 = vadd.f32 %v1779_v20, %v1737_v47  ;;  %v790_v2 = vunpack.c.h.s8.bf16 %v342_v45  ;;  %v334_v20 = vld [vmem:[%s4648_s14 + $0xa8] sm:$0xff] }
 0x1b4   : > { %2217 = vmatpush1.bf16.msra.mxu1 %v1555_v59  ;;  %2191 = vmatprep.subr.bf16.mxu0 %v1484_v61  ;;  %v1865_v53 = vpop.f32.mrf.mxu0  ;;  %v1906_v59 = vpop.f32.mrf.mxu1  ;;  %v1821_v61 = vadd.f32 %v1820_v23, %v1778_v48  ;;  %v1561_v23 = vld [vmem:[#allocation2 + $0x30] sm:$0xff]  ;;  %v774_v34 = vunpack.c.h.s8.bf16 %v334_v20 }
 0x1b5   : > { %2218 = vmatprep.subr.bf16.mxu1 %v1548_v62  ;;  %2248 = vmatprep.mubr.bf16.mxu1 %v4574_v18  ;;  %v1782_v62 = vadd.f32 %v1781_v27, %v1739_v56 }
 0x1b6   : > { %v1867_v1 = vpop.f32.mrf.mxu0  ;;  %v1864_v8 = vadd.f32 %v1863_v37, %v1821_v61  ;;  %v1908_v9 = vpop.f32.mrf.mxu1 }
 0x1b7   : > { %2192 = vmatpush2.bf16.msra.mxu0 %v1483_v3  ;;  %v918_v3 = vunpack.c.h.s8.bf16 %v406_v57  ;;  %v1825_v5 = vadd.f32 %v1824_v40, %v1782_v62 }
 0x1b8   : > { %2219 = vmatpush1.bf16.msra.mxu1 %v1547_v4  ;;  %2193 = vmatprep.subr.bf16.mxu0 %v1476_v6  ;;  %v405_v4 = vld [vmem:[%s4648_s14 + $0x2e0] sm:$0xff]  ;;  %v1823_v6 = vadd.f32 %v1822_v30, %v1780_v58  ;;  %v1907_v17 = vadd.f32 %v1906_v59, %v1864_v8  ;;  %v382_v8 = vld [vmem:[%s4648_s14 + $0x228] sm:$0xff] }
 0x1b9   : > { %2220 = vmatprep.subr.bf16.mxu1 %v1540_v7  ;;  %v1784_v7 = vadd.f32 %v1783_v35, %v1741_v52  ;;  %v1868_v19 = vadd.f32 %v1867_v1, %v1825_v5  ;;  %v909_v30 = vunpack.c.l.s8.bf16 %v405_v4  ;;  %v390_v52 = vld [vmem:[%s4648_s14 + $0x268] sm:$0xff]  ;;  %v325_v1 = vld [vmem:[%s4648_s14 + $0x60] sm:$0xff] }
 0x1ba   : > { %v1866_v10 = vadd.f32 %v1865_v53, %v1823_v6  ;;  %v1570_v53 = vld [vmem:[#allocation2 + $0x20] sm:$0xff]  ;;  %v878_v6 = vunpack.c.l.s8.bf16 %v390_v52 }
 0x1bb   : > { %2194 = vmatpush2.bf16.msra.mxu0 %v1475_v12  ;;  %v917_v12 = vunpack.c.h.s8.bf16 %v405_v4  ;;  %v1827_v16 = vadd.f32 %v1826_v51, %v1784_v7  ;;  %v318_v7 = vld [vmem:[%s4648_s14 + $0x28] sm:$0xff] }
 0x1bc   : > { %2221 = vmatpush1.bf16.msra.mxu1 %v1539_v13  ;;  %2195 = vmatprep.subr.bf16.mxu0 %v1468_v14  ;;  %v1869_v13 = vpop.f32.mrf.mxu0  ;;  %v782_v14 = vunpack.c.l.s8.bf16 %v342_v45  ;;  %v1909_v27 = vadd.f32 %v1908_v9, %v1866_v10  ;;  %v749_v9 = vunpack.c.l.s8.bf16 %v325_v1  ;;  %v742_v10 = vunpack.c.h.s8.bf16 %v318_v7 }
 0x1bd   : > { %2222 = vmatprep.subr.bf16.mxu1 %v1532_v15  ;;  %v910_v15 = vunpack.c.l.s8.bf16 %v406_v57  ;;  %v326_v57 = vld [vmem:[%s4648_s14 + $0x68] sm:$0xff] }
 0x1be   : > { %v750_v4 = vunpack.c.l.s8.bf16 %v326_v57 }
 0x1bf   : > { %2196 = vmatpush2.bf16.msra.mxu0 %v1467_v21  ;;  %v398_v21 = vld [vmem:[%s4648_s14 + $0x2a8] sm:$0xff] }
 0x1c0   : > { %2223 = vmatpush1.bf16.msra.mxu1 %v1531_v22  ;;  %2197 = vmatprep.subr.bf16.mxu0 %v1460_v24  ;;  %v1910_v22 = vpop.f32.mrf.mxu1  ;;  %v902_v35 = vunpack.c.h.s8.bf16 %v398_v21  ;;  %v894_v56 = vunpack.c.l.s8.bf16 %v398_v21 }
 0x1c1   : > { %2224 = vmatprep.subr.bf16.mxu1 %v1524_v25  ;;  %v4433_v25 = vld [vmem:[%s4650_s15 + $0x28] ss:$52 sps:$4 sm:$0xff]  }
 0x1c2   : > { %v1912_v43 = vpop.f32.mrf.mxu1 }
 0x1c3   : > { %2198 = vmatpush2.bf16.msra.mxu0 %v1459_v28  ;;  %v1870_v28 = vadd.f32 %v1869_v13, %v1827_v16  ;;  %v381_v13 = vld [vmem:[%s4648_s14 + $0x220] sm:$0xff]  ;;  %v734_v16 = vunpack.c.l.s8.bf16 %v318_v7 }
 0x1c4   : > { %2225 = vmatpush1.bf16.msra.mxu1 %v1523_v29  ;;  %2199 = vmatprep.subr.bf16.mxu0 %v1452_v31  ;;  %v333_v31 = vld [vmem:[%s4648_s14 + $0xa0] sm:$0xff] }
 0x1c5   : > { %2226 = vmatprep.subr.bf16.mxu1 %v1516_v32  ;;  %v1562_v32 = vld [vmem:[#allocation2] sm:$0xff]  ;;  %v773_v47 = vunpack.c.h.s8.bf16 %v333_v31  ;;  %v1913_v48 = vadd.f32 %v1912_v43, %v1870_v28  ;;  %v765_v61 = vunpack.c.l.s8.bf16 %v333_v31  ;;  %v430_v31 = vld [vmem:[%s4648_s14 + $0x3a8] sm:$0xff] }
 0x1c6   : > { %v358_v43 = vld [vmem:[%s4648_s14 + $0x168] sm:$0xff] }
 0x1c7   : > { %2200 = vmatpush2.bf16.msra.mxu0 %v1451_v36  ;;  %v397_v36 = vld [vmem:[%s4648_s14 + $0x2a0] sm:$0xff] }
 0x1c8   : > { %2227 = vmatpush1.bf16.msra.mxu1 %v1515_v38  ;;  %2201 = vmatprep.subr.bf16.mxu0 %v1444_v41  ;;  %v1911_v38 = vadd.f32 %v1910_v22, %v1868_v19  ;;  %v4435_v41 = vld [vmem:[%s4650_s15 + $0x4] ss:$52 sps:$4 sm:$0xff]   ;;  %v901_v51 = vunpack.c.h.s8.bf16 %v397_v36  ;;  %v893_v62 = vunpack.c.l.s8.bf16 %v397_v36  ;;  %v861_v22 = vunpack.c.l.s8.bf16 %v381_v13 }
 0x1c9   : > { %2228 = vmatprep.subr.bf16.mxu1 %v1508_v42  ;;  %v4436_v42 = vld [vmem:[%s4650_s15 + $0xc] ss:$52 sps:$4 sm:$0xff]  }
 0x1ca   : > { %v374_v19 = vld [vmem:[%s4648_s14 + $0x1e8] sm:$0xff]  ;;  %v365_v36 = vld [vmem:[%s4648_s14 + $0x1a0] sm:$0xff] }
 0x1cb   : > { %2202 = vmatpush2.bf16.msra.mxu0 %v1443_v49  ;;  %v846_v28 = vunpack.c.l.s8.bf16 %v374_v19 }
 0x1cc   : > { %2229 = vmatpush1.bf16.msra.mxu1 %v1507_v50  ;;  %2203 = vmatprep.subr.bf16.mxu0 %v1436_v54 }
 0x1cd   : > { %2230 = vmatprep.subr.bf16.mxu1 %v1500_v55  ;;  %v766_v55 = vunpack.c.l.s8.bf16 %v334_v20  ;;  %v438_v20 = vld [vmem:[%s4648_s14 + $0x3e8] sm:$0xff] }
 0x1cf   : > { %2204 = vmatpush2.bf16.msra.mxu0 %v1435_v63  ;;  %v758_v63 = vunpack.c.h.s8.bf16 %v326_v57 }
 0x1d0   : > { %2231 = vmatpush1.bf16.msra.mxu1 %v1499_v0  ;;  %2259 = vmatprep.subr.bf16.mxu0 %v790_v2  ;;  %v886_v0 = vunpack.c.h.s8.bf16 %v390_v52  ;;  %v389_v2 = vld [vmem:[%s4648_s14 + $0x260] sm:$0xff] }
 0x1d1   : > { %2302 = vmatprep.subr.bf16.mxu1 %v918_v3  ;;  %v757_v3 = vunpack.c.h.s8.bf16 %v325_v1  ;;  %v885_v60 = vunpack.c.h.s8.bf16 %v389_v2  ;;  %v877_v5 = vunpack.c.l.s8.bf16 %v389_v2 }
 0x1d2   : > { %v1949_v24 = vpop.f32.mrf.mxu0  ;;  %2206 = vmatmul.mubr.bf16.vlgmr.msra.gmra.mxu0 %v4433_v25  ;;  %v373_v25 = vld [vmem:[%s4648_s14 + $0x1e0] sm:$0xff] }
 0x1d3   : > { %2249 = vmatmul.mubr.bf16.vlgmr.msra.gmra.mxu1 %v4434_v26  ;;  %v1950_v29 = vadd.f32 %v1949_v24, %v1907_v17  ;;  %2260 = vmatpush1.bf16.msra.mxu0 %v789_v11  ;;  %v870_v11 = vunpack.c.h.s8.bf16 %v382_v8  ;;  %v862_v17 = vunpack.c.l.s8.bf16 %v382_v8  ;;  %v982_v24 = vunpack.c.h.s8.bf16 %v438_v20  ;;  %v437_v26 = vld [vmem:[%s4648_s14 + $0x3e0] sm:$0xff] }
 0x1d4   : > { %2303 = vmatpush1.bf16.msra.mxu1 %v917_v12  ;;  %v1951_v33 = vpop.f32.mrf.mxu0  ;;  %2261 = vmatprep.subr.bf16.mxu0 %v782_v14  ;;  %v317_v12 = vld [vmem:[%s4648_s14 + $0x20] sm:$0xff] }
 0x1d5   : > { %2304 = vmatprep.subr.bf16.mxu1 %v910_v15  ;;  %v2861_v40 = vadd.f32 %v1950_v29, %v1561_v23  ;;  %v1952_v37 = vadd.f32 %v1951_v33, %v1909_v27  ;;  %2291 = vmatprep.mubr.bf16.mxu0 %v4435_v41  ;;  %v741_v14 = vunpack.c.h.s8.bf16 %v317_v12  ;;  %v869_v15 = vunpack.c.h.s8.bf16 %v381_v13 }
 0x1d6   : > { %2334 = vmatprep.mubr.bf16.mxu1 %v4436_v42  ;;  %v1953_v46 = vpop.f32.mrf.mxu0  ;;  %v733_v21 = vunpack.c.l.s8.bf16 %v317_v12  ;;  %v854_v23 = vunpack.c.h.s8.bf16 %v374_v19  ;;  %v981_v27 = vunpack.c.h.s8.bf16 %v437_v26  ;;  %v974_v29 = vunpack.c.l.s8.bf16 %v438_v20  ;;  %v4438_v19 = vld [vmem:[%s4650_s15 + $0x8] ss:$52 sps:$4 sm:$0xff]  }
 0x1d7   : > { %2877 = vst [vmem:[#allocation2 + $0x30] sm:$0xff] %v2861_v40  ;;  %v2862_v49 = vadd.f32 %v1952_v37, %v1562_v32  ;;  %v1954_v50 = vadd.f32 %v1953_v46, %v1911_v38  ;;  %2262 = vmatpush1.bf16.msra.mxu0 %v781_v39  ;;  %v853_v39 = vunpack.c.h.s8.bf16 %v373_v25  ;;  %v845_v32 = vunpack.c.l.s8.bf16 %v373_v25  ;;  %v429_v38 = vld [vmem:[%s4648_s14 + $0x3a0] sm:$0xff] }
 0x1d8   : > { %2305 = vmatpush1.bf16.msra.mxu1 %v909_v30  ;;  %v1955_v54 = vpop.f32.mrf.mxu0  ;;  %2263 = vmatprep.subr.bf16.mxu0 %v774_v34  ;;  %v366_v30 = vld [vmem:[%s4648_s14 + $0x1a8] sm:$0xff]  ;;  %v973_v33 = vunpack.c.l.s8.bf16 %v437_v26  ;;  %v837_v40 = vunpack.c.h.s8.bf16 %v365_v36  ;;  %v965_v37 = vunpack.c.h.s8.bf16 %v429_v38  ;;  %v958_v42 = vunpack.c.l.s8.bf16 %v430_v31  ;;  %v525_v25 = vld [vmem:[%s4648_s14 + $0x6a0] sm:$0xff] }
 0x1d9   : > { %2306 = vmatprep.subr.bf16.mxu1 %v902_v35  ;;  %2878 = vst [vmem:[#allocation2] sm:$0xff] %v2862_v49  ;;  %v2869_v58 = vadd.f32 %v1954_v50, %v1569_v44  ;;  %v1956_v45 = vadd.f32 %v1955_v54, %v1913_v48  ;;  %v838_v34 = vunpack.c.h.s8.bf16 %v366_v30  ;;  %v966_v35 = vunpack.c.h.s8.bf16 %v430_v31  ;;  %v422_v44 = vld [vmem:[%s4648_s14 + $0x368] sm:$0xff]  ;;  %v357_v50 = vld [vmem:[%s4648_s14 + $0x160] sm:$0xff] }
 0x1da   : > { %v830_v41 = vunpack.c.l.s8.bf16 %v366_v30  ;;  %v829_v46 = vunpack.c.l.s8.bf16 %v365_v36  ;;  %v822_v48 = vunpack.c.h.s8.bf16 %v358_v43  ;;  %v950_v49 = vunpack.c.h.s8.bf16 %v422_v44  ;;  %v4439_v26 = vld [vmem:[%s4650_s15 + $0x14] ss:$52 sps:$4 sm:$0xff]  }
 0x1db   : > { %2885 = vst [vmem:[#allocation2 + $0x40] sm:$0xff] %v2869_v58  ;;  %v2870_v59 = vadd.f32 %v1956_v45, %v1570_v53  ;;  %2264 = vmatpush1.bf16.msra.mxu0 %v773_v47  ;;  %v957_v47 = vunpack.c.l.s8.bf16 %v429_v38  ;;  %v821_v53 = vunpack.c.h.s8.bf16 %v357_v50  ;;  %v350_v58 = vld [vmem:[%s4648_s14 + $0x128] sm:$0xff]  ;;  %v813_v57 = vunpack.c.l.s8.bf16 %v357_v50  ;;  %v453_v38 = vld [vmem:[%s4648_s14 + $0x460] sm:$0xff] }
 0x1dc   : > { %2307 = vmatpush1.bf16.msra.mxu1 %v901_v51  ;;  %2265 = vmatprep.subr.bf16.mxu0 %v766_v55  ;;  %v421_v51 = vld [vmem:[%s4648_s14 + $0x360] sm:$0xff]  ;;  %v814_v55 = vunpack.c.l.s8.bf16 %v358_v43  ;;  %v414_v45 = vld [vmem:[%s4648_s14 + $0x328] sm:$0xff]  ;;  %v798_v2 = vunpack.c.l.s8.bf16 %v350_v58 }
 0x1dd   : > { %2308 = vmatprep.subr.bf16.mxu1 %v894_v56  ;;  %2886 = vst [vmem:[#allocation2 + $0x20] sm:$0xff] %v2870_v59  ;;  %v949_v54 = vunpack.c.h.s8.bf16 %v421_v51  ;;  %v942_v56 = vunpack.c.l.s8.bf16 %v422_v44  ;;  %v941_v52 = vunpack.c.l.s8.bf16 %v421_v51  ;;  %v806_v59 = vunpack.c.h.s8.bf16 %v350_v58  ;;  %v454_v31 = vld [vmem:[%s4648_s14 + $0x468] sm:$0xff]  ;;  %v445_v51 = vld [vmem:[%s4648_s14 + $0x420] sm:$0xff] }
 0x1de   : > { %v446_v44 = vld [vmem:[%s4648_s14 + $0x428] sm:$0xff] }
 0x1df   : > { %2266 = vmatpush1.bf16.msra.mxu0 %v765_v61  ;;  %v934_v61 = vunpack.c.h.s8.bf16 %v414_v45 }
 0x1e0   : > { %2309 = vmatpush1.bf16.msra.mxu1 %v893_v62  ;;  %2267 = vmatprep.subr.bf16.mxu0 %v758_v63  ;;  %v349_v62 = vld [vmem:[%s4648_s14 + $0x120] sm:$0xff] }
 0x1e1   : > { %2310 = vmatprep.subr.bf16.mxu1 %v886_v0  ;;  %v413_v63 = vld [vmem:[%s4648_s14 + $0x320] sm:$0xff]  ;;  %v805_v0 = vunpack.c.h.s8.bf16 %v349_v62 }
 0x1e2   : > { %v933_v1 = vunpack.c.h.s8.bf16 %v413_v63  ;;  %v925_v7 = vunpack.c.l.s8.bf16 %v413_v63  ;;  %v501_v63 = vld [vmem:[%s4648_s14 + $0x5e0] sm:$0xff] }
 0x1e3   : > { %2268 = vmatpush1.bf16.msra.mxu0 %v757_v3  ;;  %v926_v3 = vunpack.c.l.s8.bf16 %v414_v45  ;;  %v502_v45 = vld [vmem:[%s4648_s14 + $0x5e8] sm:$0xff] }
 0x1e4   : > { %2311 = vmatpush1.bf16.msra.mxu1 %v885_v60  ;;  %2269 = vmatprep.subr.bf16.mxu0 %v750_v4  ;;  %v470_v60 = vld [vmem:[%s4648_s14 + $0x4e8] sm:$0xff] }
 0x1e5   : > { %2312 = vmatprep.subr.bf16.mxu1 %v878_v6  ;;  %v534_v4 = vld [vmem:[%s4648_s14 + $0x6e8] sm:$0xff]  ;;  %v797_v6 = vunpack.c.l.s8.bf16 %v349_v62  ;;  %v1046_v8 = vunpack.c.h.s8.bf16 %v470_v60  ;;  %v1038_v13 = vunpack.c.l.s8.bf16 %v470_v60 }
 0x1e7   : > { %2270 = vmatpush1.bf16.msra.mxu0 %v749_v9  ;;  %v1174_v9 = vunpack.c.h.s8.bf16 %v534_v4 }
 0x1e8   : > { %2313 = vmatpush1.bf16.msra.mxu1 %v877_v5  ;;  %2271 = vmatprep.subr.bf16.mxu0 %v742_v10  ;;  %v469_v5 = vld [vmem:[%s4648_s14 + $0x4e0] sm:$0xff] }
 0x1e9   : > { %2314 = vmatprep.subr.bf16.mxu1 %v870_v11  ;;  %v533_v10 = vld [vmem:[%s4648_s14 + $0x6e0] sm:$0xff]  ;;  %v1045_v11 = vunpack.c.h.s8.bf16 %v469_v5  ;;  %v1037_v20 = vunpack.c.l.s8.bf16 %v469_v5 }
 0x1ea   : > { %v1173_v12 = vunpack.c.h.s8.bf16 %v533_v10 }
 0x1eb   : > { %2272 = vmatpush1.bf16.msra.mxu0 %v741_v14  ;;  %v1166_v14 = vunpack.c.l.s8.bf16 %v534_v4  ;;  %v494_v4 = vld [vmem:[%s4648_s14 + $0x5a8] sm:$0xff] }
 0x1ec   : > { %2315 = vmatpush1.bf16.msra.mxu1 %v869_v15  ;;  %2273 = vmatprep.subr.bf16.mxu0 %v734_v16  ;;  %v462_v15 = vld [vmem:[%s4648_s14 + $0x4a8] sm:$0xff] }
 0x1ed   : > { %2316 = vmatprep.subr.bf16.mxu1 %v862_v17  ;;  %v526_v16 = vld [vmem:[%s4648_s14 + $0x6a8] sm:$0xff] }
 0x1ee   : > { %v4437_v17 = vld [vmem:[%s4650_s15] ss:$52 sps:$4 sm:$0xff]   ;;  %v1150_v30 = vunpack.c.l.s8.bf16 %v526_v16 }
 0x1ef   : > { %2274 = vmatpush1.bf16.msra.mxu0 %v733_v21  ;;  %v1165_v21 = vunpack.c.l.s8.bf16 %v533_v10  ;;  %v493_v10 = vld [vmem:[%s4648_s14 + $0x5a0] sm:$0xff] }
 0x1f0   : > { %2317 = vmatpush1.bf16.msra.mxu1 %v861_v22  ;;  %2275 = vmatprep.subr.bf16.mxu0 %v854_v23  ;;  %v1030_v22 = vunpack.c.h.s8.bf16 %v462_v15  ;;  %v1158_v23 = vunpack.c.h.s8.bf16 %v526_v16  ;;  %v486_v16 = vld [vmem:[%s4648_s14 + $0x568] sm:$0xff] }
 0x1f1   : > { %2318 = vmatprep.subr.bf16.mxu1 %v982_v24  ;;  %v461_v24 = vld [vmem:[%s4648_s14 + $0x4a0] sm:$0xff] }
 0x1f3   : > { %2276 = vmatpush2.bf16.msra.mxu0 %v853_v39  ;;  %v4440_v39 = vld [vmem:[%s4650_s15 + $0x1c] ss:$52 sps:$4 sm:$0xff]  }
 0x1f4   : > { %2319 = vmatpush2.bf16.msra.mxu1 %v981_v27  ;;  %2277 = vmatprep.subr.bf16.mxu0 %v846_v28  ;;  %v1029_v27 = vunpack.c.h.s8.bf16 %v461_v24  ;;  %v1157_v28 = vunpack.c.h.s8.bf16 %v525_v25 }
 0x1f5   : > { %2320 = vmatprep.subr.bf16.mxu1 %v974_v29  ;;  %v1022_v29 = vunpack.c.l.s8.bf16 %v462_v15 }
 0x1f7   : > { %2278 = vmatpush2.bf16.msra.mxu0 %v845_v32  ;;  %v518_v32 = vld [vmem:[%s4648_s14 + $0x668] sm:$0xff] }
 0x1f8   : > { %2321 = vmatpush2.bf16.msra.mxu1 %v973_v33  ;;  %2279 = vmatprep.subr.bf16.mxu0 %v838_v34  ;;  %v1021_v33 = vunpack.c.l.s8.bf16 %v461_v24  ;;  %v1149_v34 = vunpack.c.l.s8.bf16 %v525_v25  ;;  %v1142_v36 = vunpack.c.h.s8.bf16 %v518_v32  ;;  %v1134_v43 = vunpack.c.l.s8.bf16 %v518_v32  ;;  %v549_v24 = vld [vmem:[%s4648_s14 + $0x760] sm:$0xff] }
 0x1f9   : > { %2322 = vmatprep.subr.bf16.mxu1 %v966_v35  ;;  %v1014_v35 = vunpack.c.h.s8.bf16 %v454_v31 }
 0x1fb   : > { %2280 = vmatpush2.bf16.msra.mxu0 %v837_v40  ;;  %v517_v40 = vld [vmem:[%s4648_s14 + $0x660] sm:$0xff] }
 0x1fc   : > { %2323 = vmatpush2.bf16.msra.mxu1 %v965_v37  ;;  %2281 = vmatprep.subr.bf16.mxu0 %v830_v41  ;;  %v1013_v37 = vunpack.c.h.s8.bf16 %v453_v38  ;;  %v1141_v41 = vunpack.c.h.s8.bf16 %v517_v40 }
 0x1fd   : > { %2324 = vmatprep.subr.bf16.mxu1 %v958_v42  ;;  %v1006_v42 = vunpack.c.l.s8.bf16 %v454_v31  ;;  %v1197_v31 = vunpack.c.l.s8.bf16 %v549_v24 }
 0x1ff   : > { %2282 = vmatpush2.bf16.msra.mxu0 %v829_v46  ;;  %v510_v46 = vld [vmem:[%s4648_s14 + $0x628] sm:$0xff] }
 0x200   : > { %2325 = vmatpush2.bf16.msra.mxu1 %v957_v47  ;;  %2283 = vmatprep.subr.bf16.mxu0 %v822_v48  ;;  %v1005_v47 = vunpack.c.l.s8.bf16 %v453_v38  ;;  %v1133_v48 = vunpack.c.l.s8.bf16 %v517_v40  ;;  %v1126_v50 = vunpack.c.h.s8.bf16 %v510_v46  ;;  %v1118_v58 = vunpack.c.l.s8.bf16 %v510_v46 }
 0x201   : > { %2326 = vmatprep.subr.bf16.mxu1 %v950_v49  ;;  %v998_v49 = vunpack.c.h.s8.bf16 %v446_v44 }
 0x203   : > { %2284 = vmatpush2.bf16.msra.mxu0 %v821_v53  ;;  %v509_v53 = vld [vmem:[%s4648_s14 + $0x620] sm:$0xff] }
 0x204   : > { %2327 = vmatpush2.bf16.msra.mxu1 %v949_v54  ;;  %2285 = vmatprep.subr.bf16.mxu0 %v814_v55  ;;  %v997_v54 = vunpack.c.h.s8.bf16 %v445_v51  ;;  %v1125_v55 = vunpack.c.h.s8.bf16 %v509_v53 }
 0x205   : > { %2328 = vmatprep.subr.bf16.mxu1 %v942_v56  ;;  %v990_v56 = vunpack.c.l.s8.bf16 %v446_v44 }
 0x207   : > { %2286 = vmatpush2.bf16.msra.mxu0 %v813_v57  ;;  %v566_v57 = vld [vmem:[%s4648_s14 + $0x7e8] sm:$0xff] }
 0x208   : > { %2329 = vmatpush2.bf16.msra.mxu1 %v941_v52  ;;  %2287 = vmatprep.subr.bf16.mxu0 %v806_v59  ;;  %v989_v52 = vunpack.c.l.s8.bf16 %v445_v51  ;;  %v1117_v59 = vunpack.c.l.s8.bf16 %v509_v53  ;;  %v1238_v62 = vunpack.c.h.s8.bf16 %v566_v57  ;;  %v1230_v60 = vunpack.c.l.s8.bf16 %v566_v57 }
 0x209   : > { %2330 = vmatprep.subr.bf16.mxu1 %v934_v61  ;;  %v1110_v61 = vunpack.c.h.s8.bf16 %v502_v45 }
 0x20b   : > { %2288 = vmatpush2.bf16.msra.mxu0 %v805_v0  ;;  %v565_v0 = vld [vmem:[%s4648_s14 + $0x7e0] sm:$0xff] }
 0x20c   : > { %2331 = vmatpush2.bf16.msra.mxu1 %v933_v1  ;;  %2289 = vmatprep.subr.bf16.mxu0 %v798_v2  ;;  %v1109_v1 = vunpack.c.h.s8.bf16 %v501_v63  ;;  %v1237_v2 = vunpack.c.h.s8.bf16 %v565_v0 }
 0x20d   : > { %2332 = vmatprep.subr.bf16.mxu1 %v926_v3  ;;  %v1102_v3 = vunpack.c.l.s8.bf16 %v502_v45  ;;  %v4442_v45 = vld [vmem:[%s4650_s15 + $0x18] ss:$52 sps:$4 sm:$0xff]  }
 0x20f   : > { %2290 = vmatpush2.bf16.msra.mxu0 %v797_v6  ;;  %v558_v6 = vld [vmem:[%s4648_s14 + $0x7a8] sm:$0xff] }
 0x210   : > { %2333 = vmatpush2.bf16.msra.mxu1 %v925_v7  ;;  %2345 = vmatprep.subr.bf16.mxu0 %v1046_v8  ;;  %v1101_v7 = vunpack.c.l.s8.bf16 %v501_v63  ;;  %v1229_v8 = vunpack.c.l.s8.bf16 %v565_v0  ;;  %v1222_v5 = vunpack.c.h.s8.bf16 %v558_v6  ;;  %v1214_v15 = vunpack.c.l.s8.bf16 %v558_v6  ;;  %v653_v63 = vld [vmem:[%s4648_s14 + $0xaa0] sm:$0xff]  ;;  %v582_v6 = vld [vmem:[%s4648_s14 + $0x868] sm:$0xff] }
 0x211   : > { %2388 = vmatprep.subr.bf16.mxu1 %v1174_v9  ;;  %v1094_v9 = vunpack.c.h.s8.bf16 %v494_v4  ;;  %v4443_v0 = vld [vmem:[%s4650_s15 + $0x24] ss:$52 sps:$4 sm:$0xff]  }
 0x212   : > { %2292 = vmatmul.mubr.bf16.vlgmr.msra.gmra.mxu0 %v4437_v17  ;;  %v550_v17 = vld [vmem:[%s4648_s14 + $0x768] sm:$0xff] }
 0x213   : > { %2335 = vmatmul.mubr.bf16.vlgmr.msra.gmra.mxu1 %v4438_v19  ;;  %2346 = vmatpush1.bf16.msra.mxu0 %v1045_v11  ;;  %v557_v11 = vld [vmem:[%s4648_s14 + $0x7a0] sm:$0xff]  ;;  %v1085_v19 = vunpack.c.l.s8.bf16 %v493_v10 }
 0x214   : > { %2389 = vmatpush1.bf16.msra.mxu1 %v1173_v12  ;;  %2347 = vmatprep.subr.bf16.mxu0 %v1038_v13  ;;  %v1093_v12 = vunpack.c.h.s8.bf16 %v493_v10  ;;  %v1221_v13 = vunpack.c.h.s8.bf16 %v557_v11 }
 0x215   : > { %2390 = vmatprep.subr.bf16.mxu1 %v1166_v14  ;;  %2377 = vmatprep.mubr.bf16.mxu0 %v4439_v26  ;;  %v1086_v14 = vunpack.c.l.s8.bf16 %v494_v4  ;;  %v1205_v26 = vunpack.c.h.s8.bf16 %v549_v24  ;;  %v573_v24 = vld [vmem:[%s4648_s14 + $0x820] sm:$0xff] }
 0x216   : > { %2420 = vmatprep.mubr.bf16.mxu1 %v4440_v39  ;;  %v1070_v39 = vunpack.c.l.s8.bf16 %v486_v16 }
 0x217   : > { %2348 = vmatpush1.bf16.msra.mxu0 %v1037_v20  ;;  %v1213_v20 = vunpack.c.l.s8.bf16 %v557_v11  ;;  %v581_v11 = vld [vmem:[%s4648_s14 + $0x860] sm:$0xff] }
 0x218   : > { %2391 = vmatpush1.bf16.msra.mxu1 %v1165_v21  ;;  %2349 = vmatprep.subr.bf16.mxu0 %v1030_v22  ;;  %v1078_v21 = vunpack.c.h.s8.bf16 %v486_v16  ;;  %v1206_v22 = vunpack.c.h.s8.bf16 %v550_v17 }
 0x219   : > { %2392 = vmatprep.subr.bf16.mxu1 %v1158_v23  ;;  %v485_v23 = vld [vmem:[%s4648_s14 + $0x560] sm:$0xff] }
 0x21a   : > { %v1077_v25 = vunpack.c.h.s8.bf16 %v485_v23 }
 0x21b   : > { %2350 = vmatpush1.bf16.msra.mxu0 %v1029_v27  ;;  %v1198_v27 = vunpack.c.l.s8.bf16 %v550_v17  ;;  %v574_v17 = vld [vmem:[%s4648_s14 + $0x828] sm:$0xff] }
 0x21c   : > { %2393 = vmatpush1.bf16.msra.mxu1 %v1157_v28  ;;  %2351 = vmatprep.subr.bf16.mxu0 %v1022_v29  ;;  %v478_v28 = vld [vmem:[%s4648_s14 + $0x528] sm:$0xff] }
 0x21d   : > { %2394 = vmatprep.subr.bf16.mxu1 %v1150_v30  ;;  %v542_v29 = vld [vmem:[%s4648_s14 + $0x728] sm:$0xff]  ;;  %v1069_v30 = vunpack.c.l.s8.bf16 %v485_v23  ;;  %v1062_v32 = vunpack.c.h.s8.bf16 %v478_v28  ;;  %v1054_v40 = vunpack.c.l.s8.bf16 %v478_v28  ;;  %v1246_v28 = vunpack.c.l.s8.bf16 %v574_v17 }
 0x21f   : > { %2352 = vmatpush1.bf16.msra.mxu0 %v1021_v33  ;;  %v1190_v33 = vunpack.c.h.s8.bf16 %v542_v29 }
 0x220   : > { %2395 = vmatpush1.bf16.msra.mxu1 %v1149_v34  ;;  %2353 = vmatprep.subr.bf16.mxu0 %v1014_v35  ;;  %v477_v34 = vld [vmem:[%s4648_s14 + $0x520] sm:$0xff] }
 0x221   : > { %2396 = vmatprep.subr.bf16.mxu1 %v1142_v36  ;;  %v541_v35 = vld [vmem:[%s4648_s14 + $0x720] sm:$0xff]  ;;  %v1061_v36 = vunpack.c.h.s8.bf16 %v477_v34 }
 0x222   : > { %v1189_v38 = vunpack.c.h.s8.bf16 %v541_v35  ;;  %v1181_v44 = vunpack.c.l.s8.bf16 %v541_v35 }
 0x223   : > { %2354 = vmatpush1.bf16.msra.mxu0 %v1013_v37  ;;  %v1182_v37 = vunpack.c.l.s8.bf16 %v542_v29 }
 0x224   : > { %2397 = vmatpush1.bf16.msra.mxu1 %v1141_v41  ;;  %2355 = vmatprep.subr.bf16.mxu0 %v1006_v42  ;;  %v598_v41 = vld [vmem:[%s4648_s14 + $0x8e8] sm:$0xff] }
 0x225   : > { %2398 = vmatprep.subr.bf16.mxu1 %v1134_v43  ;;  %v662_v42 = vld [vmem:[%s4648_s14 + $0xae8] sm:$0xff]  ;;  %v1053_v43 = vunpack.c.l.s8.bf16 %v477_v34  ;;  %v1302_v46 = vunpack.c.h.s8.bf16 %v598_v41  ;;  %v1294_v53 = vunpack.c.l.s8.bf16 %v598_v41 }
 0x227   : > { %2356 = vmatpush1.bf16.msra.mxu0 %v1005_v47  ;;  %v1430_v47 = vunpack.c.h.s8.bf16 %v662_v42 }
 0x228   : > { %2399 = vmatpush1.bf16.msra.mxu1 %v1133_v48  ;;  %2357 = vmatprep.subr.bf16.mxu0 %v998_v49  ;;  %v597_v48 = vld [vmem:[%s4648_s14 + $0x8e0] sm:$0xff] }
 0x229   : > { %2400 = vmatprep.subr.bf16.mxu1 %v1126_v50  ;;  %v661_v49 = vld [vmem:[%s4648_s14 + $0xae0] sm:$0xff]  ;;  %v1301_v50 = vunpack.c.h.s8.bf16 %v597_v48  ;;  %v1293_v57 = vunpack.c.l.s8.bf16 %v597_v48 }
 0x22a   : > { %v1429_v51 = vunpack.c.h.s8.bf16 %v661_v49 }
 0x22b   : > { %2358 = vmatpush1.bf16.msra.mxu0 %v997_v54  ;;  %v1422_v54 = vunpack.c.l.s8.bf16 %v662_v42 }
 0x22c   : > { %2401 = vmatpush1.bf16.msra.mxu1 %v1125_v55  ;;  %2359 = vmatprep.subr.bf16.mxu0 %v990_v56  ;;  %v590_v55 = vld [vmem:[%s4648_s14 + $0x8a8] sm:$0xff] }
 0x22d   : > { %2402 = vmatprep.subr.bf16.mxu1 %v1118_v58  ;;  %v654_v56 = vld [vmem:[%s4648_s14 + $0xaa8] sm:$0xff] }
 0x22e   : > { %v4441_v58 = vld [vmem:[%s4650_s15 + $0x10] ss:$52 sps:$4 sm:$0xff]   ;;  %v1406_v4 = vunpack.c.l.s8.bf16 %v654_v56 }
 0x22f   : > { %2360 = vmatpush1.bf16.msra.mxu0 %v989_v52  ;;  %v1421_v52 = vunpack.c.l.s8.bf16 %v661_v49 }
 0x230   : > { %2403 = vmatpush1.bf16.msra.mxu1 %v1117_v59  ;;  %2361 = vmatprep.subr.bf16.mxu0 %v1110_v61  ;;  %v1286_v59 = vunpack.c.h.s8.bf16 %v590_v55  ;;  %v1414_v61 = vunpack.c.h.s8.bf16 %v654_v56  ;;  %v2035_v56 = vpop.f32.mrf.mxu0 }
 0x231   : > { %2404 = vmatprep.subr.bf16.mxu1 %v1238_v62  ;;  %v589_v62 = vld [vmem:[%s4648_s14 + $0x8a0] sm:$0xff] }
 0x233   : > { %2362 = vmatpush2.bf16.msra.mxu0 %v1109_v1  ;;  %v4444_v1 = vld [vmem:[%s4650_s15 + $0x2c] ss:$52 sps:$4 sm:$0xff]  }
 0x234   : > { %2405 = vmatpush2.bf16.msra.mxu1 %v1237_v2  ;;  %2363 = vmatprep.subr.bf16.mxu0 %v1102_v3  ;;  %v1285_v2 = vunpack.c.h.s8.bf16 %v589_v62  ;;  %v1413_v3 = vunpack.c.h.s8.bf16 %v653_v63 }
 0x235   : > { %2406 = vmatprep.subr.bf16.mxu1 %v1230_v60  ;;  %v1278_v60 = vunpack.c.l.s8.bf16 %v590_v55  ;;  %v685_v55 = vld [vmem:[%s4648_s14 + $0xba0] sm:$0xff] }
 0x237   : > { %2364 = vmatpush2.bf16.msra.mxu0 %v1101_v7  ;;  %v646_v7 = vld [vmem:[%s4648_s14 + $0xa68] sm:$0xff] }
 0x238   : > { %2407 = vmatpush2.bf16.msra.mxu1 %v1229_v8  ;;  %2365 = vmatprep.subr.bf16.mxu0 %v1094_v9  ;;  %v1277_v8 = vunpack.c.l.s8.bf16 %v589_v62  ;;  %v1405_v9 = vunpack.c.l.s8.bf16 %v653_v63  ;;  %v1398_v10 = vunpack.c.h.s8.bf16 %v646_v7  ;;  %v1390_v16 = vunpack.c.l.s8.bf16 %v646_v7  ;;  %v678_v62 = vld [vmem:[%s4648_s14 + $0xb68] sm:$0xff]  ;;  %v5026_v63 = vpop.f32.mrf.mxu0 }
 0x239   : > { %2408 = vmatprep.subr.bf16.mxu1 %v1222_v5  ;;  %v1270_v5 = vunpack.c.h.s8.bf16 %v582_v6 }
 0x23a   : > { %v2039_v7 = vpop.f32.mrf.mxu0 }
 0x23b   : > { %2366 = vmatpush2.bf16.msra.mxu0 %v1093_v12  ;;  %v645_v12 = vld [vmem:[%s4648_s14 + $0xa60] sm:$0xff] }
 0x23c   : > { %2409 = vmatpush2.bf16.msra.mxu1 %v1221_v13  ;;  %2367 = vmatprep.subr.bf16.mxu0 %v1086_v14  ;;  %v1269_v13 = vunpack.c.h.s8.bf16 %v581_v11  ;;  %v1397_v14 = vunpack.c.h.s8.bf16 %v645_v12 }
 0x23d   : > { %2410 = vmatprep.subr.bf16.mxu1 %v1214_v15  ;;  %v1262_v15 = vunpack.c.l.s8.bf16 %v582_v6  ;;  %v677_v6 = vld [vmem:[%s4648_s14 + $0xb60] sm:$0xff] }
 0x23f   : > { %2368 = vmatpush2.bf16.msra.mxu0 %v1085_v19  ;;  %v638_v19 = vld [vmem:[%s4648_s14 + $0xa28] sm:$0xff] }
 0x240   : > { %2411 = vmatpush2.bf16.msra.mxu1 %v1213_v20  ;;  %2369 = vmatprep.subr.bf16.mxu0 %v1078_v21  ;;  %v1261_v20 = vunpack.c.l.s8.bf16 %v581_v11  ;;  %v1389_v21 = vunpack.c.l.s8.bf16 %v645_v12  ;;  %v1382_v23 = vunpack.c.h.s8.bf16 %v638_v19  ;;  %v1374_v29 = vunpack.c.l.s8.bf16 %v638_v19  ;;  %v606_v12 = vld [vmem:[%s4648_s14 + $0x928] sm:$0xff] }
 0x241   : > { %2412 = vmatprep.subr.bf16.mxu1 %v1206_v22  ;;  %v1254_v22 = vunpack.c.h.s8.bf16 %v574_v17  ;;  %v1454_v11 = vunpack.c.l.s8.bf16 %v678_v62  ;;  %v1453_v17 = vunpack.c.l.s8.bf16 %v677_v6 }
 0x243   : > { %2370 = vmatpush2.bf16.msra.mxu0 %v1077_v25  ;;  %v637_v25 = vld [vmem:[%s4648_s14 + $0xa20] sm:$0xff] }
 0x244   : > { %2413 = vmatpush2.bf16.msra.mxu1 %v1205_v26  ;;  %2371 = vmatprep.subr.bf16.mxu0 %v1070_v39  ;;  %v1253_v26 = vunpack.c.h.s8.bf16 %v573_v24  ;;  %v1381_v39 = vunpack.c.h.s8.bf16 %v637_v25 }
 0x245   : > { %2414 = vmatprep.subr.bf16.mxu1 %v1198_v27  ;;  %v5006_v27 = vpop.f32.mrf.mxu1 }
 0x247   : > { %2372 = vmatpush2.bf16.msra.mxu0 %v1069_v30  ;;  %v630_v30 = vld [vmem:[%s4648_s14 + $0x9e8] sm:$0xff]  ;;  %v5010_v34 = vpop.f32.mrf.mxu1 }
 0x248   : > { %2415 = vmatpush2.bf16.msra.mxu1 %v1197_v31  ;;  %2373 = vmatprep.subr.bf16.mxu0 %v1062_v32  ;;  %v694_v31 = vld [vmem:[%s4648_s14 + $0xbe8] sm:$0xff]  ;;  %v1245_v32 = vunpack.c.l.s8.bf16 %v573_v24  ;;  %v1366_v35 = vunpack.c.h.s8.bf16 %v630_v30  ;;  %v669_v24 = vld [vmem:[%s4648_s14 + $0xb20] sm:$0xff] }
 0x249   : > { %2416 = vmatprep.subr.bf16.mxu1 %v1190_v33  ;;  %v1373_v33 = vunpack.c.l.s8.bf16 %v637_v25  ;;  %v5014_v42 = vpop.f32.mrf.mxu1 }
 0x24b   : > { %2374 = vmatpush2.bf16.msra.mxu0 %v1061_v36  ;;  %v1494_v36 = vunpack.c.h.s8.bf16 %v694_v31 }
 0x24c   : > { %2417 = vmatpush2.bf16.msra.mxu1 %v1189_v38  ;;  %2375 = vmatprep.subr.bf16.mxu0 %v1054_v40  ;;  %v629_v38 = vld [vmem:[%s4648_s14 + $0x9e0] sm:$0xff] }
 0x24d   : > { %2418 = vmatprep.subr.bf16.mxu1 %v1182_v37  ;;  %v693_v40 = vld [vmem:[%s4648_s14 + $0xbe0] sm:$0xff]  ;;  %v1365_v37 = vunpack.c.h.s8.bf16 %v629_v38  ;;  %v1357_v48 = vunpack.c.l.s8.bf16 %v629_v38 }
 0x24e   : > { %v1493_v41 = vunpack.c.h.s8.bf16 %v693_v40  ;;  %v1485_v49 = vunpack.c.l.s8.bf16 %v693_v40  ;;  %v5042_v38 = vld [vmem:[%s4648_s14 + $0xce0] sm:$0xff] }
 0x24f   : > { %2376 = vmatpush2.bf16.msra.mxu0 %v1053_v43  ;;  %v1358_v43 = vunpack.c.l.s8.bf16 %v630_v30 }
 0x250   : > { %2419 = vmatpush2.bf16.msra.mxu1 %v1181_v44  ;;  %2431 = vmatprep.subr.bf16.mxu0 %v1302_v46  ;;  %v1486_v44 = vunpack.c.l.s8.bf16 %v694_v31  ;;  %v622_v46 = vld [vmem:[%s4648_s14 + $0x9a8] sm:$0xff] }
 0x251   : > { %2474 = vmatprep.subr.bf16.mxu1 %v1430_v47  ;;  %v686_v47 = vld [vmem:[%s4648_s14 + $0xba8] sm:$0xff] }
 0x252   : > { %2378 = vmatmul.mubr.bf16.vlgmr.msra.gmra.mxu0 %v4441_v58  ;;  %v726_v31 = vld [vmem:[%s4648_s14 + $0xce8] sm:$0xff] }
 0x253   : > { %2421 = vmatmul.mubr.bf16.vlgmr.msra.gmra.mxu1 %v4442_v45  ;;  %2432 = vmatpush1.bf16.msra.mxu0 %v1301_v50  ;;  %v5018_v50 = vpop.f32.mrf.mxu1 }
 0x254   : > { %2475 = vmatpush1.bf16.msra.mxu1 %v1429_v51  ;;  %2433 = vmatprep.subr.bf16.mxu0 %v1294_v53  ;;  %v1350_v51 = vunpack.c.h.s8.bf16 %v622_v46  ;;  %v1478_v53 = vunpack.c.h.s8.bf16 %v686_v47 }
 0x255   : > { %2476 = vmatprep.subr.bf16.mxu1 %v1422_v54  ;;  %2463 = vmatprep.mubr.bf16.mxu0 %v4443_v0  ;;  %v621_v54 = vld [vmem:[%s4648_s14 + $0x9a0] sm:$0xff]  ;;  %v5022_v58 = vpop.f32.mrf.mxu1 }
 0x256   : > { %2506 = vmatprep.mubr.bf16.mxu1 %v4444_v1  ;;  %v1349_v45 = vunpack.c.h.s8.bf16 %v621_v54  ;;  %v1341_v1 = vunpack.c.l.s8.bf16 %v621_v54 }
 0x257   : > { %2434 = vmatpush1.bf16.msra.mxu0 %v1293_v57  ;;  %v1477_v57 = vunpack.c.h.s8.bf16 %v685_v55  ;;  %v5028_v0 = vpop.f32.mrf.mxu1 }
 0x258   : > { %2477 = vmatpush1.bf16.msra.mxu1 %v1421_v52  ;;  %2435 = vmatprep.subr.bf16.mxu0 %v1286_v59  ;;  %v1342_v52 = vunpack.c.l.s8.bf16 %v622_v46  ;;  %v1470_v59 = vunpack.c.l.s8.bf16 %v686_v47  ;;  %v2038_v46 = vadd.f32 %v5026_v63, %v5010_v34 }
 0x259   : > { %2478 = vmatprep.subr.bf16.mxu1 %v1414_v61  ;;  %v614_v61 = vld [vmem:[%s4648_s14 + $0x968] sm:$0xff] }
 0x25b   : > { %2436 = vmatpush1.bf16.msra.mxu0 %v1285_v2  ;;  %v1469_v2 = vunpack.c.l.s8.bf16 %v685_v55 }
 0x25c   : > { %2479 = vmatpush1.bf16.msra.mxu1 %v1413_v3  ;;  %2437 = vmatprep.subr.bf16.mxu0 %v1278_v60  ;;  %v1334_v3 = vunpack.c.h.s8.bf16 %v614_v61  ;;  %v1462_v60 = vunpack.c.h.s8.bf16 %v678_v62 }
 0x25d   : > { %2480 = vmatprep.subr.bf16.mxu1 %v1406_v4  ;;  %v613_v4 = vld [vmem:[%s4648_s14 + $0x960] sm:$0xff] }
 0x25f   : > { %2438 = vmatpush1.bf16.msra.mxu0 %v1277_v8  ;;  %v5032_v8 = vpop.f32.mrf.mxu1 }
 0x260   : > { %2481 = vmatpush1.bf16.msra.mxu1 %v1405_v9  ;;  %2439 = vmatprep.subr.bf16.mxu0 %v1270_v5  ;;  %v1333_v9 = vunpack.c.h.s8.bf16 %v613_v4  ;;  %v1461_v5 = vunpack.c.h.s8.bf16 %v677_v6  ;;  %v717_v6 = vld [vmem:[%s4648_s14 + $0xca0] sm:$0xff] }
 0x261   : > { %2482 = vmatprep.subr.bf16.mxu1 %v1398_v10  ;;  %v1326_v10 = vunpack.c.l.s8.bf16 %v614_v61 }
 0x263   : > { %2440 = vmatpush1.bf16.msra.mxu0 %v1269_v13  ;;  %v670_v13 = vld [vmem:[%s4648_s14 + $0xb28] sm:$0xff] }
 0x264   : > { %2483 = vmatpush1.bf16.msra.mxu1 %v1397_v14  ;;  %2441 = vmatprep.subr.bf16.mxu0 %v1262_v15  ;;  %v2041_v14 = vpop.f32.mrf.mxu0  ;;  %v2084_v15 = vpop.f32.mrf.mxu1  ;;  %v1438_v30 = vunpack.c.l.s8.bf16 %v670_v13 }
 0x265   : > { %2484 = vmatprep.subr.bf16.mxu1 %v1390_v16  ;;  %v1325_v16 = vunpack.c.l.s8.bf16 %v613_v4  ;;  %v2042_v54 = vadd.f32 %v2041_v14, %v5018_v50  ;;  %v4445_v50 = vld [vmem:[%s4650_s15 + $0x20] ss:$52 sps:$4 sm:$0xff]  }
 0x266   : > { %v2121_v19 = vpop.f32.mrf.mxu0 }
 0x267   : > { %2442 = vmatpush1.bf16.msra.mxu0 %v1261_v20  ;;  %v2085_v61 = vadd.f32 %v2084_v15, %v2042_v54 }
 0x268   : > { %2485 = vmatpush1.bf16.msra.mxu1 %v1389_v21  ;;  %2443 = vmatprep.subr.bf16.mxu0 %v1254_v22  ;;  %v1318_v21 = vunpack.c.h.s8.bf16 %v606_v12  ;;  %v1446_v22 = vunpack.c.h.s8.bf16 %v670_v13 }
 0x269   : > { %2486 = vmatprep.subr.bf16.mxu1 %v1382_v23  ;;  %v605_v23 = vld [vmem:[%s4648_s14 + $0x920] sm:$0xff] }
 0x26a   : > { %v1317_v25 = vunpack.c.h.s8.bf16 %v605_v23 }
 0x26b   : > { %2444 = vmatpush1.bf16.msra.mxu0 %v1253_v26  ;;  %v1445_v26 = vunpack.c.h.s8.bf16 %v669_v24 }
 0x26c   : > { %2487 = vmatpush1.bf16.msra.mxu1 %v1381_v39  ;;  %2445 = vmatprep.subr.bf16.mxu0 %v1246_v28  ;;  %v2123_v39 = vpop.f32.mrf.mxu0 }
 0x26d   : > { %2488 = vmatprep.subr.bf16.mxu1 %v1374_v29  ;;  %v1310_v29 = vunpack.c.l.s8.bf16 %v606_v12  ;;  %v335_v12 = vld [vmem:[%s4648_s14 + $0xb0] sm:$0xff] }
 0x26e   : > { %v2125_v40 = vpop.f32.mrf.mxu0 }
 0x26f   : > { %2446 = vmatpush1.bf16.msra.mxu0 %v1245_v32  ;;  %v344_v32 = vld [vmem:[%s4648_s14 + $0xf8] sm:$0xff] }
 0x270   : > { %2489 = vmatpush1.bf16.msra.mxu1 %v1373_v33  ;;  %2447 = vmatprep.subr.bf16.mxu0 %v1366_v35  ;;  %v2036_v33 = vadd.f32 %v2035_v56, %v5006_v27  ;;  %v1309_v35 = vunpack.c.l.s8.bf16 %v605_v23  ;;  %v1557_v27 = vunpack.c.h.s8.bf16 %v5042_v38  ;;  %v2127_v55 = vpop.f32.mrf.mxu0  ;;  %v1550_v56 = vunpack.c.l.s8.bf16 %v726_v31 }
 0x271   : > { %2490 = vmatprep.subr.bf16.mxu1 %v1494_v36  ;;  %v1437_v36 = vunpack.c.l.s8.bf16 %v669_v24 }
 0x272   : > { %v2079_v47 = vadd.f32 %v5022_v58, %v2036_v33  ;;  %v784_v58 = vunpack.c.l.s8.bf16 %v344_v32 }
 0x273   : > { %2448 = vmatpush2.bf16.msra.mxu0 %v1365_v37  ;;  %v2164_v20 = vpop.f32.mrf.mxu1 }
 0x274   : > { %2491 = vmatpush2.bf16.msra.mxu1 %v1493_v41  ;;  %2449 = vmatprep.subr.bf16.mxu0 %v1358_v43  ;;  %v1558_v41 = vunpack.c.h.s8.bf16 %v726_v31  ;;  %v792_v43 = vunpack.c.h.s8.bf16 %v344_v32 }
 0x275   : > { %2492 = vmatprep.subr.bf16.mxu1 %v1486_v44  ;;  %v2166_v28 = vpop.f32.mrf.mxu1  ;;  %v343_v44 = vld [vmem:[%s4648_s14 + $0xf0] sm:$0xff] }
 0x276   : > { %v783_v4 = vunpack.c.l.s8.bf16 %v343_v44 }
 0x277   : > { %2450 = vmatpush2.bf16.msra.mxu0 %v1357_v48  ;;  %v2168_v37 = vpop.f32.mrf.mxu1  ;;  %v2040_v48 = vadd.f32 %v2039_v7, %v5014_v42  ;;  %v2128_v7 = vadd.f32 %v2127_v55, %v2085_v61 }
 0x278   : > { %2493 = vmatpush2.bf16.msra.mxu1 %v1485_v49  ;;  %2451 = vmatprep.subr.bf16.mxu0 %v1350_v51  ;;  %v2081_v49 = vadd.f32 %v5028_v0, %v2038_v46  ;;  %v2122_v51 = vadd.f32 %v2121_v19, %v2079_v47  ;;  %v4446_v0 = vld [vmem:[%s4650_s15 + $0x28] ss:$52 sps:$4 sm:$0xff]  }
 0x279   : > { %2494 = vmatprep.subr.bf16.mxu1 %v1478_v53  ;;  %v791_v53 = vunpack.c.h.s8.bf16 %v343_v44  ;;  %v2170_v34 = vpop.f32.mrf.mxu1  ;;  %v2083_v42 = vadd.f32 %v5032_v8, %v2040_v48  ;;  %v1563_v8 = vld [vmem:[#allocation2 + $0x58] sm:$0xff]  ;;  %v767_v44 = vunpack.c.l.s8.bf16 %v335_v12  ;;  %v327_v48 = vld [vmem:[%s4648_s14 + $0x70] sm:$0xff] }
 0x27a   : > { %v1564_v19 = vld [vmem:[#allocation2 + $0x18] sm:$0xff] }
 0x27b   : > { %2452 = vmatpush2.bf16.msra.mxu0 %v1349_v45  ;;  %v2124_v45 = vadd.f32 %v2123_v39, %v2081_v49  ;;  %v1571_v39 = vld [vmem:[#allocation2 + $0x10] sm:$0xff] }
 0x27c   : > { %2495 = vmatpush2.bf16.msra.mxu1 %v1477_v57  ;;  %2453 = vmatprep.subr.bf16.mxu0 %v1342_v52  ;;  %v2165_v57 = vadd.f32 %v2164_v20, %v2122_v51  ;;  %v5054_v52 = vld [vmem:[%s4648_s14 + $0xca8] sm:$0xff] }
 0x27d   : > { %2496 = vmatprep.subr.bf16.mxu1 %v1470_v59  ;;  %v5057_v59 = vld [vmem:[%s4648_s14 + $0xb8] sm:$0xff] }
 0x27f   : > { %2454 = vmatpush2.bf16.msra.mxu0 %v1341_v1  ;;  %v1549_v1 = vunpack.c.l.s8.bf16 %v5042_v38  ;;  %v1572_v38 = vld [vmem:[#allocation2 + $0x38] sm:$0xff] }
 0x280   : > { %2497 = vmatpush2.bf16.msra.mxu1 %v1469_v2  ;;  %2455 = vmatprep.subr.bf16.mxu0 %v1334_v3  ;;  %v2126_v2 = vadd.f32 %v2125_v40, %v2083_v42  ;;  %v2167_v3 = vadd.f32 %v2166_v28, %v2124_v45  ;;  %v751_v42 = vunpack.c.l.s8.bf16 %v327_v48 }
 0x281   : > { %2498 = vmatprep.subr.bf16.mxu1 %v1462_v60 }
 0x282   : > { %v2169_v13 = vadd.f32 %v2168_v37, %v2126_v2 }
 0x283   : > { %2456 = vmatpush2.bf16.msra.mxu0 %v1333_v9 }
 0x284   : > { %2499 = vmatpush2.bf16.msra.mxu1 %v1461_v5  ;;  %2457 = vmatprep.subr.bf16.mxu0 %v1326_v10  ;;  %v1542_v10 = vunpack.c.h.s8.bf16 %v5054_v52 }
 0x285   : > { %2500 = vmatprep.subr.bf16.mxu1 %v1454_v11  ;;  %v776_v11 = vunpack.c.h.s8.bf16 %v5057_v59 }
 0x287   : > { %2458 = vmatpush2.bf16.msra.mxu0 %v1325_v16  ;;  %v4447_v16 = vld [vmem:[%s4650_s15 + $0x4] ss:$52 sps:$4 sm:$0xff]  }
 0x288   : > { %2501 = vmatpush2.bf16.msra.mxu1 %v1453_v17  ;;  %2459 = vmatprep.subr.bf16.mxu0 %v1318_v21  ;;  %v2171_v17 = vadd.f32 %v2170_v34, %v2128_v7  ;;  %v702_v34 = vld [vmem:[%s4648_s14 + $0xc28] sm:$0xff]  ;;  %v407_v7 = vld [vmem:[%s4648_s14 + $0x2f0] sm:$0xff] }
 0x289   : > { %2502 = vmatprep.subr.bf16.mxu1 %v1446_v22  ;;  %v1541_v22 = vunpack.c.h.s8.bf16 %v717_v6  ;;  %v1510_v45 = vunpack.c.h.s8.bf16 %v702_v34 }
 0x28b   : > { %2460 = vmatpush2.bf16.msra.mxu0 %v1317_v25 }
 0x28c   : > { %2503 = vmatpush2.bf16.msra.mxu1 %v1445_v26  ;;  %2461 = vmatprep.subr.bf16.mxu0 %v1310_v29  ;;  %v775_v26 = vunpack.c.h.s8.bf16 %v335_v12  ;;  %v1534_v29 = vunpack.c.l.s8.bf16 %v5054_v52  ;;  %v701_v52 = vld [vmem:[%s4648_s14 + $0xc20] sm:$0xff]  ;;  %v400_v12 = vld [vmem:[%s4648_s14 + $0x2b8] sm:$0xff] }
 0x28d   : > { %2504 = vmatprep.subr.bf16.mxu1 %v1438_v30  ;;  %v768_v30 = vunpack.c.l.s8.bf16 %v5057_v59  ;;  %v319_v59 = vld [vmem:[%s4648_s14 + $0x30] sm:$0xff]  ;;  %v1509_v61 = vunpack.c.h.s8.bf16 %v701_v52  ;;  %v1501_v2 = vunpack.c.l.s8.bf16 %v701_v52 }
 0x28e   : > { %v471_v52 = vld [vmem:[%s4648_s14 + $0x4f0] sm:$0xff] }
 0x28f   : > { %2462 = vmatpush2.bf16.msra.mxu0 %v1309_v35  ;;  %v710_v35 = vld [vmem:[%s4648_s14 + $0xc68] sm:$0xff] }
 0x290   : > { %2505 = vmatpush2.bf16.msra.mxu1 %v1437_v36  ;;  %2517 = vmatprep.subr.bf16.mxu0 %v1558_v41  ;;  %v328_v36 = vld [vmem:[%s4648_s14 + $0x78] sm:$0xff]  ;;  %v1526_v46 = vunpack.c.h.s8.bf16 %v710_v35  ;;  %v1518_v54 = vunpack.c.l.s8.bf16 %v710_v35 }
 0x291   : > { %2560 = vmatprep.subr.bf16.mxu1 %v792_v43  ;;  %v1533_v43 = vunpack.c.l.s8.bf16 %v717_v6  ;;  %v760_v47 = vunpack.c.h.s8.bf16 %v328_v36  ;;  %v752_v55 = vunpack.c.l.s8.bf16 %v328_v36  ;;  %v375_v6 = vld [vmem:[%s4648_s14 + $0x1f0] sm:$0xff] }
 0x292   : > { %v2207_v62 = vpop.f32.mrf.mxu0  ;;  %2464 = vmatmul.mubr.bf16.vlgmr.msra.gmra.mxu0 %v4445_v50 }
 0x293   : > { %v2250_v63 = vpop.f32.mrf.mxu1  ;;  %2507 = vmatmul.mubr.bf16.vlgmr.msra.gmra.mxu1 %v4446_v0  ;;  %v2208_v60 = vadd.f32 %v2207_v62, %v2165_v57  ;;  %2518 = vmatpush1.bf16.msra.mxu0 %v1557_v27  ;;  %v709_v27 = vld [vmem:[%s4648_s14 + $0xc60] sm:$0xff]  ;;  %v743_v62 = vunpack.c.h.s8.bf16 %v319_v59  ;;  %v376_v0 = vld [vmem:[%s4648_s14 + $0x1f8] sm:$0xff] }
 0x294   : > { %2561 = vmatpush1.bf16.msra.mxu1 %v791_v53  ;;  %v2209_v9 = vpop.f32.mrf.mxu0  ;;  %2519 = vmatprep.subr.bf16.mxu0 %v1550_v56  ;;  %v1525_v51 = vunpack.c.h.s8.bf16 %v709_v27  ;;  %v759_v53 = vunpack.c.h.s8.bf16 %v327_v48  ;;  %v320_v56 = vld [vmem:[%s4648_s14 + $0x38] sm:$0xff]  ;;  %v383_v48 = vld [vmem:[%s4648_s14 + $0x230] sm:$0xff] }
 0x295   : > { %v2252_v5 = vpop.f32.mrf.mxu1  ;;  %2562 = vmatprep.subr.bf16.mxu1 %v784_v58  ;;  %v2251_v14 = vadd.f32 %v2250_v63, %v2208_v60  ;;  %v2210_v15 = vadd.f32 %v2209_v9, %v2167_v3  ;;  %2549 = vmatprep.mubr.bf16.mxu0 %v4574_v18  ;;  %v1517_v58 = vunpack.c.l.s8.bf16 %v709_v27  ;;  %v744_v57 = vunpack.c.h.s8.bf16 %v320_v56  ;;  %v351_v27 = vld [vmem:[%s4648_s14 + $0x130] sm:$0xff] }
 0x296   : > { %2592 = vmatprep.mubr.bf16.mxu1 %v4447_v16  ;;  %v2211_v20 = vpop.f32.mrf.mxu0  ;;  %v1502_v63 = vunpack.c.l.s8.bf16 %v702_v34  ;;  %v736_v50 = vunpack.c.l.s8.bf16 %v320_v56  ;;  %v735_v3 = vunpack.c.l.s8.bf16 %v319_v59  ;;  %v856_v60 = vunpack.c.h.s8.bf16 %v376_v0  ;;  %v472_v34 = vld [vmem:[%s4648_s14 + $0x4f8] sm:$0xff] }
 0x297   : > { %v2254_v21 = vpop.f32.mrf.mxu1  ;;  %v2863_v23 = vadd.f32 %v2251_v14, %v1563_v8  ;;  %v2253_v24 = vadd.f32 %v2252_v5, %v2210_v15  ;;  %v2212_v25 = vadd.f32 %v2211_v20, %v2169_v13  ;;  %2520 = vmatpush1.bf16.msra.mxu0 %v1549_v1  ;;  %v408_v1 = vld [vmem:[%s4648_s14 + $0x2f8] sm:$0xff]  ;;  %v855_v8 = vunpack.c.h.s8.bf16 %v375_v6  ;;  %v399_v20 = vld [vmem:[%s4648_s14 + $0x2b0] sm:$0xff] }
 0x298   : > { %2563 = vmatpush1.bf16.msra.mxu1 %v783_v4  ;;  %v2213_v28 = vpop.f32.mrf.mxu0  ;;  %2521 = vmatprep.subr.bf16.mxu0 %v1542_v10  ;;  %v920_v4 = vunpack.c.h.s8.bf16 %v408_v1  ;;  %v919_v9 = vunpack.c.h.s8.bf16 %v407_v7  ;;  %v848_v5 = vunpack.c.l.s8.bf16 %v376_v0  ;;  %v912_v10 = vunpack.c.l.s8.bf16 %v408_v1  ;;  %v4448_v13 = vld [vmem:[%s4650_s15 + $0x30] ss:$52 sps:$4 sm:$0xff]   ;;  %v4450_v1 = vld [vmem:[%s4650_s15] ss:$52 sps:$4 sm:$0xff]  }
 0x299   : > { %2564 = vmatprep.subr.bf16.mxu1 %v776_v11  ;;  %2879 = vst [vmem:[#allocation2 + $0x58] sm:$0xff] %v2863_v23  ;;  %v2864_v31 = vadd.f32 %v2253_v24, %v1564_v19  ;;  %v2255_v32 = vadd.f32 %v2254_v21, %v2212_v25  ;;  %v2214_v33 = vadd.f32 %v2213_v28, %v2171_v17  ;;  %v2256_v40 = vpop.f32.mrf.mxu1  ;;  %v368_v11 = vld [vmem:[%s4648_s14 + $0x1b8] sm:$0xff]  ;;  %v847_v14 = vunpack.c.l.s8.bf16 %v375_v6  ;;  %v367_v19 = vld [vmem:[%s4648_s14 + $0x1b0] sm:$0xff] }
 0x29a   : > { %v911_v15 = vunpack.c.l.s8.bf16 %v407_v7  ;;  %v840_v16 = vunpack.c.h.s8.bf16 %v368_v11  ;;  %v904_v17 = vunpack.c.h.s8.bf16 %v400_v12  ;;  %v4449_v21 = vld [vmem:[%s4650_s15 + $0xc] ss:$52 sps:$4 sm:$0xff]   ;;  %v903_v23 = vunpack.c.h.s8.bf16 %v399_v20  ;;  %v464_v0 = vld [vmem:[%s4648_s14 + $0x4b8] sm:$0xff] }
 0x29b   : > { %2880 = vst [vmem:[#allocation2 + $0x18] sm:$0xff] %v2864_v31  ;;  %v2871_v37 = vadd.f32 %v2255_v32, %v1571_v39  ;;  %v2257_v41 = vadd.f32 %v2256_v40, %v2214_v33  ;;  %2522 = vmatpush1.bf16.msra.mxu0 %v1541_v22  ;;  %v839_v22 = vunpack.c.h.s8.bf16 %v367_v19  ;;  %v832_v24 = vunpack.c.l.s8.bf16 %v368_v11  ;;  %v392_v39 = vld [vmem:[%s4648_s14 + $0x278] sm:$0xff]  ;;  %v359_v32 = vld [vmem:[%s4648_s14 + $0x170] sm:$0xff] }
 0x29c   : > { %2565 = vmatpush1.bf16.msra.mxu1 %v775_v26  ;;  %2523 = vmatprep.subr.bf16.mxu0 %v1534_v29  ;;  %v896_v25 = vunpack.c.l.s8.bf16 %v400_v12  ;;  %v360_v26 = vld [vmem:[%s4648_s14 + $0x178] sm:$0xff]  ;;  %v831_v28 = vunpack.c.l.s8.bf16 %v367_v19  ;;  %v895_v29 = vunpack.c.l.s8.bf16 %v399_v20  ;;  %v888_v31 = vunpack.c.h.s8.bf16 %v392_v39  ;;  %v391_v33 = vld [vmem:[%s4648_s14 + $0x270] sm:$0xff] }
 0x29d   : > { %2566 = vmatprep.subr.bf16.mxu1 %v768_v30  ;;  %2887 = vst [vmem:[#allocation2 + $0x10] sm:$0xff] %v2871_v37  ;;  %v2872_v49 = vadd.f32 %v2257_v41, %v1572_v38  ;;  %v824_v30 = vunpack.c.h.s8.bf16 %v360_v26  ;;  %v823_v35 = vunpack.c.h.s8.bf16 %v359_v32  ;;  %v887_v36 = vunpack.c.h.s8.bf16 %v391_v33  ;;  %v352_v37 = vld [vmem:[%s4648_s14 + $0x138] sm:$0xff]  ;;  %v431_v6 = vld [vmem:[%s4648_s14 + $0x3b0] sm:$0xff] }
 0x29e   : > { %v816_v38 = vunpack.c.l.s8.bf16 %v360_v26  ;;  %v880_v40 = vunpack.c.l.s8.bf16 %v392_v39  ;;  %v384_v41 = vld [vmem:[%s4648_s14 + $0x238] sm:$0xff]  ;;  %v799_v56 = vunpack.c.l.s8.bf16 %v351_v27  ;;  %v463_v7 = vld [vmem:[%s4648_s14 + $0x4b0] sm:$0xff]  ;;  %v1024_v11 = vunpack.c.l.s8.bf16 %v464_v0 }
 0x29f   : > { %2888 = vst [vmem:[#allocation2 + $0x38] sm:$0xff] %v2872_v49  ;;  %2524 = vmatpush1.bf16.msra.mxu0 %v1533_v43  ;;  %v815_v43 = vunpack.c.l.s8.bf16 %v359_v32  ;;  %v807_v49 = vunpack.c.h.s8.bf16 %v351_v27  ;;  %v424_v12 = vld [vmem:[%s4648_s14 + $0x378] sm:$0xff]  ;;  %v423_v19 = vld [vmem:[%s4648_s14 + $0x370] sm:$0xff] }
 0x2a0   : > { %2567 = vmatpush1.bf16.msra.mxu1 %v767_v44  ;;  %2525 = vmatprep.subr.bf16.mxu0 %v1526_v46  ;;  %v879_v44 = vunpack.c.l.s8.bf16 %v391_v33  ;;  %v808_v46 = vunpack.c.h.s8.bf16 %v352_v37  ;;  %v455_v20 = vld [vmem:[%s4648_s14 + $0x470] sm:$0xff]  ;;  %v448_v26 = vld [vmem:[%s4648_s14 + $0x438] sm:$0xff]  ;;  %v943_v39 = vunpack.c.l.s8.bf16 %v423_v19 }
 0x2a1   : > { %2568 = vmatprep.subr.bf16.mxu1 %v760_v47  ;;  %v872_v47 = vunpack.c.h.s8.bf16 %v384_v41  ;;  %v447_v32 = vld [vmem:[%s4648_s14 + $0x430] sm:$0xff] }
 0x2a2   : > { %v535_v27 = vld [vmem:[%s4648_s14 + $0x6f0] sm:$0xff] }
 0x2a3   : > { %2526 = vmatpush1.bf16.msra.mxu0 %v1525_v51  ;;  %v871_v51 = vunpack.c.h.s8.bf16 %v383_v48 }
 0x2a4   : > { %2569 = vmatpush1.bf16.msra.mxu1 %v759_v53  ;;  %2527 = vmatprep.subr.bf16.mxu0 %v1518_v54  ;;  %v800_v53 = vunpack.c.l.s8.bf16 %v352_v37  ;;  %v864_v54 = vunpack.c.l.s8.bf16 %v384_v41  ;;  %v536_v37 = vld [vmem:[%s4648_s14 + $0x6f8] sm:$0xff] }
 0x2a5   : > { %2570 = vmatprep.subr.bf16.mxu1 %v752_v55  ;;  %v440_v55 = vld [vmem:[%s4648_s14 + $0x3f8] sm:$0xff] }
 0x2a7   : > { %2528 = vmatpush1.bf16.msra.mxu0 %v1517_v58  ;;  %v863_v58 = vunpack.c.l.s8.bf16 %v383_v48 }
 0x2a8   : > { %2571 = vmatpush1.bf16.msra.mxu1 %v751_v42  ;;  %2529 = vmatprep.subr.bf16.mxu0 %v1510_v45  ;;  %v984_v42 = vunpack.c.h.s8.bf16 %v440_v55  ;;  %v1048_v45 = vunpack.c.h.s8.bf16 %v472_v34 }
 0x2a9   : > { %2572 = vmatprep.subr.bf16.mxu1 %v744_v57  ;;  %v439_v57 = vld [vmem:[%s4648_s14 + $0x3f0] sm:$0xff] }
 0x2aa   : > { %v983_v59 = vunpack.c.h.s8.bf16 %v439_v57 }
 0x2ab   : > { %2530 = vmatpush1.bf16.msra.mxu0 %v1509_v61  ;;  %v1047_v61 = vunpack.c.h.s8.bf16 %v471_v52 }
 0x2ac   : > { %2573 = vmatpush1.bf16.msra.mxu1 %v743_v62  ;;  %2531 = vmatprep.subr.bf16.mxu0 %v1502_v63  ;;  %v976_v62 = vunpack.c.l.s8.bf16 %v440_v55  ;;  %v1040_v63 = vunpack.c.l.s8.bf16 %v472_v34  ;;  %v528_v55 = vld [vmem:[%s4648_s14 + $0x6b8] sm:$0xff] }
 0x2ad   : > { %2574 = vmatprep.subr.bf16.mxu1 %v736_v50  ;;  %v432_v50 = vld [vmem:[%s4648_s14 + $0x3b8] sm:$0xff] }
 0x2ae   : > { %v4452_v34 = vld [vmem:[%s4650_s15 + $0x8] ss:$52 sps:$4 sm:$0xff]  }
 0x2af   : > { %2532 = vmatpush1.bf16.msra.mxu0 %v1501_v2  ;;  %v975_v2 = vunpack.c.l.s8.bf16 %v439_v57  ;;  %v495_v57 = vld [vmem:[%s4648_s14 + $0x5b0] sm:$0xff] }
 0x2b0   : > { %2575 = vmatpush1.bf16.msra.mxu1 %v735_v3  ;;  %2603 = vmatprep.subr.bf16.mxu0 %v920_v4  ;;  %v1039_v3 = vunpack.c.l.s8.bf16 %v471_v52  ;;  %v1032_v4 = vunpack.c.h.s8.bf16 %v464_v0  ;;  %v527_v52 = vld [vmem:[%s4648_s14 + $0x6b0] sm:$0xff]  ;;  %v488_v0 = vld [vmem:[%s4648_s14 + $0x578] sm:$0xff] }
 0x2b1   : > { %2576 = vmatprep.subr.bf16.mxu1 %v856_v60  ;;  %v968_v60 = vunpack.c.h.s8.bf16 %v432_v50 }
 0x2b2   : > { %2550 = vmatmul.mubr.bf16.vlgmr.msra.gmra.mxu0 %v4448_v13  ;;  %v456_v13 = vld [vmem:[%s4648_s14 + $0x478] sm:$0xff] }
 0x2b3   : > { %2604 = vmatpush1.bf16.msra.mxu0 %v919_v9  ;;  %2635 = vmatprep.mubr.bf16.mxu0 %v4449_v21  ;;  %v967_v9 = vunpack.c.h.s8.bf16 %v431_v6  ;;  %v951_v21 = vunpack.c.h.s8.bf16 %v423_v19  ;;  %v511_v19 = vld [vmem:[%s4648_s14 + $0x630] sm:$0xff] }
 0x2b4   : > { %2577 = vmatpush2.bf16.msra.mxu1 %v855_v8  ;;  %2605 = vmatprep.subr.bf16.mxu0 %v912_v10  ;;  %v4451_v8 = vld [vmem:[%s4650_s15 + $0x14] ss:$52 sps:$4 sm:$0xff]   ;;  %v960_v10 = vunpack.c.l.s8.bf16 %v432_v50  ;;  %v1152_v50 = vunpack.c.l.s8.bf16 %v528_v55 }
 0x2b5   : > { %2578 = vmatprep.subr.bf16.mxu1 %v848_v5  ;;  %v1031_v5 = vunpack.c.h.s8.bf16 %v463_v7 }
 0x2b7   : > { %2606 = vmatpush1.bf16.msra.mxu0 %v911_v15  ;;  %v1023_v15 = vunpack.c.l.s8.bf16 %v463_v7  ;;  %v519_v7 = vld [vmem:[%s4648_s14 + $0x670] sm:$0xff] }
 0x2b8   : > { %2579 = vmatpush2.bf16.msra.mxu1 %v847_v14  ;;  %2607 = vmatprep.subr.bf16.mxu0 %v904_v17  ;;  %v959_v14 = vunpack.c.l.s8.bf16 %v431_v6  ;;  %v1016_v17 = vunpack.c.h.s8.bf16 %v456_v13  ;;  %v487_v6 = vld [vmem:[%s4648_s14 + $0x570] sm:$0xff] }
 0x2b9   : > { %2580 = vmatprep.subr.bf16.mxu1 %v840_v16  ;;  %v952_v16 = vunpack.c.h.s8.bf16 %v424_v12 }
 0x2bb   : > { %2608 = vmatpush1.bf16.msra.mxu0 %v903_v23  ;;  %v944_v23 = vunpack.c.l.s8.bf16 %v424_v12  ;;  %v512_v12 = vld [vmem:[%s4648_s14 + $0x638] sm:$0xff] }
 0x2bc   : > { %2581 = vmatpush2.bf16.msra.mxu1 %v839_v22  ;;  %2609 = vmatprep.subr.bf16.mxu0 %v896_v25  ;;  %v1015_v22 = vunpack.c.h.s8.bf16 %v455_v20  ;;  %v416_v25 = vld [vmem:[%s4648_s14 + $0x338] sm:$0xff] }
 0x2bd   : > { %2582 = vmatprep.subr.bf16.mxu1 %v832_v24  ;;  %v1008_v24 = vunpack.c.l.s8.bf16 %v456_v13  ;;  %v1071_v13 = vunpack.c.l.s8.bf16 %v487_v6 }
 0x2bf   : > { %2610 = vmatpush1.bf16.msra.mxu0 %v895_v29  ;;  %v936_v29 = vunpack.c.h.s8.bf16 %v416_v25 }
 0x2c0   : > { %2583 = vmatpush2.bf16.msra.mxu1 %v831_v28  ;;  %2611 = vmatprep.subr.bf16.mxu0 %v888_v31  ;;  %v1007_v28 = vunpack.c.l.s8.bf16 %v455_v20  ;;  %v415_v31 = vld [vmem:[%s4648_s14 + $0x330] sm:$0xff] }
 0x2c1   : > { %2584 = vmatprep.subr.bf16.mxu1 %v824_v30  ;;  %v1000_v30 = vunpack.c.h.s8.bf16 %v448_v26  ;;  %v935_v33 = vunpack.c.h.s8.bf16 %v415_v31  ;;  %v927_v41 = vunpack.c.l.s8.bf16 %v415_v31  ;;  %v599_v31 = vld [vmem:[%s4648_s14 + $0x8f0] sm:$0xff] }
 0x2c3   : > { %2612 = vmatpush1.bf16.msra.mxu0 %v887_v36  ;;  %v928_v36 = vunpack.c.l.s8.bf16 %v416_v25  ;;  %v600_v25 = vld [vmem:[%s4648_s14 + $0x8f8] sm:$0xff] }
 0x2c4   : > { %2585 = vmatpush2.bf16.msra.mxu1 %v823_v35  ;;  %2613 = vmatprep.subr.bf16.mxu0 %v880_v40  ;;  %v999_v35 = vunpack.c.h.s8.bf16 %v447_v32  ;;  %v504_v40 = vld [vmem:[%s4648_s14 + $0x5f8] sm:$0xff] }
 0x2c5   : > { %2586 = vmatprep.subr.bf16.mxu1 %v816_v38  ;;  %v992_v38 = vunpack.c.l.s8.bf16 %v448_v26 }
 0x2c7   : > { %2614 = vmatpush1.bf16.msra.mxu0 %v879_v44  ;;  %v1112_v44 = vunpack.c.h.s8.bf16 %v504_v40 }
 0x2c8   : > { %2587 = vmatpush2.bf16.msra.mxu1 %v815_v43  ;;  %2615 = vmatprep.subr.bf16.mxu0 %v872_v47  ;;  %v991_v43 = vunpack.c.l.s8.bf16 %v447_v32  ;;  %v503_v47 = vld [vmem:[%s4648_s14 + $0x5f0] sm:$0xff] }
 0x2c9   : > { %2588 = vmatprep.subr.bf16.mxu1 %v808_v46  ;;  %v1176_v46 = vunpack.c.h.s8.bf16 %v536_v37  ;;  %v1111_v48 = vunpack.c.h.s8.bf16 %v503_v47 }
 0x2cb   : > { %2616 = vmatpush1.bf16.msra.mxu0 %v871_v51  ;;  %v1104_v51 = vunpack.c.l.s8.bf16 %v504_v40  ;;  %v592_v40 = vld [vmem:[%s4648_s14 + $0x8b8] sm:$0xff] }
 0x2cc   : > { %2589 = vmatpush2.bf16.msra.mxu1 %v807_v49  ;;  %2617 = vmatprep.subr.bf16.mxu0 %v864_v54  ;;  %v1175_v49 = vunpack.c.h.s8.bf16 %v535_v27  ;;  %v496_v54 = vld [vmem:[%s4648_s14 + $0x5b8] sm:$0xff] }
 0x2cd   : > { %2590 = vmatprep.subr.bf16.mxu1 %v800_v53  ;;  %v1168_v53 = vunpack.c.l.s8.bf16 %v536_v37  ;;  %v4454_v37 = vld [vmem:[%s4650_s15 + $0x10] ss:$52 sps:$4 sm:$0xff]  }
 0x2cf   : > { %2618 = vmatpush1.bf16.msra.mxu0 %v863_v58  ;;  %v1167_v58 = vunpack.c.l.s8.bf16 %v535_v27  ;;  %v591_v27 = vld [vmem:[%s4648_s14 + $0x8b0] sm:$0xff] }
 0x2d0   : > { %2591 = vmatpush2.bf16.msra.mxu1 %v799_v56  ;;  %2619 = vmatprep.subr.bf16.mxu0 %v984_v42  ;;  %v1103_v56 = vunpack.c.l.s8.bf16 %v503_v47  ;;  %v1096_v42 = vunpack.c.h.s8.bf16 %v496_v54  ;;  %v559_v47 = vld [vmem:[%s4648_s14 + $0x7b0] sm:$0xff] }
 0x2d1   : > { %2646 = vmatprep.subr.bf16.mxu1 %v1048_v45  ;;  %v1160_v45 = vunpack.c.h.s8.bf16 %v528_v55  ;;  %v552_v55 = vld [vmem:[%s4648_s14 + $0x778] sm:$0xff] }
 0x2d3   : > { %2593 = vmatmul.mubr.bf16.vlgmr.msra.gmra.mxu1 %v4450_v1  ;;  %2620 = vmatpush2.bf16.msra.mxu0 %v983_v59  ;;  %v4453_v59 = vld [vmem:[%s4650_s15 + $0x1c] ss:$52 sps:$4 sm:$0xff]  }
 0x2d4   : > { %2647 = vmatpush1.bf16.msra.mxu1 %v1047_v61  ;;  %2621 = vmatprep.subr.bf16.mxu0 %v976_v62  ;;  %v1095_v61 = vunpack.c.h.s8.bf16 %v495_v57  ;;  %v1159_v62 = vunpack.c.h.s8.bf16 %v527_v52  ;;  %v520_v1 = vld [vmem:[%s4648_s14 + $0x678] sm:$0xff] }
 0x2d5   : > { %2648 = vmatprep.subr.bf16.mxu1 %v1040_v63  ;;  %2678 = vmatprep.mubr.bf16.mxu1 %v4451_v8  ;;  %v1088_v63 = vunpack.c.l.s8.bf16 %v496_v54  ;;  %v1079_v8 = vunpack.c.h.s8.bf16 %v487_v6  ;;  %v1280_v54 = vunpack.c.l.s8.bf16 %v592_v40  ;;  %v575_v6 = vld [vmem:[%s4648_s14 + $0x830] sm:$0xff] }
 0x2d7   : > { %2622 = vmatpush2.bf16.msra.mxu0 %v975_v2  ;;  %v1087_v2 = vunpack.c.l.s8.bf16 %v495_v57  ;;  %v551_v57 = vld [vmem:[%s4648_s14 + $0x770] sm:$0xff] }
 0x2d8   : > { %2649 = vmatpush1.bf16.msra.mxu1 %v1039_v3  ;;  %2623 = vmatprep.subr.bf16.mxu0 %v968_v60  ;;  %v1151_v3 = vunpack.c.l.s8.bf16 %v527_v52  ;;  %v1080_v60 = vunpack.c.h.s8.bf16 %v488_v0  ;;  %v583_v52 = vld [vmem:[%s4648_s14 + $0x870] sm:$0xff] }
 0x2d9   : > { %2650 = vmatprep.subr.bf16.mxu1 %v1032_v4  ;;  %v1144_v4 = vunpack.c.h.s8.bf16 %v520_v1 }
 0x2db   : > { %2624 = vmatpush2.bf16.msra.mxu0 %v967_v9  ;;  %v1143_v9 = vunpack.c.h.s8.bf16 %v519_v7 }
 0x2dc   : > { %2651 = vmatpush1.bf16.msra.mxu1 %v1031_v5  ;;  %2625 = vmatprep.subr.bf16.mxu0 %v960_v10  ;;  %v1072_v5 = vunpack.c.l.s8.bf16 %v488_v0  ;;  %v1136_v10 = vunpack.c.l.s8.bf16 %v520_v1  ;;  %v576_v0 = vld [vmem:[%s4648_s14 + $0x838] sm:$0xff]  ;;  %v1199_v1 = vunpack.c.l.s8.bf16 %v551_v57 }
 0x2dd   : > { %2652 = vmatprep.subr.bf16.mxu1 %v1024_v11  ;;  %v480_v11 = vld [vmem:[%s4648_s14 + $0x538] sm:$0xff] }
 0x2df   : > { %2626 = vmatpush2.bf16.msra.mxu0 %v959_v14  ;;  %v1135_v14 = vunpack.c.l.s8.bf16 %v519_v7 }
 0x2e0   : > { %2653 = vmatpush1.bf16.msra.mxu1 %v1023_v15  ;;  %2627 = vmatprep.subr.bf16.mxu0 %v952_v16  ;;  %v1064_v15 = vunpack.c.h.s8.bf16 %v480_v11  ;;  %v1128_v16 = vunpack.c.h.s8.bf16 %v512_v12 }
 0x2e1   : > { %2654 = vmatprep.subr.bf16.mxu1 %v1016_v17  ;;  %v479_v17 = vld [vmem:[%s4648_s14 + $0x530] sm:$0xff] }
 0x2e2   : > { %v1063_v20 = vunpack.c.h.s8.bf16 %v479_v17  ;;  %v1055_v26 = vunpack.c.l.s8.bf16 %v479_v17  ;;  %v663_v17 = vld [vmem:[%s4648_s14 + $0xaf0] sm:$0xff] }
 0x2e3   : > { %2628 = vmatpush2.bf16.msra.mxu0 %v951_v21  ;;  %v1127_v21 = vunpack.c.h.s8.bf16 %v511_v19 }
 0x2e4   : > { %2655 = vmatpush1.bf16.msra.mxu1 %v1015_v22  ;;  %2629 = vmatprep.subr.bf16.mxu0 %v944_v23  ;;  %v1056_v22 = vunpack.c.l.s8.bf16 %v480_v11  ;;  %v1120_v23 = vunpack.c.l.s8.bf16 %v512_v12  ;;  %v664_v11 = vld [vmem:[%s4648_s14 + $0xaf8] sm:$0xff] }
 0x2e5   : > { %2656 = vmatprep.subr.bf16.mxu1 %v1008_v24  ;;  %v568_v24 = vld [vmem:[%s4648_s14 + $0x7f8] sm:$0xff] }
 0x2e7   : > { %2630 = vmatpush2.bf16.msra.mxu0 %v943_v39  ;;  %v1119_v39 = vunpack.c.l.s8.bf16 %v511_v19 }
 0x2e8   : > { %2657 = vmatpush1.bf16.msra.mxu1 %v1007_v28  ;;  %2631 = vmatprep.subr.bf16.mxu0 %v936_v29  ;;  %v1240_v28 = vunpack.c.h.s8.bf16 %v568_v24  ;;  %v1304_v29 = vunpack.c.h.s8.bf16 %v600_v25 }
 0x2e9   : > { %2658 = vmatprep.subr.bf16.mxu1 %v1000_v30  ;;  %v567_v30 = vld [vmem:[%s4648_s14 + $0x7f0] sm:$0xff] }
 0x2ea   : > { %v1239_v32 = vunpack.c.h.s8.bf16 %v567_v30 }
 0x2eb   : > { %2632 = vmatpush2.bf16.msra.mxu0 %v935_v33  ;;  %v1303_v33 = vunpack.c.h.s8.bf16 %v599_v31 }
 0x2ec   : > { %2659 = vmatpush1.bf16.msra.mxu1 %v999_v35  ;;  %2633 = vmatprep.subr.bf16.mxu0 %v928_v36  ;;  %v1232_v35 = vunpack.c.l.s8.bf16 %v568_v24  ;;  %v1296_v36 = vunpack.c.l.s8.bf16 %v600_v25  ;;  %v656_v24 = vld [vmem:[%s4648_s14 + $0xab8] sm:$0xff] }
 0x2ed   : > { %2660 = vmatprep.subr.bf16.mxu1 %v992_v38  ;;  %v560_v38 = vld [vmem:[%s4648_s14 + $0x7b8] sm:$0xff] }
 0x2ee   : > { %v4456_v25 = vld [vmem:[%s4650_s15 + $0x18] ss:$52 sps:$4 sm:$0xff]  }
 0x2ef   : > { %2634 = vmatpush2.bf16.msra.mxu0 %v927_v41  ;;  %v1231_v41 = vunpack.c.l.s8.bf16 %v567_v30  ;;  %v623_v30 = vld [vmem:[%s4648_s14 + $0x9b0] sm:$0xff] }
 0x2f0   : > { %2661 = vmatpush1.bf16.msra.mxu1 %v991_v43  ;;  %2689 = vmatprep.subr.bf16.mxu0 %v1176_v46  ;;  %v1295_v43 = vunpack.c.l.s8.bf16 %v599_v31  ;;  %v1288_v46 = vunpack.c.h.s8.bf16 %v592_v40  ;;  %v655_v31 = vld [vmem:[%s4648_s14 + $0xab0] sm:$0xff]  ;;  %v616_v40 = vld [vmem:[%s4648_s14 + $0x978] sm:$0xff] }
 0x2f1   : > { %2662 = vmatprep.subr.bf16.mxu1 %v1112_v44  ;;  %v1224_v44 = vunpack.c.h.s8.bf16 %v560_v38 }
 0x2f2   : > { %2636 = vmatmul.mubr.bf16.vlgmr.msra.gmra.mxu0 %v4452_v34  ;;  %v584_v34 = vld [vmem:[%s4648_s14 + $0x878] sm:$0xff] }
 0x2f3   : > { %2690 = vmatpush1.bf16.msra.mxu0 %v1175_v49  ;;  %2721 = vmatprep.mubr.bf16.mxu0 %v4453_v59  ;;  %v1223_v49 = vunpack.c.h.s8.bf16 %v559_v47  ;;  %v1207_v59 = vunpack.c.h.s8.bf16 %v551_v57  ;;  %v639_v57 = vld [vmem:[%s4648_s14 + $0xa30] sm:$0xff] }
 0x2f4   : > { %2663 = vmatpush2.bf16.msra.mxu1 %v1111_v48  ;;  %2691 = vmatprep.subr.bf16.mxu0 %v1168_v53  ;;  %v4455_v48 = vld [vmem:[%s4650_s15 + $0x24] ss:$52 sps:$4 sm:$0xff]   ;;  %v1216_v53 = vunpack.c.l.s8.bf16 %v560_v38  ;;  %v1408_v38 = vunpack.c.l.s8.bf16 %v656_v24 }
 0x2f5   : > { %2664 = vmatprep.subr.bf16.mxu1 %v1104_v51  ;;  %v1287_v51 = vunpack.c.h.s8.bf16 %v591_v27 }
 0x2f7   : > { %2692 = vmatpush1.bf16.msra.mxu0 %v1167_v58  ;;  %v1279_v58 = vunpack.c.l.s8.bf16 %v591_v27  ;;  %v647_v27 = vld [vmem:[%s4648_s14 + $0xa70] sm:$0xff] }
 0x2f8   : > { %2665 = vmatpush2.bf16.msra.mxu1 %v1103_v56  ;;  %2693 = vmatprep.subr.bf16.mxu0 %v1160_v45  ;;  %v1215_v56 = vunpack.c.l.s8.bf16 %v559_v47  ;;  %v1272_v45 = vunpack.c.h.s8.bf16 %v584_v34  ;;  %v615_v47 = vld [vmem:[%s4648_s14 + $0x970] sm:$0xff] }
 0x2f9   : > { %2666 = vmatprep.subr.bf16.mxu1 %v1096_v42  ;;  %v1208_v42 = vunpack.c.h.s8.bf16 %v552_v55 }
 0x2fb   : > { %2694 = vmatpush1.bf16.msra.mxu0 %v1159_v62  ;;  %v1200_v62 = vunpack.c.l.s8.bf16 %v552_v55  ;;  %v640_v55 = vld [vmem:[%s4648_s14 + $0xa38] sm:$0xff] }
 0x2fc   : > { %2667 = vmatpush2.bf16.msra.mxu1 %v1095_v61  ;;  %2695 = vmatprep.subr.bf16.mxu0 %v1152_v50  ;;  %v1271_v61 = vunpack.c.h.s8.bf16 %v583_v52  ;;  %v544_v50 = vld [vmem:[%s4648_s14 + $0x738] sm:$0xff] }
 0x2fd   : > { %2668 = vmatprep.subr.bf16.mxu1 %v1088_v63  ;;  %v1264_v63 = vunpack.c.l.s8.bf16 %v584_v34  ;;  %v1327_v34 = vunpack.c.l.s8.bf16 %v615_v47 }
 0x2ff   : > { %2696 = vmatpush1.bf16.msra.mxu0 %v1151_v3  ;;  %v1192_v3 = vunpack.c.h.s8.bf16 %v544_v50 }
 0x300   : > { %2669 = vmatpush2.bf16.msra.mxu1 %v1087_v2  ;;  %2697 = vmatprep.subr.bf16.mxu0 %v1144_v4  ;;  %v1263_v2 = vunpack.c.l.s8.bf16 %v583_v52  ;;  %v543_v4 = vld [vmem:[%s4648_s14 + $0x730] sm:$0xff] }
 0x301   : > { %2670 = vmatprep.subr.bf16.mxu1 %v1080_v60  ;;  %v1256_v60 = vunpack.c.h.s8.bf16 %v576_v0  ;;  %v1191_v7 = vunpack.c.h.s8.bf16 %v543_v4  ;;  %v1183_v12 = vunpack.c.l.s8.bf16 %v543_v4 }
 0x303   : > { %2698 = vmatpush1.bf16.msra.mxu0 %v1143_v9  ;;  %v1184_v9 = vunpack.c.l.s8.bf16 %v544_v50  ;;  %v696_v50 = vld [vmem:[%s4648_s14 + $0xbf8] sm:$0xff] }
 0x304   : > { %2671 = vmatpush2.bf16.msra.mxu1 %v1079_v8  ;;  %2699 = vmatprep.subr.bf16.mxu0 %v1136_v10  ;;  %v1255_v8 = vunpack.c.h.s8.bf16 %v575_v6  ;;  %v632_v10 = vld [vmem:[%s4648_s14 + $0x9f8] sm:$0xff] }
 0x305   : > { %2672 = vmatprep.subr.bf16.mxu1 %v1072_v5  ;;  %v1248_v5 = vunpack.c.l.s8.bf16 %v576_v0  ;;  %v728_v0 = vld [vmem:[%s4648_s14 + $0xcf8] sm:$0xff] }
 0x306   : > { %v1560_v4 = vunpack.c.h.s8.bf16 %v728_v0 }
 0x307   : > { %2700 = vmatpush1.bf16.msra.mxu0 %v1135_v14  ;;  %v1368_v14 = vunpack.c.h.s8.bf16 %v632_v10 }
 0x308   : > { %2673 = vmatpush2.bf16.msra.mxu1 %v1071_v13  ;;  %2701 = vmatprep.subr.bf16.mxu0 %v1128_v16  ;;  %v1247_v13 = vunpack.c.l.s8.bf16 %v575_v6  ;;  %v631_v16 = vld [vmem:[%s4648_s14 + $0x9f0] sm:$0xff] }
 0x309   : > { %2674 = vmatprep.subr.bf16.mxu1 %v1064_v15  ;;  %v1432_v15 = vunpack.c.h.s8.bf16 %v664_v11  ;;  %v1367_v19 = vunpack.c.h.s8.bf16 %v631_v16  ;;  %v695_v6 = vld [vmem:[%s4648_s14 + $0xbf0] sm:$0xff] }
 0x30b   : > { %2702 = vmatpush1.bf16.msra.mxu0 %v1127_v21  ;;  %v1360_v21 = vunpack.c.l.s8.bf16 %v632_v10 }
 0x30c   : > { %2675 = vmatpush2.bf16.msra.mxu1 %v1063_v20  ;;  %2703 = vmatprep.subr.bf16.mxu0 %v1120_v23  ;;  %v1431_v20 = vunpack.c.h.s8.bf16 %v663_v17  ;;  %v624_v23 = vld [vmem:[%s4648_s14 + $0x9b8] sm:$0xff] }
 0x30d   : > { %2676 = vmatprep.subr.bf16.mxu1 %v1056_v22  ;;  %v1424_v22 = vunpack.c.l.s8.bf16 %v664_v11  ;;  %v1488_v11 = vunpack.c.l.s8.bf16 %v696_v50 }
 0x30f   : > { %2704 = vmatpush1.bf16.msra.mxu0 %v1119_v39  ;;  %v1423_v39 = vunpack.c.l.s8.bf16 %v663_v17  ;;  %v1487_v17 = vunpack.c.l.s8.bf16 %v695_v6 }
 0x310   : > { %2677 = vmatpush2.bf16.msra.mxu1 %v1055_v26  ;;  %2705 = vmatprep.subr.bf16.mxu0 %v1240_v28  ;;  %v1359_v26 = vunpack.c.l.s8.bf16 %v631_v16  ;;  %v1352_v28 = vunpack.c.h.s8.bf16 %v624_v23  ;;  %v4458_v16 = vld [vmem:[%s4650_s15 + $0x20] ss:$52 sps:$4 sm:$0xff]  }
 0x311   : > { %2732 = vmatprep.subr.bf16.mxu1 %v1304_v29  ;;  %v1416_v29 = vunpack.c.h.s8.bf16 %v656_v24  ;;  %v719_v24 = vld [vmem:[%s4648_s14 + $0xcb0] sm:$0xff] }
 0x313   : > { %2679 = vmatmul.mubr.bf16.vlgmr.msra.gmra.mxu1 %v4454_v37  ;;  %2706 = vmatpush2.bf16.msra.mxu0 %v1239_v32  ;;  %v4457_v32 = vld [vmem:[%s4650_s15 + $0x2c] ss:$52 sps:$4 sm:$0xff]   ;;  %v648_v37 = vld [vmem:[%s4648_s14 + $0xa78] sm:$0xff] }
 0x314   : > { %2733 = vmatpush1.bf16.msra.mxu1 %v1303_v33  ;;  %2707 = vmatprep.subr.bf16.mxu0 %v1232_v35  ;;  %v1351_v33 = vunpack.c.h.s8.bf16 %v623_v30  ;;  %v1415_v35 = vunpack.c.h.s8.bf16 %v655_v31 }
 0x315   : > { %2734 = vmatprep.subr.bf16.mxu1 %v1296_v36  ;;  %2764 = vmatprep.mubr.bf16.mxu1 %v4455_v48  ;;  %v1344_v36 = vunpack.c.l.s8.bf16 %v624_v23  ;;  %v1335_v48 = vunpack.c.h.s8.bf16 %v615_v47  ;;  %v687_v23 = vld [vmem:[%s4648_s14 + $0xbb0] sm:$0xff] }
 0x317   : > { %2708 = vmatpush2.bf16.msra.mxu0 %v1231_v41  ;;  %v1343_v41 = vunpack.c.l.s8.bf16 %v623_v30 }
 0x318   : > { %2735 = vmatpush1.bf16.msra.mxu1 %v1295_v43  ;;  %2709 = vmatprep.subr.bf16.mxu0 %v1224_v44  ;;  %v1407_v43 = vunpack.c.l.s8.bf16 %v655_v31  ;;  %v1336_v44 = vunpack.c.h.s8.bf16 %v616_v40  ;;  %v680_v31 = vld [vmem:[%s4648_s14 + $0xb78] sm:$0xff] }
 0x319   : > { %2736 = vmatprep.subr.bf16.mxu1 %v1288_v46  ;;  %v1400_v46 = vunpack.c.h.s8.bf16 %v648_v37 }
 0x31b   : > { %2710 = vmatpush2.bf16.msra.mxu0 %v1223_v49  ;;  %v1399_v49 = vunpack.c.h.s8.bf16 %v647_v27 }
 0x31c   : > { %2737 = vmatpush1.bf16.msra.mxu1 %v1287_v51  ;;  %2711 = vmatprep.subr.bf16.mxu0 %v1216_v53  ;;  %v1328_v51 = vunpack.c.l.s8.bf16 %v616_v40  ;;  %v1392_v53 = vunpack.c.l.s8.bf16 %v648_v37  ;;  %v1464_v40 = vunpack.c.h.s8.bf16 %v680_v31 }
 0x31d   : > { %2738 = vmatprep.subr.bf16.mxu1 %v1280_v54  ;;  %v608_v54 = vld [vmem:[%s4648_s14 + $0x938] sm:$0xff] }
 0x31f   : > { %2712 = vmatpush2.bf16.msra.mxu0 %v1215_v56  ;;  %v1391_v56 = vunpack.c.l.s8.bf16 %v647_v27 }
 0x320   : > { %2739 = vmatpush1.bf16.msra.mxu1 %v1279_v58  ;;  %2713 = vmatprep.subr.bf16.mxu0 %v1208_v42  ;;  %v1320_v58 = vunpack.c.h.s8.bf16 %v608_v54  ;;  %v1384_v42 = vunpack.c.h.s8.bf16 %v640_v55 }
 0x321   : > { %2740 = vmatprep.subr.bf16.mxu1 %v1272_v45  ;;  %v607_v45 = vld [vmem:[%s4648_s14 + $0x930] sm:$0xff] }
 0x322   : > { %v1319_v52 = vunpack.c.h.s8.bf16 %v607_v45 }
 0x323   : > { %2714 = vmatpush2.bf16.msra.mxu0 %v1207_v59  ;;  %v1383_v59 = vunpack.c.h.s8.bf16 %v639_v57 }
 0x324   : > { %2741 = vmatpush1.bf16.msra.mxu1 %v1271_v61  ;;  %2715 = vmatprep.subr.bf16.mxu0 %v1200_v62  ;;  %v5168_v61 = vpop.f32.mrf.mxu0  ;;  %v1312_v62 = vunpack.c.l.s8.bf16 %v608_v54 }
 0x325   : > { %2742 = vmatprep.subr.bf16.mxu1 %v1264_v63  ;;  %v1376_v63 = vunpack.c.l.s8.bf16 %v640_v55 }
 0x327   : > { %2716 = vmatpush2.bf16.msra.mxu0 %v1199_v1  ;;  %v1311_v1 = vunpack.c.l.s8.bf16 %v607_v45 }
 0x328   : > { %2743 = vmatpush1.bf16.msra.mxu1 %v1263_v2  ;;  %2717 = vmatprep.subr.bf16.mxu0 %v1192_v3  ;;  %v1375_v2 = vunpack.c.l.s8.bf16 %v639_v57  ;;  %v5172_v3 = vpop.f32.mrf.mxu0  ;;  %v671_v57 = vld [vmem:[%s4648_s14 + $0xb30] sm:$0xff] }
 0x329   : > { %2744 = vmatprep.subr.bf16.mxu1 %v1256_v60  ;;  %v1496_v60 = vunpack.c.h.s8.bf16 %v696_v50  ;;  %v1447_v50 = vunpack.c.h.s8.bf16 %v671_v57 }
 0x32a   : > { %v5178_v10 = vpop.f32.mrf.mxu0 }
 0x32b   : > { %2718 = vmatpush2.bf16.msra.mxu0 %v1191_v7  ;;  %v727_v7 = vld [vmem:[%s4648_s14 + $0xcf0] sm:$0xff] }
 0x32c   : > { %2745 = vmatpush1.bf16.msra.mxu1 %v1255_v8  ;;  %2719 = vmatprep.subr.bf16.mxu0 %v1184_v9  ;;  %v5176_v8 = vpop.f32.mrf.mxu1  ;;  %v1495_v9 = vunpack.c.h.s8.bf16 %v695_v6 }
 0x32d   : > { %2746 = vmatprep.subr.bf16.mxu1 %v1248_v5  ;;  %v1559_v5 = vunpack.c.h.s8.bf16 %v727_v7 }
 0x32f   : > { %2720 = vmatpush2.bf16.msra.mxu0 %v1183_v12  ;;  %v1552_v12 = vunpack.c.l.s8.bf16 %v728_v0 }
 0x330   : > { %2747 = vmatpush1.bf16.msra.mxu1 %v1247_v13  ;;  %2775 = vmatprep.subr.bf16.mxu0 %v1432_v15  ;;  %v688_v13 = vld [vmem:[%s4648_s14 + $0xbb8] sm:$0xff]  ;;  %v5182_v15 = vpop.f32.mrf.mxu1 }
 0x331   : > { %2748 = vmatprep.subr.bf16.mxu1 %v1368_v14  ;;  %v720_v14 = vld [vmem:[%s4648_s14 + $0xcb8] sm:$0xff] }
 0x332   : > { %2722 = vmatmul.mubr.bf16.vlgmr.msra.gmra.mxu0 %v4456_v25  ;;  %v5190_v25 = vpop.f32.mrf.mxu1  ;;  %v1536_v30 = vunpack.c.l.s8.bf16 %v720_v14 }
 0x333   : > { %2776 = vmatpush1.bf16.msra.mxu0 %v1431_v20  ;;  %2807 = vmatprep.mubr.bf16.mxu0 %v4457_v32  ;;  %v5185_v20 = vpop.f32.mrf.mxu0  ;;  %v712_v32 = vld [vmem:[%s4648_s14 + $0xc78] sm:$0xff]  ;;  %v2341_v6 = vadd.f32 %v5190_v25, %v5178_v10 }
 0x334   : > { %2749 = vmatpush2.bf16.msra.mxu1 %v1367_v19  ;;  %2777 = vmatprep.subr.bf16.mxu0 %v1424_v22  ;;  %v1551_v19 = vunpack.c.l.s8.bf16 %v727_v7  ;;  %v1544_v22 = vunpack.c.h.s8.bf16 %v720_v14  ;;  %v1528_v37 = vunpack.c.h.s8.bf16 %v712_v32 }
 0x335   : > { %2750 = vmatprep.subr.bf16.mxu1 %v1360_v21  ;;  %v1480_v21 = vunpack.c.h.s8.bf16 %v688_v13 }
 0x337   : > { %2778 = vmatpush1.bf16.msra.mxu0 %v1423_v39  ;;  %v1479_v39 = vunpack.c.h.s8.bf16 %v687_v23 }
 0x338   : > { %2751 = vmatpush2.bf16.msra.mxu1 %v1359_v26  ;;  %2779 = vmatprep.subr.bf16.mxu0 %v1416_v29  ;;  %v2379_v26 = vpop.f32.mrf.mxu0  ;;  %v1472_v29 = vunpack.c.l.s8.bf16 %v688_v13 }
 0x339   : > { %2752 = vmatprep.subr.bf16.mxu1 %v1352_v28  ;;  %v1543_v28 = vunpack.c.h.s8.bf16 %v719_v24 }
 0x33b   : > { %2780 = vmatpush1.bf16.msra.mxu0 %v1415_v35  ;;  %v2381_v35 = vpop.f32.mrf.mxu0 }
 0x33c   : > { %2753 = vmatpush2.bf16.msra.mxu1 %v1351_v33  ;;  %2781 = vmatprep.subr.bf16.mxu0 %v1408_v38  ;;  %v2342_v33 = vpop.f32.mrf.mxu1 }
 0x33d   : > { %2754 = vmatprep.subr.bf16.mxu1 %v1344_v36  ;;  %v1535_v36 = vunpack.c.l.s8.bf16 %v719_v24  ;;  %v1565_v24 = vld [vmem:[#allocation2 + $0x50] sm:$0xff] }
 0x33e   : > { %v2422_v38 = vpop.f32.mrf.mxu1 }
 0x33f   : > { %2782 = vmatpush1.bf16.msra.mxu0 %v1407_v43  ;;  %v711_v43 = vld [vmem:[%s4648_s14 + $0xc70] sm:$0xff] }
 0x340   : > { %2755 = vmatpush2.bf16.msra.mxu1 %v1343_v41  ;;  %2783 = vmatprep.subr.bf16.mxu0 %v1400_v46  ;;  %v679_v41 = vld [vmem:[%s4648_s14 + $0xb70] sm:$0xff]  ;;  %v1527_v47 = vunpack.c.h.s8.bf16 %v711_v43  ;;  %v2424_v27 = vpop.f32.mrf.mxu1 }
 0x341   : > { %2756 = vmatprep.subr.bf16.mxu1 %v1336_v44  ;;  %v2383_v44 = vpop.f32.mrf.mxu0  ;;  %v1463_v46 = vunpack.c.h.s8.bf16 %v679_v41  ;;  %v1455_v55 = vunpack.c.l.s8.bf16 %v679_v41 }
 0x343   : > { %2784 = vmatpush1.bf16.msra.mxu0 %v1399_v49  ;;  %v1520_v49 = vunpack.c.l.s8.bf16 %v712_v32  ;;  %v2385_v54 = vpop.f32.mrf.mxu0 }
 0x344   : > { %2757 = vmatpush2.bf16.msra.mxu1 %v1335_v48  ;;  %2785 = vmatprep.subr.bf16.mxu0 %v1392_v53  ;;  %v1456_v48 = vunpack.c.l.s8.bf16 %v680_v31  ;;  %v704_v53 = vld [vmem:[%s4648_s14 + $0xc38] sm:$0xff]  ;;  %v1566_v31 = vld [vmem:[#allocation2 + $0x68] sm:$0xff] }
 0x345   : > { %2758 = vmatprep.subr.bf16.mxu1 %v1328_v51  ;;  %v672_v51 = vld [vmem:[%s4648_s14 + $0xb38] sm:$0xff]  ;;  %v1512_v45 = vunpack.c.h.s8.bf16 %v704_v53 }
 0x347   : > { %2786 = vmatpush1.bf16.msra.mxu0 %v1391_v56  ;;  %v2426_v56 = vpop.f32.mrf.mxu1 }
 0x348   : > { %2759 = vmatpush2.bf16.msra.mxu1 %v1327_v34  ;;  %2787 = vmatprep.subr.bf16.mxu0 %v1384_v42  ;;  %v1519_v34 = vunpack.c.l.s8.bf16 %v711_v43  ;;  %v1448_v42 = vunpack.c.h.s8.bf16 %v672_v51 }
 0x349   : > { %2760 = vmatprep.subr.bf16.mxu1 %v1320_v58 }
 0x34b   : > { %2788 = vmatpush1.bf16.msra.mxu0 %v1383_v59  ;;  %v2337_v59 = vadd.f32 %v5176_v8, %v5168_v61  ;;  %v2343_v61 = vadd.f32 %v2342_v33, %v5185_v20 }
 0x34c   : > { %2761 = vmatpush2.bf16.msra.mxu1 %v1319_v52  ;;  %2789 = vmatprep.subr.bf16.mxu0 %v1376_v63  ;;  %v703_v52 = vld [vmem:[%s4648_s14 + $0xc30] sm:$0xff] }
 0x34d   : > { %2762 = vmatprep.subr.bf16.mxu1 %v1312_v62  ;;  %v2339_v62 = vadd.f32 %v5182_v15, %v5172_v3  ;;  %v2380_v63 = vadd.f32 %v2379_v26, %v2337_v59  ;;  %v1511_v0 = vunpack.c.h.s8.bf16 %v703_v52  ;;  %v2384_v3 = vadd.f32 %v2383_v44, %v2341_v6  ;;  %v4459_v26 = vld [vmem:[%s4650_s15 + $0x28] ss:$52 sps:$4 sm:$0xff]  }
 0x34e   : > { %v2386_v14 = vadd.f32 %v2385_v54, %v2343_v61  ;;  %v1574_v44 = vld [vmem:[#allocation2 + $0x70] sm:$0xff] }
 0x34f   : > { %2790 = vmatpush1.bf16.msra.mxu0 %v1375_v2  ;;  %v2382_v7 = vadd.f32 %v2381_v35, %v2339_v62  ;;  %v2427_v10 = vadd.f32 %v2426_v56, %v2384_v3 }
 0x350   : > { %2763 = vmatpush2.bf16.msra.mxu1 %v1311_v1  ;;  %2791 = vmatprep.subr.bf16.mxu0 %v1496_v60  ;;  %v2428_v1 = vpop.f32.mrf.mxu1  ;;  %v1440_v60 = vunpack.c.l.s8.bf16 %v672_v51 }
 0x351   : > { %2818 = vmatprep.subr.bf16.mxu1 %v1560_v4  ;;  %v1504_v4 = vunpack.c.l.s8.bf16 %v704_v53  ;;  %v2425_v13 = vadd.f32 %v2424_v27, %v2382_v7  ;;  %v2429_v20 = vadd.f32 %v2428_v1, %v2386_v14 }
 0x352   : > { %v2465_v58 = vpop.f32.mrf.mxu0 }
 0x353   : > { %2765 = vmatmul.mubr.bf16.vlgmr.msra.gmra.mxu1 %v4458_v16  ;;  %2792 = vmatpush2.bf16.msra.mxu0 %v1495_v9  ;;  %v2508_v8 = vpop.f32.mrf.mxu1  ;;  %v2423_v9 = vadd.f32 %v2422_v38, %v2380_v63  ;;  %v1573_v38 = vld [vmem:[#allocation2 + $0x60] sm:$0xff] }
 0x354   : > { %2819 = vmatpush1.bf16.msra.mxu1 %v1559_v5  ;;  %2793 = vmatprep.subr.bf16.mxu0 %v1488_v11  ;;  %v2467_v2 = vpop.f32.mrf.mxu0  ;;  %v1439_v5 = vunpack.c.l.s8.bf16 %v671_v57  ;;  %v1503_v11 = vunpack.c.l.s8.bf16 %v703_v52 }
 0x355   : > { %2820 = vmatprep.subr.bf16.mxu1 %v1552_v12  ;;  %2850 = vmatprep.mubr.bf16.mxu1 %v4574_v18  ;;  %v1471_v18 = vunpack.c.l.s8.bf16 %v687_v23  ;;  %v2466_v15 = vadd.f32 %v2465_v58, %v2423_v9  ;;  %v2510_v16 = vpop.f32.mrf.mxu1 }
 0x356   : > { %v2469_v12 = vpop.f32.mrf.mxu0 }
 0x357   : > { %2794 = vmatpush2.bf16.msra.mxu0 %v1487_v17  ;;  %v2468_v17 = vadd.f32 %v2467_v2, %v2425_v13  ;;  %v2512_v23 = vpop.f32.mrf.mxu1 }
 0x358   : > { %2821 = vmatpush1.bf16.msra.mxu1 %v1551_v19  ;;  %2795 = vmatprep.subr.bf16.mxu0 %v1480_v21  ;;  %v2471_v19 = vpop.f32.mrf.mxu0  ;;  %v2509_v21 = vadd.f32 %v2508_v8, %v2466_v15 }
 0x359   : > { %2822 = vmatprep.subr.bf16.mxu1 %v1544_v22  ;;  %v2470_v22 = vadd.f32 %v2469_v12, %v2427_v10 }
 0x35b   : > { %2796 = vmatpush2.bf16.msra.mxu0 %v1479_v39  ;;  %v4460_v39 = vld [vmem:[%s4650_s15 + $0x30] ss:$52 sps:$4 sm:$0xff]   ;;  %v2513_v33 = vadd.f32 %v2512_v23, %v2470_v22 }
 0x35c   : > { %2823 = vmatpush1.bf16.msra.mxu1 %v1543_v28  ;;  %2797 = vmatprep.subr.bf16.mxu0 %v1472_v29  ;;  %v2511_v28 = vadd.f32 %v2510_v16, %v2468_v17  ;;  %v2472_v29 = vadd.f32 %v2471_v19, %v2429_v20  ;;  %v1567_v19 = vld [vmem:[#allocation2 + $0x8] sm:$0xff] }
 0x35d   : > { %2824 = vmatprep.subr.bf16.mxu1 %v1536_v30 }
 0x35f   : > { %2798 = vmatpush2.bf16.msra.mxu0 %v1471_v18 }
 0x360   : > { %2825 = vmatpush1.bf16.msra.mxu1 %v1535_v36  ;;  %2799 = vmatprep.subr.bf16.mxu0 %v1464_v40  ;;  %v2514_v36 = vpop.f32.mrf.mxu1 }
 0x361   : > { %2826 = vmatprep.subr.bf16.mxu1 %v1528_v37  ;;  %v2515_v37 = vadd.f32 %v2514_v36, %v2472_v29 }
 0x363   : > { %2800 = vmatpush2.bf16.msra.mxu0 %v1463_v46 }
 0x364   : > { %2827 = vmatpush1.bf16.msra.mxu1 %v1527_v47  ;;  %2801 = vmatprep.subr.bf16.mxu0 %v1456_v48 }
 0x365   : > { %2828 = vmatprep.subr.bf16.mxu1 %v1520_v49 }
 0x367   : > { %2802 = vmatpush2.bf16.msra.mxu0 %v1455_v55 }
 0x368   : > { %2829 = vmatpush1.bf16.msra.mxu1 %v1519_v34  ;;  %2803 = vmatprep.subr.bf16.mxu0 %v1448_v42 }
 0x369   : > { %2830 = vmatprep.subr.bf16.mxu1 %v1512_v45 }
 0x36b   : > { %2804 = vmatpush2.bf16.msra.mxu0 %v1447_v50 }
 0x36c   : > { %2831 = vmatpush1.bf16.msra.mxu1 %v1511_v0  ;;  %2805 = vmatprep.subr.bf16.mxu0 %v1440_v60 }
 0x36d   : > { %2832 = vmatprep.subr.bf16.mxu1 %v1504_v4 }
 0x36f   : > { %2806 = vmatpush2.bf16.msra.mxu0 %v1439_v5 }
 0x370   : > { %2833 = vmatpush1.bf16.msra.mxu1 %v1503_v11 }
 0x372   : > { %v2551_v25 = vpop.f32.mrf.mxu0  ;;  %2808 = vmatmul.mubr.bf16.vlgmr.msra.gmra.mxu0 %v4459_v26  ;;  %v1568_v26 = vld [vmem:[#allocation2 + $0x48] sm:$0xff] }
 0x373   : > { %2851 = vmatmul.mubr.bf16.vlgmr.msra.gmra.mxu1 %v4460_v39  ;;  %v2552_v30 = vadd.f32 %v2551_v25, %v2509_v21 }
 0x374   : > { %v2553_v32 = vpop.f32.mrf.mxu0 }
 0x375   : > { %v2865_v35 = vadd.f32 %v2552_v30, %v1565_v24  ;;  %v2554_v18 = vadd.f32 %v2553_v32, %v2511_v28 }
 0x376   : > { %v2555_v40 = vpop.f32.mrf.mxu0 }
 0x377   : > { %2881 = vst [vmem:[#allocation2 + $0x50] sm:$0xff] %v2865_v35  ;;  %v2866_v41 = vadd.f32 %v2554_v18, %v1566_v31  ;;  %v2556_v43 = vadd.f32 %v2555_v40, %v2513_v33  ;;  %v1575_v33 = vld [vmem:[#allocation2 + $0x78] sm:$0xff]  ;;  %v1576_v40 = vld [vmem:[#allocation2 + $0x28] sm:$0xff] }
 0x378   : > { %v2557_v46 = vpop.f32.mrf.mxu0 }
 0x379   : > { %2882 = vst [vmem:[#allocation2 + $0x68] sm:$0xff] %v2866_v41  ;;  %v2873_v47 = vadd.f32 %v2556_v43, %v1573_v38  ;;  %v2558_v27 = vadd.f32 %v2557_v46, %v2515_v37 }
 0x37b   : > { %2889 = vst [vmem:[#allocation2 + $0x60] sm:$0xff] %v2873_v47  ;;  %v2874_v48 = vadd.f32 %v2558_v27, %v1574_v44 }
 0x37d   : > { %2890 = vst [vmem:[#allocation2 + $0x70] sm:$0xff] %v2874_v48 }
 0x393   : > { %v2594_v49 = vpop.f32.mrf.mxu1 }
 0x395   : > { %v2596_v51 = vpop.f32.mrf.mxu1 }
 0x397   : > { %v2598_v53 = vpop.f32.mrf.mxu1 }
 0x399   : > { %v2600_v54 = vpop.f32.mrf.mxu1 }
 0x3b2   : > { %v2637_v55 = vpop.f32.mrf.mxu0 }
 0x3b3   : > { %v2638_v0 = vadd.f32 %v2637_v55, %v2594_v49 }
 0x3b4   : > { %v2639_v56 = vpop.f32.mrf.mxu0 }
 0x3b5   : > { %v2640_v60 = vadd.f32 %v2639_v56, %v2596_v51 }
 0x3b6   : > { %v2641_v42 = vpop.f32.mrf.mxu0 }
 0x3b7   : > { %v2642_v6 = vadd.f32 %v2641_v42, %v2598_v53 }
 0x3b8   : > { %v2643_v57 = vpop.f32.mrf.mxu0 }
 0x3b9   : > { %v2644_v3 = vadd.f32 %v2643_v57, %v2600_v54 }
 0x3d3   : > { %v2680_v34 = vpop.f32.mrf.mxu1 }
 0x3d4   : > { %v2681_v4 = vadd.f32 %v2680_v34, %v2638_v0 }
 0x3d5   : > { %v2682_v58 = vpop.f32.mrf.mxu1 }
 0x3d6   : > { %v2683_v7 = vadd.f32 %v2682_v58, %v2640_v60 }
 0x3d7   : > { %v2684_v45 = vpop.f32.mrf.mxu1 }
 0x3d8   : > { %v2685_v5 = vadd.f32 %v2684_v45, %v2642_v6 }
 0x3d9   : > { %v2686_v52 = vpop.f32.mrf.mxu1 }
 0x3da   : > { %v2687_v15 = vadd.f32 %v2686_v52, %v2644_v3 }
 0x3f2   : > { %v2723_v59 = vpop.f32.mrf.mxu0 }
 0x3f3   : > { %v2724_v61 = vadd.f32 %v2723_v59, %v2681_v4 }
 0x3f4   : > { %v2725_v63 = vpop.f32.mrf.mxu0 }
 0x3f5   : > { %v2726_v11 = vadd.f32 %v2725_v63, %v2683_v7 }
 0x3f6   : > { %v2727_v1 = vpop.f32.mrf.mxu0 }
 0x3f7   : > { %v2728_v16 = vadd.f32 %v2727_v1, %v2685_v5 }
 0x3f8   : > { %v2729_v8 = vpop.f32.mrf.mxu0 }
 0x3f9   : > { %v2730_v22 = vadd.f32 %v2729_v8, %v2687_v15 }
 0x413   : > { %v2766_v62 = vpop.f32.mrf.mxu1 }
 0x414   : > { %v2767_v12 = vadd.f32 %v2766_v62, %v2724_v61 }
 0x415   : > { %v2768_v50 = vpop.f32.mrf.mxu1 }
 0x416   : > { %v2769_v10 = vadd.f32 %v2768_v50, %v2726_v11 }
 0x417   : > { %v2770_v2 = vpop.f32.mrf.mxu1 }
 0x418   : > { %v2771_v23 = vadd.f32 %v2770_v2, %v2728_v16 }
 0x419   : > { %v2772_v9 = vpop.f32.mrf.mxu1 }
 0x41a   : > { %v2773_v29 = vadd.f32 %v2772_v9, %v2730_v22 }
 0x432   : > { %v2809_v13 = vpop.f32.mrf.mxu0 }
 0x433   : > { %v2852_v14 = vpop.f32.mrf.mxu1  ;;  %v2810_v17 = vadd.f32 %v2809_v13, %v2767_v12 }
 0x434   : > { %v2811_v20 = vpop.f32.mrf.mxu0 }
 0x435   : > { %v2854_v21 = vpop.f32.mrf.mxu1  ;;  %v2853_v24 = vadd.f32 %v2852_v14, %v2810_v17  ;;  %v2812_v25 = vadd.f32 %v2811_v20, %v2769_v10 }
 0x436   : > { %v2813_v39 = vpop.f32.mrf.mxu0 }
 0x437   : > { %v2856_v28 = vpop.f32.mrf.mxu1  ;;  %v2867_v30 = vadd.f32 %v2853_v24, %v1567_v19  ;;  %v2855_v31 = vadd.f32 %v2854_v21, %v2812_v25  ;;  %v2814_v32 = vadd.f32 %v2813_v39, %v2771_v23 }
 0x438   : > { %v2815_v35 = vpop.f32.mrf.mxu0 }
 0x439   : > { %2883 = vst [vmem:[#allocation2 + $0x8] sm:$0xff] %v2867_v30  ;;  %v2868_v18 = vadd.f32 %v2855_v31, %v1568_v26  ;;  %v2857_v36 = vadd.f32 %v2856_v28, %v2814_v32  ;;  %v2816_v38 = vadd.f32 %v2815_v35, %v2773_v29  ;;  %v2858_v37 = vpop.f32.mrf.mxu1 }
 0x43b   : > { %2884 = vst [vmem:[#allocation2 + $0x48] sm:$0xff] %v2868_v18  ;;  %v2875_v41 = vadd.f32 %v2857_v36, %v1575_v33  ;;  %v2859_v43 = vadd.f32 %v2858_v37, %v2816_v38  ;;  %2896 = sbr.rel (%p4212_p10) target bundleno = 1452 (0x5ac), region = 74 }
 0x43d   : > { %2891 = vst [vmem:[#allocation2 + $0x78] sm:$0xff] %v2875_v41  ;;  %v2876_v44 = vadd.f32 %v2859_v43, %v1576_v40 }
 0x43f   : > { %2892 = vst [vmem:[#allocation2 + $0x28] sm:$0xff] %v2876_v44 }
 0x440   : > { %v4461_v46 = vld [vmem:[%s5744_s3 + $0x78] sm:$0xff]   ;;  %v4465_v49 = vld [vmem:[%s5744_s3 + $0x70] sm:$0xff]   ;;  %v4469_v55 = vld [vmem:[%s5744_s3 + $0x68] sm:$0xff]   ;;  %v2918_v6 = vlaneseq }
 0x441   : > { %v4462_v47 = vld [vmem:[%s5744_s3 + $0xf8] sm:$0xff]   ;;  %4289 = vmatprep.subr.bf16.mxu0 %v4461_v46  ;;  %v4466_v51 = vld [vmem:[%s5744_s3 + $0xf0] sm:$0xff]   ;;  %v4470_v34 = vld [vmem:[%s5744_s3 + $0xe8] sm:$0xff]  }
 0x442   : > { %v4463_v27 = vld [vmem:[%s5744_s3 + $0x38] sm:$0xff]   ;;  %4311 = vmatprep.subr.bf16.mxu1 %v4462_v47  ;;  %v4467_v53 = vld [vmem:[%s5744_s3 + $0x30] sm:$0xff]   ;;  %v4471_v56 = vld [vmem:[%s5744_s3 + $0x28] sm:$0xff]   ;;  %v5297_v3 = vshrl.u32 %v2918_v6, 7 }
 0x443   : > { %v4464_v48 = vld [vmem:[%s5744_s3 + $0xb8] sm:$0xff]   ;;  %4290 = vmatpush3.bf16.msra.mxu0 %v4463_v27  ;;  %v4468_v54 = vld [vmem:[%s5744_s3 + $0xb0] sm:$0xff]   ;;  %v4472_v58 = vld [vmem:[%s5744_s3 + $0xa8] sm:$0xff]  }
 0x444   : > { %4312 = vmatpush3.bf16.msra.mxu1 %v4464_v48  ;;  %4291 = vmatprep.subr.bf16.mxu0 %v4465_v49  ;;  %v4473_v42 = vld [vmem:[%s5744_s3 + $0x60] sm:$0xff]   ;;  %v4477_v59 = vld [vmem:[%s5744_s3 + $0x58] sm:$0xff]   ;;  %v4481_v0 = vld [vmem:[%s5744_s3 + $0x50] sm:$0xff]   ;;  %v5312_v14 = vsub.s32 1, %v5297_v3  ;;  %v5315_v15 = vsub.s32 3, %v5297_v3  ;;  %v5318_v16 = vsub.s32 0, %v5297_v3 }
 0x445   : > { %4313 = vmatprep.subr.bf16.mxu1 %v4466_v51  ;;  %v4474_v45 = vld [vmem:[%s5744_s3 + $0xe0] sm:$0xff]   ;;  %v4478_v62 = vld [vmem:[%s5744_s3 + $0xd8] sm:$0xff]   ;;  %v4482_v1 = vld [vmem:[%s5744_s3 + $0xd0] sm:$0xff]   ;;  %v5366_v35 = vsub.s32 2, %v5297_v3  ;;  %vm3037_vm0 = vcmp.lt.s32.totalorder %v5297_v3, 4 }
 0x446   : > { %v4475_v57 = vld [vmem:[%s5744_s3 + $0x20] sm:$0xff]   ;;  %v4479_v63 = vld [vmem:[%s5744_s3 + $0x18] sm:$0xff]   ;;  %v4483_v2 = vld [vmem:[%s5744_s3 + $0x10] sm:$0xff]  }
 0x447   : > { %4292 = vmatpush3.bf16.msra.mxu0 %v4467_v53  ;;  %v4476_v52 = vld [vmem:[%s5744_s3 + $0xa0] sm:$0xff]   ;;  %v4480_v50 = vld [vmem:[%s5744_s3 + $0x98] sm:$0xff]   ;;  %v4484_v60 = vld [vmem:[%s5744_s3 + $0x90] sm:$0xff]  }
 0x448   : > { %4314 = vmatpush3.bf16.msra.mxu1 %v4468_v54  ;;  %4293 = vmatprep.subr.bf16.mxu0 %v4469_v55  ;;  %v4485_v4 = vld [vmem:[%s5744_s3 + $0x48] sm:$0xff]   ;;  %v4489_v9 = vld [vmem:[%s5744_s3 + $0x40] sm:$0xff]   ;;  %v2900_v24 = vld [vmem:[#allocation2 + $0x18] sm:$0xff] }
 0x449   : > { %4315 = vmatprep.subr.bf16.mxu1 %v4470_v34  ;;  %v4486_v7 = vld [vmem:[%s5744_s3 + $0xc8] sm:$0xff]   ;;  %v4490_v5 = vld [vmem:[%s5744_s3 + $0xc0] sm:$0xff]   ;;  %v4493_v29 = vld [vmem:[%s5744_s3 + $0x178] sm:$0xff]  }
 0x44a   : > { %v4487_v61 = vld [vmem:[%s5744_s3 + $0x8] sm:$0xff]   ;;  %v4491_v11 = vld [vmem:[%s5744_s3] sm:$0xff]   ;;  %v4494_v32 = vld [vmem:[%s5744_s3 + $0x1f8] sm:$0xff]  }
 0x44b   : > { %4294 = vmatpush3.bf16.msra.mxu0 %v4471_v56  ;;  %v4488_v8 = vld [vmem:[%s5744_s3 + $0x88] sm:$0xff]   ;;  %v4492_v12 = vld [vmem:[%s5744_s3 + $0x80] sm:$0xff]   ;;  %v2897_v18 = vld [vmem:[#allocation2 + $0x30] sm:$0xff] }
 0x44c   : > { %4316 = vmatpush3.bf16.msra.mxu1 %v4472_v58  ;;  %4295 = vmatprep.subr.bf16.mxu0 %v4473_v42  ;;  %v4213_v13 = vld [vmem:[%s5743_s2 + $0x3] ss:$8 sm:$0xf]  ;;  %v2974_v17 = vld [vmem:[%s5743_s2] ss:$8 sm:$0xf] }
 0x44d   : > { %4317 = vmatprep.subr.bf16.mxu1 %v4474_v45  ;;  %v4214_v10 = vld [vmem:[%s5743_s2 + $0x3] ss:$8 sm:$0xf0]  ;;  %v2975_v20 = vld [vmem:[%s5743_s2] ss:$8 sm:$0xf0] }
 0x44e   : > { %v5326_v19 = vor.u32 %v4214_v10, %v4213_v13  ;;  %v2898_v21 = vld [vmem:[#allocation2] sm:$0xff]  ;;  %v5331_v22 = vor.u32 %v2975_v20, %v2974_v17  ;;  %v2899_v37 = vld [vmem:[#allocation2 + $0x58] sm:$0xff] }
 0x44f   : > { %4296 = vmatpush3.bf16.msra.mxu0 %v4475_v57 }
 0x450   : > { %4318 = vmatpush3.bf16.msra.mxu1 %v4476_v52  ;;  %4297 = vmatprep.subr.bf16.mxu0 %v4477_v59  ;;  %v5335_v23 = vrot.slane %v5326_v19, %v5312_v14  ;;  %v5339_v25 = vrot.slane %v5326_v19, %v5315_v15  ;;  %v5343_v26 = vrot.slane %v5326_v19, %v5318_v16 }
 0x451   : > { %4319 = vmatprep.subr.bf16.mxu1 %v4478_v62  ;;  %v5347_v39 = vrot.slane %v5331_v22, %v5312_v14  ;;  %v5351_v28 = vrot.slane %v5331_v22, %v5315_v15  ;;  %v5363_v33 = vrot.slane %v5331_v22, %v5318_v16  ;;  %v5387_v46 = vrot.slane %v5326_v19, %v5366_v35 }
 0x452   : > { %v2959_v30 = vmul.f32 %v5335_v23, %v2898_v21  ;;  %v2961_v31 = vmul.f32 %v5339_v25, %v2900_v24  ;;  %v2958_v40 = vmul.f32 %v5343_v26, %v2897_v18  ;;  %v5395_v45 = vrot.slane %v5331_v22, %v5366_v35 }
 0x453   : > { %4298 = vmatpush3.bf16.msra.mxu0 %v4479_v63  ;;  %v2960_v53 = vmul.f32 %v5387_v46, %v2899_v37 }
 0x454   : > { %4320 = vmatpush3.bf16.msra.mxu1 %v4480_v50  ;;  %4299 = vmatprep.subr.bf16.mxu0 %v4481_v0  ;;  %v5370_v36 = vadd.f32 %v5347_v39, %v2959_v30  ;;  %v5373_v38 = vadd.f32 %v5351_v28, %v2961_v31  ;;  %v5383_v44 = vadd.f32 %v5363_v33, %v2958_v40 }
 0x455   : > { %4321 = vmatprep.subr.bf16.mxu1 %v4482_v1  ;;  %v5398_v0 = vadd.f32 %v5395_v45, %v2960_v53 }
 0x456   : > { %v3044_v41 = vsel %vm3037_vm0, %v5370_v36, 0.0  ;;  %v3046_v43 = vsel %vm3037_vm0, %v5373_v38, 0.0  ;;  %v3043_v51 = vsel %vm3037_vm0, %v5383_v44, 0.0 }
 0x457   : > { %4300 = vmatpush3.bf16.msra.mxu0 %v4483_v2  ;;  %v3067_v47 = vrot.slane %v3044_v41, 4  ;;  %v3124_v27 = vmul.f32 %v3044_v41, %v3044_v41  ;;  %v3081_v48 = vrot.slane %v3046_v43, 4  ;;  %v3126_v49 = vmul.f32 %v3046_v43, %v3046_v43 }
 0x458   : > { %4322 = vmatpush3.bf16.msra.mxu1 %v4484_v60  ;;  %4301 = vmatprep.subr.bf16.mxu0 %v4485_v4  ;;  %v3060_v58 = vrot.slane %v3043_v51, 4  ;;  %v3123_v42 = vmul.f32 %v3043_v51, %v3043_v51 }
 0x459   : > { %4323 = vmatprep.subr.bf16.mxu1 %v4486_v7  ;;  %v3068_v54 = vadd.f32 %v3067_v47, %v3044_v41  ;;  %v3147_v55 = vrot.slane %v3124_v27, 4  ;;  %v3082_v34 = vadd.f32 %v3081_v48, %v3046_v43  ;;  %v3161_v56 = vrot.slane %v3126_v49, 4 }
 0x45a   : > { %v3061_v63 = vadd.f32 %v3060_v58, %v3043_v51  ;;  %v3140_v50 = vrot.slane %v3123_v42, 4 }
 0x45b   : > { %4302 = vmatpush3.bf16.msra.mxu0 %v4487_v61  ;;  %v3069_v57 = vrot.slane %v3068_v54, 2  ;;  %v3148_v52 = vadd.f32 %v3147_v55, %v3124_v27  ;;  %v3083_v59 = vrot.slane %v3082_v34, 2  ;;  %v3162_v62 = vadd.f32 %v3161_v56, %v3126_v49  ;;  %v4216_v55 = vld [vmem:[%s5743_s2 + $0x1] ss:$8 sm:$0xf0] }
 0x45c   : > { %4324 = vmatpush3.bf16.msra.mxu1 %v4488_v8  ;;  %4303 = vmatprep.subr.bf16.mxu0 %v4489_v9  ;;  %v3062_v6 = vrot.slane %v3061_v63, 2  ;;  %v3141_v7 = vadd.f32 %v3140_v50, %v3123_v42  ;;  %v3045_v61 = vsel %vm3037_vm0, %v5398_v0, 0.0  ;;  %v4218_v56 = vld [vmem:[%s5743_s2 + $0x2] ss:$8 sm:$0xf0] }
 0x45d   : > { %4325 = vmatprep.subr.bf16.mxu1 %v4490_v5  ;;  %v3070_v1 = vadd.f32 %v3069_v57, %v3068_v54  ;;  %v3149_v2 = vrot.slane %v3148_v52, 2  ;;  %v3084_v60 = vadd.f32 %v3083_v59, %v3082_v34  ;;  %v3163_v4 = vrot.slane %v3162_v62, 2  ;;  %v4215_v54 = vld [vmem:[%s5743_s2 + $0x1] ss:$8 sm:$0xf] }
 0x45e   : > { %v3142_v13 = vrot.slane %v3141_v7, 2  ;;  %v3074_v10 = vrot.slane %v3045_v61, 4  ;;  %v3125_v17 = vmul.f32 %v3045_v61, %v3045_v61  ;;  %v4217_v34 = vld [vmem:[%s5743_s2 + $0x2] ss:$8 sm:$0xf]  ;;  %v5424_v57 = vsub.s32 5, %v5297_v3 }
 0x45f   : > { %4304 = vmatpush3.bf16.msra.mxu0 %v4491_v11  ;;  %v3071_v8 = vrot.slane %v3070_v1, 1  ;;  %v3150_v9 = vadd.f32 %v3149_v2, %v3148_v52  ;;  %v3085_v5 = vrot.slane %v3084_v60, 1  ;;  %v3164_v11 = vadd.f32 %v3163_v4, %v3162_v62 }
 0x460   : > { %4326 = vmatpush3.bf16.msra.mxu1 %v4492_v12  ;;  %4333 = vmatprep.subr.bf16.mxu0 %v4493_v29  ;;  %v3063_v12 = vadd.f32 %v3062_v6, %v3061_v63  ;;  %v3143_v31 = vadd.f32 %v3142_v13, %v3141_v7  ;;  %v3154_v18 = vrot.slane %v3125_v17, 4  ;;  %v2944_v2 = vsub.s32 6, %v5297_v3 }
 0x461   : > { %4355 = vmatprep.subr.bf16.mxu1 %v4494_v32  ;;  %v3072_v20 = vadd.f32 %v3071_v8, %v3070_v1  ;;  %v3151_v21 = vrot.slane %v3150_v9, 1  ;;  %v3086_v24 = vadd.f32 %v3085_v5, %v3084_v60  ;;  %v3165_v29 = vrot.slane %v3164_v11, 1  ;;  %v2906_v60 = vld [vmem:[#allocation2 + $0x20] sm:$0xff]  ;;  %v2908_v8 = vld [vmem:[#allocation2 + $0x38] sm:$0xff] }
 0x462   : > { %v3064_v30 = vrot.slane %v3063_v12, 1  ;;  %v3075_v32 = vadd.f32 %v3074_v10, %v3045_v61  ;;  %v3144_v27 = vrot.slane %v3143_v31, 1  ;;  %v3155_v49 = vadd.f32 %v3154_v18, %v3125_v17  ;;  %v2905_v17 = vld [vmem:[#allocation2 + $0x40] sm:$0xff]  ;;  %v2907_v18 = vld [vmem:[#allocation2 + $0x10] sm:$0xff] }
 0x463   : > { %v5403_v40 = vmul.f32 0.25, %v3072_v20  ;;  %v3152_v37 = vadd.f32 %v3151_v21, %v3150_v9  ;;  %v5405_v41 = vmul.f32 0.25, %v3086_v24  ;;  %v3166_v43 = vadd.f32 %v3165_v29, %v3164_v11 }
 0x464   : > { %v3065_v47 = vadd.f32 %v3064_v30, %v3063_v12  ;;  %v3076_v48 = vrot.slane %v3075_v32, 2  ;;  %v3145_v62 = vadd.f32 %v3144_v27, %v3143_v31  ;;  %v3156_v1 = vrot.slane %v3155_v49, 2 }
 0x465   : > { %v3196_v51 = vmul.f32 0.25, %v3152_v37  ;;  %v3204_v53 = vmul.f32 %v5403_v40, %v5403_v40  ;;  %v3198_v58 = vmul.f32 0.25, %v3166_v43  ;;  %v3206_v42 = vmul.f32 %v5405_v41, %v5405_v41 }
 0x466   : > { %v5426_v59 = vmul.f32 0.25, %v3065_v47  ;;  %v3077_v63 = vadd.f32 %v3076_v48, %v3075_v32  ;;  %v3195_v6 = vmul.f32 0.25, %v3145_v62  ;;  %v5431_v61 = vor.u32 %v4216_v55, %v4215_v54 }
 0x467   : > { %v3212_v52 = vsub.f32 %v3196_v51, %v3204_v53  ;;  %v3214_v50 = vsub.f32 %v3198_v58, %v3206_v42  ;;  %v3157_v11 = vadd.f32 %v3156_v1, %v3155_v49  ;;  %v5433_v12 = vor.u32 %v4218_v56, %v4217_v34  ;;  %v2902_v1 = vld [vmem:[#allocation2 + $0x68] sm:$0xff] }
 0x468   : > { %v3203_v7 = vmul.f32 %v5426_v59, %v5426_v59  ;;  %v3078_v5 = vrot.slane %v3077_v63, 1  ;;  %v2967_v10 = vmul.f32 %v5335_v23, %v2906_v60  ;;  %v5437_v29 = vsub.s32 7, %v5297_v3 }
 0x469   : > { %v3236_v4 = vadd.f32 1e-05, %v3212_v52  ;;  %v3238_v9 = vadd.f32 1e-05, %v3214_v50  ;;  %v3158_v21 = vrot.slane %v3157_v11, 1  ;;  %v5440_v30 = vsub.s32 4, %v5297_v3 }
 0x46a   : > { %v3211_v13 = vsub.f32 %v3195_v6, %v3203_v7  ;;  %v3079_v20 = vadd.f32 %v3078_v5, %v3077_v63  ;;  %v3279_v31 = vrot.slane %v5431_v61, %v5312_v14  ;;  %v2969_v32 = vmul.f32 %v5339_v25, %v2908_v8  ;;  %v2904_v6 = vld [vmem:[#allocation2 + $0x48] sm:$0xff]  ;;  %v4509_v3 = vld [vmem:[%s5744_s3 + $0x158] sm:$0xff]  }
 0x46b   : > { %4525 = vrsqrt.f32 %v3236_v4  ;;  %v3159_v23 = vadd.f32 %v3158_v21, %v3157_v11  ;;  %v5449_v43 = vrot.slane %v5433_v12, %v5312_v14  ;;  %v2966_v47 = vmul.f32 %v5343_v26, %v2905_v17 }
 0x46c   : > { %4527 = vrsqrt.f32 %v3238_v9  ;;  %v3235_v24 = vadd.f32 1e-05, %v3211_v13  ;;  %v5445_v37 = vmul.f32 0.25, %v3079_v20  ;;  %v5453_v27 = vrot.slane %v5326_v19, %v2944_v2  ;;  %v2903_v9 = vld [vmem:[#allocation2 + $0x8] sm:$0xff] }
 0x46d   : > { %v3027_v48 = vadd.f32 %v5347_v39, %v2967_v10  ;;  %v3287_v49 = vrot.slane %v5431_v61, %v5315_v15  ;;  %v3197_v25 = vmul.f32 0.25, %v3159_v23  ;;  %v2968_v53 = vmul.f32 %v5387_v46, %v2907_v18 }
 0x46e   : > { %4529 = vrsqrt.f32 %v3235_v24  ;;  %v3205_v51 = vmul.f32 %v5445_v37, %v5445_v37  ;;  %v5462_v14 = vrot.slane %v5331_v22, %v2944_v2  ;;  %v5465_v26 = vrot.slane %v5431_v61, %v2944_v2 }
 0x46f   : > { %v5468_v54 = vrot.slane %v5433_v12, %v2944_v2  ;;  %v3029_v39 = vadd.f32 %v5351_v28, %v2969_v32  ;;  %v3348_v55 = vrot.slane %v5433_v12, %v5315_v15  ;;  %v5475_v56 = vrot.slane %v5326_v19, %v5424_v57 }
 0x470   : > { %v3213_v34 = vsub.f32 %v3197_v25, %v3205_v51  ;;  %v3026_v46 = vadd.f32 %v5363_v33, %v2966_v47  ;;  %v5480_v58 = vrot.slane %v5431_v61, %v5318_v16  ;;  %v5484_v42 = vrot.slane %v5433_v12, %v5318_v16 }
 0x471   : > { %v5488_v28 = vrot.slane %v5326_v19, %v5437_v29  ;;  %v5492_v52 = vrot.slane %v5431_v61, %v5366_v35  ;;  %v5496_v33 = vrot.slane %v5331_v22, %v5424_v57  ;;  %v5500_v62 = vrot.slane %v5326_v19, %v5440_v30 }
 0x472   : > { %v3237_v15 = vadd.f32 1e-05, %v3213_v34  ;;  %v3220_v16 = vsub.f32 %v5370_v36, %v5403_v40  ;;  %v3228_v63 = vsub.f32 %v3027_v48, %v5403_v40  ;;  %v5506_v50 = vadd.f32 %v5395_v45, %v2968_v53  ;;  %v2901_v36 = vld [vmem:[#allocation2 + $0x50] sm:$0xff] }
 0x473   : > { %v5510_v2 = vrot.slane %v5331_v22, %v5437_v29  ;;  %v3222_v60 = vsub.f32 %v5373_v38, %v5405_v41  ;;  %v3230_v4 = vsub.f32 %v3029_v39, %v5405_v41  ;;  %v2963_v19 = vmul.f32 %v5475_v56, %v2902_v1 }
 0x474   : > { %4531 = vrsqrt.f32 %v3237_v15  ;;  %v3219_v40 = vsub.f32 %v5383_v44, %v5426_v59  ;;  %v3227_v45 = vsub.f32 %v3026_v46, %v5426_v59  ;;  %v5521_v7 = vrot.slane %v5433_v12, %v5366_v35 }
 0x475   : > { %v2965_v8 = vmul.f32 %v5488_v28, %v2904_v6  ;;  %v3221_v41 = vsub.f32 %v5398_v0, %v5445_v37  ;;  %v5527_v5 = vadd.f32 %v5496_v33, %v2963_v19  ;;  %v2962_v11 = vmul.f32 %v5500_v62, %v2901_v36 }
 0x476   : > { %v5532_v44 = vrot.slane %v5331_v22, %v5440_v30  ;;  %v3229_v10 = vsub.f32 %v5506_v50, %v5445_v37  ;;  %v5543_v24 = vmul.f32 %v5453_v27, %v2903_v9 }
 0x477   : > { %v5537_v17 = vadd.f32 %v5510_v2, %v2965_v8  ;;  %v3048_v21 = vsel %vm3037_vm0, %v5527_v5, 0.0 }
 0x478   : > { %v4526_v38 = vpop.eup %4525  ;;  %v3095_v18 = vrot.slane %v3048_v21, 4  ;;  %v3128_v23 = vmul.f32 %v3048_v21, %v3048_v21  ;;  %v5549_v51 = vadd.f32 %v5532_v44, %v2962_v11 }
 0x479   : > { %v4528_v59 = vpop.eup %4527  ;;  %v3252_v13 = vmul.f32 %v4526_v38, %v3220_v16  ;;  %v3260_v35 = vmul.f32 %v4526_v38, %v3228_v63  ;;  %v3050_v37 = vsel %vm3037_vm0, %v5537_v17, 0.0 }
 0x47a   : > { %v3254_v20 = vmul.f32 %v4528_v59, %v3222_v60  ;;  %v3262_v0 = vmul.f32 %v4528_v59, %v3230_v4  ;;  %v3096_v16 = vadd.f32 %v3095_v18, %v3048_v21  ;;  %v3175_v63 = vrot.slane %v3128_v23, 4 }
 0x47b   : > { %v3313_v22 = vmul.f32 %v3279_v31, %v3252_v13  ;;  %v3321_v32 = vmul.f32 %v3279_v31, %v3260_v35  ;;  %v4530_v47 = vpop.eup %4529 }
 0x47c   : > { %v3315_v48 = vmul.f32 %v3287_v49, %v3254_v20  ;;  %v3323_v25 = vmul.f32 %v3287_v49, %v3262_v0  ;;  %v3251_v34 = vmul.f32 %v4530_v47, %v3219_v40  ;;  %v3259_v46 = vmul.f32 %v4530_v47, %v3227_v45 }
 0x47d   : > { %v3374_v53 = vadd.f32 %v5449_v43, %v3313_v22  ;;  %v3382_v39 = vadd.f32 %v5449_v43, %v3321_v32  ;;  %v3176_v59 = vadd.f32 %v3175_v63, %v3128_v23  ;;  %v3109_v0 = vrot.slane %v3050_v37, 4 }
 0x47e   : > { %v3376_v15 = vadd.f32 %v3348_v55, %v3315_v48  ;;  %v3384_v31 = vadd.f32 %v3348_v55, %v3323_v25  ;;  %v3312_v6 = vmul.f32 %v5480_v58, %v3251_v34  ;;  %v3320_v43 = vmul.f32 %v5480_v58, %v3259_v46  ;;  %v4497_v34 = vld [vmem:[%s5744_s3 + $0x170] sm:$0xff]  }
 0x47f   : > { %vm3390_vm1 = vcmp.gt.f32.partialorder %v3374_v53, 0.0  ;;  %vm3398_vm2 = vcmp.gt.f32.partialorder %v3382_v39, 0.0  ;;  %v3406_v49 = vmul.f32 0.01, %v3374_v53  ;;  %v3414_v50 = vmul.f32 0.01, %v3382_v39 }
 0x480   : > { %vm3392_vm3 = vcmp.gt.f32.partialorder %v3376_v15, 0.0  ;;  %vm3400_vm4 = vcmp.gt.f32.partialorder %v3384_v31, 0.0  ;;  %v3408_v1 = vmul.f32 0.01, %v3376_v15  ;;  %v3416_v60 = vmul.f32 0.01, %v3384_v31 }
 0x481   : > { %v3422_v4 = vsel %vm3390_vm1, %v3374_v53, %v3406_v49  ;;  %v3430_v19 = vsel %vm3398_vm2, %v3382_v39, %v3414_v50  ;;  %v3097_v55 = vrot.slane %v3096_v16, 2  ;;  %v4532_v8 = vpop.eup %4531  ;;  %v3373_v38 = vadd.f32 %v5484_v42, %v3312_v6  ;;  %v4496_v6 = vld [vmem:[%s5744_s3 + $0x1b8] sm:$0xff]  }
 0x482   : > { %v3438_v36 = vpack.c.bf16 %v3430_v19, %v3422_v4  ;;  %v3424_v40 = vsel %vm3392_vm3, %v3376_v15, %v3408_v1  ;;  %v3432_v45 = vsel %vm3400_vm4, %v3384_v31, %v3416_v60  ;;  %v3381_v11 = vadd.f32 %v5484_v42, %v3320_v43  ;;  %v4495_v42 = vld [vmem:[%s5744_s3 + $0x138] sm:$0xff]   ;;  %v4501_v43 = vld [vmem:[%s5744_s3 + $0x168] sm:$0xff]  }
 0x483   : > { %v3440_v9 = vpack.c.bf16 %v3432_v45, %v3424_v40  ;;  %v3253_v13 = vmul.f32 %v4532_v8, %v3221_v41  ;;  %v3261_v35 = vmul.f32 %v4532_v8, %v3229_v10  ;;  %v3098_v20 = vadd.f32 %v3097_v55, %v3096_v16  ;;  %v2911_v45 = vld [vmem:[#allocation2 + $0x78] sm:$0xff]  ;;  %v4498_v8 = vld [vmem:[%s5744_s3 + $0x1f0] sm:$0xff]  }
 0x484   : > { %3991 = vmatprep.mubr.bf16.mxu0 %v3438_v36  ;;  %vm3389_vm5 = vcmp.gt.f32.partialorder %v3373_v38, 0.0  ;;  %vm3397_vm6 = vcmp.gt.f32.partialorder %v3381_v11, 0.0  ;;  %v3405_v58 = vmul.f32 0.01, %v3373_v38  ;;  %v3413_v21 = vmul.f32 0.01, %v3381_v11 }
 0x485   : > { %4032 = vmatprep.mubr.bf16.mxu1 %v3440_v9  ;;  %v3314_v22 = vmul.f32 %v5492_v52, %v3253_v13  ;;  %v3322_v32 = vmul.f32 %v5492_v52, %v3261_v35  ;;  %v3099_v18 = vrot.slane %v3098_v20, 1  ;;  %v3177_v47 = vrot.slane %v3176_v59, 2  ;;  %v4503_v35 = vld [vmem:[%s5744_s3 + $0x128] sm:$0xff]  }
 0x486   : > { %v3421_v48 = vsel %vm3389_vm5, %v3373_v38, %v3405_v58  ;;  %v3429_v25 = vsel %vm3397_vm6, %v3381_v11, %v3413_v21  ;;  %v3110_v41 = vadd.f32 %v3109_v0, %v3050_v37  ;;  %v3130_v10 = vmul.f32 %v3050_v37, %v3050_v37 }
 0x487   : > { %v3437_v23 = vpack.c.bf16 %v3429_v25, %v3421_v48  ;;  %v3375_v53 = vadd.f32 %v5521_v7, %v3314_v22  ;;  %v3383_v39 = vadd.f32 %v5521_v7, %v3322_v32  ;;  %v3100_v52 = vadd.f32 %v3099_v18, %v3098_v20  ;;  %v4499_v7 = vld [vmem:[%s5744_s3 + $0x130] sm:$0xff]   ;;  %v4505_v32 = vld [vmem:[%s5744_s3 + $0x160] sm:$0xff]  }
 0x488   : > { %v3178_v46 = vadd.f32 %v3177_v47, %v3176_v59  ;;  %v3111_v15 = vrot.slane %v3110_v41, 2  ;;  %v3189_v31 = vrot.slane %v3130_v10, 4  ;;  %v3047_v16 = vsel %vm3037_vm0, %v5549_v51, 0.0  ;;  %v4500_v22 = vld [vmem:[%s5744_s3 + $0x1b0] sm:$0xff]  }
 0x489   : > { %3992 = vmatmul.mubr.bf16.vlgmr.msra.gmra.mxu0 %v3437_v23  ;;  %vm3391_vm7 = vcmp.gt.f32.partialorder %v3375_v53, 0.0  ;;  %vm3399_vm8 = vcmp.gt.f32.partialorder %v3383_v39, 0.0  ;;  %v3407_v37 = vmul.f32 0.01, %v3375_v53  ;;  %v3415_v63 = vmul.f32 0.01, %v3383_v39 }
 0x48a   : > { %4334 = vmatpush3.bf16.msra.mxu0 %v4495_v42  ;;  %v5573_v49 = vmul.f32 0.25, %v3100_v52  ;;  %v3179_v50 = vrot.slane %v3178_v46, 1  ;;  %v3112_v1 = vadd.f32 %v3111_v15, %v3110_v41  ;;  %v3190_v60 = vadd.f32 %v3189_v31, %v3130_v10  ;;  %v2910_v31 = vld [vmem:[#allocation2 + $0x70] sm:$0xff] }
 0x48b   : > { %v3423_v4 = vsel %vm3391_vm7, %v3375_v53, %v3407_v37  ;;  %v3431_v19 = vsel %vm3399_vm8, %v3383_v39, %v3415_v63  ;;  %4335 = vmatprep.subr.bf16.mxu0 %v4497_v34  ;;  %v3088_v36 = vrot.slane %v3047_v16, 4  ;;  %v3127_v40 = vmul.f32 %v3047_v16, %v3047_v16  ;;  %v4507_v34 = vld [vmem:[%s5744_s3 + $0x120] sm:$0xff]  }
 0x48c   : > { %v3439_v55 = vpack.c.bf16 %v3431_v19, %v3423_v4  ;;  %v3180_v9 = vadd.f32 %v3179_v50, %v3178_v46  ;;  %v3208_v38 = vmul.f32 %v5573_v49, %v5573_v49  ;;  %v3113_v11 = vrot.slane %v3112_v1, 1 }
 0x48d   : > { %v3191_v59 = vrot.slane %v3190_v60, 2  ;;  %v3089_v13 = vadd.f32 %v3088_v36, %v3047_v16  ;;  %v3168_v0 = vrot.slane %v3127_v40, 4  ;;  %v2972_v58 = vmul.f32 %v5453_v27, %v2911_v45  ;;  %v4502_v27 = vld [vmem:[%s5744_s3 + $0x1e8] sm:$0xff]   ;;  %v4508_v45 = vld [vmem:[%s5744_s3 + $0x1a0] sm:$0xff]  }
 0x48e   : > { %4033 = vmatmul.mubr.bf16.vlgmr.msra.gmra.mxu1 %v3439_v55  ;;  %4336 = vmatpush3.bf16.msra.mxu0 %v4499_v7  ;;  %v3200_v20 = vmul.f32 0.25, %v3180_v9  ;;  %v5592_v21 = vadd.f32 %v5462_v14, %v5543_v24  ;;  %v3114_v18 = vadd.f32 %v3113_v11, %v3112_v1  ;;  %v4506_v7 = vld [vmem:[%s5744_s3 + $0x1e0] sm:$0xff]   ;;  %v4513_v55 = vld [vmem:[%s5744_s3 + $0x150] sm:$0xff]  }
 0x48f   : > { %4356 = vmatpush3.bf16.msra.mxu1 %v4496_v6  ;;  %4337 = vmatprep.subr.bf16.mxu0 %v4501_v43  ;;  %v3192_v47 = vadd.f32 %v3191_v59, %v3190_v60  ;;  %v3090_v48 = vrot.slane %v3089_v13, 2  ;;  %v3169_v25 = vadd.f32 %v3168_v0, %v3127_v40  ;;  %v5604_v42 = vadd.f32 %v5462_v14, %v2972_v58  ;;  %v4504_v14 = vld [vmem:[%s5744_s3 + $0x1a8] sm:$0xff]   ;;  %v4511_v6 = vld [vmem:[%s5744_s3 + $0x118] sm:$0xff]  }
 0x490   : > { %4357 = vmatprep.subr.bf16.mxu1 %v4498_v8  ;;  %v3216_v24 = vsub.f32 %v3200_v20, %v3208_v38  ;;  %v3049_v41 = vsel %vm3037_vm0, %v5592_v21, 0.0  ;;  %v5609_v10 = vmul.f32 0.25, %v3114_v18  ;;  %v2971_v43 = vmul.f32 %v5475_v56, %v2910_v31  ;;  %v4510_v56 = vld [vmem:[%s5744_s3 + $0x1d8] sm:$0xff]   ;;  %v4515_v20 = vld [vmem:[%s5744_s3 + $0x110] sm:$0xff]   ;;  %v2912_v58 = vld [vmem:[#allocation2 + $0x28] sm:$0xff] }
 0x491   : > { %v3193_v23 = vrot.slane %v3192_v47, 1  ;;  %v3091_v53 = vadd.f32 %v3090_v48, %v3089_v13  ;;  %v3102_v39 = vrot.slane %v3049_v41, 4  ;;  %v3170_v46 = vrot.slane %v3169_v25, 2  ;;  %v4517_v48 = vld [vmem:[%s5744_s3 + $0x148] sm:$0xff]  }
 0x492   : > { %4338 = vmatpush3.bf16.msra.mxu0 %v4503_v35  ;;  %v3240_v52 = vadd.f32 1e-05, %v3216_v24  ;;  %v3129_v15 = vmul.f32 %v3049_v41, %v3049_v41  ;;  %v3210_v37 = vmul.f32 %v5609_v10, %v5609_v10  ;;  %v3031_v0 = vadd.f32 %v5496_v33, %v2971_v43  ;;  %v4514_v33 = vld [vmem:[%s5744_s3 + $0x1d0] sm:$0xff]  }
 0x493   : > { %4358 = vmatpush3.bf16.msra.mxu1 %v4500_v22  ;;  %4339 = vmatprep.subr.bf16.mxu0 %v4505_v32  ;;  %v3194_v16 = vadd.f32 %v3193_v23, %v3192_v47  ;;  %v3092_v63 = vrot.slane %v3091_v53, 1  ;;  %v3171_v50 = vadd.f32 %v3170_v46, %v3169_v25  ;;  %v3103_v1 = vadd.f32 %v3102_v39, %v3049_v41  ;;  %v4512_v47 = vld [vmem:[%s5744_s3 + $0x198] sm:$0xff]  }
 0x494   : > { %4359 = vmatprep.subr.bf16.mxu1 %v4502_v27  ;;  %4533 = vrsqrt.f32 %v3240_v52  ;;  %v3182_v19 = vrot.slane %v3129_v15, 4  ;;  %v3224_v41 = vsub.f32 %v5527_v5, %v5573_v49  ;;  %v2973_v23 = vmul.f32 %v5488_v28, %v2912_v58  ;;  %v4521_v28 = vld [vmem:[%s5744_s3 + $0x140] sm:$0xff]  }
 0x495   : > { %v3202_v60 = vmul.f32 0.25, %v3194_v16  ;;  %v3093_v4 = vadd.f32 %v3092_v63, %v3091_v53  ;;  %v3172_v36 = vrot.slane %v3171_v50, 1  ;;  %v3104_v40 = vrot.slane %v3103_v1, 2  ;;  %v4519_v53 = vld [vmem:[%s5744_s3 + $0x108] sm:$0xff]   ;;  %v2909_v5 = vld [vmem:[#allocation2 + $0x60] sm:$0xff] }
 0x496   : > { %4340 = vmatpush3.bf16.msra.mxu0 %v4507_v34  ;;  %v3183_v38 = vadd.f32 %v3182_v19, %v3129_v15  ;;  %v3232_v39 = vsub.f32 %v3031_v0, %v5573_v49  ;;  %v4516_v15 = vld [vmem:[%s5744_s3 + $0x190] sm:$0xff]   ;;  %v4518_v49 = vld [vmem:[%s5744_s3 + $0x1c8] sm:$0xff]   ;;  %v3033_v63 = vadd.f32 %v5510_v2, %v2973_v23  ;;  %v4522_v2 = vld [vmem:[%s5744_s3 + $0x1c0] sm:$0xff]  }
 0x497   : > { %4360 = vmatpush3.bf16.msra.mxu1 %v4504_v14  ;;  %4341 = vmatprep.subr.bf16.mxu0 %v4509_v3  ;;  %v3218_v8 = vsub.f32 %v3202_v60, %v3210_v37  ;;  %v5635_v9 = vmul.f32 0.25, %v3093_v4  ;;  %v3173_v11 = vadd.f32 %v3172_v36, %v3171_v50  ;;  %v3105_v59 = vadd.f32 %v3104_v40, %v3103_v1  ;;  %v4523_v50 = vld [vmem:[%s5744_s3 + $0x100] sm:$0xff]  }
 0x498   : > { %4361 = vmatprep.subr.bf16.mxu1 %v4506_v7  ;;  %v3184_v18 = vrot.slane %v3183_v38, 2  ;;  %v3295_v14 = vrot.slane %v5431_v61, %v5424_v57  ;;  %v3356_v37 = vrot.slane %v5433_v12, %v5424_v57  ;;  %v2970_v4 = vmul.f32 %v5500_v62, %v2909_v5  ;;  %v4520_v57 = vld [vmem:[%s5744_s3 + $0x188] sm:$0xff]  }
 0x499   : > { %v3242_v13 = vadd.f32 1e-05, %v3218_v8  ;;  %v3207_v35 = vmul.f32 %v5635_v9, %v5635_v9  ;;  %v3199_v22 = vmul.f32 0.25, %v3173_v11  ;;  %v3106_v32 = vrot.slane %v3105_v59, 1 }
 0x49a   : > { %4342 = vmatpush3.bf16.msra.mxu0 %v4511_v6  ;;  %v3185_v25 = vadd.f32 %v3184_v18, %v3183_v38  ;;  %v3226_v40 = vsub.f32 %v5537_v17, %v5609_v10  ;;  %v3234_v62 = vsub.f32 %v3033_v63, %v5609_v10  ;;  %v3030_v8 = vadd.f32 %v5532_v44, %v2970_v4 }
 0x49b   : > { %4362 = vmatpush3.bf16.msra.mxu1 %v4508_v45  ;;  %4343 = vmatprep.subr.bf16.mxu0 %v4513_v55  ;;  %4535 = vrsqrt.f32 %v3242_v13  ;;  %v3215_v27 = vsub.f32 %v3199_v22, %v3207_v35  ;;  %v3107_v24 = vadd.f32 %v3106_v32, %v3105_v59  ;;  %v3303_v11 = vrot.slane %v5431_v61, %v5437_v29 }
 0x49c   : > { %4363 = vmatprep.subr.bf16.mxu1 %v4510_v56  ;;  %v3186_v46 = vrot.slane %v3185_v25, 1  ;;  %v4524_v56 = vld [vmem:[%s5744_s3 + $0x180] sm:$0xff]   ;;  %v3364_v44 = vrot.slane %v5433_v12, %v5437_v29  ;;  %v3223_v58 = vsub.f32 %v5549_v51, %v5635_v9  ;;  %v3231_v22 = vsub.f32 %v3030_v8, %v5635_v9 }
 0x49d   : > { %v3239_v34 = vadd.f32 1e-05, %v3215_v27  ;;  %v5662_v52 = vmul.f32 0.25, %v3107_v24 }
 0x49e   : > { %4344 = vmatpush3.bf16.msra.mxu0 %v4515_v20  ;;  %v3187_v3 = vadd.f32 %v3186_v46, %v3185_v25 }
 0x49f   : > { %4364 = vmatpush3.bf16.msra.mxu1 %v4512_v47  ;;  %4345 = vmatprep.subr.bf16.mxu0 %v4517_v48  ;;  %4537 = vrsqrt.f32 %v3239_v34  ;;  %v3209_v31 = vmul.f32 %v5662_v52, %v5662_v52  ;;  %v3233_v7 = vsub.f32 %v5604_v42, %v5662_v52  ;;  %v3291_v48 = vrot.slane %v5431_v61, %v5440_v30 }
 0x4a0   : > { %4365 = vmatprep.subr.bf16.mxu1 %v4514_v33  ;;  %v3201_v19 = vmul.f32 0.25, %v3187_v3 }
 0x4a1   : > { %v4534_v16 = vpop.eup %4533 }
 0x4a2   : > { %4346 = vmatpush3.bf16.msra.mxu0 %v4519_v53  ;;  %v3256_v1 = vmul.f32 %v4534_v16, %v3224_v41  ;;  %v3264_v60 = vmul.f32 %v4534_v16, %v3232_v39  ;;  %v3217_v36 = vsub.f32 %v3201_v19, %v3209_v31  ;;  %v3352_v41 = vrot.slane %v5433_v12, %v5440_v30 }
 0x4a3   : > { %4366 = vmatpush3.bf16.msra.mxu1 %v4516_v15  ;;  %4347 = vmatprep.subr.bf16.mxu0 %v4521_v28  ;;  %v3225_v28 = vsub.f32 %v5592_v21, %v5662_v52 }
 0x4a4   : > { %4367 = vmatprep.subr.bf16.mxu1 %v4518_v49  ;;  %v3317_v6 = vmul.f32 %v3295_v14, %v3256_v1  ;;  %v3325_v43 = vmul.f32 %v3295_v14, %v3264_v60  ;;  %v3241_v38 = vadd.f32 1e-05, %v3217_v36 }
 0x4a6   : > { %4348 = vmatpush3.bf16.msra.mxu0 %v4523_v50  ;;  %v3378_v45 = vadd.f32 %v3356_v37, %v3317_v6  ;;  %v3386_v55 = vadd.f32 %v3356_v37, %v3325_v43  ;;  %4539 = vrsqrt.f32 %v3241_v38  ;;  %v3574_v38 = vld [vmem:[%s5745_s4 + $0x8] sm:$0xff] }
 0x4a7   : > { %4368 = vmatpush3.bf16.msra.mxu1 %v4520_v57 }
 0x4a8   : > { %v4536_v59 = vpop.eup %4535  ;;  %4369 = vmatprep.subr.bf16.mxu1 %v4522_v2  ;;  %vm3394_vm9 = vcmp.gt.f32.partialorder %v3378_v45, 0.0  ;;  %vm3402_vm10 = vcmp.gt.f32.partialorder %v3386_v55, 0.0  ;;  %v3410_v17 = vmul.f32 0.01, %v3378_v45  ;;  %v3418_v10 = vmul.f32 0.01, %v3386_v55 }
 0x4a9   : > { %v3258_v13 = vmul.f32 %v4536_v59, %v3226_v40  ;;  %v3266_v35 = vmul.f32 %v4536_v59, %v3234_v62 }
 0x4aa   : > { %v3426_v20 = vsel %vm3394_vm9, %v3378_v45, %v3410_v17  ;;  %v3434_v0 = vsel %vm3402_vm10, %v3386_v55, %v3418_v10 }
 0x4ab   : > { %4370 = vmatpush3.bf16.msra.mxu1 %v4524_v56  ;;  %v3442_v32 = vpack.c.bf16 %v3434_v0, %v3426_v20  ;;  %v3319_v18 = vmul.f32 %v3303_v11, %v3258_v13  ;;  %v3327_v47 = vmul.f32 %v3303_v11, %v3266_v35 }
 0x4ac   : > { %v4538_v33 = vpop.eup %4537 }
 0x4ad   : > { %4073 = vmatprep.mubr.bf16.mxu0 %v3442_v32  ;;  %v3380_v27 = vadd.f32 %v3364_v44, %v3319_v18  ;;  %v3388_v24 = vadd.f32 %v3364_v44, %v3327_v47  ;;  %v3255_v29 = vmul.f32 %v4538_v33, %v3223_v58  ;;  %v3263_v25 = vmul.f32 %v4538_v33, %v3231_v22 }
 0x4af   : > { %vm3396_vm11 = vcmp.gt.f32.partialorder %v3380_v27, 0.0  ;;  %vm3404_vm12 = vcmp.gt.f32.partialorder %v3388_v24, 0.0  ;;  %v3412_v51 = vmul.f32 0.01, %v3380_v27  ;;  %v3420_v9 = vmul.f32 0.01, %v3388_v24 }
 0x4b0   : > { %v3316_v23 = vmul.f32 %v3291_v48, %v3255_v29  ;;  %v3324_v53 = vmul.f32 %v3291_v48, %v3263_v25 }
 0x4b1   : > { %v3428_v39 = vsel %vm3396_vm11, %v3380_v27, %v3412_v51  ;;  %v3436_v34 = vsel %vm3404_vm12, %v3388_v24, %v3420_v9 }
 0x4b2   : > { %v3444_v46 = vpack.c.bf16 %v3436_v34, %v3428_v39  ;;  %v3377_v15 = vadd.f32 %v3352_v41, %v3316_v23  ;;  %v3385_v61 = vadd.f32 %v3352_v41, %v3324_v53 }
 0x4b3   : > { %v4540_v12 = vpop.eup %4539 }
 0x4b4   : > { %4114 = vmatprep.mubr.bf16.mxu1 %v3444_v46  ;;  %vm3393_vm13 = vcmp.gt.f32.partialorder %v3377_v15, 0.0  ;;  %vm3401_vm14 = vcmp.gt.f32.partialorder %v3385_v61, 0.0  ;;  %v3409_v5 = vmul.f32 0.01, %v3377_v15  ;;  %v3417_v49 = vmul.f32 0.01, %v3385_v61 }
 0x4b5   : > { %v3257_v31 = vmul.f32 %v4540_v12, %v3225_v28  ;;  %v3265_v16 = vmul.f32 %v4540_v12, %v3233_v7 }
 0x4b6   : > { %v3425_v30 = vsel %vm3393_vm13, %v3377_v15, %v3409_v5  ;;  %v3433_v14 = vsel %vm3401_vm14, %v3385_v61, %v3417_v49 }
 0x4b7   : > { %v3441_v3 = vpack.c.bf16 %v3433_v14, %v3425_v30  ;;  %v3318_v37 = vmul.f32 %v5465_v26, %v3257_v31  ;;  %v3326_v63 = vmul.f32 %v5465_v26, %v3265_v16 }
 0x4b9   : > { %4074 = vmatmul.mubr.bf16.vlgmr.msra.gmra.mxu0 %v3441_v3  ;;  %v3379_v21 = vadd.f32 %v5468_v54, %v3318_v37  ;;  %v3387_v50 = vadd.f32 %v5468_v54, %v3326_v63  ;;  %v3573_v54 = vld [vmem:[%s5745_s4] sm:$0xff] }
 0x4bb   : > { %vm3395_vm15 = vcmp.gt.f32.partialorder %v3379_v21, 0.0  ;;  %vm3403_vm0 = vcmp.gt.f32.partialorder %v3387_v50, 0.0  ;;  %v3411_v1 = vmul.f32 0.01, %v3379_v21  ;;  %v3419_v60 = vmul.f32 0.01, %v3387_v50 }
 0x4bd   : > { %v3427_v4 = vsel %vm3395_vm15, %v3379_v21, %v3411_v1  ;;  %v3435_v19 = vsel %vm3403_vm0, %v3387_v50, %v3419_v60 }
 0x4be   : > { %v3443_v57 = vpack.c.bf16 %v3435_v19, %v3427_v4 }
 0x4c0   : > { %4115 = vmatmul.mubr.bf16.vlgmr.msra.gmra.mxu1 %v3443_v57 }
 0x549   : > { %v4305_v2 = vpop.f32.mrf.mxu0 }
 0x54b   : > { %v4306_v42 = vpop.f32.mrf.mxu0 }
 0x54c   : > { %v4307_v36 = vadd.f32 %v4306_v42, %v4305_v2 }
 0x54d   : > { %v4308_v52 = vpop.f32.mrf.mxu0 }
 0x54e   : > { %v4327_v7 = vpop.f32.mrf.mxu1  ;;  %v3994_v45 = vadd.f32 %v4307_v36, %v3573_v54 }
 0x54f   : > { %v4309_v6 = vpop.f32.mrf.mxu0 }
 0x550   : > { %v4328_v43 = vpop.f32.mrf.mxu1  ;;  %v4310_v55 = vadd.f32 %v4309_v6, %v4308_v52 }
 0x551   : > { %v4329_v56 = vadd.f32 %v4328_v43, %v4327_v7 }
 0x552   : > { %v4330_v62 = vpop.f32.mrf.mxu1  ;;  %v3997_v13 = vadd.f32 %v4310_v55, %v3574_v38 }
 0x553   : > { %v4035_v10 = vadd.f32 %v4329_v56, %v3994_v45 }
 0x554   : > { %v4331_v59 = vpop.f32.mrf.mxu1 }
 0x555   : > { %v4332_v44 = vadd.f32 %v4331_v59, %v4330_v62 }
 0x557   : > { %v4038_v22 = vadd.f32 %v4332_v44, %v3997_v13 }
 0x579   : > { %v4349_v26 = vpop.f32.mrf.mxu0 }
 0x57b   : > { %v4350_v40 = vpop.f32.mrf.mxu0 }
 0x57c   : > { %v4351_v11 = vadd.f32 %v4350_v40, %v4349_v26 }
 0x57d   : > { %v4352_v8 = vpop.f32.mrf.mxu0 }
 0x57e   : > { %v4076_v20 = vadd.f32 %v4351_v11, %v4035_v10 }
 0x57f   : > { %v4353_v17 = vpop.f32.mrf.mxu0 }
 0x580   : > { %v4371_v35 = vpop.f32.mrf.mxu1  ;;  %v4354_v0 = vadd.f32 %v4353_v17, %v4352_v8 }
 0x582   : > { %v4372_v58 = vpop.f32.mrf.mxu1  ;;  %v4079_v48 = vadd.f32 %v4354_v0, %v4038_v22 }
 0x583   : > { %v4373_v32 = vadd.f32 %v4372_v58, %v4371_v35 }
 0x584   : > { %v4374_v18 = vpop.f32.mrf.mxu1 }
 0x585   : > { %v4117_v47 = vadd.f32 %v4373_v32, %v4076_v20 }
 0x586   : > { %v4375_v33 = vpop.f32.mrf.mxu1 }
 0x587   : > { %v4283_v27 = vmul.f32 -1.442695, %v4117_v47  ;;  %v4376_v24 = vadd.f32 %v4375_v33, %v4374_v18 }
 0x589   : > { %4541 = vpow2.f32 %v4283_v27  ;;  %v4120_v29 = vadd.f32 %v4376_v24, %v4079_v48 }
 0x58b   : > { %v4284_v25 = vmul.f32 -1.442695, %v4120_v29 }
 0x58d   : > { %4543 = vpow2.f32 %v4284_v25 }
 0x596   : > { %v4542_v41 = vpop.eup %4541 }
 0x597   : > { %v4129_v51 = vadd.f32 1.0, %v4542_v41 }
 0x599   : > { %4545 = vrcp.f32 %v4129_v51 }
 0x59a   : > { %v4544_v9 = vpop.eup %4543 }
 0x59b   : > { %v4130_v23 = vadd.f32 1.0, %v4544_v9 }
 0x59d   : > { %4547 = vrcp.f32 %v4130_v23 }
 0x5a6   : > { %v4546_v53 = vpop.eup %4545 }
 0x5a7   : > { %4135 = vst [vmem:[%s5746_s5] sm:$0xff] %v4546_v53 }
 0x5aa   : > { %v4548_v39 = vpop.eup %4547 }
 0x5ab   : > { %4136 = vst [vmem:[%s5746_s5 + $0x8] sm:$0xff] %v4548_v39 }
 0x5ac PF: > { %p12_p11 = scmp.ge.s32.totalorder %s4624_s22, 7   ;;  %s5747_s18 = smov %s4567_s19 }
 0x5ad   : > { %s5748_s19 = smov %s4633_s25  ;;  %s5749_s20 = smov %s4624_s22 }
 0x5ae   :  { %14 = sbr.rel (!%p12_p11) target bundleno = 2 (0x2), region = 117 }

</bundles_post_ra>
